<compile_context>
chip_gen: v7x
topology: tpu7x:2x2x1
jax: 0.10.0
libtpu: 0.0.40
codegen_flags: <defaults>
</compile_context>

<pallas_src>
import functools

import jax
import jax.numpy as jnp
from jax.experimental import pallas as pl
from jax.experimental.pallas import tpu as pltpu


_IM2COL_MAX_CIN = 128  # below this, use the single-dot im2col form (K = 9*Cin)


def _pick_tile_h(H, W):
    """Band height: TILE_H*W ~ 256 (MXU M fill) with TILE_H | H.

    When W is not a multiple of 8 (tiny deep levels: 4/2/1 spatial), fall back to one
    row per grid step so all in-kernel reshapes are trivial unit-dim squeezes.
    """
    if W % 8 != 0:
        return 1
    t = max(1, min(H, 256 // W))
    while H % t:
        t -= 1
    return t


# -----------------------------------------------------------------------------
# Pallas kernel: fused 3x3 same-padding conv (+ folded BatchNorm + optional ReLU)
# over a band of TILE_H output rows, with optional fused channel-concat inputs.
# -----------------------------------------------------------------------------
def _conv3x3_band_kernel(*refs, n_in, im2col, relu):
    """refs layout (set up by conv3x3):

      x_refs[i]  : (1, H+2, W+2, Cin_i)  zero-padded bf16 input (whole image, 1 batch elem)
      w_refs[i]  : (9*Cin_i, Cout) bf16 if im2col[i] else (9, Cin_i, Cout) bf16
      s_ref      : (1, Cout) f32   folded-BN scale
      b_ref      : (1, Cout) f32   folded-BN bias (+ conv bias)
      o_ref      : (1, TILE_H, W, Cout)  output band
      scratch[k] : (TILE_H*W, 9*Cin_i) bf16 im2col patch, one per im2col input
    """
    x_refs = refs[:n_in]
    w_refs = refs[n_in:2 * n_in]
    s_ref = refs[2 * n_in]
    b_ref = refs[2 * n_in + 1]
    o_ref = refs[2 * n_in + 2]
    scratch_refs = refs[2 * n_in + 3:]

    th = o_ref.shape[1]
    W = o_ref.shape[2]
    cout = o_ref.shape[3]

    row0 = pl.program_id(1) * th
    if th > 1:
        row0 = pl.multiple_of(row0, th)

    acc = jnp.zeros((th * W, cout), jnp.float32)
    si = 0
    for x_ref, w_ref, use_i2c in zip(x_refs, w_refs, im2col):
        cin = x_ref.shape[3]
        if use_i2c:
            # Single dot with K = 9*Cin: assemble the im2col patch in VMEM scratch.
            patch_ref = scratch_refs[si]
            si += 1
            for dy in range(3):
                for dx in range(3):
                    tap = 3 * dy + dx
                    tap_val = x_ref[0, pl.ds(row0 + dy, th), dx:dx + W, :]  # (th, W, cin)
                    patch_ref[:, tap * cin:(tap + 1) * cin] = tap_val.reshape(th * W, cin)
            acc = acc + jnp.dot(patch_ref[...], w_ref[...],
                                preferred_element_type=jnp.float32)
        else:
            # Deep layers (Cin >= 128): 9 dots, K = Cin already fills the MXU.
            for dy in range(3):
                for dx in range(3):
                    tap_val = x_ref[0, pl.ds(row0 + dy, th), dx:dx + W, :]  # (th, W, cin)
                    acc = acc + jnp.dot(tap_val.reshape(th * W, cin),
                                        w_ref[3 * dy + dx],
                                        preferred_element_type=jnp.float32)

    out = acc * s_ref[...] + b_ref[...]
    if relu:
        out = jnp.maximum(out, 0.0)
    o_ref[0] = out.reshape(th, W, cout).astype(o_ref.dtype)


def conv3x3(xs, p, out_dtype=jnp.bfloat16):
    """3x3 'same' conv (+folded BN, +optional ReLU) on NHWC tensor(s) via Pallas.

    `xs` may be a list of tensors: they are treated as a channel-concatenation whose
    concat is fused into the kernel (never materialized in HBM).
    """
    if not isinstance(xs, (list, tuple)):
        xs = [xs]
    N, H, W, _ = xs[0].shape
    cins = [int(x.shape[-1]) for x in xs]
    w_full = p["w"]                                   # (3, 3, sum(cins), Cout) bf16
    cout = int(w_full.shape[-1])
    assert int(w_full.shape[2]) == sum(cins)

    tile_h = _pick_tile_h(H, W)
    nb = H // tile_h

    # Split + reshape the weight per fused input; decide im2col per input.
    im2col_flags, w_parts, w_specs, scratch_shapes = [], [], [], []
    off = 0
    for cin in cins:
        wp = w_full[:, :, off:off + cin, :]
        off += cin
        use_i2c = cin < _IM2COL_MAX_CIN
        im2col_flags.append(use_i2c)
        if use_i2c:
            # tap-major K layout: row index = (3*dy+dx)*cin + c
            w_parts.append(wp.reshape(9 * cin, cout))
            w_specs.append(pl.BlockSpec((9 * cin, cout), lambda n, h: (0, 0)))
            scratch_shapes.append(pltpu.VMEM((tile_h * W, 9 * cin), jnp.bfloat16))
        else:
            w_parts.append(wp.reshape(9, cin, cout))
            w_specs.append(pl.BlockSpec((9, cin, cout), lambda n, h: (0, 0, 0)))

    # Zero 'same' padding (like Conv2d(padding=1)) + bf16 cast of the activations.
    xps = [jnp.pad(x.astype(jnp.bfloat16), ((0, 0), (1, 1), (1, 1), (0, 0)))
           for x in xs]

    x_specs = [pl.BlockSpec((1, H + 2, W + 2, cin), lambda n, h: (n, 0, 0, 0))
               for cin in cins]

    kernel = functools.partial(_conv3x3_band_kernel, n_in=len(xs),
                               im2col=tuple(im2col_flags), relu=p["relu"])

    return pl.pallas_call(
        kernel,
        out_shape=jax.ShapeDtypeStruct((N, H, W, cout), out_dtype),
        grid=(N, nb),
        in_specs=x_specs + w_specs + [
            pl.BlockSpec((1, cout), lambda n, h: (0, 0)),
            pl.BlockSpec((1, cout), lambda n, h: (0, 0)),
        ],
        out_specs=pl.BlockSpec((1, tile_h, W, cout), lambda n, h: (n, h, 0, 0)),
        scratch_shapes=scratch_shapes,
        compiler_params=pltpu.CompilerParams(
            dimension_semantics=("parallel", "parallel")),
    )(*xps, *w_parts, p["scale"], p["bias"])


# -----------------------------------------------------------------------------
# Plain-JAX glue: pooling / upsampling
# -----------------------------------------------------------------------------
def maxpool2(x):  # NHWC, 2x2 max pool, stride 2 (nn.MaxPool2d(2))
    N, H, W, C = x.shape
    return jnp.max(x.reshape(N, H // 2, 2, W // 2, 2, C), axis=(2, 4))


def upsample2_bilinear(x):  # NHWC, matches nn.Upsample(scale_factor=2, mode='bilinear')
    N, H, W, C = x.shape
    return jax.image.resize(x, (N, 2 * H, 2 * W, C), method="bilinear")


# -----------------------------------------------------------------------------
# Deterministic parameter construction (synthetic weights, no checkpoint load)
# -----------------------------------------------------------------------------
def _conv_weights(key, cin, cout, k=3):
    kw, kb = jax.random.split(key)
    fan_in = cin * k * k
    w = jax.random.normal(kw, (k, k, cin, cout), jnp.float32) / jnp.sqrt(float(fan_in))
    b = 0.01 * jax.random.normal(kb, (cout,), jnp.float32)
    return w, b


def make_plain_conv(key, cin, cout):
    """nn.Conv2d(cin, cout, 3, padding=1) with bias, no BN / ReLU."""
    w, b = _conv_weights(key, cin, cout)
    return {"w": w.astype(jnp.bfloat16),
            "scale": jnp.ones((1, cout), jnp.float32),
            "bias": b.reshape(1, cout),
            "relu": False}


def make_conv_bn_relu(key, cin, cout):
    """Conv2d(3x3,pad=1) + BatchNorm2d (inference-mode, folded) + ReLU."""
    k1, kg, kbeta, km, kv = jax.random.split(key, 5)
    w, b = _conv_weights(k1, cin, cout)
    gamma = 1.0 + 0.05 * jax.random.normal(kg, (cout,), jnp.float32)
    beta = 0.05 * jax.random.normal(kbeta, (cout,), jnp.float32)
    r_mean = 0.01 * jax.random.normal(km, (cout,), jnp.float32)
    r_var = 1.0 + 0.05 * jnp.abs(jax.random.normal(kv, (cout,), jnp.float32))
    scale = gamma / jnp.sqrt(r_var + 1e-5)
    bias = scale * (b - r_mean) + beta
    return {"w": w.astype(jnp.bfloat16),
            "scale": scale.reshape(1, cout),
            "bias": bias.reshape(1, cout),
            "relu": True}


def build_params(key, z_shape=3):
    keys = iter(jax.random.split(key, 64))

    def nk():
        return next(keys)

    # TODO(synk): grad_unet (net1) is constructor-injected and not defined in the
    # source; stand-in = a frozen 3x3 Pallas conv on the centre z-slice producing the
    # 2-channel 'gradient' map (2 ch so that cat(gradient, centre-slice) == 3 ch,
    # matching first_conv_in_net2's in_ch=3).
    params = {"z_shape": z_shape, "net1_conv": make_plain_conv(nk(), 1, 2)}

    # TODO(synk): Downblock class is referenced but not provided in the source;
    # reconstructed (to match Unet's channel arithmetic) as MaxPool2d(2) followed by
    # num_conv x (Conv3x3 + BN + ReLU), first conv expanding channels by ch_change_rate.
    def make_down(cin, rate):
        cout = cin * rate
        return {"convs": [make_conv_bn_relu(nk(), cin, cout),
                          make_conv_bn_relu(nk(), cout, cout)]}

    def make_up(cin, rate):
        cout = cin // rate
        return {"convs": [make_conv_bn_relu(nk(), cin, cout),
                          make_conv_bn_relu(nk(), cout, cout)]}

    net2 = {}
    # conv_2d_1 is replaced by first_conv_in_net2 = nn.Conv2d(3, 16, 3, padding=1)
    net2["conv_2d_1"] = make_plain_conv(nk(), 3, 16)
    net2["down1"] = make_down(16, 2)     # -> 32 ch
    net2["down2"] = make_down(32, 2)     # -> 64 ch
    net2["down3"] = make_down(64, 2)     # -> 128 ch
    net2["down4"] = make_down(128, 2)    # -> 256 ch
    net2["down5"] = make_down(256, 1)    # -> 256 ch
    net2["up0"] = make_up(512, 2)        # -> 256 ch
    net2["up1"] = make_up(384, 2)        # -> 192 ch
    net2["up2"] = make_up(256, 2)        # -> 128 ch
    net2["up3"] = make_up(160, 2)        # -> 80 ch
    net2["up4"] = make_up(96, 2)         # -> 48 ch
    # finnal_conv2d is replaced by final_conv_in_net2 = nn.Conv2d(48, 1, 3, padding=1)
    net2["final"] = make_plain_conv(nk(), 48, 1)
    params["net2"] = net2
    return params


# -----------------------------------------------------------------------------
# Forward passes (NHWC internally)
# -----------------------------------------------------------------------------
def downblock(p, x):
    x = maxpool2(x)
    for layer in p["convs"]:
        x = conv3x3(x, layer)
    return x


def upblock(p, xs):
    x = conv3x3(xs, p["convs"][0])       # first conv fuses the skip concat
    for layer in p["convs"][1:]:
        x = conv3x3(x, layer)
    return x


def unet2_forward(p, grad, centre):      # grad: (N,H,W,2), centre: (N,H,W,1) NHWC
    x1 = conv3x3([grad, centre], p["conv_2d_1"])           # 16 ch (plain conv; fused cat)
    d1 = downblock(p["down1"], x1)                         # 32 ch,  H/2
    d2 = downblock(p["down2"], d1)                         # 64 ch,  H/4
    d3 = downblock(p["down3"], d2)                         # 128 ch, H/8
    d4 = downblock(p["down4"], d3)                         # 256 ch, H/16
    d5 = downblock(p["down5"], d4)                         # 256 ch, H/32
    u0 = upblock(p["up0"], [upsample2_bilinear(d5), d4])   # 512 -> 256 ch
    u1 = upblock(p["up1"], [upsample2_bilinear(u0), d3])   # 384 -> 192 ch
    u2 = upblock(p["up2"], [upsample2_bilinear(u1), d2])   # 256 -> 128 ch
    u3 = upblock(p["up3"], [upsample2_bilinear(u2), d1])   # 160 -> 80 ch
    u4 = upblock(p["up4"], [upsample2_bilinear(u3), x1])   # 96  -> 48 ch
    return conv3x3(u4, p["final"], out_dtype=jnp.float32)  # 1 ch (plain conv)


def net1_forward(params, x_ncdhw):
    # Stand-in for the injected grad_unet (see TODO in build_params).
    z_mid = (params["z_shape"] - 1) // 2
    xc = jnp.transpose(x_ncdhw[:, :, z_mid], (0, 2, 3, 1))           # (N, H, W, 1)
    grad = conv3x3(xc, params["net1_conv"], out_dtype=jnp.float32)   # (N, H, W, 2)
    return {"gradient": grad}


def dunet3d_forward(params, x_ncdhw):
    """x_ncdhw: (N, C=1, Z, H, W) float32 (PyTorch NCDHW). Returns NCHW outputs."""
    z_mid = (params["z_shape"] - 1) // 2
    grad_nhwc = net1_forward(params, x_ncdhw)["gradient"]              # (N,H,W,2)
    centre_nhwc = jnp.transpose(x_ncdhw[:, :, z_mid], (0, 2, 3, 1))    # (N,H,W,1)
    dist_nhwc = unet2_forward(params["net2"], grad_nhwc, centre_nhwc)  # (N,H,W,1)
    return {
        "gradient": jnp.transpose(grad_nhwc, (0, 3, 1, 2)),   # (N, 2, H, W)
        "distance": jnp.transpose(dist_nhwc, (0, 3, 1, 2)),   # (N, 1, H, W)
    }


# -----------------------------------------------------------------------------
# Pure-JAX reference of the fused conv (for self-checking only)
# -----------------------------------------------------------------------------
def _conv3x3_ref(xs, p, out_dtype=jnp.bfloat16):
    if not isinstance(xs, (list, tuple)):
        xs = [xs]
    x = jnp.concatenate([xi.astype(jnp.bfloat16) for xi in xs], axis=-1)
    y = jax.lax.conv_general_dilated(
        x, p["w"], window_strides=(1, 1), padding="SAME",
        dimension_numbers=("NHWC", "HWIO", "NHWC"),
        preferred_element_type=jnp.float32)
    y = y * p["scale"][0] + p["bias"][0]
    if p["relu"]:
        y = jnp.maximum(y, 0.0)
    return y.astype(out_dtype)


# -----------------------------------------------------------------------------
if __name__ == "__main__":
    key = jax.random.PRNGKey(0)
    pkey, xkey, ckey = jax.random.split(key, 3)

    # --- quick self-checks of the fused conv kernel against lax.conv ---------
    k1, k2, k3, k4, k5, k6, k7, k8 = jax.random.split(ckey, 8)
    # (a) fused concat conv, mixed im2col(48ch) + 9-dot(160ch), multi-band grid.
    xa = jax.random.normal(k1, (1, 32, 32, 48), jnp.float32)
    xb = jax.random.normal(k2, (1, 32, 32, 160), jnp.float32)
    pa = make_conv_bn_relu(k3, 48 + 160, 64)
    diff_a = jnp.max(jnp.abs(conv3x3([xa, xb], pa).astype(jnp.float32)
                             - _conv3x3_ref([xa, xb], pa).astype(jnp.float32)))
    assert float(diff_a) < 0.1, "fused conv mismatch"
    # (b) tiny-Cin im2col path (2ch + 1ch -> 16ch plain conv, like first_conv_in_net2).
    xc_ = jax.random.normal(k4, (1, 32, 32, 2), jnp.float32)
    xd = jax.random.normal(k5, (1, 32, 32, 1), jnp.float32)
    pb = make_plain_conv(k6, 3, 16)
    diff_b = jnp.max(jnp.abs(conv3x3([xc_, xd], pb).astype(jnp.float32)
                             - _conv3x3_ref([xc_, xd], pb).astype(jnp.float32)))
    assert float(diff_b) < 0.1, "tiny-Cin conv mismatch"
    # (c) small-spatial fallback path (W=4 -> one row per step).
    xe = jax.random.normal(k7, (1, 4, 4, 64), jnp.float32)
    pc = make_conv_bn_relu(k8, 64, 128)
    diff_c = jnp.max(jnp.abs(conv3x3(xe, pc).astype(jnp.float32)
                             - _conv3x3_ref(xe, pc).astype(jnp.float32)))
    assert float(diff_c) < 0.1, "small-spatial conv mismatch"

    # --- full forward ---------------------------------------------------------
    params = build_params(pkey, z_shape=3)
    N, C, Z, H, W = 2, 1, 3, 32, 32
    x = jax.random.normal(xkey, (N, C, Z, H, W), jnp.float32)

    fwd = jax.jit(lambda inp: dunet3d_forward(params, inp))
    outs = fwd(x)
    jax.block_until_ready(outs)

    assert outs["gradient"].shape == (N, 2, H, W)
    assert outs["distance"].shape == (N, 1, H, W)
    print("KERNEL_OK")
</pallas_src>

<mosaic_0001>
module attributes {stable_mosaic.version = 11 : i64} {
  func.func @_conv3x3_band_kernel(%arg0: i32, %arg1: i32, %arg2: memref<1x34x34x48xbf16, #tpu.memory_space<vmem>>, %arg3: memref<1x34x34x160xbf16, #tpu.memory_space<vmem>>, %arg4: memref<432x64xbf16, #tpu.memory_space<vmem>>, %arg5: memref<9x160x64xbf16, #tpu.memory_space<vmem>>, %arg6: memref<1x64xf32, #tpu.memory_space<vmem>>, %arg7: memref<1x64xf32, #tpu.memory_space<vmem>>, %arg8: memref<1x8x32x64xbf16, #tpu.memory_space<vmem>>, %arg9: memref<256x432xbf16, #tpu.memory_space<vmem>>) attributes {dimension_semantics = [#tpu.dimension_semantics<parallel>, #tpu.dimension_semantics<parallel>], iteration_bounds = array<i64: 1, 4>, scalar_prefetch = 0 : i64, scratch_operands = 1 : i64, tpu.core_type = #tpu.core_type<tc>, window_params = [{transform_indices = @transform_0, window_bounds = array<i64: 1, 34, 34, 48>}, {transform_indices = @transform_1, window_bounds = array<i64: 1, 34, 34, 160>}, {pipeline_mode = #tpu.pipeline_mode<synchronous>, transform_indices = @transform_2, window_bounds = array<i64: 432, 64>}, {pipeline_mode = #tpu.pipeline_mode<synchronous>, transform_indices = @transform_3, window_bounds = array<i64: 9, 160, 64>}, {pipeline_mode = #tpu.pipeline_mode<synchronous>, transform_indices = @transform_4, window_bounds = array<i64: 1, 64>}, {pipeline_mode = #tpu.pipeline_mode<synchronous>, transform_indices = @transform_5, window_bounds = array<i64: 1, 64>}, {transform_indices = @transform_6, window_bounds = array<i64: 1, 8, 32, 64>}]} {
    %c8_i32 = arith.constant 8 : i32
    %0 = arith.muli %arg1, %c8_i32 : i32
    %1 = tpu.assume_multiple %0, 8 : i32
    %cst = arith.constant 0.000000e+00 : f32
    %2 = vector.broadcast %cst : f32 to vector<256x64xf32>
    %c0_i32 = arith.constant 0 : i32
    %3 = arith.addi %1, %c0_i32 : i32
    %c0 = arith.constant 0 : index
    %4 = arith.index_cast %3 : i32 to index
    %c0_0 = arith.constant 0 : index
    %c0_1 = arith.constant 0 : index
    %5 = vector.load %arg2[%c0, %4, %c0_0, %c0_1] : memref<1x34x34x48xbf16, #tpu.memory_space<vmem>>, vector<1x8x32x48xbf16>
    %6 = vector.shape_cast %5 : vector<1x8x32x48xbf16> to vector<8x32x48xbf16>
    %7 = vector.shape_cast %6 : vector<8x32x48xbf16> to vector<256x48xbf16>
    %c0_2 = arith.constant 0 : index
    %c0_3 = arith.constant 0 : index
    %8 = vector.load %arg9[%c0_2, %c0_3] : memref<256x432xbf16, #tpu.memory_space<vmem>>, vector<256x48xbf16>
    tpu.vector_store %arg9[%c0_2, %c0_3], %7 {strides = array<i32>} : memref<256x432xbf16, #tpu.memory_space<vmem>>, vector<256x48xbf16>,
    %c0_i32_4 = arith.constant 0 : i32
    %9 = arith.addi %1, %c0_i32_4 : i32
    %c0_5 = arith.constant 0 : index
    %10 = arith.index_cast %9 : i32 to index
    %c1 = arith.constant 1 : index
    %c0_6 = arith.constant 0 : index
    %11 = vector.load %arg2[%c0_5, %10, %c1, %c0_6] : memref<1x34x34x48xbf16, #tpu.memory_space<vmem>>, vector<1x8x32x48xbf16>
    %12 = vector.shape_cast %11 : vector<1x8x32x48xbf16> to vector<8x32x48xbf16>
    %13 = vector.shape_cast %12 : vector<8x32x48xbf16> to vector<256x48xbf16>
    %c0_7 = arith.constant 0 : index
    %c48 = arith.constant 48 : index
    %14 = vector.load %arg9[%c0_7, %c48] : memref<256x432xbf16, #tpu.memory_space<vmem>>, vector<256x48xbf16>
    tpu.vector_store %arg9[%c0_7, %c48], %13 {strides = array<i32>} : memref<256x432xbf16, #tpu.memory_space<vmem>>, vector<256x48xbf16>,
    %c0_i32_8 = arith.constant 0 : i32
    %15 = arith.addi %1, %c0_i32_8 : i32
    %c0_9 = arith.constant 0 : index
    %16 = arith.index_cast %15 : i32 to index
    %c2 = arith.constant 2 : index
    %c0_10 = arith.constant 0 : index
    %17 = vector.load %arg2[%c0_9, %16, %c2, %c0_10] : memref<1x34x34x48xbf16, #tpu.memory_space<vmem>>, vector<1x8x32x48xbf16>
    %18 = vector.shape_cast %17 : vector<1x8x32x48xbf16> to vector<8x32x48xbf16>
    %19 = vector.shape_cast %18 : vector<8x32x48xbf16> to vector<256x48xbf16>
    %c0_11 = arith.constant 0 : index
    %c96 = arith.constant 96 : index
    %20 = vector.load %arg9[%c0_11, %c96] : memref<256x432xbf16, #tpu.memory_space<vmem>>, vector<256x48xbf16>
    tpu.vector_store %arg9[%c0_11, %c96], %19 {strides = array<i32>} : memref<256x432xbf16, #tpu.memory_space<vmem>>, vector<256x48xbf16>,
    %c1_i32 = arith.constant 1 : i32
    %21 = arith.addi %1, %c1_i32 : i32
    %c0_12 = arith.constant 0 : index
    %22 = arith.index_cast %21 : i32 to index
    %c0_13 = arith.constant 0 : index
    %c0_14 = arith.constant 0 : index
    %23 = vector.load %arg2[%c0_12, %22, %c0_13, %c0_14] : memref<1x34x34x48xbf16, #tpu.memory_space<vmem>>, vector<1x8x32x48xbf16>
    %24 = vector.shape_cast %23 : vector<1x8x32x48xbf16> to vector<8x32x48xbf16>
    %25 = vector.shape_cast %24 : vector<8x32x48xbf16> to vector<256x48xbf16>
    %c0_15 = arith.constant 0 : index
    %c144 = arith.constant 144 : index
    %26 = vector.load %arg9[%c0_15, %c144] : memref<256x432xbf16, #tpu.memory_space<vmem>>, vector<256x48xbf16>
    tpu.vector_store %arg9[%c0_15, %c144], %25 {strides = array<i32>} : memref<256x432xbf16, #tpu.memory_space<vmem>>, vector<256x48xbf16>,
    %c1_i32_16 = arith.constant 1 : i32
    %27 = arith.addi %1, %c1_i32_16 : i32
    %c0_17 = arith.constant 0 : index
    %28 = arith.index_cast %27 : i32 to index
    %c1_18 = arith.constant 1 : index
    %c0_19 = arith.constant 0 : index
    %29 = vector.load %arg2[%c0_17, %28, %c1_18, %c0_19] : memref<1x34x34x48xbf16, #tpu.memory_space<vmem>>, vector<1x8x32x48xbf16>
    %30 = vector.shape_cast %29 : vector<1x8x32x48xbf16> to vector<8x32x48xbf16>
    %31 = vector.shape_cast %30 : vector<8x32x48xbf16> to vector<256x48xbf16>
    %c0_20 = arith.constant 0 : index
    %c192 = arith.constant 192 : index
    %32 = vector.load %arg9[%c0_20, %c192] : memref<256x432xbf16, #tpu.memory_space<vmem>>, vector<256x48xbf16>
    tpu.vector_store %arg9[%c0_20, %c192], %31 {strides = array<i32>} : memref<256x432xbf16, #tpu.memory_space<vmem>>, vector<256x48xbf16>,
    %c1_i32_21 = arith.constant 1 : i32
    %33 = arith.addi %1, %c1_i32_21 : i32
    %c0_22 = arith.constant 0 : index
    %34 = arith.index_cast %33 : i32 to index
    %c2_23 = arith.constant 2 : index
    %c0_24 = arith.constant 0 : index
    %35 = vector.load %arg2[%c0_22, %34, %c2_23, %c0_24] : memref<1x34x34x48xbf16, #tpu.memory_space<vmem>>, vector<1x8x32x48xbf16>
    %36 = vector.shape_cast %35 : vector<1x8x32x48xbf16> to vector<8x32x48xbf16>
    %37 = vector.shape_cast %36 : vector<8x32x48xbf16> to vector<256x48xbf16>
    %c0_25 = arith.constant 0 : index
    %c240 = arith.constant 240 : index
    %38 = vector.load %arg9[%c0_25, %c240] : memref<256x432xbf16, #tpu.memory_space<vmem>>, vector<256x48xbf16>
    tpu.vector_store %arg9[%c0_25, %c240], %37 {strides = array<i32>} : memref<256x432xbf16, #tpu.memory_space<vmem>>, vector<256x48xbf16>,
    %c2_i32 = arith.constant 2 : i32
    %39 = arith.addi %1, %c2_i32 : i32
    %c0_26 = arith.constant 0 : index
    %40 = arith.index_cast %39 : i32 to index
    %c0_27 = arith.constant 0 : index
    %c0_28 = arith.constant 0 : index
    %41 = vector.load %arg2[%c0_26, %40, %c0_27, %c0_28] : memref<1x34x34x48xbf16, #tpu.memory_space<vmem>>, vector<1x8x32x48xbf16>
    %42 = vector.shape_cast %41 : vector<1x8x32x48xbf16> to vector<8x32x48xbf16>
    %43 = vector.shape_cast %42 : vector<8x32x48xbf16> to vector<256x48xbf16>
    %c0_29 = arith.constant 0 : index
    %c288 = arith.constant 288 : index
    %44 = vector.load %arg9[%c0_29, %c288] : memref<256x432xbf16, #tpu.memory_space<vmem>>, vector<256x48xbf16>
    tpu.vector_store %arg9[%c0_29, %c288], %43 {strides = array<i32>} : memref<256x432xbf16, #tpu.memory_space<vmem>>, vector<256x48xbf16>,
    %c2_i32_30 = arith.constant 2 : i32
    %45 = arith.addi %1, %c2_i32_30 : i32
    %c0_31 = arith.constant 0 : index
    %46 = arith.index_cast %45 : i32 to index
    %c1_32 = arith.constant 1 : index
    %c0_33 = arith.constant 0 : index
    %47 = vector.load %arg2[%c0_31, %46, %c1_32, %c0_33] : memref<1x34x34x48xbf16, #tpu.memory_space<vmem>>, vector<1x8x32x48xbf16>
    %48 = vector.shape_cast %47 : vector<1x8x32x48xbf16> to vector<8x32x48xbf16>
    %49 = vector.shape_cast %48 : vector<8x32x48xbf16> to vector<256x48xbf16>
    %c0_34 = arith.constant 0 : index
    %c336 = arith.constant 336 : index
    %50 = vector.load %arg9[%c0_34, %c336] : memref<256x432xbf16, #tpu.memory_space<vmem>>, vector<256x48xbf16>
    tpu.vector_store %arg9[%c0_34, %c336], %49 {strides = array<i32>} : memref<256x432xbf16, #tpu.memory_space<vmem>>, vector<256x48xbf16>,
    %c2_i32_35 = arith.constant 2 : i32
    %51 = arith.addi %1, %c2_i32_35 : i32
    %c0_36 = arith.constant 0 : index
    %52 = arith.index_cast %51 : i32 to index
    %c2_37 = arith.constant 2 : index
    %c0_38 = arith.constant 0 : index
    %53 = vector.load %arg2[%c0_36, %52, %c2_37, %c0_38] : memref<1x34x34x48xbf16, #tpu.memory_space<vmem>>, vector<1x8x32x48xbf16>
    %54 = vector.shape_cast %53 : vector<1x8x32x48xbf16> to vector<8x32x48xbf16>
    %55 = vector.shape_cast %54 : vector<8x32x48xbf16> to vector<256x48xbf16>
    %c0_39 = arith.constant 0 : index
    %c384 = arith.constant 384 : index
    %56 = vector.load %arg9[%c0_39, %c384] : memref<256x432xbf16, #tpu.memory_space<vmem>>, vector<256x48xbf16>
    tpu.vector_store %arg9[%c0_39, %c384], %55 {strides = array<i32>} : memref<256x432xbf16, #tpu.memory_space<vmem>>, vector<256x48xbf16>,
    %c0_40 = arith.constant 0 : index
    %c0_41 = arith.constant 0 : index
    %57 = vector.load %arg9[%c0_40, %c0_41] : memref<256x432xbf16, #tpu.memory_space<vmem>>, vector<256x432xbf16>
    %c0_42 = arith.constant 0 : index
    %c0_43 = arith.constant 0 : index
    %58 = vector.load %arg4[%c0_42, %c0_43] : memref<432x64xbf16, #tpu.memory_space<vmem>>, vector<432x64xbf16>
    %cst_44 = arith.constant dense<0.000000e+00> : vector<256x64xf32>
    %59 = tpu.matmul %57, %58, %cst_44 {dimension_numbers = #tpu.dot_dimension_numbers<[1], [0], [0], [1], [0, 0, 1, 1], [], []>} : vector<256x432xbf16>, vector<432x64xbf16>, vector<256x64xf32> -> vector<256x64xf32>
    %60 = arith.addf %2, %59 : vector<256x64xf32>
    %c0_i32_45 = arith.constant 0 : i32
    %61 = arith.addi %1, %c0_i32_45 : i32
    %c0_46 = arith.constant 0 : index
    %62 = arith.index_cast %61 : i32 to index
    %c0_47 = arith.constant 0 : index
    %c0_48 = arith.constant 0 : index
    %63 = vector.load %arg3[%c0_46, %62, %c0_47, %c0_48] : memref<1x34x34x160xbf16, #tpu.memory_space<vmem>>, vector<1x8x32x160xbf16>
    %64 = vector.shape_cast %63 : vector<1x8x32x160xbf16> to vector<8x32x160xbf16>
    %65 = vector.shape_cast %64 : vector<8x32x160xbf16> to vector<256x160xbf16>
    %c0_49 = arith.constant 0 : index
    %c0_50 = arith.constant 0 : index
    %c0_51 = arith.constant 0 : index
    %66 = vector.load %arg5[%c0_49, %c0_50, %c0_51] : memref<9x160x64xbf16, #tpu.memory_space<vmem>>, vector<1x160x64xbf16>
    %67 = vector.shape_cast %66 : vector<1x160x64xbf16> to vector<160x64xbf16>
    %cst_52 = arith.constant dense<0.000000e+00> : vector<256x64xf32>
    %68 = tpu.matmul %65, %67, %cst_52 {dimension_numbers = #tpu.dot_dimension_numbers<[1], [0], [0], [1], [0, 0, 1, 1], [], []>} : vector<256x160xbf16>, vector<160x64xbf16>, vector<256x64xf32> -> vector<256x64xf32>
    %69 = arith.addf %60, %68 : vector<256x64xf32>
    %c0_i32_53 = arith.constant 0 : i32
    %70 = arith.addi %1, %c0_i32_53 : i32
    %c0_54 = arith.constant 0 : index
    %71 = arith.index_cast %70 : i32 to index
    %c1_55 = arith.constant 1 : index
    %c0_56 = arith.constant 0 : index
    %72 = vector.load %arg3[%c0_54, %71, %c1_55, %c0_56] : memref<1x34x34x160xbf16, #tpu.memory_space<vmem>>, vector<1x8x32x160xbf16>
    %73 = vector.shape_cast %72 : vector<1x8x32x160xbf16> to vector<8x32x160xbf16>
    %74 = vector.shape_cast %73 : vector<8x32x160xbf16> to vector<256x160xbf16>
    %c1_57 = arith.constant 1 : index
    %c0_58 = arith.constant 0 : index
    %c0_59 = arith.constant 0 : index
    %75 = vector.load %arg5[%c1_57, %c0_58, %c0_59] : memref<9x160x64xbf16, #tpu.memory_space<vmem>>, vector<1x160x64xbf16>
    %76 = vector.shape_cast %75 : vector<1x160x64xbf16> to vector<160x64xbf16>
    %cst_60 = arith.constant dense<0.000000e+00> : vector<256x64xf32>
    %77 = tpu.matmul %74, %76, %cst_60 {dimension_numbers = #tpu.dot_dimension_numbers<[1], [0], [0], [1], [0, 0, 1, 1], [], []>} : vector<256x160xbf16>, vector<160x64xbf16>, vector<256x64xf32> -> vector<256x64xf32>
    %78 = arith.addf %69, %77 : vector<256x64xf32>
    %c0_i32_61 = arith.constant 0 : i32
    %79 = arith.addi %1, %c0_i32_61 : i32
    %c0_62 = arith.constant 0 : index
    %80 = arith.index_cast %79 : i32 to index
    %c2_63 = arith.constant 2 : index
    %c0_64 = arith.constant 0 : index
    %81 = vector.load %arg3[%c0_62, %80, %c2_63, %c0_64] : memref<1x34x34x160xbf16, #tpu.memory_space<vmem>>, vector<1x8x32x160xbf16>
    %82 = vector.shape_cast %81 : vector<1x8x32x160xbf16> to vector<8x32x160xbf16>
    %83 = vector.shape_cast %82 : vector<8x32x160xbf16> to vector<256x160xbf16>
    %c2_65 = arith.constant 2 : index
    %c0_66 = arith.constant 0 : index
    %c0_67 = arith.constant 0 : index
    %84 = vector.load %arg5[%c2_65, %c0_66, %c0_67] : memref<9x160x64xbf16, #tpu.memory_space<vmem>>, vector<1x160x64xbf16>
    %85 = vector.shape_cast %84 : vector<1x160x64xbf16> to vector<160x64xbf16>
    %cst_68 = arith.constant dense<0.000000e+00> : vector<256x64xf32>
    %86 = tpu.matmul %83, %85, %cst_68 {dimension_numbers = #tpu.dot_dimension_numbers<[1], [0], [0], [1], [0, 0, 1, 1], [], []>} : vector<256x160xbf16>, vector<160x64xbf16>, vector<256x64xf32> -> vector<256x64xf32>
    %87 = arith.addf %78, %86 : vector<256x64xf32>
    %c1_i32_69 = arith.constant 1 : i32
    %88 = arith.addi %1, %c1_i32_69 : i32
    %c0_70 = arith.constant 0 : index
    %89 = arith.index_cast %88 : i32 to index
    %c0_71 = arith.constant 0 : index
    %c0_72 = arith.constant 0 : index
    %90 = vector.load %arg3[%c0_70, %89, %c0_71, %c0_72] : memref<1x34x34x160xbf16, #tpu.memory_space<vmem>>, vector<1x8x32x160xbf16>
    %91 = vector.shape_cast %90 : vector<1x8x32x160xbf16> to vector<8x32x160xbf16>
    %92 = vector.shape_cast %91 : vector<8x32x160xbf16> to vector<256x160xbf16>
    %c3 = arith.constant 3 : index
    %c0_73 = arith.constant 0 : index
    %c0_74 = arith.constant 0 : index
    %93 = vector.load %arg5[%c3, %c0_73, %c0_74] : memref<9x160x64xbf16, #tpu.memory_space<vmem>>, vector<1x160x64xbf16>
    %94 = vector.shape_cast %93 : vector<1x160x64xbf16> to vector<160x64xbf16>
    %cst_75 = arith.constant dense<0.000000e+00> : vector<256x64xf32>
    %95 = tpu.matmul %92, %94, %cst_75 {dimension_numbers = #tpu.dot_dimension_numbers<[1], [0], [0], [1], [0, 0, 1, 1], [], []>} : vector<256x160xbf16>, vector<160x64xbf16>, vector<256x64xf32> -> vector<256x64xf32>
    %96 = arith.addf %87, %95 : vector<256x64xf32>
    %c1_i32_76 = arith.constant 1 : i32
    %97 = arith.addi %1, %c1_i32_76 : i32
    %c0_77 = arith.constant 0 : index
    %98 = arith.index_cast %97 : i32 to index
    %c1_78 = arith.constant 1 : index
    %c0_79 = arith.constant 0 : index
    %99 = vector.load %arg3[%c0_77, %98, %c1_78, %c0_79] : memref<1x34x34x160xbf16, #tpu.memory_space<vmem>>, vector<1x8x32x160xbf16>
    %100 = vector.shape_cast %99 : vector<1x8x32x160xbf16> to vector<8x32x160xbf16>
    %101 = vector.shape_cast %100 : vector<8x32x160xbf16> to vector<256x160xbf16>
    %c4 = arith.constant 4 : index
    %c0_80 = arith.constant 0 : index
    %c0_81 = arith.constant 0 : index
    %102 = vector.load %arg5[%c4, %c0_80, %c0_81] : memref<9x160x64xbf16, #tpu.memory_space<vmem>>, vector<1x160x64xbf16>
    %103 = vector.shape_cast %102 : vector<1x160x64xbf16> to vector<160x64xbf16>
    %cst_82 = arith.constant dense<0.000000e+00> : vector<256x64xf32>
    %104 = tpu.matmul %101, %103, %cst_82 {dimension_numbers = #tpu.dot_dimension_numbers<[1], [0], [0], [1], [0, 0, 1, 1], [], []>} : vector<256x160xbf16>, vector<160x64xbf16>, vector<256x64xf32> -> vector<256x64xf32>
    %105 = arith.addf %96, %104 : vector<256x64xf32>
    %c1_i32_83 = arith.constant 1 : i32
    %106 = arith.addi %1, %c1_i32_83 : i32
    %c0_84 = arith.constant 0 : index
    %107 = arith.index_cast %106 : i32 to index
    %c2_85 = arith.constant 2 : index
    %c0_86 = arith.constant 0 : index
    %108 = vector.load %arg3[%c0_84, %107, %c2_85, %c0_86] : memref<1x34x34x160xbf16, #tpu.memory_space<vmem>>, vector<1x8x32x160xbf16>
    %109 = vector.shape_cast %108 : vector<1x8x32x160xbf16> to vector<8x32x160xbf16>
    %110 = vector.shape_cast %109 : vector<8x32x160xbf16> to vector<256x160xbf16>
    %c5 = arith.constant 5 : index
    %c0_87 = arith.constant 0 : index
    %c0_88 = arith.constant 0 : index
    %111 = vector.load %arg5[%c5, %c0_87, %c0_88] : memref<9x160x64xbf16, #tpu.memory_space<vmem>>, vector<1x160x64xbf16>
    %112 = vector.shape_cast %111 : vector<1x160x64xbf16> to vector<160x64xbf16>
    %cst_89 = arith.constant dense<0.000000e+00> : vector<256x64xf32>
    %113 = tpu.matmul %110, %112, %cst_89 {dimension_numbers = #tpu.dot_dimension_numbers<[1], [0], [0], [1], [0, 0, 1, 1], [], []>} : vector<256x160xbf16>, vector<160x64xbf16>, vector<256x64xf32> -> vector<256x64xf32>
    %114 = arith.addf %105, %113 : vector<256x64xf32>
    %c2_i32_90 = arith.constant 2 : i32
    %115 = arith.addi %1, %c2_i32_90 : i32
    %c0_91 = arith.constant 0 : index
    %116 = arith.index_cast %115 : i32 to index
    %c0_92 = arith.constant 0 : index
    %c0_93 = arith.constant 0 : index
    %117 = vector.load %arg3[%c0_91, %116, %c0_92, %c0_93] : memref<1x34x34x160xbf16, #tpu.memory_space<vmem>>, vector<1x8x32x160xbf16>
    %118 = vector.shape_cast %117 : vector<1x8x32x160xbf16> to vector<8x32x160xbf16>
    %119 = vector.shape_cast %118 : vector<8x32x160xbf16> to vector<256x160xbf16>
    %c6 = arith.constant 6 : index
    %c0_94 = arith.constant 0 : index
    %c0_95 = arith.constant 0 : index
    %120 = vector.load %arg5[%c6, %c0_94, %c0_95] : memref<9x160x64xbf16, #tpu.memory_space<vmem>>, vector<1x160x64xbf16>
    %121 = vector.shape_cast %120 : vector<1x160x64xbf16> to vector<160x64xbf16>
    %cst_96 = arith.constant dense<0.000000e+00> : vector<256x64xf32>
    %122 = tpu.matmul %119, %121, %cst_96 {dimension_numbers = #tpu.dot_dimension_numbers<[1], [0], [0], [1], [0, 0, 1, 1], [], []>} : vector<256x160xbf16>, vector<160x64xbf16>, vector<256x64xf32> -> vector<256x64xf32>
    %123 = arith.addf %114, %122 : vector<256x64xf32>
    %c2_i32_97 = arith.constant 2 : i32
    %124 = arith.addi %1, %c2_i32_97 : i32
    %c0_98 = arith.constant 0 : index
    %125 = arith.index_cast %124 : i32 to index
    %c1_99 = arith.constant 1 : index
    %c0_100 = arith.constant 0 : index
    %126 = vector.load %arg3[%c0_98, %125, %c1_99, %c0_100] : memref<1x34x34x160xbf16, #tpu.memory_space<vmem>>, vector<1x8x32x160xbf16>
    %127 = vector.shape_cast %126 : vector<1x8x32x160xbf16> to vector<8x32x160xbf16>
    %128 = vector.shape_cast %127 : vector<8x32x160xbf16> to vector<256x160xbf16>
    %c7 = arith.constant 7 : index
    %c0_101 = arith.constant 0 : index
    %c0_102 = arith.constant 0 : index
    %129 = vector.load %arg5[%c7, %c0_101, %c0_102] : memref<9x160x64xbf16, #tpu.memory_space<vmem>>, vector<1x160x64xbf16>
    %130 = vector.shape_cast %129 : vector<1x160x64xbf16> to vector<160x64xbf16>
    %cst_103 = arith.constant dense<0.000000e+00> : vector<256x64xf32>
    %131 = tpu.matmul %128, %130, %cst_103 {dimension_numbers = #tpu.dot_dimension_numbers<[1], [0], [0], [1], [0, 0, 1, 1], [], []>} : vector<256x160xbf16>, vector<160x64xbf16>, vector<256x64xf32> -> vector<256x64xf32>
    %132 = arith.addf %123, %131 : vector<256x64xf32>
    %c2_i32_104 = arith.constant 2 : i32
    %133 = arith.addi %1, %c2_i32_104 : i32
    %c0_105 = arith.constant 0 : index
    %134 = arith.index_cast %133 : i32 to index
    %c2_106 = arith.constant 2 : index
    %c0_107 = arith.constant 0 : index
    %135 = vector.load %arg3[%c0_105, %134, %c2_106, %c0_107] : memref<1x34x34x160xbf16, #tpu.memory_space<vmem>>, vector<1x8x32x160xbf16>
    %136 = vector.shape_cast %135 : vector<1x8x32x160xbf16> to vector<8x32x160xbf16>
    %137 = vector.shape_cast %136 : vector<8x32x160xbf16> to vector<256x160xbf16>
    %c8 = arith.constant 8 : index
    %c0_108 = arith.constant 0 : index
    %c0_109 = arith.constant 0 : index
    %138 = vector.load %arg5[%c8, %c0_108, %c0_109] : memref<9x160x64xbf16, #tpu.memory_space<vmem>>, vector<1x160x64xbf16>
    %139 = vector.shape_cast %138 : vector<1x160x64xbf16> to vector<160x64xbf16>
    %cst_110 = arith.constant dense<0.000000e+00> : vector<256x64xf32>
    %140 = tpu.matmul %137, %139, %cst_110 {dimension_numbers = #tpu.dot_dimension_numbers<[1], [0], [0], [1], [0, 0, 1, 1], [], []>} : vector<256x160xbf16>, vector<160x64xbf16>, vector<256x64xf32> -> vector<256x64xf32>
    %141 = arith.addf %132, %140 : vector<256x64xf32>
    %c0_111 = arith.constant 0 : index
    %c0_112 = arith.constant 0 : index
    %142 = vector.load %arg6[%c0_111, %c0_112] : memref<1x64xf32, #tpu.memory_space<vmem>>, vector<1x64xf32>
    %143 = vector.broadcast %142 : vector<1x64xf32> to vector<256x64xf32>
    %144 = arith.mulf %141, %143 : vector<256x64xf32>
    %c0_113 = arith.constant 0 : index
    %c0_114 = arith.constant 0 : index
    %145 = vector.load %arg7[%c0_113, %c0_114] : memref<1x64xf32, #tpu.memory_space<vmem>>, vector<1x64xf32>
    %146 = vector.broadcast %145 : vector<1x64xf32> to vector<256x64xf32>
    %147 = arith.addf %144, %146 : vector<256x64xf32>
    %cst_115 = arith.constant 0.000000e+00 : f32
    %148 = vector.broadcast %cst_115 : f32 to vector<256x64xf32>
    %149 = arith.maximumf %147, %148 : vector<256x64xf32>
    %150 = vector.shape_cast %149 : vector<256x64xf32> to vector<8x32x64xf32>
    %151 = arith.truncf %150 : vector<8x32x64xf32> to vector<8x32x64xbf16>
    %c0_116 = arith.constant 0 : index
    %c0_117 = arith.constant 0 : index
    %c0_118 = arith.constant 0 : index
    %c0_119 = arith.constant 0 : index
    %152 = vector.load %arg8[%c0_116, %c0_117, %c0_118, %c0_119] : memref<1x8x32x64xbf16, #tpu.memory_space<vmem>>, vector<1x8x32x64xbf16>
    %153 = vector.shape_cast %152 : vector<1x8x32x64xbf16> to vector<8x32x64xbf16>
    %154 = vector.shape_cast %151 : vector<8x32x64xbf16> to vector<1x8x32x64xbf16>
    tpu.vector_store %arg8[%c0_116, %c0_117, %c0_118, %c0_119], %154 {strides = array<i32>} : memref<1x8x32x64xbf16, #tpu.memory_space<vmem>>, vector<1x8x32x64xbf16>,
    return
  }
  func.func @transform_0(%arg0: i32, %arg1: i32) -> (i32, i32, i32, i32) {
    %c0_i32 = arith.constant 0 : i32
    %c0_i32_0 = arith.constant 0 : i32
    %c0_i32_1 = arith.constant 0 : i32
    %c0_i32_2 = arith.constant 0 : i32
    return %arg0, %c0_i32, %c0_i32_0, %c0_i32_1 : i32, i32, i32, i32
  }
  func.func @transform_1(%arg0: i32, %arg1: i32) -> (i32, i32, i32, i32) {
    %c0_i32 = arith.constant 0 : i32
    %c0_i32_0 = arith.constant 0 : i32
    %c0_i32_1 = arith.constant 0 : i32
    %c0_i32_2 = arith.constant 0 : i32
    return %arg0, %c0_i32, %c0_i32_0, %c0_i32_1 : i32, i32, i32, i32
  }
  func.func @transform_2(%arg0: i32, %arg1: i32) -> (i32, i32) {
    %c0_i32 = arith.constant 0 : i32
    %c0_i32_0 = arith.constant 0 : i32
    %c0_i32_1 = arith.constant 0 : i32
    return %c0_i32, %c0_i32_0 : i32, i32
  }
  func.func @transform_3(%arg0: i32, %arg1: i32) -> (i32, i32, i32) {
    %c0_i32 = arith.constant 0 : i32
    %c0_i32_0 = arith.constant 0 : i32
    %c0_i32_1 = arith.constant 0 : i32
    %c0_i32_2 = arith.constant 0 : i32
    return %c0_i32, %c0_i32_0, %c0_i32_1 : i32, i32, i32
  }
  func.func @transform_4(%arg0: i32, %arg1: i32) -> (i32, i32) {
    %c0_i32 = arith.constant 0 : i32
    %c0_i32_0 = arith.constant 0 : i32
    %c0_i32_1 = arith.constant 0 : i32
    return %c0_i32, %c0_i32_0 : i32, i32
  }
  func.func @transform_5(%arg0: i32, %arg1: i32) -> (i32, i32) {
    %c0_i32 = arith.constant 0 : i32
    %c0_i32_0 = arith.constant 0 : i32
    %c0_i32_1 = arith.constant 0 : i32
    return %c0_i32, %c0_i32_0 : i32, i32
  }
  func.func @transform_6(%arg0: i32, %arg1: i32) -> (i32, i32, i32, i32) {
    %c0_i32 = arith.constant 0 : i32
    %c0_i32_0 = arith.constant 0 : i32
    %c0_i32_1 = arith.constant 0 : i32
    return %arg0, %arg1, %c0_i32, %c0_i32_0 : i32, i32, i32, i32
  }
}

</mosaic_0001>

<bundles_post_ra>
// kernel: tpu_custom_call.1
= control target key start
LH: loop header
LB: loop body
LE: loop exit
PB: predicated region body
PF: predicated region fallthrough
CT: control target
= control target key end

     0   :  { %11 = vsyncpa [#allocation4], 0  ;;  %s16508_s0 = inlined_call_operand.hbm [shape: bf16[1,34,34,48], index: 0, kind: input, shape index: {}]   ;;  %s16509_s1 = inlined_call_operand.vmem [shape: bf16[1,34,34,160], index: 1, kind: input, shape index: {}]   ;;  %s16510_s2 = inlined_call_operand.vmem [shape: bf16[432,64], index: 2, kind: input, shape index: {}]   ;;  %s16511_s3 = inlined_call_operand.vmem [shape: bf16[9,160,64], index: 3, kind: input, shape index: {}]   ;;  %s16512_s4 = inlined_call_operand.vmem [shape: f32[1,64], index: 4, kind: input, shape index: {}]   ;;  %s16513_s5 = inlined_call_operand.vmem [shape: f32[1,64], index: 5, kind: input, shape index: {}]   ;;  %s16514_s6 = inlined_call_operand.hbm [shape: bf16[1,32,32,64], index: 6, kind: output, shape index: {}]  }
   0x1   :  { %12 = vsyncpa [#allocation5], 0 }
   0x2   :  { %14 = vsyncpa [#allocation5 + $0x1], 0  ;;  %s12652_s21 = smov 0   ;;  %s12654_s22 = smov 0  }
   0x3   :  { %s12656_s23 = smov 0   ;;  %s12658_s24 = smov 0  }
   0x4   :  { %s12660_s25 = smov 0   ;;  %s12662_s26 = smov 0  }
   0x5 LB: > { %s9967_s27 = sadd.s32 4294967295, %s12602_s26   ;;  %s9968_s28 = sadd.s32 4294967294, %s12602_s26   ;;  %s12602_s26 = sphi %s12662_s26, %s20_s26   ;;  %s12598_s25 = sphi %s12660_s25, %s16585_s25   ;;  %s12594_s24 = sphi %s12658_s24, %s16584_s24   ;;  %s12590_s23 = sphi %s12656_s23, %s16583_s23   ;;  %s12586_s22 = sphi %s12654_s22, %s16582_s22   ;;  %s12582_s21 = sphi %s12652_s21, %s16581_s21  }
   0x6   : > { %s29_s29 = sadd.s32 1, %s12598_s25  ;;  %s177_s30 = sadd.s32 1, %s12590_s23 }
   0x7   : > { %p30_p0 = scmp.ge.s32.totalorder %s29_s29, 4  ;;  %p187_p1 = scmp.ne.s32.totalorder %s12590_s23, %s12586_s22 }
   0x8   : > { %p188_p2 = scmp.eq.s32.totalorder %s9967_s27, 3  ;;  %p193_p3 = scmp.ne.s32.totalorder %s12586_s22, %s12582_s21 }
   0x9   : > { %s16587_s29 = smov (%p30_p0, %s29_s29), 0  ;;  %p194_p5 = scmp.eq.s32.totalorder %s9968_s28, 3 }
   0xa   : > { %p12692_p4 = por %p188_p2, %p187_p1  ;;  %s173_s8 = ssub.s32 %s12598_s25, %s16587_s29 }
   0xb   : > { %p9969_p6 = scmp.ge.s32.totalorder %s12602_s26, 1  ;;  %p175_p7 = scmp.eq.s32.totalorder %s173_s8, 0 }
   0xc   : > { %s16521_s7 = scalar_select %p12692_p4, 1, 0 }
   0xd   : > { %p12699_p8 = por %p194_p5, %p193_p3  ;;  %p201_p9 = scmp.lt.s32.totalorder %s12602_s26, 5 }
   0xe   : > { %s12705_s10 = scalar_select %p175_p7, %s12590_s23, %s177_s30  }
   0xf   : > { %s16522_s9 = scalar_select %p12699_p8, 1, 0 }
  0x10   : > { %p12707_p10 = pnand %p9969_p6, %p201_p9  ;;  %p12711_p11 = scmp.eq.s32.totalorder %s9967_s27, 0 }
  0x11   : > { %s12604_s13 = smov [#allocation3]   ;;  %s12492_s18 = scalar_lea.hbm %s16508_s0, 10880 }
  0x12   : > { %s16523_s11 = scalar_select %p12707_p10, 1, 0 }
  0x13   : > { %s16524_s12 = scalar_select %p12711_p11, 1, 0 }
  0x14   : > { %p12079_p12 = pneg %p12707_p10  ;;  %s216_s14 = sshll.u32 %s12604_s13, 4  ;;  %s217_s14 = int_to_ptr.vmem [resolvable:$true] %s216_s14 }
  0x15   : > { %p12493_p0 = scmp.ne.s32.totalorder %s16508_s0, %s12492_s18  ;;  %p12499_p5 = scmp.lt.u32.totalorder %s12492_s18, %s16508_s0 }
  0x16   : > { %p12719_p13 = pnand %p12711_p11, %p12079_p12 }
  0x18   : > { %p12494_p1 = pneg %p12719_p13 }
  0x1a   : > { %p12495_p2 = pnand %p12494_p1, %p12493_p0 }
  0x1c   : > { %p12496_p3 = pneg %p12495_p2 }
  0x1e   : > { %p12501_p6 = pnand %p12499_p5, %p12496_p3 }
  0x20   : > { %12504 = shalt.err (!%p12501_p6)
}
  0x21   : > { %s12505_s30 = scalar_lea.vmem %s217_s14, 10880  ;;  %p12513_p8 = scmp.lt.s32.totalorder %s217_s14, %s217_s14 }
  0x22   : > { %p12506_p7 = scmp.ne.s32.totalorder %s217_s14, %s12505_s30  ;;  %p12514_p4 = scmp.lt.s32.totalorder %s12505_s30, %s12505_s30 }
  0x24   : > { %p12508_p9 = pnand %p12506_p7, %p12494_p1  ;;  %p12515_p11 = por %p12514_p4, %p12513_p8 }
  0x26   : > { %p12509_p12 = pneg %p12508_p9 }
  0x28   : > { %p12516_p10 = pnand %p12515_p11, %p12509_p12 }
  0x2a   : > { %12519 = shalt.err (!%p12516_p10)
}
  0x2b   : > { %s12605_s8 = smov 64   ;;  %s12606_s13 = smov 4  }
  0x2c   : > { %12082 = dma.hbm_to_vmem [thread:$0]  (!%p12719_p13), %s16508_s0, 10880, %s217_s14, [#allocation4], %s12605_s8, %s12605_s8, %s12606_s13  }
  0x2d   : > { %p16526_p0 = scmp.ne.s32.totalorder %s16523_s11, 0 }
  0x2f   : > { %252 = sbr.rel (%p16526_p0) target bundleno = 1108 (0x454), region = 44 }
  0x36   : > { %p16527_p2 = scmp.ne.s32.totalorder %s16524_s12, 0 }
  0x38   : > { %12573 = dma.done.wait (%p16527_p2), [#allocation4], 10880  }
  0x39   : > { %12575 = vsyncadd (%p16527_p2), [#allocation4], 4294956416  ;;  %v16519_v0 = vmov 0   ;;  %s11329_s15 = smul.u32 160, %s12594_s24  ;;  %v12150_v1 = vld [vmem:[%s16511_s3] sm:$0xff]   ;;  %v12151_v2 = vld [vmem:[%s16511_s3 + $0xf0] sm:$0xff]  }
  0x3a   : > { %3638 = vmatprep.subr.bf16.mxu1 %v16519_v0  ;;  %6051 = vmatprep.subr.bf16.mxu0 %v16519_v0  ;;  %vm1026_vm0 = vcmask 1042432   ;;  %vm1027_vm1 = vcmask 1046532   ;;  %v12153_v4 = vld [vmem:[%s16511_s3 + $0x8] sm:$0xff]   ;;  %s12608_s28 = smov 16   ;;  %v12154_v5 = vld [vmem:[%s16511_s3 + $0xf8] sm:$0xff]   ;;  %v12156_v14 = vld [vmem:[%s16511_s3 + $0x10] sm:$0xff]  }
  0x3b   : > { %3639 = vmatpush1.bf16.msra.mxu1 %v12150_v1  ;;  %s12754_s20 = scalar_lea.vmem [#allocation3], %s11329_s15  ;;  %6052 = vmatpush1.bf16.msra.mxu0 %v12151_v2  ;;  %vm12771_vm2 = vmor %vm1026_vm0, %vm1027_vm1  ;;  %v12157_v17 = vld [vmem:[%s16511_s3 + $0x100] sm:$0xff]   ;;  %v12158_v19 = vld [vmem:[%s16511_s3 + $0x18] sm:$0xff]   ;;  %vm478_vm3 = vsmask.f32 3328  ;;  %s12609_s12 = smov 96  }
  0x3c   : > { %v12152_v3 = vld [vmem:[%s12754_s20 + $0x14] sm:$0xff]   ;;  %3640 = vmatprep.subr.bf16.mxu1 %v16519_v0  ;;  %6053 = vmatprep.subr.bf16.mxu0 %v16519_v0  ;;  %v12155_v6 = vld [vmem:[%s12754_s20 + $0x1c] sm:$0xff]   ;;  %v948_v7 = vld [vmem:[%s12754_s20 + $0x8] sm:$0xf]  ;;  %vm479_vm4 = vsmask.f32 7440 }
  0x3d   : > { %1379 = vrot.lane.b32.xlu0 %v12152_v3, %s12608_s28  ;;  %v949_v8 = vld [vmem:[%s12754_s20 + $0xc] sm:$0xf]  ;;  %v950_v9 = vld [vmem:[%s12754_s20 + $0x10] sm:$0x1]  ;;  %v1034_v11 = vrot.slane %v948_v7, 5  ;;  %v12160_v39 = vld [vmem:[%s16511_s3 + $0x20] sm:$0xff]  }
  0x3e   : > { %v1037_v12 = vrot.slane %v949_v8, 5  ;;  %v1040_v13 = vrot.slane %v950_v9, 5  ;;  %v946_v18 = vld [vmem:[%s12754_s20] sm:$0xe]  ;;  %v947_v20 = vld [vmem:[%s12754_s20 + $0x4] sm:$0xf]  ;;  %vm12844_vm5 = vmor %vm478_vm3, %vm479_vm4 }
  0x3f   : > { %3641 = vmatpush1.bf16.msra.mxu1 %v12153_v4  ;;  %6054 = vmatpush1.bf16.msra.mxu0 %v12154_v5  ;;  %v1036_v15 = vrot.slane %v1034_v11, 4  ;;  %v10010_v21 = vrot.slane %v946_v18, 9  ;;  %v10142_v22 = vld [vmem:[%s12754_s20 + $0x1c] sm:$0xf]  ;;  %v12159_v23 = vld [vmem:[%s16511_s3 + $0x108] sm:$0xff]   ;;  %v1031_v26 = vrot.slane %v947_v20, 5 }
  0x40   : > { %3642 = vmatprep.subr.bf16.mxu1 %v16519_v0  ;;  %6055 = vmatprep.subr.bf16.mxu0 %v16519_v0  ;;  %v1039_v16 = vrot.slane %v1037_v12, 4  ;;  %v10143_v27 = vld [vmem:[%s12754_s20 + $0x20] sm:$0xf]  ;;  %v10144_v28 = vld [vmem:[%s12754_s20 + $0x24] sm:$0x1]  ;;  %v2034_v29 = vrot.slane %v10142_v22, 5 }
  0x41   : > { %1381 = vrot.lane.b32.xlu0 %v12155_v6, %s12608_s28  ;;  %v1038_v24 = vsel %vm12771_vm2, %v1036_v15, %v1037_v12  ;;  %v2037_v31 = vrot.slane %v10143_v27, 5  ;;  %v2040_v32 = vrot.slane %v10144_v28, 5  ;;  %v1032_v33 = vsel %vm12771_vm2, %v10010_v21, %v1031_v26  ;;  %v10140_v37 = vld [vmem:[%s12754_s20 + $0x14] sm:$0xe]  ;;  %v10141_v38 = vld [vmem:[%s12754_s20 + $0x18] sm:$0xf] }
  0x42   : > { %v1041_v25 = vsel %vm12771_vm2, %v1039_v16, %v1040_v13  ;;  %v1033_v34 = vrot.slane %v1031_v26, 4  ;;  %v2036_v35 = vrot.slane %v2034_v29, 4  ;;  %v10180_v42 = vrot.slane %v10140_v37, 9  ;;  %v10084_v44 = vld [vmem:[%s12754_s20 + $0x14] sm:$0xf]  ;;  %s12610_s8 = smov 112  }
  0x43   : > { %3643 = vmatpush1.bf16.msra.mxu1 %v12156_v14  ;;  %6056 = vmatpush1.bf16.msra.mxu0 %v12157_v17  ;;  %v10019_v30 = vcombine.low %v1038_v24, %v1041_v25  ;;  %v2039_v36 = vrot.slane %v2037_v31, 4  ;;  %v2031_v43 = vrot.slane %v10141_v38, 5  ;;  %v10085_v45 = vld [vmem:[%s12754_s20 + $0x18] sm:$0xf]  ;;  %v12819_v48 = vld [vmem:[%s12754_s20 + $0x1c] sm:$0xf] }
  0x44   : > { %3644 = vmatprep.subr.bf16.mxu1 %v16519_v0  ;;  %6057 = vmatprep.subr.bf16.mxu0 %v16519_v0  ;;  %v1035_v40 = vsel %vm12771_vm2, %v1033_v34, %v1034_v11  ;;  %v2038_v41 = vsel %vm12771_vm2, %v2036_v35, %v2037_v31  ;;  %v1485_v49 = vshrl.u32 %v10084_v44, 16  ;;  %v1488_v50 = vshll.u32 %v10084_v44, 16  ;;  %v12161_v62 = vld [vmem:[%s16511_s3 + $0x110] sm:$0xff]   ;;  %v440_v63 = vld [vmem:[%s12754_s20 + $0x8] sm:$0xf]  ;;  %v12163_v20 = vld [vmem:[%s16511_s3 + $0x118] sm:$0xff]  }
  0x45   : > { %1183 = vrot.lane.b32.xlu1 %v10019_v30, %s12609_s12  ;;  %v10018_v46 = vcombine.low %v1032_v33, %v1035_v40  ;;  %v2041_v47 = vsel %vm12771_vm2, %v2039_v36, %v2040_v32  ;;  %v2032_v52 = vsel %vm12771_vm2, %v10180_v42, %v2031_v43  ;;  %v2033_v53 = vrot.slane %v2031_v43, 4  ;;  %v12162_v1 = vld [vmem:[%s16511_s3 + $0x28] sm:$0xff]   ;;  %v442_v7 = vld [vmem:[%s12754_s20 + $0x10] sm:$0x1]  ;;  %v438_v14 = vld [vmem:[%s12754_s20] sm:$0xf] }
  0x46   : > { %v10189_v51 = vcombine.low %v2038_v41, %v2041_v47  ;;  %v1494_v54 = vshll.u32 %v10085_v45, 16  ;;  %v1487_v55 = vrot.slane %v1485_v49, 4  ;;  %v1490_v56 = vrot.slane %v1488_v50, 5  ;;  %v441_v6 = vld [vmem:[%s12754_s20 + $0xc] sm:$0xf]  ;;  %v12165_v44 = vld [vmem:[%s16511_s3 + $0x120] sm:$0xff]  }
  0x47   : > { %3645 = vmatpush1.bf16.msra.mxu1 %v12158_v19  ;;  %6058 = vmatpush1.bf16.msra.mxu0 %v12159_v23  ;;  %v1498_v57 = vshrl.u32 %v10085_v45, 16  ;;  %v1504_v58 = vshll.u32 %v12819_v48, 16  ;;  %v2035_v59 = vsel %vm12771_vm2, %v2033_v53, %v2034_v29  ;;  %v1508_v61 = vshrl.u32 %v12819_v48, 16  ;;  %v439_v18 = vld [vmem:[%s12754_s20 + $0x4] sm:$0xf]  ;;  %v12164_v29 = vld [vmem:[%s16511_s3 + $0x30] sm:$0xff]  }
  0x48   : > { %3646 = vmatprep.subr.bf16.mxu1 %v16519_v0  ;;  %6059 = vmatprep.subr.bf16.mxu0 %v16519_v0  ;;  %v1496_v60 = vrot.slane %v1494_v54, 5  ;;  %v10188_v2 = vcombine.low %v2032_v52, %v2035_v59  ;;  %v1491_v3 = vor.u32 %v1490_v56, %v1487_v55  ;;  %v501_v9 = vshll.u32 %v440_v63, 16  ;;  %v951_v36 = vld [vmem:[%s12754_s20 + $0x14] sm:$0xe]  ;;  %v952_v37 = vld [vmem:[%s12754_s20 + $0x18] sm:$0xf] }
  0x49   : > { %1181 = vrot.lane.b32.xlu0 %v10018_v46, %s12609_s12  ;;  %2183 = vrot.lane.b32.xlu1 %v10189_v51, %s12610_s8  ;;  %v1500_v4 = vrot.slane %v1498_v57, 4  ;;  %v12838_v5 = vrot.slane %v1504_v58, 5  ;;  %v505_v11 = vshrl.u32 %v440_v63, 16  ;;  %v511_v12 = vshll.u32 %v441_v6, 16  ;;  %v12871_v43 = vld [vmem:[%s12754_s20 + $0x1c] sm:$0xf] }
  0x4a   : > { %v515_v13 = vshrl.u32 %v441_v6, 16  ;;  %v1492_v15 = vrot.slane %v1491_v3, 4  ;;  %v521_v17 = vshll.u32 %v442_v7, 16  ;;  %v482_v19 = vshrl.u32 %v438_v14, 16  ;;  %v10087_v49 = vld [vmem:[%s12754_s20 + $0x20] sm:$0xf] }
  0x4b   : > { %3647 = vmatpush1.bf16.msra.mxu1 %v12160_v39  ;;  %6060 = vmatpush1.bf16.msra.mxu0 %v12161_v62  ;;  %v1501_v16 = vor.u32 %v1500_v4, %v1496_v60  ;;  %v12855_v21 = vrot.slane %v501_v9, 5  ;;  %v507_v22 = vrot.slane %v505_v11, 4  ;;  %v513_v23 = vrot.slane %v511_v12, 5  ;;  %s12611_s13 = smov 64   ;;  %v10088_v54 = vld [vmem:[%s12754_s20 + $0x24] sm:$0x1] }
  0x4c   : > { %3648 = vmatprep.subr.bf16.mxu1 %v16519_v0  ;;  %6061 = vmatprep.subr.bf16.mxu0 %v16519_v0  ;;  %v517_v24 = vrot.slane %v515_v13, 4  ;;  %v1497_v25 = vsel %vm12844_vm5, %v1492_v15, %v1496_v60  ;;  %v523_v27 = vrot.slane %v521_v17, 5  ;;  %v484_v28 = vrot.slane %v482_v19, 4  ;;  %v12167_v59 = vld [vmem:[%s16511_s3 + $0x38] sm:$0xff]   ;;  %s12612_s19 = smov 48   ;;  %s11330_s16 = smul.u32 320, %s12594_s24 }
  0x4d   : > { %2181 = vrot.lane.b32.xlu0 %v10188_v2, %s12610_s8  ;;  %v1502_v26 = vrot.slane %v1501_v16, 4  ;;  %v508_v30 = vor.u32 %v507_v22, %v12855_v21  ;;  %v485_v32 = vshll.u32 %v438_v14, 16  ;;  %v491_v33 = vshll.u32 %v439_v18, 16  ;;  %v10089_v6 = vld [vmem:[%s12754_s20 + $0x28] sm:$0xf]  ;;  %s12614_s18 = smov 80  }
  0x4e   : > { %v518_v31 = vor.u32 %v517_v24, %v513_v23  ;;  %v495_v35 = vshrl.u32 %v439_v18, 16  ;;  %v1510_v38 = vrot.slane %v1508_v61, 4  ;;  %v10011_v47 = vrot.slane %v951_v36, 9  ;;  %v10090_v7 = vld [vmem:[%s12754_s20 + $0x2c] sm:$0xf]  ;;  %v12169_v18 = vld [vmem:[%s16511_s3 + $0x40] sm:$0xff]   ;;  %s12948_s30 = scalar_lea.vmem %s16509_s1, %s11330_s16 }
  0x4f   : > { %3649 = vmatpush1.bf16.msra.mxu1 %v12162_v1  ;;  %6062 = vmatpush1.bf16.msra.mxu0 %v12163_v20  ;;  %v1507_v34 = vsel %vm12844_vm5, %v1502_v26, %v12838_v5  ;;  %v509_v40 = vrot.slane %v508_v30, 4  ;;  %v487_v42 = vrot.slane %v485_v32, 5  ;;  %v493_v45 = vrot.slane %v491_v33, 5  ;;  %v12168_v1 = vld [vmem:[%s16511_s3 + $0x128] sm:$0xff]   ;;  %v12903_v13 = vld [vmem:[%s12754_s20 + $0x30] sm:$0xf] }
  0x50   : > { %3650 = vmatprep.subr.bf16.mxu1 %v16519_v0  ;;  %6063 = vmatprep.subr.bf16.mxu0 %v16519_v0  ;;  %v10124_v39 = vcombine.low %v1497_v25, %v1507_v34  ;;  %v519_v41 = vrot.slane %v518_v31, 4  ;;  %v497_v46 = vrot.slane %v495_v35, 4  ;;  %v1044_v48 = vrot.slane %v952_v37, 5  ;;  %v12170_v26 = vld [vmem:[%s16511_s3 + $0x130] sm:$0xff]   ;;  %v10145_v34 = vld [vmem:[%s12754_s20 + $0x28] sm:$0xe] }
  0x51   : > { %v514_v50 = vsel %vm12844_vm5, %v509_v40, %v513_v23  ;;  %v488_v52 = vor.u32 %v487_v42, %v484_v28  ;;  %v1047_v53 = vrot.slane %v12871_v43, 5  ;;  %v1511_v61 = vor.u32 %v1510_v38, %v12838_v5  ;;  %v10146_v37 = vld [vmem:[%s12754_s20 + $0x2c] sm:$0xf]  ;;  %v12929_v38 = vld [vmem:[%s12754_s20 + $0x30] sm:$0xf]  ;;  %s279_s11 = sand.u32 1, %s12586_s22  }
  0x52   : > { %1884 = vrot.lane.b32.xlu1 %v10124_v39, %s12611_s13  ;;  %v524_v51 = vsel %vm12844_vm5, %v519_v41, %v523_v27  ;;  %v498_v56 = vor.u32 %v497_v46, %v493_v45  ;;  %v1045_v57 = vsel %vm12771_vm2, %v10011_v47, %v1044_v48  ;;  %v1046_v58 = vrot.slane %v1044_v48, 4  ;;  %v12172_v40 = vld [vmem:[%s16511_s3 + $0x48] sm:$0xff]   ;;  %v444_v46 = vld [vmem:[%s12754_s20 + $0x18] sm:$0xf]  ;;  %s9974_s17 = sshll.u32 %s279_s11, 7  ;;  %p16579_p8 = scmp.ne.s32.totalorder %s16521_s7, 0 }
  0x53   : > { %3651 = vmatpush1.bf16.msra.mxu1 %v12164_v29  ;;  %6064 = vmatpush1.bf16.msra.mxu0 %v12165_v44  ;;  %v9995_v55 = vcombine.low %v514_v50, %v524_v51  ;;  %v489_v60 = vrot.slane %v488_v52, 4  ;;  %v1514_v62 = vshll.u32 %v10087_v49, 16  ;;  %v1518_v63 = vshrl.u32 %v10087_v49, 16  ;;  %v12166_v49 = vld [vmem:[%s12754_s20 + $0x28] sm:$0xff]   ;;  %v445_v50 = vld [vmem:[%s12754_s20 + $0x1c] sm:$0xf] }
  0x54   : > { %3652 = vmatprep.subr.bf16.mxu1 %v16519_v0  ;;  %6065 = vmatprep.subr.bf16.mxu0 %v16519_v0  ;;  %v499_v2 = vrot.slane %v498_v56, 4  ;;  %v1048_v3 = vsel %vm12771_vm2, %v1046_v58, %v1047_v53  ;;  %v1524_v4 = vshll.u32 %v10088_v54, 16  ;;  %v1512_v11 = vrot.slane %v1511_v61, 4  ;;  %s16294_s15 = scalar_lea.vmem [#allocation6], %s9974_s17 }
  0x55   : > { %883 = vrot.lane.b32.xlu0 %v9995_v55, %s12612_s19  ;;  %v494_v5 = vsel %vm12844_vm5, %v489_v60, %v493_v45  ;;  %v10020_v9 = vcombine.low %v1045_v57, %v1048_v3  ;;  %v1516_v12 = vrot.slane %v1514_v62, 5  ;;  %v1520_v15 = vrot.slane %v1518_v63, 4  ;;  %v443_v45 = vld [vmem:[%s12754_s20 + $0x14] sm:$0xf] }
  0x56   : > { %v504_v14 = vsel %vm12844_vm5, %v499_v2, %v12855_v21  ;;  %v1526_v16 = vrot.slane %v1524_v4, 5  ;;  %v1529_v17 = vshrl.u32 %v10089_v6, 16  ;;  %v1532_v20 = vshll.u32 %v10089_v6, 16 }
  0x57   : > { %3653 = vmatpush1.bf16.msra.mxu1 %v12167_v59  ;;  %6066 = vmatpush1.bf16.msra.mxu0 %v12168_v1  ;;  %v9994_v19 = vcombine.low %v494_v5, %v504_v14  ;;  %v1538_v22 = vshll.u32 %v10090_v7, 16  ;;  %v1521_v23 = vor.u32 %v1520_v15, %v1516_v12  ;;  %v1542_v25 = vshrl.u32 %v10090_v7, 16 }
  0x58   : > { %3654 = vmatprep.subr.bf16.mxu1 %v16519_v0  ;;  %6067 = vmatprep.subr.bf16.mxu0 %v16519_v0  ;;  %v1531_v24 = vrot.slane %v1529_v17, 4  ;;  %v1548_v21 = vshll.u32 %v12903_v13, 16  ;;  %v1517_v27 = vsel %vm12844_vm5, %v1512_v11, %v1516_v12  ;;  %v1534_v28 = vrot.slane %v1532_v20, 5  ;;  %v954_v11 = vld [vmem:[%s12754_s20 + $0x20] sm:$0xf]  ;;  %v12171_v20 = vld [vmem:[%s12754_s20 + $0x30] sm:$0xff]  }
  0x59   : > { %1185 = vrot.lane.b32.xlu0 %v10020_v9, %s12609_s12  ;;  %881 = vrot.lane.b32.xlu1 %v9994_v19, %s12612_s19  ;;  %v1540_v29 = vrot.slane %v1538_v22, 5  ;;  %v1552_v30 = vshrl.u32 %v12903_v13, 16  ;;  %v1522_v31 = vrot.slane %v1521_v23, 4  ;;  %v1544_v32 = vrot.slane %v1542_v25, 4  ;;  %v955_v12 = vld [vmem:[%s12754_s20 + $0x24] sm:$0x1] }
  0x5a   : > { %v12924_v33 = vrot.slane %v1548_v21, 5  ;;  %v1049_v35 = vrot.slane %v1047_v53, 4  ;;  %v1535_v36 = vor.u32 %v1534_v28, %v1531_v24  ;;  %v10181_v39 = vrot.slane %v10145_v34, 9  ;;  %v12173_v53 = vld [vmem:[%s16511_s3 + $0x138] sm:$0xff]   ;;  %v446_v24 = vld [vmem:[%s12754_s20 + $0x20] sm:$0xf] }
  0x5b   : > { %3655 = vmatpush1.bf16.msra.mxu1 %v12169_v18  ;;  %6068 = vmatpush1.bf16.msra.mxu0 %v12170_v26  ;;  %v1527_v41 = vsel %vm12844_vm5, %v1522_v31, %v1526_v16  ;;  %v1545_v42 = vor.u32 %v1544_v32, %v1540_v29  ;;  %v2044_v43 = vrot.slane %v10146_v37, 5  ;;  %v2047_v44 = vrot.slane %v12929_v38, 5  ;;  %v447_v25 = vld [vmem:[%s12754_s20 + $0x24] sm:$0x1]  ;;  %v10093_v34 = vld [vmem:[%s12754_s20 + $0x38] sm:$0x1] }
  0x5c   : > { %3656 = vmatprep.subr.bf16.mxu1 %v16519_v0  ;;  %6069 = vmatprep.subr.bf16.mxu0 %v16519_v0  ;;  %v10125_v47 = vcombine.low %v1517_v27, %v1527_v41  ;;  %v1536_v48 = vrot.slane %v1535_v36, 4  ;;  %v526_v51 = vshrl.u32 %v443_v45, 16  ;;  %v529_v52 = vshll.u32 %v443_v45, 16  ;;  %v12174_v37 = vld [vmem:[%s12948_s30] ss:$8 sps:$4 sm:$0xff]  }
  0x5d   : > { %v1546_v54 = vrot.slane %v1545_v42, 4  ;;  %v2045_v55 = vsel %vm12771_vm2, %v10181_v39, %v2044_v43  ;;  %v2046_v56 = vrot.slane %v2044_v43, 4  ;;  %v535_v57 = vshll.u32 %v444_v46, 16  ;;  %v12176_v43 = vld [vmem:[%s12948_s30 + $0x4] ss:$8 sps:$4 sm:$0xff]  }
  0x5e   : > { %1886 = vrot.lane.b32.xlu1 %v10125_v47, %s12611_s13  ;;  %v1541_v58 = vsel %vm12844_vm5, %v1536_v48, %v1540_v29  ;;  %v528_v59 = vrot.slane %v526_v51, 4  ;;  %v531_v60 = vrot.slane %v529_v52, 5  ;;  %v539_v61 = vshrl.u32 %v444_v46, 16  ;;  %v10092_v29 = vld [vmem:[%s12754_s20 + $0x34] sm:$0xf]  ;;  %v12180_v46 = vld [vmem:[%s16510_s2 + $0x40] sm:$0xff]  }
  0x5f   : > { %3657 = vmatpush1.bf16.msra.mxu1 %v12172_v40  ;;  %6070 = vmatpush1.bf16.msra.mxu0 %v12173_v53  ;;  %vm2231_vm6 = vcmask 261120   ;;  %v1551_v62 = vsel %vm12844_vm5, %v1546_v54, %v12924_v33  ;;  %v2048_v63 = vsel %vm12771_vm2, %v2046_v56, %v2047_v44  ;;  %v537_v1 = vrot.slane %v535_v57, 5  ;;  %v12986_v45 = vld [vmem:[%s12948_s30 + $0x28] ss:$8 sps:$4 sm:$0xff]   ;;  %v12993_v13 = vld [vmem:[%s12948_s30 + $0x2c] ss:$8 sps:$4 sm:$0xff]  }
  0x60   : > { %v545_v2 = vshll.u32 %v445_v50, 16  ;;  %6877 = vmatprep.subr.bf16.mxu0 %v16519_v0  ;;  %v10126_v3 = vcombine.low %v1541_v58, %v1551_v62  ;;  %v532_v4 = vor.u32 %v531_v60, %v528_v59  ;;  %v541_v6 = vrot.slane %v539_v61, 4  ;;  %10418 = vmatprep.mubr.msk.bf16.mxu1 %vm2231_vm6, %v12176_v43  ;;  %v12182_v56 = vld [vmem:[%s16511_s3 + $0x140] sm:$0xff]   ;;  %v956_v38 = vld [vmem:[%s12754_s20 + $0x28] sm:$0xe] }
  0x61   : > { %v10190_v7 = vcombine.low %v2045_v55, %v2048_v63  ;;  %v549_v9 = vshrl.u32 %v445_v50, 16  ;;  %v1050_v16 = vrot.slane %v954_v11, 5  ;;  %v1053_v17 = vrot.slane %v955_v12, 5  ;;  %10737 = vmatprep.mubr.msk.bf16.mxu0 %vm2231_vm6, %v12993_v13  ;;  %11365 = vmatprep.subr.bf16.mxu1 %v12180_v46  ;;  %v957_v60 = vld [vmem:[%s12754_s20 + $0x2c] sm:$0xf] }
  0x62   : > { %v547_v5 = vrot.slane %v545_v2, 5  ;;  %1888 = vrot.lane.b32.xlu0 %v10126_v3, %s12611_s13  ;;  %1383 = vrot.lane.b32.xlu1 %v12166_v49, %s12608_s28  ;;  %v533_v14 = vrot.slane %v532_v4, 4  ;;  %v542_v15 = vor.u32 %v541_v6, %v537_v1  ;;  %v555_v26 = vshll.u32 %v446_v24, 16  ;;  %v13014_v61 = vld [vmem:[%s12754_s20 + $0x30] sm:$0xf] }
  0x63   : > { %v1051_v22 = vsel %vm12771_vm2, %v1049_v35, %v1050_v16  ;;  %v1052_v23 = vrot.slane %v1050_v16, 4  ;;  %v551_v21 = vrot.slane %v549_v9, 4  ;;  %v559_v27 = vshrl.u32 %v446_v24, 16  ;;  %3671 = vmatmul.mubr.bf16.vlgmr.msra.gmra.mrb[0].mxu1 %v12174_v37  ;;  %6084 = vmatmul.mubr.bf16.vlgmr.msra.gmra.mrb[0].mxu0 %v12986_v45  ;;  %v10148_v3 = vld [vmem:[%s12754_s20 + $0x34] sm:$0xf]  ;;  %v12190_v37 = vld [vmem:[%s16511_s3 + $0x148] sm:$0xff]  }
  0x64   : > { %v538_v18 = vsel %vm12844_vm5, %v533_v14, %v537_v1  ;;  %v543_v19 = vrot.slane %v542_v15, 4  ;;  %v565_v28 = vshll.u32 %v447_v25, 16  ;;  %v1554_v35 = vrot.slane %v1552_v30, 4  ;;  %v12181_v30 = vld [vmem:[%s16510_s2] sm:$0xff]   ;;  %v10149_v4 = vld [vmem:[%s12754_s20 + $0x38] sm:$0x1]  ;;  %6878 = vmatpush1.bf16.msra.mxu0 %v12182_v56 }
  0x65   : > { %v1054_v32 = vsel %vm12771_vm2, %v1052_v23, %v1053_v17  ;;  %v1558_v36 = vshll.u32 %v10092_v29, 16  ;;  %v552_v41 = vor.u32 %v551_v21, %v547_v5  ;;  %v557_v42 = vrot.slane %v555_v26, 5  ;;  %11366 = vmatpush3.bf16.msra.mxu1 %v12181_v30  ;;  %6879 = vmatprep.subr.bf16.mxu0 %v16519_v0  ;;  %v10094_v16 = vld [vmem:[%s12754_s20 + $0x3c] sm:$0xf]  ;;  %v10095_v17 = vld [vmem:[%s12754_s20 + $0x40] sm:$0xf] }
  0x66   : > { %2185 = vrot.lane.b32.xlu0 %v10190_v7, %s12610_s8  ;;  %v548_v31 = vsel %vm12844_vm5, %v543_v19, %v547_v5  ;;  %v10021_v40 = vcombine.low %v1051_v22, %v1054_v32  ;;  %v561_v47 = vrot.slane %v559_v27, 4  ;;  %v567_v48 = vrot.slane %v565_v28, 5  ;;  %v12184_v32 = vld [vmem:[%s12948_s30 + $0x14] ss:$8 sps:$4 sm:$0xff]  }
  0x67   : > { %v9996_v39 = vcombine.low %v538_v18, %v548_v31  ;;  %v1555_v49 = vor.u32 %v1554_v35, %v12924_v33  ;;  %v1560_v50 = vrot.slane %v1558_v36, 5  ;;  %v553_v51 = vrot.slane %v552_v41, 4  ;;  %10419 = vmatprep.mubr.msk.bf16.mxu1 %vm2231_vm6, %v12184_v32  ;;  %v13049_v41 = vld [vmem:[%s12948_s30 + $0x3c] ss:$8 sps:$4 sm:$0xff]  }
  0x68   : > { %v1562_v52 = vshrl.u32 %v10092_v29, 16  ;;  %v1568_v53 = vshll.u32 %v10093_v34, 16  ;;  %v2049_v54 = vrot.slane %v2047_v44, 4  ;;  %v562_v33 = vor.u32 %v561_v47, %v557_v42  ;;  %v13054_v47 = vld [vmem:[%s12948_s30 + $0x38] ss:$8 sps:$4 sm:$0xff]   ;;  %6880 = vmatpush1.bf16.msra.mxu0 %v12190_v37  ;;  %10738 = vmatprep.mubr.msk.bf16.mxu0 %vm2231_vm6, %v13049_v41 }
  0x69   : > { %885 = vrot.lane.b32.xlu1 %v9996_v39, %s12612_s19  ;;  %v1556_v55 = vrot.slane %v1555_v49, 4  ;;  %v558_v44 = vsel %vm12844_vm5, %v553_v51, %v557_v42  ;;  %v10012_v62 = vrot.slane %v956_v38, 9  ;;  %v1057_v1 = vrot.slane %v957_v60, 5  ;;  %v12188_v42 = vld [vmem:[%s12948_s30 + $0x10] ss:$8 sps:$4 sm:$0xff]   ;;  %v12183_v51 = vld [vmem:[%s12754_s20 + $0x3c] sm:$0xff]   ;;  %6881 = vmatprep.subr.bf16.mxu0 %v16519_v0 }
  0x6a   : > { %1385 = vrot.lane.b32.xlu0 %v12171_v20, %s12608_s28  ;;  %v1564_v57 = vrot.slane %v1562_v52, 4  ;;  %v1570_v58 = vrot.slane %v1568_v53, 5  ;;  %v563_v59 = vrot.slane %v562_v33, 4  ;;  %v1060_v2 = vrot.slane %v13014_v61, 5  ;;  %v13032_v20 = vld [vmem:[%s12754_s20 + $0x44] sm:$0xf] }
  0x6b   : > { %v1561_v7 = vsel %vm12844_vm5, %v1556_v55, %v1560_v50  ;;  %v2050_v5 = vrot.slane %v10148_v3, 5  ;;  %v2053_v9 = vrot.slane %v10149_v4, 5  ;;  %v1058_v14 = vsel %vm12771_vm2, %v10012_v62, %v1057_v1  ;;  %v10151_v49 = vld [vmem:[%s12754_s20 + $0x40] sm:$0xf]  ;;  %3679 = vmatmul.mubr.bf16.gmra.mrb[4].mxu1 %v12188_v42  ;;  %v13065_v52 = vld [vmem:[%s12754_s20 + $0x44] sm:$0xf]  ;;  %6092 = vmatmul.mubr.bf16.gmra.mrb[4].mxu0 %v13054_v47 }
  0x6c   : > { %v1565_v63 = vor.u32 %v1564_v57, %v1560_v50  ;;  %v568_v6 = vsel %vm12844_vm5, %v563_v59, %v567_v48  ;;  %v1059_v15 = vrot.slane %v1057_v1, 4  ;;  %v1573_v22 = vshrl.u32 %v10094_v16, 16  ;;  %v10150_v48 = vld [vmem:[%s12754_s20 + $0x3c] sm:$0xe]  ;;  %10420 = vmatprep.mubr.msk.bf16.mxu1 %vm2231_vm6, %v12993_v13  ;;  %v449_v61 = vld [vmem:[%s12754_s20 + $0x2c] sm:$0xf] }
  0x6d   : > { %1187 = vrot.lane.b32.xlu1 %v10021_v40, %s12609_s12  ;;  %v9997_v11 = vcombine.low %v558_v44, %v568_v6  ;;  %v2051_v18 = vsel %vm12771_vm2, %v2049_v54, %v2050_v5  ;;  %v2052_v19 = vrot.slane %v2050_v5, 4  ;;  %v1576_v23 = vshll.u32 %v10094_v16, 16  ;;  %v448_v44 = vld [vmem:[%s12754_s20 + $0x28] sm:$0xf]  ;;  %v450_v62 = vld [vmem:[%s12754_s20 + $0x30] sm:$0xf] }
  0x6e   : > { %v1566_v12 = vrot.slane %v1565_v63, 4  ;;  %v1061_v25 = vsel %vm12771_vm2, %v1059_v15, %v1060_v2  ;;  %v1582_v21 = vshll.u32 %v10095_v17, 16  ;;  %v1586_v26 = vshrl.u32 %v10095_v17, 16  ;;  %v960_v16 = vld [vmem:[%s12754_s20 + $0x38] sm:$0x1] }
  0x6f   : > { %887 = vrot.lane.b32.xlu0 %v9997_v11, %s12612_s19  ;;  %v10022_v28 = vcombine.low %v1058_v14, %v1061_v25  ;;  %v2054_v29 = vsel %vm12771_vm2, %v2052_v19, %v2053_v9  ;;  %v1575_v31 = vrot.slane %v1573_v22, 4  ;;  %v1578_v34 = vrot.slane %v1576_v23, 5  ;;  %v959_v11 = vld [vmem:[%s12754_s20 + $0x34] sm:$0xf]  ;;  %v12191_v25 = vld [vmem:[%s12754_s20 + $0x44] sm:$0xff]  }
  0x70   : > { %v1571_v24 = vsel %vm12844_vm5, %v1566_v12, %v1570_v58  ;;  %v1584_v35 = vrot.slane %v1582_v21, 5  ;;  %v1588_v36 = vrot.slane %v1586_v26, 4  ;;  %v10191_v39 = vcombine.low %v2051_v18, %v2054_v29  ;;  %v12192_v23 = vld [vmem:[%s12948_s30 + $0x54] ss:$8 sps:$4 sm:$0xff]  }
  0x71   : > { %v10127_v27 = vcombine.low %v1561_v7, %v1571_v24  ;;  %v1592_v40 = vshll.u32 %v13032_v20, 16  ;;  %v1579_v43 = vor.u32 %v1578_v34, %v1575_v31  ;;  %v1596_v30 = vshrl.u32 %v13032_v20, 16  ;;  %10739 = vmatprep.mubr.msk.bf16.mxu0 %vm2231_vm6, %v12192_v23  ;;  %v12196_v31 = vld [vmem:[%s16511_s3 + $0x150] sm:$0xff]   ;;  %v12197_v34 = vld [vmem:[%s16510_s2 + $0x8] sm:$0xff]  }
  0x72   : > { %v1589_v46 = vor.u32 %v1588_v36, %v1584_v35  ;;  %v10182_v53 = vrot.slane %v10150_v48, 9  ;;  %v2057_v54 = vrot.slane %v10151_v49, 5  ;;  %v2060_v56 = vrot.slane %v13065_v52, 5  ;;  %v451_v37 = vld [vmem:[%s12754_s20 + $0x34] sm:$0xf]  ;;  %6882 = vmatpush1.bf16.msra.mxu0 %v12196_v31 }
  0x73   : > { %1890 = vrot.lane.b32.xlu1 %v10127_v27, %s12611_s13  ;;  %1189 = vrot.lane.b32.xlu0 %v10022_v28, %s12609_s12  ;;  %v13058_v50 = vrot.slane %v1592_v40, 5  ;;  %v1580_v33 = vrot.slane %v1579_v43, 4  ;;  %v1062_v57 = vrot.slane %v1060_v2, 4  ;;  %v570_v13 = vshrl.u32 %v448_v44, 16  ;;  %v12194_v27 = vld [vmem:[%s16510_s2 + $0x48] sm:$0xff]  }
  0x74   : > { %v1590_v55 = vrot.slane %v1589_v46, 4  ;;  %v2058_v58 = vsel %vm12771_vm2, %v10182_v53, %v2057_v54  ;;  %v2059_v38 = vrot.slane %v2057_v54, 4  ;;  %v573_v63 = vshll.u32 %v448_v44, 16  ;;  %3687 = vmatmul.mubr.bf16.gmra.mrb[8].mxu1 %v12986_v45  ;;  %v13102_v28 = vld [vmem:[%s12948_s30 + $0x50] ss:$8 sps:$4 sm:$0xff]   ;;  %11367 = vmatprep.subr.bf16.mxu1 %v12194_v27 }
  0x75   : > { %v1585_v59 = vsel %vm12844_vm5, %v1580_v33, %v1584_v35  ;;  %v579_v3 = vshll.u32 %v449_v61, 16  ;;  %v583_v4 = vshrl.u32 %v449_v61, 16  ;;  %v572_v7 = vrot.slane %v570_v13, 4  ;;  %10421 = vmatprep.mubr.msk.bf16.mxu1 %vm2231_vm6, %v13049_v41  ;;  %6100 = vmatmul.mubr.bf16.gmra.mrb[8].mxu0 %v13102_v28  ;;  %v10097_v49 = vld [vmem:[%s12754_s20 + $0x48] sm:$0xf] }
  0x76   : > { %v1595_v60 = vsel %vm12844_vm5, %v1590_v55, %v13058_v50  ;;  %v2061_v2 = vsel %vm12771_vm2, %v2059_v38, %v2060_v56  ;;  %v575_v5 = vrot.slane %v573_v63, 5  ;;  %v589_v9 = vshll.u32 %v450_v62, 16  ;;  %11368 = vmatpush3.bf16.msra.mxu1 %v12197_v34  ;;  %v10098_v54 = vld [vmem:[%s12754_s20 + $0x4c] sm:$0x1]  ;;  %6883 = vmatprep.subr.bf16.mxu0 %v16519_v0  ;;  %v962_v44 = vld [vmem:[%s12754_s20 + $0x40] sm:$0xf] }
  0x77   : > { %2187 = vrot.lane.b32.xlu1 %v10191_v39, %s12610_s8  ;;  %v10128_v1 = vcombine.low %v1585_v59, %v1595_v60  ;;  %v10192_v6 = vcombine.low %v2058_v58, %v2061_v2  ;;  %v581_v12 = vrot.slane %v579_v3, 5  ;;  %v585_v14 = vrot.slane %v583_v4, 4  ;;  %v452_v39 = vld [vmem:[%s12754_s20 + $0x38] sm:$0x1]  ;;  %v10153_v3 = vld [vmem:[%s12754_s20 + $0x48] sm:$0xf] }
  0x78   : > { %v593_v15 = vshrl.u32 %v450_v62, 16  ;;  %v1063_v17 = vrot.slane %v959_v11, 5  ;;  %v576_v18 = vor.u32 %v575_v5, %v572_v7  ;;  %v591_v19 = vrot.slane %v589_v9, 5  ;;  %v13135_v62 = vld [vmem:[%s12754_s20 + $0x44] sm:$0xf]  ;;  %v12200_v4 = vld [vmem:[%s16511_s3 + $0x158] sm:$0xff]  }
  0x79   : > { %1892 = vrot.lane.b32.xlu0 %v10128_v1, %s12611_s13  ;;  %v1066_v22 = vrot.slane %v960_v16, 5  ;;  %v586_v24 = vor.u32 %v585_v14, %v581_v12  ;;  %v1598_v41 = vrot.slane %v1596_v30, 4  ;;  %v599_v43 = vshll.u32 %v451_v37, 16  ;;  %v10154_v9 = vld [vmem:[%s12754_s20 + $0x4c] sm:$0x1]  ;;  %6884 = vmatpush1.bf16.msra.mxu0 %v12200_v4 }
  0x7a   : > { %v13095_v21 = vsel %vm12771_vm2, %v1062_v57, %v1063_v17  ;;  %v1065_v26 = vrot.slane %v1063_v17, 4  ;;  %v577_v29 = vrot.slane %v576_v18, 4  ;;  %v595_v40 = vrot.slane %v593_v15, 4  ;;  %v961_v57 = vld [vmem:[%s12754_s20 + $0x3c] sm:$0xe]  ;;  %6885 = vmatprep.subr.bf16.mxu0 %v16519_v0 }
  0x7b   : > { %1387 = vrot.lane.b32.xlu1 %v12183_v51, %s12608_s28  ;;  %v587_v45 = vrot.slane %v586_v24, 4  ;;  %v603_v46 = vshrl.u32 %v451_v37, 16  ;;  %v609_v48 = vshll.u32 %v452_v39, 16  ;;  %v1599_v33 = vor.u32 %v1598_v41, %v13058_v50  ;;  %v12198_v11 = vld [vmem:[%s12948_s30 + $0x64] ss:$8 sps:$4 sm:$0xff]  }
  0x7c   : > { %v1067_v32 = vsel %vm12771_vm2, %v1065_v26, %v1066_v22  ;;  %v582_v35 = vsel %vm12844_vm5, %v577_v29, %v581_v12  ;;  %v596_v53 = vor.u32 %v595_v40, %v591_v19  ;;  %v1602_v55 = vshll.u32 %v10097_v49, 16  ;;  %3695 = vmatmul.mubr.bf16.gmra.mrb[12].mxu1 %v13054_v47  ;;  %10740 = vmatprep.mubr.msk.bf16.mxu0 %vm2231_vm6, %v12198_v11  ;;  %v12204_v4 = vld [vmem:[%s12948_s30 + $0x7c] ss:$8 sps:$4 sm:$0xff]  }
  0x7d   : > { %2189 = vrot.lane.b32.xlu0 %v10192_v6, %s12610_s8  ;;  %v10023_v36 = vcombine.low %v13095_v21, %v1067_v32  ;;  %v592_v42 = vsel %vm12844_vm5, %v587_v45, %v591_v19  ;;  %v601_v20 = vrot.slane %v599_v43, 5  ;;  %v605_v30 = vrot.slane %v603_v46, 4  ;;  %10422 = vmatprep.mubr.msk.bf16.mxu1 %vm2231_vm6, %v12192_v23  ;;  %v13155_v19 = vld [vmem:[%s12948_s30 + $0x60] ss:$8 sps:$4 sm:$0xff]   ;;  %v13175_v45 = vld [vmem:[%s12754_s20 + $0x58] sm:$0xf] }
  0x7e   : > { %v9998_v51 = vcombine.low %v582_v35, %v592_v42  ;;  %v611_v58 = vrot.slane %v609_v48, 5  ;;  %v1606_v38 = vshrl.u32 %v10097_v49, 16  ;;  %v597_v59 = vrot.slane %v596_v53, 4  ;;  %v12203_v21 = vld [vmem:[%s16511_s3 + $0x160] sm:$0xff]   ;;  %6108 = vmatmul.mubr.bf16.gmra.mrb[12].mxu0 %v13155_v19  ;;  %v10155_v49 = vld [vmem:[%s12754_s20 + $0x50] sm:$0xe] }
  0x7f   : > { %v1600_v60 = vrot.slane %v1599_v33, 4  ;;  %v1604_v61 = vrot.slane %v1602_v55, 5  ;;  %v1612_v50 = vshll.u32 %v10098_v54, 16  ;;  %v606_v13 = vor.u32 %v605_v30, %v601_v20  ;;  %6886 = vmatpush1.bf16.msra.mxu0 %v12203_v21  ;;  %v10156_v55 = vld [vmem:[%s12754_s20 + $0x54] sm:$0xf]  ;;  %10741 = vmatprep.mubr.msk.bf16.mxu0 %vm2231_vm6, %v12204_v4 }
  0x80   : > { %889 = vrot.lane.b32.xlu1 %v9998_v51, %s12612_s19  ;;  %v1608_v63 = vrot.slane %v1606_v38, 4  ;;  %v10013_v1 = vrot.slane %v961_v57, 9  ;;  %v1070_v2 = vrot.slane %v962_v44, 5  ;;  %v602_v6 = vsel %vm12844_vm5, %v597_v59, %v601_v20  ;;  %6887 = vmatprep.subr.bf16.mxu0 %v16519_v0  ;;  %v12206_v51 = vld [vmem:[%s16510_s2 + $0x50] sm:$0xff]  }
  0x81   : > { %1389 = vrot.lane.b32.xlu0 %v12191_v25, %s12608_s28  ;;  %v1614_v7 = vrot.slane %v1612_v50, 5  ;;  %v1073_v5 = vrot.slane %v13135_v62, 5  ;;  %v607_v12 = vrot.slane %v606_v13, 4  ;;  %v2062_v47 = vrot.slane %v2060_v56, 4  ;;  %v10099_v56 = vld [vmem:[%s12754_s20 + $0x50] sm:$0xf]  ;;  %11369 = vmatprep.subr.bf16.mxu1 %v12206_v51 }
  0x82   : > { %v1609_v14 = vor.u32 %v1608_v63, %v1604_v61  ;;  %v1071_v15 = vsel %vm12771_vm2, %v10013_v1, %v1070_v2  ;;  %v1072_v16 = vrot.slane %v1070_v2, 4  ;;  %v2063_v17 = vrot.slane %v10153_v3, 5  ;;  %v10100_v25 = vld [vmem:[%s12754_s20 + $0x54] sm:$0xf] }
  0x83   : > { %v2066_v18 = vrot.slane %v10154_v9, 5  ;;  %v612_v22 = vsel %vm12844_vm5, %v607_v12, %v611_v58  ;;  %v1605_v23 = vsel %vm12844_vm5, %v1600_v60, %v1604_v61  ;;  %v1617_v34 = vshrl.u32 %v10099_v56, 16  ;;  %v453_v58 = vld [vmem:[%s12754_s20 + $0x3c] sm:$0xf]  ;;  %v12208_v38 = vld [vmem:[%s16510_s2 + $0x10] sm:$0xff]  }
  0x84   : > { %1191 = vrot.lane.b32.xlu1 %v10023_v36, %s12609_s12  ;;  %v1610_v24 = vrot.slane %v1609_v14, 4  ;;  %v1074_v52 = vsel %vm12771_vm2, %v1072_v16, %v1073_v5  ;;  %v9999_v26 = vcombine.low %v602_v6, %v612_v22  ;;  %v2064_v29 = vsel %vm12771_vm2, %v2062_v47, %v2063_v17  ;;  %3703 = vmatmul.mubr.bf16.gmra.mrb[16].mxu1 %v13102_v28  ;;  %v13196_v28 = vld [vmem:[%s12754_s20 + $0x58] sm:$0xf]  ;;  %v454_v60 = vld [vmem:[%s12754_s20 + $0x40] sm:$0xf]  ;;  %v12202_v63 = vld [vmem:[%s12754_s20 + $0x50] sm:$0xff]  }
  0x85   : > { %v10024_v27 = vcombine.low %v1071_v15, %v1074_v52  ;;  %v2065_v31 = vrot.slane %v2063_v17, 4  ;;  %v1620_v35 = vshll.u32 %v10099_v56, 16  ;;  %v1626_v36 = vshll.u32 %v10100_v25, 16  ;;  %10423 = vmatprep.mubr.msk.bf16.mxu1 %vm2231_vm6, %v12198_v11  ;;  %v455_v61 = vld [vmem:[%s12754_s20 + $0x44] sm:$0xf]  ;;  %11370 = vmatpush3.bf16.msra.mxu1 %v12208_v38  ;;  %v12214_v38 = vld [vmem:[%s16511_s3 + $0x170] sm:$0xff]  }
  0x86   : > { %v1615_v32 = vsel %vm12844_vm5, %v1610_v24, %v1614_v7  ;;  %891 = vrot.lane.b32.xlu0 %v9999_v26, %s12612_s19  ;;  %v1630_v40 = vshrl.u32 %v10100_v25, 16  ;;  %v1636_v41 = vshll.u32 %v13175_v45, 16  ;;  %v1619_v43 = vrot.slane %v1617_v34, 4  ;;  %v13219_v47 = vld [vmem:[%s12948_s30 + $0x78] ss:$8 sps:$4 sm:$0xff]  }
  0x87   : > { %v10129_v37 = vcombine.low %v1605_v23, %v1615_v32  ;;  %v2067_v39 = vsel %vm12771_vm2, %v2065_v31, %v2066_v18  ;;  %v1622_v46 = vrot.slane %v1620_v35, 5  ;;  %v1628_v48 = vrot.slane %v1626_v36, 5  ;;  %6116 = vmatmul.mubr.bf16.gmra.mrb[16].mxu0 %v13219_v47  ;;  %v964_v26 = vld [vmem:[%s12754_s20 + $0x48] sm:$0xf] }
  0x88   : > { %v10193_v42 = vcombine.low %v2064_v29, %v2067_v39  ;;  %v1632_v53 = vrot.slane %v1630_v40, 4  ;;  %v13190_v54 = vrot.slane %v1636_v41, 5  ;;  %v1640_v33 = vshrl.u32 %v13175_v45, 16  ;;  %v12210_v31 = vld [vmem:[%s16511_s3 + $0x168] sm:$0xff]  }
  0x89   : > { %1894 = vrot.lane.b32.xlu1 %v10129_v37, %s12611_s13  ;;  %v10183_v57 = vrot.slane %v10155_v49, 9  ;;  %v1623_v20 = vor.u32 %v1622_v46, %v1619_v43  ;;  %v2070_v30 = vrot.slane %v10156_v55, 5  ;;  %v2073_v59 = vrot.slane %v13196_v28, 5  ;;  %6888 = vmatpush1.bf16.msra.mxu0 %v12210_v31  ;;  %v456_v36 = vld [vmem:[%s12754_s20 + $0x48] sm:$0xf]  ;;  %v12209_v37 = vld [vmem:[%s12754_s20 + $0x58] sm:$0xff]  }
  0x8a   : > { %1193 = vrot.lane.b32.xlu0 %v10024_v27, %s12609_s12  ;;  %v1633_v44 = vor.u32 %v1632_v53, %v1628_v48  ;;  %v614_v50 = vshrl.u32 %v453_v58, 16  ;;  %v617_v3 = vshll.u32 %v453_v58, 16  ;;  %v623_v9 = vshll.u32 %v454_v60, 16  ;;  %v965_v27 = vld [vmem:[%s12754_s20 + $0x4c] sm:$0x1]  ;;  %6889 = vmatprep.subr.bf16.mxu0 %v16519_v0 }
  0x8b   : > { %v1624_v13 = vrot.slane %v1623_v20, 4  ;;  %v2071_v1 = vsel %vm12771_vm2, %v10183_v57, %v2070_v30  ;;  %v2072_v2 = vrot.slane %v2070_v30, 4  ;;  %v627_v11 = vshrl.u32 %v454_v60, 16  ;;  %v457_v41 = vld [vmem:[%s12754_s20 + $0x4c] sm:$0x1] }
  0x8c   : > { %v1634_v6 = vrot.slane %v1633_v44, 4  ;;  %v616_v7 = vrot.slane %v614_v50, 4  ;;  %v619_v15 = vrot.slane %v617_v3, 5  ;;  %v633_v16 = vshll.u32 %v455_v61, 16  ;;  %3711 = vmatmul.mubr.bf16.gmra.mrb[20].mxu1 %v13155_v19  ;;  %v10102_v43 = vld [vmem:[%s12754_s20 + $0x5c] sm:$0xf] }
  0x8d   : > { %2191 = vrot.lane.b32.xlu1 %v10193_v42, %s12610_s8  ;;  %v1629_v12 = vsel %vm12844_vm5, %v1624_v13, %v1628_v48  ;;  %v2074_v14 = vsel %vm12771_vm2, %v2072_v2, %v2073_v59  ;;  %v625_v18 = vrot.slane %v623_v9, 5  ;;  %v629_v22 = vrot.slane %v627_v11, 4  ;;  %10424 = vmatprep.mubr.msk.bf16.mxu1 %vm2231_vm6, %v12204_v4  ;;  %v10103_v53 = vld [vmem:[%s12754_s20 + $0x60] sm:$0x1]  ;;  %v12211_v30 = vld [vmem:[%s12948_s30 + $0x8c] ss:$8 sps:$4 sm:$0xff]  }
  0x8e   : > { %v1639_v17 = vsel %vm12844_vm5, %v1634_v6, %v13190_v54  ;;  %v620_v24 = vor.u32 %v619_v15, %v616_v7  ;;  %v635_v52 = vrot.slane %v633_v16, 5  ;;  %v637_v56 = vshrl.u32 %v455_v61, 16  ;;  %v13254_v58 = vld [vmem:[%s12948_s30 + $0x88] ss:$8 sps:$4 sm:$0xff]   ;;  %10742 = vmatprep.mubr.msk.bf16.mxu0 %vm2231_vm6, %v12211_v30  ;;  %v13265_v6 = vld [vmem:[%s12754_s20 + $0x58] sm:$0xf]  ;;  %6890 = vmatpush1.bf16.msra.mxu0 %v12214_v38 }
  0x8f   : > { %v10130_v23 = vcombine.low %v1629_v12, %v1639_v17  ;;  %v10194_v25 = vcombine.low %v2071_v1, %v2074_v14  ;;  %v630_v21 = vor.u32 %v629_v22, %v625_v18  ;;  %v1075_v29 = vrot.slane %v1073_v5, 4  ;;  %v966_v13 = vld [vmem:[%s12754_s20 + $0x50] sm:$0xe]  ;;  %6124 = vmatmul.mubr.bf16.gmra.mrb[20].mxu0 %v13254_v58  ;;  %6891 = vmatprep.subr.bf16.mxu0 %v16519_v0 }
  0x90   : > { %v621_v19 = vrot.slane %v620_v24, 4  ;;  %v1076_v45 = vrot.slane %v964_v26, 5  ;;  %v1079_v32 = vrot.slane %v965_v27, 5  ;;  %v639_v34 = vrot.slane %v637_v56, 4  ;;  %v10105_v26 = vld [vmem:[%s12754_s20 + $0x68] sm:$0xf] }
  0x91   : > { %1391 = vrot.lane.b32.xlu1 %v12202_v63, %s12608_s28  ;;  %1896 = vrot.lane.b32.xlu0 %v10130_v23, %s12611_s13  ;;  %v631_v35 = vrot.slane %v630_v21, 4  ;;  %v1642_v62 = vrot.slane %v1640_v33, 4  ;;  %v643_v48 = vshll.u32 %v456_v36, 16  ;;  %v647_v49 = vshrl.u32 %v456_v36, 16  ;;  %v10159_v23 = vld [vmem:[%s12754_s20 + $0x60] sm:$0x1] }
  0x92   : > { %v626_v5 = vsel %vm12844_vm5, %v621_v19, %v625_v18  ;;  %v1077_v39 = vsel %vm12771_vm2, %v1075_v29, %v1076_v45  ;;  %v1078_v40 = vrot.slane %v1076_v45, 4  ;;  %v640_v42 = vor.u32 %v639_v34, %v635_v52  ;;  %v10104_v21 = vld [vmem:[%s12754_s20 + $0x64] sm:$0xf]  ;;  %v10106_v19 = vld [vmem:[%s12754_s20 + $0x6c] sm:$0xf] }
  0x93   : > { %v636_v46 = vsel %vm12844_vm5, %v631_v35, %v635_v52  ;;  %v653_v51 = vshll.u32 %v457_v41, 16  ;;  %v1643_v20 = vor.u32 %v1642_v62, %v13190_v54  ;;  %v645_v60 = vrot.slane %v643_v48, 5  ;;  %v967_v54 = vld [vmem:[%s12754_s20 + $0x54] sm:$0xf] }
  0x94   : > { %v10000_v33 = vcombine.low %v626_v5, %v636_v46  ;;  %v1080_v55 = vsel %vm12771_vm2, %v1078_v40, %v1079_v32  ;;  %v641_v57 = vrot.slane %v640_v42, 4  ;;  %v649_v61 = vrot.slane %v647_v49, 4  ;;  %3719 = vmatmul.mubr.bf16.gmra.mrb[24].mxu1 %v13219_v47  ;;  %v10158_v47 = vld [vmem:[%s12754_s20 + $0x5c] sm:$0xf] }
  0x95   : > { %2193 = vrot.lane.b32.xlu0 %v10194_v25, %s12610_s8  ;;  %v10025_v44 = vcombine.low %v1077_v39, %v1080_v55  ;;  %v655_v50 = vrot.slane %v653_v51, 5  ;;  %v1644_v63 = vrot.slane %v1643_v20, 4  ;;  %v1646_v1 = vshll.u32 %v10102_v43, 16  ;;  %10425 = vmatprep.mubr.msk.bf16.mxu1 %vm2231_vm6, %v12211_v30  ;;  %v12220_v30 = vld [vmem:[%s16511_s3 + $0x178] sm:$0xff]  }
  0x96   : > { %893 = vrot.lane.b32.xlu1 %v10000_v33, %s12612_s19  ;;  %v1650_v2 = vshrl.u32 %v10102_v43, 16  ;;  %v1656_v3 = vshll.u32 %v10103_v53, 16  ;;  %v650_v4 = vor.u32 %v649_v61, %v645_v60  ;;  %v10014_v7 = vrot.slane %v966_v13, 9  ;;  %v12218_v43 = vld [vmem:[%s16510_s2 + $0x58] sm:$0xff]   ;;  %v12219_v53 = vld [vmem:[%s12948_s30 + $0xa0] ss:$8 sps:$4 sm:$0xff]   ;;  %6892 = vmatpush1.bf16.msra.mxu0 %v12220_v30 }
  0x97   : > { %v1083_v9 = vrot.slane %v967_v54, 5  ;;  %v1648_v11 = vrot.slane %v1646_v1, 5  ;;  %v1086_v15 = vrot.slane %v13265_v6, 5  ;;  %v646_v16 = vsel %vm12844_vm5, %v641_v57, %v645_v60  ;;  %11371 = vmatprep.subr.bf16.mxu1 %v12218_v43  ;;  %v10161_v60 = vld [vmem:[%s12754_s20 + $0x68] sm:$0xf]  ;;  %6893 = vmatprep.subr.bf16.mxu0 %v16519_v0 }
  0x98   : > { %v1652_v12 = vrot.slane %v1650_v2, 4  ;;  %v1658_v14 = vrot.slane %v1656_v3, 5  ;;  %v651_v17 = vrot.slane %v650_v4, 4  ;;  %v2075_v56 = vrot.slane %v2073_v59, 4  ;;  %v12215_v13 = vld [vmem:[%s12754_s20 + $0x64] sm:$0xff]  }
  0x99   : > { %1393 = vrot.lane.b32.xlu0 %v12209_v37, %s12608_s28  ;;  %v1084_v18 = vsel %vm12771_vm2, %v10014_v7, %v1083_v9  ;;  %v1085_v22 = vrot.slane %v1083_v9, 4  ;;  %v1649_v24 = vsel %vm12844_vm5, %v1644_v63, %v1648_v11  ;;  %v2076_v25 = vrot.slane %v10158_v47, 5  ;;  %v12216_v37 = vld [vmem:[%s12948_s30 + $0xa4] ss:$8 sps:$4 sm:$0xff]   ;;  %v458_v9 = vld [vmem:[%s12754_s20 + $0x50] sm:$0xf] }
  0x9a   : > { %1195 = vrot.lane.b32.xlu1 %v10025_v44, %s12609_s12  ;;  %v1653_v52 = vor.u32 %v1652_v12, %v1648_v11  ;;  %v656_v27 = vsel %vm12844_vm5, %v651_v17, %v655_v50  ;;  %v2079_v31 = vrot.slane %v10159_v23, 5  ;;  %v1661_v45 = vshrl.u32 %v10104_v21, 16  ;;  %10743 = vmatprep.mubr.msk.bf16.mxu0 %vm2231_vm6, %v12216_v37  ;;  %v10160_v44 = vld [vmem:[%s12754_s20 + $0x64] sm:$0xe]  ;;  %v13319_v63 = vld [vmem:[%s12754_s20 + $0x6c] sm:$0xf] }
  0x9b   : > { %v1087_v29 = vsel %vm12771_vm2, %v1085_v22, %v1086_v15  ;;  %v10001_v32 = vcombine.low %v646_v16, %v656_v27  ;;  %v2077_v28 = vsel %vm12771_vm2, %v2075_v56, %v2076_v25  ;;  %v2078_v59 = vrot.slane %v2076_v25, 4  ;;  %6132 = vmatmul.mubr.bf16.gmra.mrb[24].mxu0 %v12219_v53  ;;  %v459_v11 = vld [vmem:[%s12754_s20 + $0x54] sm:$0xf]  ;;  %v460_v16 = vld [vmem:[%s12754_s20 + $0x58] sm:$0xf] }
  0x9c   : > { %v1654_v34 = vrot.slane %v1653_v52, 4  ;;  %v10026_v35 = vcombine.low %v1084_v18, %v1087_v29  ;;  %v1663_v36 = vrot.slane %v1661_v45, 4  ;;  %v1664_v62 = vshll.u32 %v10104_v21, 16  ;;  %3727 = vmatmul.mubr.bf16.gmra.mrb[28].mxu1 %v13254_v58  ;;  %v12221_v58 = vld [vmem:[%s16510_s2 + $0x18] sm:$0xff]  }
  0x9d   : > { %v1670_v5 = vshll.u32 %v10105_v26, 16  ;;  %895 = vrot.lane.b32.xlu0 %v10001_v32, %s12612_s19  ;;  %v1674_v40 = vshrl.u32 %v10105_v26, 16  ;;  %v1680_v41 = vshll.u32 %v10106_v19, 16  ;;  %v1684_v42 = vshrl.u32 %v10106_v19, 16  ;;  %10426 = vmatprep.mubr.msk.bf16.mxu1 %vm2231_vm6, %v12216_v37  ;;  %v969_v21 = vld [vmem:[%s12754_s20 + $0x5c] sm:$0xf] }
  0x9e   : > { %v1659_v39 = vsel %vm12844_vm5, %v1654_v34, %v1658_v14  ;;  %v2080_v48 = vsel %vm12771_vm2, %v2078_v59, %v2079_v31  ;;  %v1666_v49 = vrot.slane %v1664_v62, 5  ;;  %v10184_v1 = vrot.slane %v10160_v44, 9  ;;  %11372 = vmatpush3.bf16.msra.mxu1 %v12221_v58  ;;  %v970_v26 = vld [vmem:[%s12754_s20 + $0x60] sm:$0x1]  ;;  %v12223_v45 = vld [vmem:[%s12948_s30 + $0xb4] ss:$8 sps:$4 sm:$0xff]  }
  0x9f   : > { %v10131_v46 = vcombine.low %v1649_v24, %v1659_v39  ;;  %v1672_v51 = vrot.slane %v1670_v5, 5  ;;  %v1676_v33 = vrot.slane %v1674_v40, 4  ;;  %v10195_v55 = vcombine.low %v2077_v28, %v2080_v48  ;;  %10744 = vmatprep.mubr.msk.bf16.mxu0 %vm2231_vm6, %v12223_v45  ;;  %v12225_v5 = vld [vmem:[%s16511_s3 + $0x180] sm:$0xff]   ;;  %v12226_v37 = vld [vmem:[%s12948_s30 + $0xb0] ss:$8 sps:$4 sm:$0xff]  }
  0xa0   : > { %v1667_v57 = vor.u32 %v1666_v49, %v1663_v36  ;;  %v1682_v20 = vrot.slane %v1680_v41, 5  ;;  %v1686_v61 = vrot.slane %v1684_v42, 4  ;;  %v2083_v2 = vrot.slane %v10161_v60, 5  ;;  %v12222_v40 = vld [vmem:[%s12754_s20 + $0x6c] sm:$0xff]   ;;  %v461_v43 = vld [vmem:[%s12754_s20 + $0x5c] sm:$0xf]  ;;  %6894 = vmatpush1.bf16.msra.mxu0 %v12225_v5 }
  0xa1   : > { %1898 = vrot.lane.b32.xlu1 %v10131_v46, %s12611_s13  ;;  %1197 = vrot.lane.b32.xlu0 %v10026_v35, %s12609_s12  ;;  %v1677_v38 = vor.u32 %v1676_v33, %v1672_v51  ;;  %v1088_v3 = vrot.slane %v1086_v15, 4  ;;  %v2086_v7 = vrot.slane %v13319_v63, 5  ;;  %v658_v17 = vshrl.u32 %v458_v9, 16  ;;  %v462_v46 = vld [vmem:[%s12754_s20 + $0x60] sm:$0x1] }
  0xa2   : > { %v1668_v50 = vrot.slane %v1667_v57, 4  ;;  %v1687_v12 = vor.u32 %v1686_v61, %v1682_v20  ;;  %v2084_v6 = vsel %vm12771_vm2, %v10184_v1, %v2083_v2  ;;  %v2085_v15 = vrot.slane %v2083_v2, 4  ;;  %v10107_v57 = vld [vmem:[%s12754_s20 + $0x70] sm:$0xf]  ;;  %v10108_v58 = vld [vmem:[%s12754_s20 + $0x74] sm:$0x1]  ;;  %6895 = vmatprep.subr.bf16.mxu0 %v16519_v0 }
  0xa3   : > { %v1678_v4 = vrot.slane %v1677_v38, 4  ;;  %v661_v22 = vshll.u32 %v458_v9, 16  ;;  %v667_v47 = vshll.u32 %v459_v11, 16  ;;  %v671_v23 = vshrl.u32 %v459_v11, 16  ;;  %6140 = vmatmul.mubr.bf16.gmra.mrb[28].mxu0 %v12226_v37  ;;  %v12227_v1 = vld [vmem:[%s16511_s3 + $0x188] sm:$0xff]  }
  0xa4   : > { %v1673_v14 = vsel %vm12844_vm5, %v1668_v50, %v1672_v51  ;;  %v2087_v52 = vsel %vm12771_vm2, %v2085_v15, %v2086_v7  ;;  %v660_v56 = vrot.slane %v658_v17, 4  ;;  %v677_v25 = vshll.u32 %v460_v16, 16  ;;  %3735 = vmatmul.mubr.bf16.gmra.mrb[32].mxu1 %v12219_v53  ;;  %v971_v2 = vld [vmem:[%s12754_s20 + $0x64] sm:$0xe]  ;;  %6896 = vmatpush1.bf16.msra.mxu0 %v12227_v1 }
  0xa5   : > { %2195 = vrot.lane.b32.xlu1 %v10195_v55, %s12610_s8  ;;  %v1683_v18 = vsel %vm12844_vm5, %v1678_v4, %v1682_v20  ;;  %v10196_v27 = vcombine.low %v2084_v6, %v2087_v52  ;;  %v663_v29 = vrot.slane %v661_v22, 5  ;;  %v669_v31 = vrot.slane %v667_v47, 5  ;;  %10427 = vmatprep.mubr.msk.bf16.mxu1 %vm2231_vm6, %v12223_v45 }
  0xa6   : > { %v10132_v24 = vcombine.low %v1673_v14, %v1683_v18  ;;  %v673_v19 = vrot.slane %v671_v23, 4  ;;  %v679_v32 = vrot.slane %v677_v25, 5  ;;  %v681_v34 = vshrl.u32 %v460_v16, 16  ;;  %v10753_v14 = vld [vmem:[%s12948_s30 + $0x28] sm:$0xff]  ;;  %v10163_v25 = vld [vmem:[%s12754_s20 + $0x70] sm:$0xf]  ;;  %7463 = vmatprep.subr.bf16.mxu0 %v16519_v0 }
  0xa7   : > { %v1089_v35 = vrot.slane %v969_v21, 5  ;;  %v1092_v28 = vrot.slane %v970_v26, 5  ;;  %v664_v36 = vor.u32 %v663_v29, %v660_v56  ;;  %v13353_v39 = vrot.slane %v1687_v12, 4  ;;  %v972_v12 = vld [vmem:[%s12754_s20 + $0x68] sm:$0xf] }
  0xa8   : > { %1900 = vrot.lane.b32.xlu0 %v10132_v24, %s12611_s13  ;;  %v674_v62 = vor.u32 %v673_v19, %v669_v31  ;;  %v683_v48 = vrot.slane %v681_v34, 4  ;;  %v687_v33 = vshll.u32 %v461_v43, 16  ;;  %v691_v55 = vshrl.u32 %v461_v43, 16  ;;  %v13385_v18 = vld [vmem:[%s12754_s20 + $0x6c] sm:$0xf]  ;;  %v12228_v19 = vld [vmem:[%s16510_s2 + $0x60] sm:$0xff]  }
  0xa9   : > { %1395 = vrot.lane.b32.xlu1 %v12215_v13, %s12608_s28  ;;  %v13359_v41 = vsel %vm12771_vm2, %v1088_v3, %v1089_v35  ;;  %v1091_v42 = vrot.slane %v1089_v35, 4  ;;  %v665_v51 = vrot.slane %v664_v36, 4  ;;  %v697_v38 = vshll.u32 %v462_v46, 16  ;;  %v10164_v21 = vld [vmem:[%s12754_s20 + $0x74] sm:$0x1]  ;;  %11373 = vmatprep.subr.bf16.mxu1 %v12228_v19  ;;  %v13427_v43 = vld [vmem:[%s12948_s30 + $0x38] sm:$0xff] }
  0xaa   : > { %v675_v53 = vrot.slane %v674_v62, 4  ;;  %v684_v30 = vor.u32 %v683_v48, %v679_v32  ;;  %v1690_v44 = vshll.u32 %v10107_v57, 16  ;;  %v689_v13 = vrot.slane %v687_v33, 5  ;;  %v10754_v62 = vld [vmem:[%s12948_s30 + $0x30] sm:$0xff]  ;;  %v10109_v33 = vld [vmem:[%s12754_s20 + $0x78] sm:$0xf] }
  0xab   : > { %v1093_v20 = vsel %vm12771_vm2, %v1091_v42, %v1092_v28  ;;  %v670_v60 = vsel %vm12844_vm5, %v665_v51, %v669_v31  ;;  %v693_v9 = vrot.slane %v691_v55, 4  ;;  %v699_v11 = vrot.slane %v697_v38, 5  ;;  %v12229_v28 = vld [vmem:[%s16510_s2 + $0x20] sm:$0xff]   ;;  %v10110_v55 = vld [vmem:[%s12754_s20 + $0x7c] sm:$0xf] }
  0xac   : > { %2197 = vrot.lane.b32.xlu0 %v10196_v27, %s12610_s8  ;;  %v680_v61 = vsel %vm12844_vm5, %v675_v53, %v679_v32  ;;  %v10027_v50 = vcombine.low %v13359_v41, %v1093_v20  ;;  %v685_v4 = vrot.slane %v684_v30, 4  ;;  %3743 = vmatmul.mubr.bf16.gmra.mrb[36].mxu1 %v12226_v37  ;;  %v1692_v15 = vrot.slane %v1690_v44, 5 }
  0xad   : > { %v10002_v3 = vcombine.low %v670_v60, %v680_v61  ;;  %v1694_v16 = vshrl.u32 %v10107_v57, 16  ;;  %v1700_v17 = vshll.u32 %v10108_v58, 16  ;;  %v10015_v22 = vrot.slane %v971_v2, 9  ;;  %11374 = vmatpush3.bf16.msra.mxu1 %v12229_v28  ;;  %v13434_v58 = vld [vmem:[%s12754_s20 + $0x80] sm:$0xf] }
  0xae   : > { %v690_v23 = vsel %vm12844_vm5, %v685_v4, %v689_v13  ;;  %v694_v24 = vor.u32 %v693_v9, %v689_v13  ;;  %v1096_v52 = vrot.slane %v972_v12, 5  ;;  %v1099_v56 = vrot.slane %v13385_v18, 5  ;;  %v12238_v18 = vld [vmem:[%s16510_s2 + $0x28] sm:$0xff]  }
  0xaf   : > { %v13323_v54 = vpop.permute.xlu0 %1379  ;;  %897 = vrot.lane.b32.xlu1 %v10002_v3, %s12612_s19  ;;  %v1693_v26 = vsel %vm12844_vm5, %v13353_v39, %v1692_v15  ;;  %v1696_v27 = vrot.slane %v1694_v16, 4  ;;  %v1702_v29 = vrot.slane %v1700_v17, 5  ;;  %v2088_v31 = vrot.slane %v2086_v7, 4 }
  0xb0   : > { %1397 = vrot.lane.b32.xlu0 %v12222_v40, %s12608_s28  ;;  %v695_v45 = vrot.slane %v694_v24, 4  ;;  %v1097_v32 = vsel %vm12771_vm2, %v10015_v22, %v1096_v52  ;;  %v1098_v34 = vrot.slane %v1096_v52, 4  ;;  %v2089_v35 = vrot.slane %v10163_v25, 5  ;;  %v13448_v25 = vld [vmem:[%s12754_s20 + $0x80] sm:$0xf] }
  0xb1   : > { %v1697_v63 = vor.u32 %v1696_v27, %v1692_v15  ;;  %v2092_v7 = vrot.slane %v10164_v21, 5  ;;  %v6285_v5 = vshrl.u32 %v10753_v14, 16  ;;  %v6288_v37 = vshll.u32 %v10753_v14, 16  ;;  %v10165_v14 = vld [vmem:[%s12754_s20 + $0x78] sm:$0xe] }
  0xb2   : > { %v700_v39 = vsel %vm12844_vm5, %v695_v45, %v699_v11  ;;  %v1100_v40 = vsel %vm12771_vm2, %v1098_v34, %v1099_v56  ;;  %v2090_v41 = vsel %vm12771_vm2, %v2088_v31, %v2089_v35  ;;  %v2091_v42 = vrot.slane %v2089_v35, 4  ;;  %v463_v45 = vld [vmem:[%s12754_s20 + $0x64] sm:$0xf]  ;;  %v12230_v35 = vld [vmem:[%s12754_s20 + $0x78] sm:$0xff]  }
  0xb3   : > { %v13346_v59 = vpop.permute.xlu0 %1381  ;;  %1199 = vrot.lane.b32.xlu1 %v10027_v50, %s12609_s12  ;;  %v10003_v46 = vcombine.low %v690_v23, %v700_v39  ;;  %v1698_v48 = vrot.slane %v1697_v63, 4  ;;  %v10028_v51 = vcombine.low %v1097_v32, %v1100_v40  ;;  %v6287_v53 = vrot.slane %v6285_v5, 4  ;;  %v10166_v23 = vld [vmem:[%s12754_s20 + $0x7c] sm:$0xf] }
  0xb4   : > { %v2093_v57 = vsel %vm12771_vm2, %v2091_v42, %v2092_v7  ;;  %v6290_v20 = vrot.slane %v6288_v37, 5  ;;  %v6294_v30 = vshll.u32 %v10754_v62, 16  ;;  %v6298_v38 = vshrl.u32 %v10754_v62, 16  ;;  %v464_v7 = vld [vmem:[%s12754_s20 + $0x68] sm:$0xf] }
  0xb5   : > { %899 = vrot.lane.b32.xlu0 %v10003_v46, %s12612_s19  ;;  %v1703_v44 = vsel %vm12844_vm5, %v1698_v48, %v1702_v29  ;;  %v10197_v60 = vcombine.low %v2090_v41, %v2093_v57  ;;  %v6304_v61 = vshll.u32 %v13427_v43, 16  ;;  %v1705_v50 = vshrl.u32 %v10109_v33, 16  ;;  %v13466_v37 = vld [vmem:[%s12754_s20 + $0x6c] sm:$0xf]  ;;  %v12231_v48 = vld [vmem:[%s16511_s3 + $0x190] sm:$0xff]  }
  0xb6   : > { %v10133_v13 = vcombine.low %v1693_v26, %v1703_v44  ;;  %v6291_v1 = vor.u32 %v6290_v20, %v6287_v53  ;;  %v6296_v2 = vrot.slane %v6294_v30, 5  ;;  %v6300_v3 = vrot.slane %v6298_v38, 4 }
  0xb7   : > { %v13363_v49 = vpop.permute.xlu1 %1183  ;;  %v13440_v4 = vrot.slane %v6304_v61, 5  ;;  %v1707_v9 = vrot.slane %v1705_v50, 4  ;;  %v1708_v11 = vshll.u32 %v10109_v33, 16  ;;  %v1714_v12 = vshll.u32 %v10110_v55, 16  ;;  %v10756_v61 = vld [vmem:[%s12948_s30 + $0x40] sm:$0xff] }
  0xb8   : > { %1902 = vrot.lane.b32.xlu1 %v10133_v13, %s12611_s13  ;;  %v6292_v15 = vrot.slane %v6291_v1, 4  ;;  %v6301_v16 = vor.u32 %v6300_v3, %v6296_v2  ;;  %v1718_v17 = vshrl.u32 %v10110_v55, 16  ;;  %v1724_v22 = vshll.u32 %v13434_v58, 16 }
  0xb9   : > { %1201 = vrot.lane.b32.xlu0 %v10028_v51, %s12609_s12  ;;  %v1710_v24 = vrot.slane %v1708_v11, 5  ;;  %v1716_v52 = vrot.slane %v1714_v12, 5  ;;  %v10185_v21 = vrot.slane %v10165_v14, 9  ;;  %v1728_v19 = vshrl.u32 %v13434_v58, 16  ;;  %v974_v11 = vld [vmem:[%s12754_s20 + $0x70] sm:$0xf] }
  0xba   : > { %v6297_v27 = vsel %vm12844_vm5, %v6292_v15, %v6296_v2  ;;  %v6302_v29 = vrot.slane %v6301_v16, 4  ;;  %v1720_v31 = vrot.slane %v1718_v17, 4  ;;  %v13456_v34 = vrot.slane %v1724_v22, 5  ;;  %v975_v17 = vld [vmem:[%s12754_s20 + $0x74] sm:$0x1] }
  0xbb   : > { %v13382_v6 = vpop.permute.xlu0 %1181  ;;  %v13387_v47 = vpop.permute.xlu1 %2183  ;;  %v1711_v32 = vor.u32 %v1710_v24, %v1707_v9  ;;  %v2096_v28 = vrot.slane %v10166_v23, 5  ;;  %v2099_v63 = vrot.slane %v13448_v25, 5  ;;  %v702_v39 = vshrl.u32 %v463_v45, 16  ;;  %v10757_v9 = vld [vmem:[%s12948_s30 + $0x48] sm:$0x11] }
  0xbc   : > { %2234 = vst.msk [vmem:[#allocation2 + $0x30] sm:$0xff] %vm2231_vm6, %v13387_v47  ;;  %2199 = vrot.lane.b32.xlu1 %v10197_v60, %s12610_s8  ;;  %v6307_v62 = vsel %vm12844_vm5, %v6302_v29, %v13440_v4  ;;  %v1721_v5 = vor.u32 %v1720_v31, %v1716_v52  ;;  %v705_v40 = vshll.u32 %v463_v45, 16  ;;  %v711_v38 = vshll.u32 %v464_v7, 16  ;;  %v12233_v22 = vld [vmem:[%s12948_s30 + $0xcc] ss:$8 sps:$4 sm:$0xff]  }
  0xbd   : > { %v10813_v41 = vcombine.low %v6297_v27, %v6307_v62  ;;  %v10814_v42 = vcombine.high %v6297_v27, %v6307_v62  ;;  %v1712_v46 = vrot.slane %v1711_v32, 4  ;;  %v13473_v51 = vsel %vm12771_vm2, %v10185_v21, %v2096_v28  ;;  %v466_v27 = vld [vmem:[%s12754_s20 + $0x70] sm:$0xf]  ;;  %v12236_v29 = vld [vmem:[%s16510_s2 + $0x68] sm:$0xff]   ;;  %10428 = vmatprep.mubr.msk.bf16.mxu1 %vm2231_vm6, %v12233_v22 }
  0xbe   : > { %v1722_v33 = vrot.slane %v1721_v5, 4  ;;  %v2098_v55 = vrot.slane %v2096_v28, 4  ;;  %v704_v57 = vrot.slane %v702_v39, 4  ;;  %v707_v20 = vrot.slane %v705_v40, 5  ;;  %v12237_v28 = vld [vmem:[%s16511_s3 + $0x198] sm:$0xff]   ;;  %11375 = vmatprep.subr.bf16.mxu1 %v12236_v29 }
  0xbf   : > { %v13412_v36 = vpop.permute.xlu0 %2181  ;;  %10855 = vmatprep.mubr.msk.bf16.mxu0 %vm2231_vm6, %v10814_v42  ;;  %v1717_v30 = vsel %vm12844_vm5, %v1712_v46, %v1716_v52  ;;  %v715_v44 = vshrl.u32 %v464_v7, 16  ;;  %v721_v60 = vshll.u32 %v13466_v37, 16  ;;  %v725_v3 = vshrl.u32 %v13466_v37, 16  ;;  %v12232_v42 = vld [vmem:[%s12754_s20 + $0x80] sm:$0xff]   ;;  %11376 = vmatpush3.bf16.msra.mxu1 %v12238_v18 }
  0xc0   : > { %2232 = vst.msk [vmem:[#allocation2 + $0x10] sm:$0xff] %vm2231_vm6, %v13412_v36  ;;  %6910 = vmatmul.mubr.bf16.vlgmr.msra.gmra.mrb[0].mxu0 %v10813_v41  ;;  %v1727_v13 = vsel %vm12844_vm5, %v1722_v33, %v13456_v34  ;;  %1399 = vrot.lane.b32.xlu1 %v12230_v35, %s12608_s28  ;;  %v2100_v1 = vsel %vm12771_vm2, %v2098_v55, %v2099_v63  ;;  %v713_v15 = vrot.slane %v711_v38, 5  ;;  %v6308_v52 = vshrl.u32 %v13427_v43, 16  ;;  %v12235_v43 = vld [vmem:[%s12948_s30 + $0xc8] ss:$8 sps:$4 sm:$0xff]  }
  0xc1   : > { %v708_v2 = vor.u32 %v707_v20, %v704_v57  ;;  %v10134_v12 = vcombine.low %v1717_v30, %v1727_v13  ;;  %7464 = vmatpush1.bf16.msra.mxu0 %v12231_v48  ;;  %v10198_v14 = vcombine.low %v13473_v51, %v2100_v1  ;;  %v717_v16 = vrot.slane %v715_v44, 4  ;;  %v467_v48 = vld [vmem:[%s12754_s20 + $0x74] sm:$0x1]  ;;  %3751 = vmatmul.mubr.bf16.gmra.mrb[40].mxu1 %v12235_v43 }
  0xc2   : > { %v723_v24 = vrot.slane %v721_v60, 5  ;;  %v6314_v21 = vshll.u32 %v10756_v61, 16  ;;  %7465 = vmatprep.subr.bf16.mxu0 %v16519_v0  ;;  %v6318_v45 = vshrl.u32 %v10756_v61, 16  ;;  %v6324_v32 = vshll.u32 %v10757_v9, 16 }
  0xc3   : > { %v709_v23 = vrot.slane %v708_v2, 4  ;;  %1904 = vrot.lane.b32.xlu0 %v10134_v12, %s12611_s13  ;;  %v718_v31 = vor.u32 %v717_v16, %v713_v15  ;;  %v1101_v35 = vrot.slane %v1099_v56, 4  ;;  %v6310_v5 = vrot.slane %v6308_v52, 4  ;;  %v10112_v2 = vld [vmem:[%s12754_s20 + $0x84] sm:$0xf] }
  0xc4   : > { %v13450_v26 = vpop.permute.xlu1 %1884  ;;  %v6316_v37 = vrot.slane %v6314_v21, 5  ;;  %v1102_v39 = vrot.slane %v974_v11, 5  ;;  %v6320_v40 = vrot.slane %v6318_v45, 4  ;;  %v6326_v41 = vrot.slane %v6324_v32, 5  ;;  %v10113_v21 = vld [vmem:[%s12754_s20 + $0x88] sm:$0x1] }
  0xc5   : > { %v714_v62 = vsel %vm12844_vm5, %v709_v23, %v713_v15  ;;  %v719_v56 = vrot.slane %v718_v31, 4  ;;  %v1105_v46 = vrot.slane %v975_v17, 5  ;;  %7466 = vmatpush1.bf16.msra.mxu0 %v12237_v28  ;;  %v6311_v33 = vor.u32 %v6310_v5, %v13440_v4  ;;  %v10758_v31 = vld [vmem:[%s12948_s30 + $0x50] sm:$0xff]  ;;  %v10759_v45 = vld [vmem:[%s12948_s30 + $0x58] sm:$0xff] }
  0xc6   : > { %v1103_v55 = vsel %vm12771_vm2, %v1101_v35, %v1102_v39  ;;  %v1104_v57 = vrot.slane %v1102_v39, 4  ;;  %v727_v20 = vrot.slane %v725_v3, 4  ;;  %7467 = vmatprep.subr.bf16.mxu0 %v16519_v0  ;;  %v6321_v38 = vor.u32 %v6320_v40, %v6316_v37 }
  0xc7   : > { %v13475_v53 = vpop.permute.xlu0 %883  ;;  %2201 = vrot.lane.b32.xlu0 %v10198_v14, %s12610_s8  ;;  %v724_v30 = vsel %vm12844_vm5, %v719_v56, %v723_v24  ;;  %v731_v44 = vshll.u32 %v466_v27, 16  ;;  %v735_v60 = vshrl.u32 %v466_v27, 16  ;;  %v6312_v13 = vrot.slane %v6311_v33, 4  ;;  %v976_v33 = vld [vmem:[%s12754_s20 + $0x78] sm:$0xe] }
  0xc8   : > { %v10004_v61 = vcombine.low %v714_v62, %v724_v30  ;;  %v1106_v4 = vsel %vm12771_vm2, %v1104_v57, %v1105_v46  ;;  %v728_v1 = vor.u32 %v727_v20, %v723_v24  ;;  %v6322_v3 = vrot.slane %v6321_v38, 4 }
  0xc9   : > { %v10029_v9 = vcombine.low %v1103_v55, %v1106_v4  ;;  %v733_v11 = vrot.slane %v731_v44, 5  ;;  %v737_v12 = vrot.slane %v735_v60, 4  ;;  %v6317_v15 = vsel %vm12844_vm5, %v6312_v13, %v6316_v37  ;;  %v13552_v37 = vld [vmem:[%s12948_s30 + $0x60] sm:$0xff]  ;;  %v977_v55 = vld [vmem:[%s12754_s20 + $0x7c] sm:$0xf] }
  0xca   : > { %901 = vrot.lane.b32.xlu1 %v10004_v61, %s12612_s19  ;;  %v729_v16 = vrot.slane %v728_v1, 4  ;;  %v741_v17 = vshll.u32 %v467_v48, 16  ;;  %v1730_v22 = vrot.slane %v1728_v19, 4  ;;  %v6327_v24 = vsel %vm12844_vm5, %v6322_v3, %v6326_v41  ;;  %v13565_v44 = vld [vmem:[%s12754_s20 + $0x80] sm:$0xf] }
  0xcb   : > { %v13482_v50 = vpop.permute.xlu1 %881  ;;  %v13512_v7 = vpop.permute.xlu0 %1185  ;;  %1401 = vrot.lane.b32.xlu0 %v12232_v42, %s12608_s28  ;;  %v738_v52 = vor.u32 %v737_v12, %v733_v11  ;;  %v1734_v27 = vshll.u32 %v10112_v2, 16  ;;  %v1738_v29 = vshrl.u32 %v10112_v2, 16  ;;  %v10816_v32 = vcombine.high %v6317_v15, %v6327_v24  ;;  %v12243_v2 = vld [vmem:[%s16511_s3 + $0x1a0] sm:$0xff]  }
  0xcc   : > { %v10815_v35 = vcombine.low %v6317_v15, %v6327_v24  ;;  %v734_v58 = vsel %vm12844_vm5, %v729_v16, %v733_v11  ;;  %v743_v19 = vrot.slane %v741_v17, 5  ;;  %v1731_v28 = vor.u32 %v1730_v22, %v13456_v34  ;;  %v10168_v12 = vld [vmem:[%s12754_s20 + $0x84] sm:$0xf]  ;;  %7468 = vmatpush1.bf16.msra.mxu0 %v12243_v2  ;;  %v12246_v2 = vld [vmem:[%s16510_s2 + $0x70] sm:$0xff]  }
  0xcd   : > { %v739_v43 = vrot.slane %v738_v52, 4  ;;  %v1736_v62 = vrot.slane %v1734_v27, 5  ;;  %v1740_v5 = vrot.slane %v1738_v29, 4  ;;  %10856 = vmatprep.mubr.msk.bf16.mxu0 %vm2231_vm6, %v10816_v32  ;;  %v1744_v18 = vshll.u32 %v10113_v21, 16  ;;  %v10169_v52 = vld [vmem:[%s12754_s20 + $0x88] sm:$0x1]  ;;  %7469 = vmatprep.subr.bf16.mxu0 %v16519_v0 }
  0xce   : > { %1203 = vrot.lane.b32.xlu1 %v10029_v9, %s12609_s12  ;;  %v6329_v56 = vshrl.u32 %v10758_v31, 16  ;;  %v6332_v40 = vshll.u32 %v10758_v31, 16  ;;  %v6338_v41 = vshll.u32 %v10759_v45, 16  ;;  %6918 = vmatmul.mubr.bf16.gmra.mrb[4].mxu0 %v10815_v35  ;;  %v1732_v42 = vrot.slane %v1731_v28, 4  ;;  %v10114_v21 = vld [vmem:[%s12754_s20 + $0x8c] sm:$0xf] }
  0xcf   : > { %v744_v34 = vsel %vm12844_vm5, %v739_v43, %v743_v19  ;;  %v1741_v46 = vor.u32 %v1740_v5, %v1736_v62  ;;  %v6342_v48 = vshrl.u32 %v10759_v45, 16  ;;  %v1746_v20 = vrot.slane %v1744_v18, 5  ;;  %v10115_v32 = vld [vmem:[%s12754_s20 + $0x90] sm:$0xf]  ;;  %11377 = vmatprep.subr.bf16.mxu1 %v12246_v2  ;;  %v12241_v2 = vld [vmem:[%s12754_s20 + $0x8] sm:$0xff]  }
  0xd0   : > { %v13521_v51 = vpop.permute.xlu1 %1886  ;;  %v10005_v57 = vcombine.low %v734_v58, %v744_v34  ;;  %v6331_v30 = vrot.slane %v6329_v56, 4  ;;  %v6334_v38 = vrot.slane %v6332_v40, 5  ;;  %v1737_v61 = vsel %vm12844_vm5, %v1732_v42, %v1736_v62  ;;  %v13601_v62 = vld [vmem:[%s12754_s20 + $0x94] sm:$0xf]  ;;  %v3356_v56 = vld [vmem:[%s12948_s30 + $0xd8] sm:$0xff] }
  0xd1   : > { %v1742_v13 = vrot.slane %v1741_v46, 4  ;;  %v6340_v4 = vrot.slane %v6338_v41, 5  ;;  %v6344_v1 = vrot.slane %v6342_v48, 4  ;;  %v6348_v9 = vshll.u32 %v13552_v37, 16  ;;  %v3357_v46 = vld [vmem:[%s12948_s30 + $0xe0] sm:$0xff] }
  0xd2   : > { %903 = vrot.lane.b32.xlu0 %v10005_v57, %s12612_s19  ;;  %v6335_v3 = vor.u32 %v6334_v38, %v6331_v30  ;;  %vm1231_vm7 = vcmask 130048   ;;  %v10016_v11 = vrot.slane %v976_v33, 9  ;;  %v1109_v22 = vrot.slane %v977_v55, 5  ;;  %v10762_v48 = vld [vmem:[%s12948_s30 + $0x70] sm:$0x11]  ;;  %v10761_v30 = vld [vmem:[%s12948_s30 + $0x68] sm:$0xff] }
  0xd3   : > { %v1747_v16 = vsel %vm12844_vm5, %v1742_v13, %v1746_v20  ;;  %v6345_v17 = vor.u32 %v6344_v1, %v6340_v4  ;;  %1234 = vst.msk [vmem:[#allocation2 + $0x28] sm:$0xff] %vm1231_vm7, %v13363_v49  ;;  %v1112_v24 = vrot.slane %v13565_v44, 5  ;;  %1232 = vst.msk [vmem:[#allocation2 + $0x8] sm:$0xff] %vm1231_vm7, %v13382_v6  ;;  %v13590_v31 = vrot.slane %v6348_v9, 5  ;;  %v13736_v44 = vld [vmem:[%s12948_s30 + $0x88] sm:$0xff] }
  0xd4   : > { %v13533_v14 = vpop.permute.xlu0 %1888  ;;  %v13540_v23 = vpop.permute.xlu1 %1383  ;;  %1236 = vst.msk [vmem:[#allocation2 + $0x48] sm:$0xff] %vm1231_vm7, %v13512_v7  ;;  %v10135_v27 = vcombine.low %v1737_v61, %v1747_v16  ;;  %v6336_v29 = vrot.slane %v6335_v3, 4  ;;  %v2101_v45 = vrot.slane %v2099_v63, 4  ;;  %v1110_v19 = vsel %vm12771_vm2, %v10016_v11, %v1109_v22 }
  0xd5   : > { %v6346_v58 = vrot.slane %v6345_v17, 4  ;;  %v1111_v43 = vrot.slane %v1109_v22, 4  ;;  %v2102_v28 = vrot.slane %v10168_v12, 5  ;;  %v2105_v63 = vrot.slane %v10169_v52, 5  ;;  %v12239_v12 = vld [vmem:[%s12754_s20 + $0x8c] sm:$0xff]  }
  0xd6   : > { %1906 = vrot.lane.b32.xlu1 %v10135_v27, %s12611_s13  ;;  %v6341_v25 = vsel %vm12844_vm5, %v6336_v29, %v6340_v4  ;;  %v1749_v5 = vshrl.u32 %v10114_v21, 16  ;;  %v1752_v18 = vshll.u32 %v10114_v21, 16  ;;  %v1758_v4 = vshll.u32 %v10115_v32, 16  ;;  %v10170_v27 = vld [vmem:[%s12754_s20 + $0x8c] sm:$0xe] }
  0xd7   : > { %v6351_v40 = vsel %vm12844_vm5, %v6346_v58, %v13590_v31  ;;  %v1113_v41 = vsel %vm12771_vm2, %v1111_v43, %v1112_v24  ;;  %v2103_v34 = vsel %vm12771_vm2, %v2101_v45, %v2102_v28  ;;  %v2104_v42 = vrot.slane %v2102_v28, 4  ;;  %v10171_v29 = vld [vmem:[%s12754_s20 + $0x90] sm:$0xf] }
  0xd8   : > { %v13554_v39 = vpop.permute.xlu0 %2185  ;;  %v10818_v33 = vcombine.high %v6341_v25, %v6351_v40  ;;  %v10817_v55 = vcombine.low %v6341_v25, %v6351_v40  ;;  %v10030_v57 = vcombine.low %v1110_v19, %v1113_v41  ;;  %v1751_v20 = vrot.slane %v1749_v5, 4  ;;  %v12247_v45 = vld [vmem:[%s16510_s2 + $0x30] sm:$0xff]  }
  0xd9   : > { %2236 = vst.msk [vmem:[#allocation2 + $0x50] sm:$0xff] %vm2231_vm6, %v13554_v39  ;;  %v2106_v61 = vsel %vm12771_vm2, %v2104_v42, %v2105_v63  ;;  %v1754_v13 = vrot.slane %v1752_v18, 5  ;;  %v1762_v1 = vshrl.u32 %v10115_v32, 16  ;;  %v1768_v9 = vshll.u32 %v13601_v62, 16  ;;  %v13644_v25 = vld [vmem:[%s12754_s20 + $0x94] sm:$0xf]  ;;  %11378 = vmatpush3.bf16.msra.mxu1 %v12247_v45 }
  0xda   : > { %10857 = vmatprep.mubr.msk.bf16.mxu0 %vm2231_vm6, %v10818_v33  ;;  %1205 = vrot.lane.b32.xlu0 %v10030_v57, %s12609_s12  ;;  %v10199_v3 = vcombine.low %v2103_v34, %v2106_v61  ;;  %v1772_v11 = vshrl.u32 %v13601_v62, 16  ;;  %v10399_v16 = vcombine.high %v3356_v56, %v3357_v46  ;;  %v1760_v22 = vrot.slane %v1758_v4, 5  ;;  %v468_v33 = vld [vmem:[%s12754_s20 + $0x78] sm:$0xf] }
  0xdb   : > { %v13567_v60 = vpop.permute.xlu1 %885  ;;  %6926 = vmatmul.mubr.bf16.gmra.mrb[8].mxu0 %v10817_v55  ;;  %v1755_v17 = vor.u32 %v1754_v13, %v1751_v20  ;;  %v1764_v52 = vrot.slane %v1762_v1, 4  ;;  %v6352_v21 = vshrl.u32 %v13552_v37, 16  ;;  %v13640_v58 = vrot.slane %v1768_v9, 5  ;;  %v469_v20 = vld [vmem:[%s12754_s20 + $0x7c] sm:$0xf] }
  0xdc   : > { %v13577_v15 = vpop.permute.xlu0 %1385  ;;  %2203 = vrot.lane.b32.xlu1 %v10199_v3, %s12610_s8  ;;  %10429 = vmatprep.mubr.msk.bf16.mxu1 %vm2231_vm6, %v10399_v16  ;;  %v6358_v19 = vshll.u32 %v10761_v30, 16  ;;  %v6362_v43 = vshrl.u32 %v10761_v30, 16  ;;  %v6368_v28 = vshll.u32 %v10762_v48, 16  ;;  %v10398_v40 = vcombine.low %v3356_v56, %v3357_v46  ;;  %v12242_v3 = vld [vmem:[%s12754_s20] sm:$0xff]   ;;  %v12255_v62 = vld [vmem:[%s16510_s2 + $0x38] sm:$0xff]  }
  0xdd   : > { %v1756_v63 = vrot.slane %v1755_v17, 4  ;;  %v1765_v5 = vor.u32 %v1764_v52, %v1760_v22  ;;  %v6354_v18 = vrot.slane %v6352_v21, 4  ;;  %vm1427_vm8 = vcmask 523392   ;;  %v979_v52 = vld [vmem:[%s12754_s20 + $0x84] sm:$0xf] }
  0xde   : > { %v6360_v41 = vrot.slane %v6358_v19, 5  ;;  %v6364_v34 = vrot.slane %v6362_v43, 4  ;;  %v6370_v42 = vrot.slane %v6368_v28, 5  ;;  %3759 = vmatmul.mubr.bf16.gmra.mrb[44].mxu1 %v10398_v40  ;;  %vm1932_vm9 = vcmask 916992   ;;  %1428 = vst.msk [vmem:[#allocation2 + $0x8] sm:$0xff] %vm1427_vm8, %v13323_v54  ;;  %1429 = vst.msk [vmem:[#allocation2 + $0x28] sm:$0xff] %vm1427_vm8, %v13346_v59 }
  0xdf   : > { %v13596_v35 = vpop.permute.xlu1 %1187  ;;  %v1761_v48 = vsel %vm12844_vm5, %v1756_v63, %v1760_v22  ;;  %v1766_v55 = vrot.slane %v1765_v5, 4  ;;  %v6355_v57 = vor.u32 %v6354_v18, %v13590_v31  ;;  %1430 = vst.msk [vmem:[#allocation2 + $0x48] sm:$0xff] %vm1427_vm8, %v13540_v23  ;;  %vm2229_vm10 = vcmask 1048448   ;;  %v980_v21 = vld [vmem:[%s12754_s20 + $0x88] sm:$0x1]  ;;  %v12249_v43 = vld [vmem:[%s12754_s20 + $0x14] sm:$0xff]  }
  0xe0   : > { %1238 = vst.msk [vmem:[#allocation2 + $0x68] sm:$0xff] %vm1231_vm7, %v13596_v35  ;;  %1403 = vrot.lane.b32.xlu1 %v12239_v12, %s12608_s28  ;;  %v6365_v46 = vor.u32 %v6364_v34, %v6360_v41  ;;  %v10186_v31 = vrot.slane %v10170_v27, 9  ;;  %v2109_v54 = vrot.slane %v10171_v29, 5  ;;  %v749_v1 = vshll.u32 %v468_v33, 16  ;;  %v13703_v27 = vld [vmem:[%s12948_s30 + $0xf0] sm:$0xff]  ;;  %v13712_v40 = vld [vmem:[%s12948_s30 + $0xf8] sm:$0xff] }
  0xe1   : > { %v13621_v38 = vpop.permute.xlu0 %887  ;;  %1431 = vst.msk [vmem:[#allocation2 + $0x68] sm:$0xff] %vm1427_vm8, %v13577_v15  ;;  %v1771_v59 = vsel %vm12844_vm5, %v1766_v55, %v13640_v58  ;;  %v6356_v23 = vrot.slane %v6355_v57, 4  ;;  %v746_v15 = vshrl.u32 %v468_v33, 16  ;;  %v759_v17 = vshrl.u32 %v469_v20, 16  ;;  %v12250_v33 = vld [vmem:[%s16511_s3 + $0x1a8] sm:$0xff]   ;;  %v12244_v57 = vld [vmem:[%s12754_s20 + $0x94] sm:$0xff]  }
  0xe2   : > { %1933 = vst.msk [vmem:[#allocation2 + $0x8] sm:$0xff] %vm1932_vm9, %v13450_v26  ;;  %1934 = vst.msk [vmem:[#allocation2 + $0x28] sm:$0xff] %vm1932_vm9, %v13521_v51  ;;  %v2112_v26 = vrot.slane %v13644_v25, 5  ;;  %v13679_v51 = vld [vmem:[%s12754_s20 + $0x80] sm:$0xf]  ;;  %v6366_v30 = vrot.slane %v6365_v46, 4  ;;  %7470 = vmatpush1.bf16.msra.mxu0 %v12250_v33 }
  0xe3   : > { %1935 = vst.msk [vmem:[#allocation2 + $0x48] sm:$0xff] %vm1932_vm9, %v13533_v14  ;;  %v10136_v14 = vcombine.low %v1761_v48, %v1771_v59  ;;  %v2111_v61 = vrot.slane %v2109_v54, 4  ;;  %v6361_v13 = vsel %vm12844_vm5, %v6356_v23, %v6360_v41  ;;  %v748_v4 = vrot.slane %v746_v15, 4  ;;  %v10763_v41 = vld [vmem:[%s12948_s30 + $0x78] sm:$0xff]  ;;  %v471_v23 = vld [vmem:[%s12754_s20 + $0x84] sm:$0xf]  ;;  %7471 = vmatprep.subr.bf16.mxu0 %v16519_v0 }
  0xe4   : > { %2230 = vst.msk [vmem:[#allocation2 + $0x8] sm:$0xff] %vm2229_vm10, %v13412_v36  ;;  %2233 = vst.msk [vmem:[#allocation2 + $0x28] sm:$0xff] %vm2229_vm10, %v13387_v47  ;;  %v2110_v36 = vsel %vm12771_vm2, %v10186_v31, %v2109_v54  ;;  %v755_v47 = vshll.u32 %v469_v20, 16  ;;  %v6371_v12 = vsel %vm12844_vm5, %v6366_v30, %v6370_v42  ;;  %v765_v22 = vshll.u32 %v13679_v51, 16  ;;  %v10764_v42 = vld [vmem:[%s12948_s30 + $0x80] sm:$0xff] }
  0xe5   : > { %v1891_v32 = vpop.permute.xlu1 %1890  ;;  %v13646_v37 = vpop.permute.xlu0 %1189  ;;  %2235 = vst.msk [vmem:[#allocation2 + $0x48] sm:$0xff] %vm2229_vm10, %v13554_v39  ;;  %1908 = vrot.lane.b32.xlu0 %v10136_v14, %s12611_s13  ;;  %v2113_v16 = vsel %vm12771_vm2, %v2111_v61, %v2112_v26  ;;  %v10820_v29 = vcombine.high %v6361_v13, %v6371_v12  ;;  %v10819_v45 = vcombine.low %v6361_v13, %v6371_v12  ;;  %v751_v19 = vrot.slane %v749_v1, 5  ;;  %v472_v13 = vld [vmem:[%s12754_s20 + $0x88] sm:$0x1] }
  0xe6   : > { %1240 = vst.msk [vmem:[#allocation2 + $0x88] sm:$0xff] %vm1231_vm7, %v13646_v37  ;;  %v757_v28 = vrot.slane %v755_v47, 5  ;;  %v761_v63 = vrot.slane %v759_v17, 4  ;;  %v13708_v5 = vrot.slane %v765_v22, 5  ;;  %v769_v18 = vshrl.u32 %v13679_v51, 16 }
  0xe7   : > { %1936 = vst.msk [vmem:[#allocation2 + $0x68] sm:$0xff] %vm1932_vm9, %v1891_v32  ;;  %v10200_v32 = vcombine.low %v2110_v36, %v2113_v16  ;;  %10858 = vmatprep.mubr.msk.bf16.mxu0 %vm2231_vm6, %v10820_v29  ;;  %v752_v34 = vor.u32 %v751_v19, %v748_v4  ;;  %vm421_vm11 = vcmask 392192   ;;  %vm929_vm12 = vcmask 785792   ;;  %v10118_v22 = vld [vmem:[%s12754_s20 + $0x9c] sm:$0x1] }
  0xe8   : > { %vm1229_vm13 = vcmask 1048320   ;;  %6934 = vmatmul.mubr.bf16.gmra.mrb[12].mxu0 %v10819_v45  ;;  %v762_v55 = vor.u32 %v761_v63, %v757_v28  ;;  %423 = vst.msk [vmem:[#allocation2 + $0x20] sm:$0xff] %vm421_vm11, %v12241_v2  ;;  %422 = vst.msk [vmem:[#allocation2] sm:$0xff] %vm421_vm11, %v12242_v3  ;;  %v1115_v46 = vrot.slane %v979_v52, 5  ;;  %v1118_v31 = vrot.slane %v980_v21, 5 }
  0xe9   : > { %v2188_v56 = vpop.permute.xlu1 %2187  ;;  %2205 = vrot.lane.b32.xlu0 %v10200_v32, %s12610_s8  ;;  %424 = vst.msk [vmem:[#allocation2 + $0x40] sm:$0xff] %vm421_vm11, %v12249_v43  ;;  %v753_v54 = vrot.slane %v752_v34, 4  ;;  %v10401_v20 = vcombine.high %v13703_v27, %v13712_v40  ;;  %v6376_v59 = vshll.u32 %v10763_v41, 16  ;;  %v6382_v15 = vshll.u32 %v10764_v42, 16  ;;  %v981_v19 = vld [vmem:[%s12754_s20 + $0x8c] sm:$0xe] }
  0xea   : > { %2238 = vst.msk [vmem:[#allocation2 + $0x70] sm:$0xff] %vm2231_vm6, %v2188_v56  ;;  %v763_v51 = vrot.slane %v762_v55, 4  ;;  %v6392_v61 = vshll.u32 %v13736_v44, 16  ;;  %v10400_v12 = vcombine.low %v13703_v27, %v13712_v40  ;;  %v771_v16 = vrot.slane %v769_v18, 4  ;;  %v12253_v43 = vld [vmem:[%s12754_s20 + $0x1c] sm:$0xff]  }
  0xeb   : > { %2237 = vst.msk [vmem:[#allocation2 + $0x68] sm:$0xff] %vm2229_vm10, %v2188_v56  ;;  %v1893_v39 = vpop.permute.xlu0 %1892  ;;  %v1114_v56 = vrot.slane %v1112_v24, 4  ;;  %v6373_v24 = vshrl.u32 %v10763_v41, 16  ;;  %10430 = vmatprep.mubr.msk.bf16.mxu1 %vm2231_vm6, %v10401_v20  ;;  %v6378_v14 = vrot.slane %v6376_v59, 5  ;;  %v6384_v36 = vrot.slane %v6382_v15, 5  ;;  %v12254_v41 = vld [vmem:[%s16510_s2 + $0x78] sm:$0xff]  }
  0xec   : > { %931 = vst.msk [vmem:[#allocation2 + $0x20] sm:$0xff] %vm929_vm12, %v13475_v53  ;;  %930 = vst.msk [vmem:[#allocation2] sm:$0xff] %vm929_vm12, %v13482_v50  ;;  %v1117_v50 = vrot.slane %v1115_v46, 4  ;;  %v768_v30 = vsel %vm12844_vm5, %v763_v51, %v13708_v5  ;;  %v775_v17 = vshll.u32 %v471_v23, 16  ;;  %v779_v45 = vshrl.u32 %v471_v23, 16  ;;  %3767 = vmatmul.mubr.bf16.gmra.mrb[48].mxu1 %v10400_v12  ;;  %11379 = vmatprep.subr.bf16.mxu1 %v12254_v41 }
  0xed   : > { %v1388_v9 = vpop.permute.xlu1 %1387  ;;  %932 = vst.msk [vmem:[#allocation2 + $0x40] sm:$0xff] %vm929_vm12, %v13567_v60  ;;  %v1116_v53 = vsel %vm12771_vm2, %v1114_v56, %v1115_v46  ;;  %v758_v60 = vsel %vm12844_vm5, %v753_v54, %v757_v28  ;;  %1405 = vrot.lane.b32.xlu0 %v12244_v57, %s12608_s28  ;;  %v785_v32 = vshll.u32 %v472_v13, 16  ;;  %v772_v28 = vor.u32 %v771_v16, %v13708_v5  ;;  %v982_v40 = vld [vmem:[%s12754_s20 + $0x90] sm:$0xf]  ;;  %v13784_v57 = vld [vmem:[%s12754_s20 + $0x94] sm:$0xf] }
  0xee   : > { %1432 = vst.msk [vmem:[#allocation2 + $0x88] sm:$0xff] %vm1427_vm8, %v1388_v9  ;;  %v10006_v1 = vcombine.low %v758_v60, %v768_v30  ;;  %v13764_v9 = vrot.slane %v6392_v61, 5  ;;  %v777_v63 = vrot.slane %v775_v17, 5  ;;  %v1774_v27 = vrot.slane %v1772_v11, 4  ;;  %v10173_v5 = vld [vmem:[%s12754_s20 + $0x98] sm:$0xf]  ;;  %11380 = vmatpush3.bf16.msra.mxu1 %v12255_v62 }
  0xef   : > { %1937 = vst.msk [vmem:[#allocation2 + $0x88] sm:$0xff] %vm1932_vm9, %v1893_v39  ;;  %v2190_v48 = vpop.permute.xlu0 %2189  ;;  %v10117_v39 = vld [vmem:[%s12754_s20 + $0x98] sm:$0xf]  ;;  %v787_v55 = vrot.slane %v785_v32, 5  ;;  %v773_v11 = vrot.slane %v772_v28, 4  ;;  %v10017_v59 = vrot.slane %v981_v19, 9  ;;  %4170 = vmatprep.subr.bf16.mxu1 %v16519_v0 }
  0xf0   : > { %2239 = vst.msk [vmem:[#allocation2 + $0x88] sm:$0xff] %vm2229_vm10, %v2190_v48  ;;  %905 = vrot.lane.b32.xlu1 %v10006_v1, %s12612_s19  ;;  %v1778_v18 = vshll.u32 %v10117_v39, 16  ;;  %v1775_v56 = vor.u32 %v1774_v27, %v13640_v58  ;;  %v10174_v58 = vld [vmem:[%s12754_s20 + $0x9c] sm:$0x1]  ;;  %v1125_v30 = vrot.slane %v13784_v57, 5  ;;  %v3361_v61 = vld [vmem:[%s12948_s30 + $0x108] sm:$0xff] }
  0xf1   : > { %2240 = vst.msk [vmem:[#allocation2 + $0x90] sm:$0xff] %vm2231_vm6, %v2190_v48  ;;  %v781_v48 = vrot.slane %v779_v45, 4  ;;  %v778_v51 = vsel %vm12844_vm5, %v773_v11, %v777_v63  ;;  %v2118_v16 = vrot.slane %v10174_v58, 5  ;;  %v10767_v17 = vld [vmem:[%s12948_s30 + $0x98] sm:$0x11]  ;;  %v6396_v45 = vshrl.u32 %v13736_v44, 16 }
  0xf2   : > { %1233 = vst.msk [vmem:[#allocation2 + $0x20] sm:$0xff] %vm1229_vm13, %v13363_v49  ;;  %1230 = vst.msk [vmem:[#allocation2] sm:$0xff] %vm1229_vm13, %v13382_v6  ;;  %v6375_v49 = vrot.slane %v6373_v24, 4  ;;  %v6386_v6 = vshrl.u32 %v10764_v42, 16  ;;  %v13761_v4 = vpop.permute.xlu1 %889  ;;  %v13794_v46 = vrot.slane %v1778_v18, 5  ;;  %v1788_v24 = vshll.u32 %v10118_v22, 16 }
  0xf3   : > { %1235 = vst.msk [vmem:[#allocation2 + $0x40] sm:$0xff] %vm1229_vm13, %v13512_v7  ;;  %v1119_v7 = vsel %vm12771_vm2, %v1117_v50, %v1118_v31  ;;  %v1390_v52 = vpop.permute.xlu0 %1389  ;;  %v1782_v31 = vshrl.u32 %v10117_v39, 16  ;;  %v782_v20 = vor.u32 %v781_v48, %v777_v63  ;;  %v13809_v50 = vld [vmem:[%s12948_s30 + $0x100] sm:$0xff]  ;;  %v10766_v39 = vld [vmem:[%s12948_s30 + $0x90] sm:$0xff]  ;;  %v6398_v41 = vrot.slane %v6396_v45, 4  ;;  %v12260_v58 = vld [vmem:[%s12754_s20 + $0x28] sm:$0xff]  }
  0xf4   : > { %v10031_v47 = vcombine.low %v1116_v53, %v1119_v7  ;;  %v6379_v2 = vor.u32 %v6378_v14, %v6375_v49  ;;  %v6388_v3 = vrot.slane %v6386_v6, 4  ;;  %425 = vst.msk [vmem:[#allocation2 + $0x60] sm:$0xff] %vm421_vm11, %v12253_v43  ;;  %v1776_v53 = vrot.slane %v1775_v56, 4  ;;  %v10119_v32 = vld [vmem:[%s12754_s20 + $0xa0] sm:$0xf]  ;;  %v12258_v27 = vld [vmem:[%s16511_s3 + $0x1b0] sm:$0xff]  }
  0xf5   : > { %933 = vst.msk [vmem:[#allocation2 + $0x60] sm:$0xff] %vm929_vm12, %v13621_v38  ;;  %v783_v60 = vrot.slane %v782_v20, 4  ;;  %v1784_v49 = vrot.slane %v1782_v31, 4  ;;  %v1790_v14 = vrot.slane %v1788_v24, 5  ;;  %v1122_v6 = vrot.slane %v982_v40, 5  ;;  %7472 = vmatpush1.bf16.msra.mxu0 %v12258_v27 }
  0xf6   : > { %v6380_v21 = vrot.slane %v6379_v2, 4  ;;  %v6389_v29 = vor.u32 %v6388_v3, %v6384_v36  ;;  %v13779_v34 = vpop.permute.xlu1 %1191  ;;  %1207 = vrot.lane.b32.xlu1 %v10031_v47, %s12609_s12  ;;  %1237 = vst.msk [vmem:[#allocation2 + $0x60] sm:$0xff] %vm1229_vm13, %v13596_v35  ;;  %v1781_v35 = vsel %vm12844_vm5, %v1776_v53, %v13794_v46  ;;  %v2114_v7 = vrot.slane %v2112_v26, 4  ;;  %v13857_v48 = vld [vmem:[%s12754_s20 + $0xa8] sm:$0xf]  ;;  %7473 = vmatprep.subr.bf16.mxu0 %v16519_v0 }
  0xf7   : > { %1242 = vst.msk [vmem:[#allocation2 + $0xa8] sm:$0xff] %vm1231_vm7, %v13779_v34  ;;  %v788_v1 = vsel %vm12844_vm5, %v783_v60, %v787_v55  ;;  %v1785_v47 = vor.u32 %v1784_v49, %v13794_v46  ;;  %v1123_v2 = vsel %vm12771_vm2, %v10017_v59, %v1122_v6  ;;  %v1124_v3 = vrot.slane %v1122_v6, 4  ;;  %v10175_v56 = vld [vmem:[%s12754_s20 + $0xa0] sm:$0xe]  ;;  %v10176_v46 = vld [vmem:[%s12754_s20 + $0xa4] sm:$0xf] }
  0xf8   : > { %v6385_v42 = vsel %vm12844_vm5, %v6380_v21, %v6384_v36  ;;  %v6390_v33 = vrot.slane %v6389_v29, 4  ;;  %1433 = vst.msk [vmem:[#allocation2 + $0xa8] sm:$0xff] %vm1427_vm8, %v1390_v52  ;;  %v13812_v15 = vpop.permute.xlu0 %891  ;;  %v2115_v36 = vrot.slane %v10173_v5, 5  ;;  %v10007_v25 = vcombine.low %v778_v51, %v788_v1  ;;  %v13866_v59 = vld [vmem:[%s12754_s20 + $0xa8] sm:$0xf] }
  0xf9   : > { %v1786_v52 = vrot.slane %v1785_v47, 4  ;;  %v1126_v21 = vsel %vm12771_vm2, %v1124_v3, %v1125_v30  ;;  %v10403_v29 = vcombine.high %v13809_v50, %v3361_v61  ;;  %v6402_v28 = vshll.u32 %v10766_v39, 16  ;;  %426 = vst.msk [vmem:[#allocation2 + $0x80] sm:$0xff] %vm421_vm11, %v12260_v58  ;;  %v12251_v47 = vld [vmem:[%s12754_s20 + $0xa0] sm:$0xff]   ;;  %v13882_v3 = vld [vmem:[%s12754_s20 + $0x94] sm:$0xf] }
  0xfa   : > { %v6395_v54 = vsel %vm12844_vm5, %v6390_v33, %v13764_v9  ;;  %v13831_v26 = vsel %vm12771_vm2, %v2114_v7, %v2115_v36  ;;  %v2117_v12 = vrot.slane %v2115_v36, 4  ;;  %907 = vrot.lane.b32.xlu0 %v10007_v25, %s12612_s19  ;;  %v10032_v19 = vcombine.low %v1123_v2, %v1126_v21  ;;  %v10120_v33 = vld [vmem:[%s12754_s20 + $0xa4] sm:$0xf]  ;;  %v474_v2 = vld [vmem:[%s12754_s20 + $0x90] sm:$0xf]  ;;  %934 = vst.msk [vmem:[#allocation2 + $0x80] sm:$0xff] %vm929_vm12, %v13761_v4 }
  0xfb   : > { %v10822_v23 = vcombine.high %v6385_v42, %v6395_v54  ;;  %v10821_v38 = vcombine.low %v6385_v42, %v6395_v54  ;;  %v1895_v13 = vpop.permute.xlu1 %1894  ;;  %v6406_v63 = vshrl.u32 %v10766_v39, 16  ;;  %v1791_v18 = vsel %vm12844_vm5, %v1786_v52, %v1790_v14  ;;  %10431 = vmatprep.mubr.msk.bf16.mxu1 %vm2231_vm6, %v10403_v29  ;;  %1239 = vst.msk [vmem:[#allocation2 + $0x80] sm:$0xff] %vm1229_vm13, %v13646_v37  ;;  %v12262_v37 = vld [vmem:[%s16511_s3 + $0x1b8] sm:$0xff]  }
  0xfc   : > { %1938 = vst.msk [vmem:[#allocation2 + $0xa8] sm:$0xff] %vm1932_vm9, %v1895_v13  ;;  %v13834_v22 = vpop.permute.xlu0 %1193  ;;  %v2119_v43 = vsel %vm12771_vm2, %v2117_v12, %v2118_v16  ;;  %v6412_v42 = vshll.u32 %v10767_v17, 16  ;;  %v10137_v55 = vcombine.low %v1781_v35, %v1791_v18  ;;  %v6404_v5 = vrot.slane %v6402_v28, 5  ;;  %v473_v35 = vld [vmem:[%s12754_s20 + $0x8c] sm:$0xf]  ;;  %v13906_v18 = vld [vmem:[%s12948_s30 + $0x120] sm:$0xff]  ;;  %7474 = vmatpush1.bf16.msra.mxu0 %v12262_v37 }
  0xfd   : > { %10859 = vmatprep.mubr.msk.bf16.mxu0 %vm2231_vm6, %v10822_v23  ;;  %1244 = vst.msk [vmem:[#allocation2 + $0xc8] sm:$0xff] %vm1231_vm7, %v13834_v22  ;;  %v10201_v40 = vcombine.low %v13831_v26, %v2119_v43  ;;  %v6408_v62 = vrot.slane %v6406_v63, 4  ;;  %v10402_v11 = vcombine.low %v13809_v50, %v3361_v61  ;;  %v6399_v31 = vor.u32 %v6398_v41, %v13764_v9  ;;  %v476_v37 = vld [vmem:[%s12754_s20 + $0x98] sm:$0xf] }
  0xfe   : > { %6942 = vmatmul.mubr.bf16.gmra.mrb[16].mxu0 %v10821_v38  ;;  %v6414_v54 = vrot.slane %v6412_v42, 5  ;;  %v1793_v20 = vshrl.u32 %v10119_v32, 16  ;;  %v1796_v24 = vshll.u32 %v10119_v32, 16  ;;  %1910 = vrot.lane.b32.xlu1 %v10137_v55, %s12611_s13  ;;  %v1802_v38 = vshll.u32 %v10120_v33, 16 }
  0xff   : > { %v2192_v44 = vpop.permute.xlu1 %2191  ;;  %1209 = vrot.lane.b32.xlu0 %v10032_v19, %s12609_s12  ;;  %v6409_v23 = vor.u32 %v6408_v62, %v6404_v5  ;;  %v1806_v51 = vshrl.u32 %v10120_v33, 16  ;;  %v1812_v53 = vshll.u32 %v13857_v48, 16  ;;  %v6400_v60 = vrot.slane %v6399_v31, 4  ;;  %3775 = vmatmul.mubr.bf16.gmra.mrb[52].mxu1 %v10402_v11  ;;  %v13900_v19 = vld [vmem:[%s12948_s30 + $0x118] sm:$0xff] }
 0x100   : > { %2241 = vst.msk [vmem:[#allocation2 + $0xa8] sm:$0xff] %vm2229_vm10, %v2192_v44  ;;  %v1795_v49 = vrot.slane %v1793_v20, 4  ;;  %v1798_v14 = vrot.slane %v1796_v24, 5  ;;  %v1816_v6 = vshrl.u32 %v13857_v48, 16  ;;  %v1804_v61 = vrot.slane %v1802_v38, 5  ;;  %v13931_v38 = vld [vmem:[%s12948_s30 + $0xb0] sm:$0xff]  ;;  %7475 = vmatprep.subr.bf16.mxu0 %v16519_v0 }
 0x101   : > { %2242 = vst.msk [vmem:[#allocation2 + $0xb0] sm:$0xff] %vm2231_vm6, %v2192_v44  ;;  %v6410_v36 = vrot.slane %v6409_v23, 4  ;;  %v1808_v13 = vrot.slane %v1806_v51, 4  ;;  %v13877_v1 = vrot.slane %v1812_v53, 5  ;;  %v6405_v39 = vsel %vm12844_vm5, %v6400_v60, %v6404_v5  ;;  %v10768_v5 = vld [vmem:[%s12948_s30 + $0xa0] sm:$0xff] }
 0x102   : > { %v1799_v25 = vor.u32 %v1798_v14, %v1795_v49  ;;  %v10187_v26 = vrot.slane %v10175_v56, 9  ;;  %v2122_v12 = vrot.slane %v10176_v46, 5  ;;  %2207 = vrot.lane.b32.xlu1 %v10201_v40, %s12610_s8  ;;  %v2125_v17 = vrot.slane %v13866_v59, 5  ;;  %v12263_v40 = vld [vmem:[%s12754_s20 + $0x30] sm:$0xff]   ;;  %v984_v14 = vld [vmem:[%s12754_s20 + $0x98] sm:$0xf] }
 0x103   : > { %v1392_v9 = vpop.permute.xlu1 %1391  ;;  %v1897_v7 = vpop.permute.xlu0 %1896  ;;  %v6415_v16 = vsel %vm12844_vm5, %v6410_v36, %v6414_v54  ;;  %v1809_v4 = vor.u32 %v1808_v13, %v1804_v61  ;;  %v790_v52 = vshrl.u32 %v473_v35, 16  ;;  %v793_v44 = vshll.u32 %v473_v35, 16  ;;  %v10769_v54 = vld [vmem:[%s12948_s30 + $0xa8] sm:$0xff]  ;;  %427 = vst.msk [vmem:[#allocation2 + $0xa0] sm:$0xff] %vm421_vm11, %v12263_v40  ;;  %v477_v40 = vld [vmem:[%s12754_s20 + $0x9c] sm:$0x1] }
 0x104   : > { %1434 = vst.msk [vmem:[#allocation2 + $0xc8] sm:$0xff] %vm1427_vm8, %v1392_v9  ;;  %v10824_v21 = vcombine.high %v6405_v39, %v6415_v16  ;;  %v10823_v29 = vcombine.low %v6405_v39, %v6415_v16  ;;  %v1800_v45 = vrot.slane %v1799_v25, 4  ;;  %v13897_v32 = vsel %vm12771_vm2, %v10187_v26, %v2122_v12  ;;  %v12256_v16 = vld [vmem:[%s12754_s20 + $0xa8] sm:$0xff]   ;;  %v12261_v59 = vld [vmem:[%s16510_s2 + $0x80] sm:$0xff]  }
 0x105   : > { %1939 = vst.msk [vmem:[#allocation2 + $0xc8] sm:$0xff] %vm1932_vm9, %v1897_v7  ;;  %v1810_v28 = vrot.slane %v1809_v4, 4  ;;  %v2124_v63 = vrot.slane %v2122_v12, 4  ;;  %v792_v27 = vrot.slane %v790_v52, 4  ;;  %v799_v42 = vshll.u32 %v474_v2, 16  ;;  %v13955_v4 = vld [vmem:[%s12948_s30 + $0x128] sm:$0xff] }
 0x106   : > { %10860 = vmatprep.mubr.msk.bf16.mxu0 %vm2231_vm6, %v10824_v21  ;;  %v1805_v41 = vsel %vm12844_vm5, %v1800_v45, %v1804_v61  ;;  %v803_v33 = vshrl.u32 %v474_v2, 16  ;;  %v809_v55 = vshll.u32 %v13882_v3, 16  ;;  %1407 = vrot.lane.b32.xlu1 %v12251_v47, %s12608_s28  ;;  %v795_v46 = vrot.slane %v793_v44, 5  ;;  %935 = vst.msk [vmem:[#allocation2 + $0xa0] sm:$0xff] %vm929_vm12, %v13812_v15  ;;  %v985_v61 = vld [vmem:[%s12754_s20 + $0x9c] sm:$0x1] }
 0x107   : > { %v2194_v43 = vpop.permute.xlu0 %2193  ;;  %6950 = vmatmul.mubr.bf16.gmra.mrb[20].mxu0 %v10823_v29  ;;  %v1815_v11 = vsel %vm12844_vm5, %v1810_v28, %v13877_v1  ;;  %v2126_v56 = vsel %vm12771_vm2, %v2124_v63, %v2125_v17  ;;  %v813_v31 = vshrl.u32 %v13882_v3, 16  ;;  %v801_v58 = vrot.slane %v799_v42, 5  ;;  %1241 = vst.msk [vmem:[#allocation2 + $0xa0] sm:$0xff] %vm1229_vm13, %v13779_v34  ;;  %v13958_v52 = vld [vmem:[%s12948_s30 + $0x130] sm:$0xff] }
 0x108   : > { %2243 = vst.msk [vmem:[#allocation2 + $0xc8] sm:$0xff] %vm2229_vm10, %v2194_v43  ;;  %v13916_v62 = vpop.permute.xlu1 %893  ;;  %v10138_v20 = vcombine.low %v1805_v41, %v1815_v11  ;;  %v10202_v24 = vcombine.low %v13897_v32, %v2126_v56  ;;  %v805_v23 = vrot.slane %v803_v33, 4  ;;  %v796_v53 = vor.u32 %v795_v46, %v792_v27  ;;  %v12268_v41 = vld [vmem:[%s12754_s20 + $0x3c] sm:$0xff]  }
 0x109   : > { %2244 = vst.msk [vmem:[#allocation2 + $0xd0] sm:$0xff] %vm2231_vm6, %v2194_v43  ;;  %v13936_v9 = vrot.slane %v809_v55, 5  ;;  %v10405_v60 = vcombine.high %v13900_v19, %v13906_v18  ;;  %v6417_v49 = vshrl.u32 %v10768_v5, 16  ;;  %v6420_v7 = vshll.u32 %v10768_v5, 16  ;;  %v12267_v43 = vld [vmem:[%s16511_s3 + $0x1c0] sm:$0xff]  }
 0x10a   : > { %1912 = vrot.lane.b32.xlu0 %v10138_v20, %s12611_s13  ;;  %v806_v35 = vor.u32 %v805_v23, %v801_v58  ;;  %v6426_v15 = vshll.u32 %v10769_v54, 16  ;;  %v6430_v36 = vshrl.u32 %v10769_v54, 16  ;;  %v797_v47 = vrot.slane %v796_v53, 4  ;;  %7476 = vmatpush1.bf16.msra.mxu0 %v12267_v43  ;;  %v10772_v54 = vld [vmem:[%s12948_s30 + $0xc0] sm:$0x11]  ;;  %428 = vst.msk [vmem:[#allocation2 + $0xc0] sm:$0xff] %vm421_vm11, %v12268_v41 }
 0x10b   : > { %v1394_v51 = vpop.permute.xlu0 %1393  ;;  %10432 = vmatprep.mubr.msk.bf16.mxu1 %vm2231_vm6, %v10405_v60  ;;  %v6419_v2 = vrot.slane %v6417_v49, 4  ;;  %v6436_v3 = vshll.u32 %v13931_v38, 16  ;;  %v10404_v34 = vcombine.low %v13900_v19, %v13906_v18  ;;  %v6422_v25 = vrot.slane %v6420_v7, 5  ;;  %7477 = vmatprep.subr.bf16.mxu0 %v16519_v0  ;;  %v10771_v23 = vld [vmem:[%s12948_s30 + $0xb8] sm:$0xff]  ;;  %936 = vst.msk [vmem:[#allocation2 + $0xc0] sm:$0xff] %vm929_vm12, %v13916_v62 }
 0x10c   : > { %v13945_v13 = vpop.permute.xlu1 %1195  ;;  %v807_v39 = vrot.slane %v806_v35, 4  ;;  %v6428_v26 = vrot.slane %v6426_v15, 5  ;;  %v6432_v12 = vrot.slane %v6430_v36, 4  ;;  %v802_v21 = vsel %vm12844_vm5, %v797_v47, %v801_v58  ;;  %1243 = vst.msk [vmem:[#allocation2 + $0xc0] sm:$0xff] %vm1229_vm13, %v13834_v22  ;;  %v12270_v36 = vld [vmem:[%s12754_s20 + $0x44] sm:$0xff]  }
 0x10d   : > { %1246 = vst.msk [vmem:[#allocation2 + $0xe8] sm:$0xff] %vm1231_vm7, %v13945_v13  ;;  %v13963_v29 = vrot.slane %v6436_v3, 5  ;;  %3783 = vmatmul.mubr.bf16.gmra.mrb[56].mxu1 %v10404_v34  ;;  %v1127_v45 = vrot.slane %v1125_v30, 4  ;;  %v1128_v32 = vrot.slane %v984_v14, 5  ;;  %v6423_v63 = vor.u32 %v6422_v25, %v6419_v2  ;;  %v10122_v3 = vld [vmem:[%s12754_s20 + $0xac] sm:$0xf] }
 0x10e   : > { %1435 = vst.msk [vmem:[#allocation2 + $0xe8] sm:$0xff] %vm1427_vm8, %v1394_v51  ;;  %2209 = vrot.lane.b32.xlu0 %v10202_v24, %s12610_s8  ;;  %v812_v28 = vsel %vm12844_vm5, %v807_v39, %v13936_v9  ;;  %v6433_v27 = vor.u32 %v6432_v12, %v6428_v26  ;;  %v1131_v44 = vrot.slane %v985_v61, 5  ;;  %v815_v55 = vrot.slane %v813_v31, 4  ;;  %v10123_v12 = vld [vmem:[%s12754_s20 + $0xb0] sm:$0x1] }
 0x10f   : > { %v896_v57 = vpop.permute.xlu0 %895  ;;  %v10008_v30 = vcombine.low %v802_v21, %v812_v28  ;;  %v1129_v42 = vsel %vm12771_vm2, %v1127_v45, %v1128_v32  ;;  %v1130_v33 = vrot.slane %v1128_v32, 4  ;;  %v6424_v5 = vrot.slane %v6423_v63, 4  ;;  %429 = vst.msk [vmem:[#allocation2 + $0xe0] sm:$0xff] %vm421_vm11, %v12270_v36  ;;  %v10178_v43 = vld [vmem:[%s12754_s20 + $0xac] sm:$0xf] }
 0x110   : > { %v6434_v11 = vrot.slane %v6433_v27, 4  ;;  %v819_v56 = vshll.u32 %v476_v37, 16  ;;  %v823_v46 = vshrl.u32 %v476_v37, 16  ;;  %v816_v24 = vor.u32 %v815_v55, %v13936_v9  ;;  %v14020_v28 = vld [vmem:[%s12754_s20 + $0xb0] sm:$0x1]  ;;  %937 = vst.msk [vmem:[#allocation2 + $0xe0] sm:$0xff] %vm929_vm12, %v896_v57 }
 0x111   : > { %909 = vrot.lane.b32.xlu1 %v10008_v30, %s12612_s19  ;;  %v1132_v20 = vsel %vm12771_vm2, %v1130_v33, %v1131_v44  ;;  %v829_v58 = vshll.u32 %v477_v40, 16  ;;  %v10407_v31 = vcombine.high %v13955_v4, %v13958_v52  ;;  %v6429_v53 = vsel %vm12844_vm5, %v6424_v5, %v6428_v26  ;;  %1245 = vst.msk [vmem:[#allocation2 + $0xe0] sm:$0xff] %vm1229_vm13, %v13945_v13  ;;  %v10773_v5 = vld [vmem:[%s12948_s30 + $0xc8] sm:$0xff] }
 0x112   : > { %v6439_v60 = vsel %vm12844_vm5, %v6434_v11, %v13963_v29  ;;  %1409 = vrot.lane.b32.xlu0 %v12256_v16, %s12608_s28  ;;  %v10033_v9 = vcombine.low %v1129_v42, %v1132_v20  ;;  %v821_v49 = vrot.slane %v819_v56, 5  ;;  %v817_v7 = vrot.slane %v816_v24, 4  ;;  %v3214_v16 = vld [vmem:[#allocation2 + $0x8] sm:$0xff]  ;;  %v10774_v20 = vld [vmem:[%s12948_s30 + $0xd0] sm:$0xff]  ;;  %s11364_s28 = sshll.u32 %s12594_s24, 11  ;;  %s16460_s24 = scalar_lea.sflag [#allocation5], %s279_s11 }
 0x113   : > { %v1899_v51 = vpop.permute.xlu1 %1898  ;;  %v14000_v14 = vpop.permute.xlu0 %1197  ;;  %v10826_v62 = vcombine.high %v6429_v53, %v6439_v60  ;;  %v10825_v35 = vcombine.low %v6429_v53, %v6439_v60  ;;  %v825_v15 = vrot.slane %v823_v46, 4  ;;  %10433 = vmatprep.mubr.msk.bf16.mxu1 %vm2231_vm6, %v10407_v31  ;;  %v831_v61 = vrot.slane %v829_v58, 5 }
 0x114   : > { %1940 = vst.msk [vmem:[#allocation2 + $0xe8] sm:$0xff] %vm1932_vm9, %v1899_v51  ;;  %v6440_v47 = vshrl.u32 %v13931_v38, 16  ;;  %v6446_v2 = vshll.u32 %v10771_v23, 16  ;;  %v6450_v22 = vshrl.u32 %v10771_v23, 16  ;;  %v822_v34 = vsel %vm12844_vm5, %v817_v7, %v821_v49 }
 0x115   : > { %1248 = vst.msk [vmem:[#allocation2 + $0x108] sm:$0xff] %vm1231_vm7, %v14000_v14  ;;  %10861 = vmatprep.mubr.msk.bf16.mxu0 %vm2231_vm6, %v10826_v62  ;;  %1211 = vrot.lane.b32.xlu1 %v10033_v9, %s12609_s12  ;;  %v826_v39 = vor.u32 %v825_v15, %v821_v49  ;;  %v6456_v25 = vshll.u32 %v10772_v54, 16  ;;  %v10406_v26 = vcombine.low %v13955_v4, %v13958_v52  ;;  %v1818_v37 = vrot.slane %v1816_v6, 4  ;;  %v3213_v9 = vld [vmem:[#allocation2] sm:$0xff]  ;;  %v12264_v49 = vld [vmem:[%s12754_s20 + $0x28] sm:$0xff]   ;;  %s16450_s12 = scalar_lea.hbm %s16514_s6, %s11364_s28 }
 0x116   : > { %6958 = vmatmul.mubr.bf16.gmra.mrb[24].mxu0 %v10825_v35  ;;  %v6442_v21 = vrot.slane %v6440_v47, 4  ;;  %v6448_v45 = vrot.slane %v6446_v2, 5  ;;  %v6452_v32 = vrot.slane %v6450_v22, 4  ;;  %v1822_v44 = vshll.u32 %v10122_v3, 16  ;;  %v10254_v62 = vld [vmem:[%s12754_s20 + $0x28] sm:$0xf] }
 0x117   : > { %v2196_v38 = vpop.permute.xlu1 %2195  ;;  %v827_v63 = vrot.slane %v826_v39, 4  ;;  %v6458_v27 = vrot.slane %v6456_v25, 5  ;;  %3791 = vmatmul.mubr.bf16.gmra.mrb[60].mxu1 %v10406_v26  ;;  %v1826_v40 = vshrl.u32 %v10122_v3, 16  ;;  %v1819_v41 = vor.u32 %v1818_v37, %v13877_v1  ;;  %v14059_v39 = vld [vmem:[%s12754_s20 + $0x30] sm:$0xf] }
 0x118   : > { %2245 = vst.msk [vmem:[#allocation2 + $0xe8] sm:$0xff] %vm2229_vm10, %v2196_v38  ;;  %v6443_v48 = vor.u32 %v6442_v21, %v13963_v29  ;;  %v6453_v6 = vor.u32 %v6452_v32, %v6448_v45  ;;  %v1832_v57 = vshll.u32 %v10123_v12, 16  ;;  %4041 = vmatprep.mubr.bf16.mxu1 %v3214_v16  ;;  %v1824_v42 = vrot.slane %v1822_v44, 5  ;;  %v12404_v12 = vld [vmem:[%s12948_s30 + $0xd8] sm:$0xff] }
 0x119   : > { %2246 = vst.msk [vmem:[#allocation2 + $0xf0] sm:$0xff] %vm2231_vm6, %v2196_v38  ;;  %v832_v30 = vsel %vm12844_vm5, %v827_v63, %v831_v61  ;;  %v1828_v33 = vrot.slane %v1826_v40, 4  ;;  %v2127_v55 = vrot.slane %v2125_v17, 4  ;;  %v1820_v54 = vrot.slane %v1819_v41, 4  ;;  %v12273_v17 = vld [vmem:[%s16511_s3 + $0x1c8] sm:$0xff]   ;;  %v12275_v63 = vld [vmem:[%s12754_s20 + $0x50] sm:$0xff]  }
 0x11a   : > { %v1901_v11 = vpop.permute.xlu0 %1900  ;;  %v10009_v13 = vcombine.low %v822_v34, %v832_v30  ;;  %v6444_v46 = vrot.slane %v6443_v48, 4  ;;  %v6454_v29 = vrot.slane %v6453_v6, 4  ;;  %v1834_v24 = vrot.slane %v1832_v57, 5  ;;  %v10255_v61 = vld [vmem:[%s12754_s20 + $0x2c] sm:$0xf]  ;;  %7478 = vmatpush1.bf16.msra.mxu0 %v12273_v17  ;;  %430 = vst.msk [vmem:[#allocation2 + $0x100] sm:$0xff] %vm421_vm11, %v12275_v63 }
 0x11b   : > { %v1396_v56 = vpop.permute.xlu1 %1395  ;;  %v1829_v1 = vor.u32 %v1828_v33, %v1824_v42  ;;  %v2128_v58 = vrot.slane %v10178_v43, 5  ;;  %v2131_v31 = vrot.slane %v14020_v28, 5  ;;  %v1825_v53 = vsel %vm12844_vm5, %v1820_v54, %v1824_v42  ;;  %7479 = vmatprep.subr.bf16.mxu0 %v16519_v0  ;;  %v3218_v38 = vld [vmem:[#allocation2 + $0x28] sm:$0xff]  ;;  %v12265_v28 = vld [vmem:[%s12754_s20 + $0x30] sm:$0xff]  }
 0x11c   : > { %1436 = vst.msk [vmem:[#allocation2 + $0x108] sm:$0xff] %vm1427_vm8, %v1396_v56  ;;  %911 = vrot.lane.b32.xlu0 %v10009_v13, %s12612_s19  ;;  %v6449_v23 = vsel %vm12844_vm5, %v6444_v46, %v6448_v45  ;;  %v6459_v51 = vsel %vm12844_vm5, %v6454_v29, %v6458_v27  ;;  %v6461_v60 = vshrl.u32 %v10773_v5, 16  ;;  %v6464_v3 = vshll.u32 %v10773_v5, 16  ;;  %s12613_s19 = smov 32   ;;  %v12266_v6 = vld [vmem:[%s16510_s2 + $0x88] sm:$0xff]   ;;  %v12277_v54 = vld [vmem:[%s16511_s3 + $0x1d0] sm:$0xff]  }
 0x11d   : > { %1941 = vst.msk [vmem:[#allocation2 + $0x108] sm:$0xff] %vm1932_vm9, %v1901_v11  ;;  %v10828_v35 = vcombine.high %v6449_v23, %v6459_v51  ;;  %v10827_v7 = vcombine.low %v6449_v23, %v6459_v51  ;;  %v1830_v15 = vrot.slane %v1829_v1, 4  ;;  %v14055_v36 = vsel %vm12771_vm2, %v2127_v55, %v2128_v58  ;;  %v10776_v55 = vld [vmem:[%s12948_s30 + $0xe0] sm:$0xff]  ;;  %v10777_v46 = vld [vmem:[%s12948_s30 + $0xe8] sm:$0x11] }
 0x11e   : > { %v2198_v47 = vpop.permute.xlu0 %2197  ;;  %v2130_v2 = vrot.slane %v2128_v58, 4  ;;  %v6463_v22 = vrot.slane %v6461_v60, 4  ;;  %v6470_v34 = vshll.u32 %v10774_v20, 16  ;;  %v6474_v26 = vshrl.u32 %v10774_v20, 16  ;;  %v12269_v60 = vld [vmem:[%s12754_s20 + $0x3c] sm:$0xff]   ;;  %7480 = vmatpush1.bf16.msra.mxu0 %v12277_v54 }
 0x11f   : > { %2247 = vst.msk [vmem:[#allocation2 + $0x108] sm:$0xff] %vm2229_vm10, %v2198_v47  ;;  %10862 = vmatprep.mubr.msk.bf16.mxu0 %vm2231_vm6, %v10828_v35  ;;  %v1835_v25 = vsel %vm12844_vm5, %v1830_v15, %v1834_v24  ;;  %v6480_v16 = vshll.u32 %v12404_v12, 16  ;;  %4042 = vmatmul.mubr.bf16.vlgmr.msra.gmra.mrb[64].mxu1 %v3213_v9  ;;  %v2485_v21 = vshrl.u32 %v10254_v62, 16  ;;  %v6466_v37 = vrot.slane %v6464_v3, 5  ;;  %v12271_v9 = vld [vmem:[%s16510_s2 + $0x90] sm:$0xff]  }
 0x120   : > { %2248 = vst.msk [vmem:[#allocation2 + $0x110] sm:$0xff] %vm2231_vm6, %v2198_v47  ;;  %6966 = vmatmul.mubr.bf16.gmra.mrb[28].mxu0 %v10827_v7  ;;  %v10139_v45 = vcombine.low %v1825_v53, %v1835_v25  ;;  %v2132_v32 = vsel %vm12771_vm2, %v2130_v2, %v2131_v31  ;;  %v6472_v43 = vrot.slane %v6470_v34, 5  ;;  %4049 = vmatprep.mubr.bf16.mxu1 %v3218_v38  ;;  %v6476_v44 = vrot.slane %v6474_v26, 4  ;;  %v3217_v31 = vld [vmem:[#allocation2 + $0x20] sm:$0xff]  ;;  %v3222_v53 = vld [vmem:[#allocation2 + $0x48] sm:$0xff] }
 0x121   : > { %v10203_v27 = vcombine.low %v14055_v36, %v2132_v32  ;;  %v14073_v40 = vrot.slane %v6480_v16, 5  ;;  %4171 = vmatpush1.bf16.msra.mxu1 %v12261_v59  ;;  %2379 = vrot.lane.b32.xlu0 %v12264_v49, %s12613_s19  ;;  %v2487_v48 = vrot.slane %v2485_v21, 4  ;;  %v898_v41 = vpop.permute.xlu1 %897  ;;  %v6467_v57 = vor.u32 %v6466_v37, %v6463_v22  ;;  %v10257_v15 = vld [vmem:[%s12754_s20 + $0x34] sm:$0xf]  ;;  %v12278_v36 = vld [vmem:[%s12754_s20 + $0x58] sm:$0xff]   ;;  %v12272_v34 = vld [vmem:[%s12754_s20 + $0x44] sm:$0xff]  }
 0x122   : > { %1914 = vrot.lane.b32.xlu1 %v10139_v45, %s12611_s13  ;;  %v2488_v30 = vshll.u32 %v10254_v62, 16  ;;  %v2494_v42 = vshll.u32 %v10255_v61, 16  ;;  %v2498_v33 = vshrl.u32 %v10255_v61, 16  ;;  %4172 = vmatprep.subr.bf16.mxu1 %v16519_v0  ;;  %v1398_v5 = vpop.permute.xlu0 %1397  ;;  %v6477_v11 = vor.u32 %v6476_v44, %v6472_v43  ;;  %938 = vst.msk [vmem:[#allocation2 + $0x100] sm:$0xff] %vm929_vm12, %v898_v41  ;;  %v10258_v3 = vld [vmem:[%s12754_s20 + $0x38] sm:$0x1] }
 0x123   : > { %v2504_v56 = vshll.u32 %v14059_v39, 16  ;;  %v2508_v13 = vshrl.u32 %v14059_v39, 16  ;;  %v6484_v29 = vshrl.u32 %v12404_v12, 16  ;;  %v6468_v20 = vrot.slane %v6467_v57, 4  ;;  %1247 = vst.msk [vmem:[#allocation2 + $0x100] sm:$0xff] %vm1229_vm13, %v14000_v14  ;;  %7481 = vmatprep.subr.bf16.mxu0 %v16519_v0 }
 0x124   : > { %v2490_v1 = vrot.slane %v2488_v30, 5  ;;  %v2496_v24 = vrot.slane %v2494_v42, 5  ;;  %v2500_v58 = vrot.slane %v2498_v33, 4  ;;  %v6478_v59 = vrot.slane %v6477_v11, 4  ;;  %431 = vst.msk [vmem:[#allocation2 + $0x120] sm:$0xff] %vm421_vm11, %v12278_v36  ;;  %v12405_v33 = vld [vmem:[%s12948_s30 + $0xf0] sm:$0xff] }
 0x125   : > { %v14092_v17 = vrot.slane %v2504_v56, 5  ;;  %v6486_v23 = vrot.slane %v6484_v29, 4  ;;  %v6490_v51 = vshll.u32 %v10776_v55, 16  ;;  %2381 = vrot.lane.b32.xlu0 %v12265_v28, %s12613_s19  ;;  %4173 = vmatpush1.bf16.msra.mxu1 %v12266_v6  ;;  %v1200_v49 = vpop.permute.xlu1 %1199  ;;  %v6473_v14 = vsel %vm12844_vm5, %v6468_v20, %v6472_v43  ;;  %v10259_v11 = vld [vmem:[%s12754_s20 + $0x3c] sm:$0xf]  ;;  %v12274_v56 = vld [vmem:[%s12754_s20 + $0x50] sm:$0xff]  }
 0x126   : > { %2211 = vrot.lane.b32.xlu1 %v10203_v27, %s12610_s8  ;;  %v2491_v62 = vor.u32 %v2490_v1, %v2487_v48  ;;  %v2501_v35 = vor.u32 %v2500_v58, %v2496_v24  ;;  %v6494_v7 = vshrl.u32 %v10776_v55, 16  ;;  %4174 = vmatprep.subr.bf16.mxu1 %v16519_v0  ;;  %1250 = vst.msk [vmem:[#allocation2 + $0x128] sm:$0xff] %vm1231_vm7, %v1200_v49  ;;  %v6500_v22 = vshll.u32 %v10777_v46, 16  ;;  %v12276_v27 = vld [vmem:[%s16510_s2 + $0x98] sm:$0xff]   ;;  %v10260_v58 = vld [vmem:[%s12754_s20 + $0x40] sm:$0xf] }
 0x127   : > { %v6483_v61 = vsel %vm12844_vm5, %v6478_v59, %v14073_v40  ;;  %v6487_v47 = vor.u32 %v6486_v23, %v14073_v40  ;;  %v6492_v2 = vrot.slane %v6490_v51, 5  ;;  %4050 = vmatmul.mubr.bf16.gmra.mrb[68].mxu1 %v3217_v31  ;;  %1437 = vst.msk [vmem:[#allocation2 + $0x128] sm:$0xff] %vm1427_vm8, %v1398_v5  ;;  %v900_v16 = vpop.permute.xlu0 %899  ;;  %v2510_v32 = vrot.slane %v2508_v13, 4  ;;  %v3221_v5 = vld [vmem:[#allocation2 + $0x40] sm:$0xff]  ;;  %v12406_v20 = vld [vmem:[%s12948_s30 + $0xf8] sm:$0xff] }
 0x128   : > { %v10830_v39 = vcombine.high %v6473_v14, %v6483_v61  ;;  %v10829_v25 = vcombine.low %v6473_v14, %v6483_v61  ;;  %v2492_v26 = vrot.slane %v2491_v62, 4  ;;  %v2502_v12 = vrot.slane %v2501_v35, 4  ;;  %4057 = vmatprep.mubr.bf16.mxu1 %v3222_v53  ;;  %939 = vst.msk [vmem:[#allocation2 + $0x120] sm:$0xff] %vm929_vm12, %v900_v16  ;;  %v12280_v51 = vld [vmem:[%s16510_s2 + $0xa0] sm:$0xff]  }
 0x129   : > { %v6488_v38 = vrot.slane %v6487_v47, 4  ;;  %v6496_v21 = vrot.slane %v6494_v7, 4  ;;  %v6502_v45 = vrot.slane %v6500_v22, 5  ;;  %2383 = vrot.lane.b32.xlu0 %v12269_v60, %s12613_s19  ;;  %4175 = vmatpush1.bf16.msra.mxu1 %v12271_v9  ;;  %v2514_v28 = vshll.u32 %v10257_v15, 16  ;;  %1249 = vst.msk [vmem:[#allocation2 + $0x120] sm:$0xff] %vm1229_vm13, %v1200_v49  ;;  %v12279_v22 = vld [vmem:[%s12754_s20 + $0x58] sm:$0xff]  }
 0x12a   : > { %10863 = vmatprep.mubr.msk.bf16.mxu0 %vm2231_vm6, %v10830_v39  ;;  %v2497_v37 = vsel %vm12844_vm5, %v2492_v26, %v2496_v24  ;;  %v2507_v43 = vsel %vm12844_vm5, %v2502_v12, %v14092_v17  ;;  %v2518_v63 = vshrl.u32 %v10257_v15, 16  ;;  %4176 = vmatprep.subr.bf16.mxu1 %v16519_v0  ;;  %v2511_v6 = vor.u32 %v2510_v32, %v14092_v17  ;;  %v1903_v41 = vpop.permute.xlu1 %1902  ;;  %v3226_v24 = vld [vmem:[#allocation2 + $0x68] sm:$0xff] }
 0x12b   : > { %6974 = vmatmul.mubr.bf16.gmra.mrb[32].mxu0 %v10829_v25  ;;  %v10294_v44 = vcombine.low %v2497_v37, %v2507_v43  ;;  %v6493_v40 = vsel %vm12844_vm5, %v6488_v38, %v6492_v2  ;;  %v6497_v48 = vor.u32 %v6496_v21, %v6492_v2  ;;  %v2516_v57 = vrot.slane %v2514_v28, 5  ;;  %1942 = vst.msk [vmem:[#allocation2 + $0x128] sm:$0xff] %vm1932_vm9, %v1903_v41  ;;  %v14135_v13 = vpop.permute.xlu0 %1201  ;;  %v10261_v25 = vld [vmem:[%s12754_s20 + $0x44] sm:$0xf] }
 0x12c   : > { %v2520_v30 = vrot.slane %v2518_v63, 4  ;;  %v2524_v42 = vshll.u32 %v10258_v3, 16  ;;  %v6505_v55 = vshrl.u32 %v12405_v33, 16  ;;  %v2512_v29 = vrot.slane %v2511_v6, 4  ;;  %1252 = vst.msk [vmem:[#allocation2 + $0x148] sm:$0xff] %vm1231_vm7, %v14135_v13  ;;  %v12282_v3 = vld [vmem:[%s16511_s3 + $0x1d8] sm:$0xff]  }
 0x12d   : > { %2884 = vrot.lane.b32.xlu1 %v10294_v44, %s12614_s18  ;;  %v6498_v46 = vrot.slane %v6497_v48, 4  ;;  %v6508_v54 = vshll.u32 %v12405_v33, 16  ;;  %v6514_v1 = vshll.u32 %v12406_v20, 16  ;;  %2385 = vrot.lane.b32.xlu0 %v12272_v34, %s12613_s19  ;;  %v6518_v23 = vshrl.u32 %v12406_v20, 16  ;;  %v12283_v32 = vld [vmem:[%s12754_s20 + $0x64] sm:$0xff]  }
 0x12e   : > { %v2521_v31 = vor.u32 %v2520_v30, %v2516_v57  ;;  %v2526_v59 = vrot.slane %v2524_v42, 5  ;;  %v6507_v17 = vrot.slane %v6505_v55, 4  ;;  %4177 = vmatpush1.bf16.msra.mxu1 %v12276_v27  ;;  %v2517_v60 = vsel %vm12844_vm5, %v2512_v29, %v2516_v57  ;;  %v2200_v14 = vpop.permute.xlu1 %2199  ;;  %v10782_v27 = vld [vmem:[%s12948_s30 + $0x110] sm:$0x11]  ;;  %v3225_v44 = vld [vmem:[#allocation2 + $0x60] sm:$0xff]  ;;  %7482 = vmatpush1.bf16.msra.mxu0 %v12282_v3  ;;  %432 = vst.msk [vmem:[#allocation2 + $0x140] sm:$0xff] %vm421_vm11, %v12283_v32 }
 0x12f   : > { %v6503_v53 = vsel %vm12844_vm5, %v6498_v46, %v6502_v45  ;;  %v6510_v9 = vrot.slane %v6508_v54, 5  ;;  %v6516_v49 = vrot.slane %v6514_v1, 5  ;;  %4058 = vmatmul.mubr.bf16.gmra.mrb[72].mxu1 %v3221_v5  ;;  %4178 = vmatprep.subr.bf16.mxu1 %v16519_v0  ;;  %v6520_v15 = vrot.slane %v6518_v23, 4  ;;  %2249 = vst.msk [vmem:[#allocation2 + $0x128] sm:$0xff] %vm2229_vm10, %v2200_v14  ;;  %v12407_v57 = vld [vmem:[%s12948_s30 + $0x100] sm:$0xff]  ;;  %v3230_v46 = vld [vmem:[#allocation2 + $0x88] sm:$0xff] }
 0x130   : > { %v10832_v62 = vcombine.high %v6493_v40, %v6503_v53  ;;  %v10831_v35 = vcombine.low %v6493_v40, %v6503_v53  ;;  %v2522_v7 = vrot.slane %v2521_v31, 4  ;;  %4065 = vmatprep.mubr.bf16.mxu1 %v3226_v24  ;;  %2250 = vst.msk [vmem:[#allocation2 + $0x130] sm:$0xff] %vm2231_vm6, %v2200_v14  ;;  %v6524_v61 = vshll.u32 %v13809_v50, 16  ;;  %v10262_v40 = vld [vmem:[%s12754_s20 + $0x48] sm:$0xf]  ;;  %7964 = vmatprep.subr.bf16.mxu0 %v16519_v0  ;;  %v12284_v31 = vld [vmem:[%s12754_s20 + $0x6c] sm:$0xff]  }
 0x131   : > { %v6511_v36 = vor.u32 %v6510_v9, %v6507_v17  ;;  %v2529_v47 = vshrl.u32 %v10259_v11, 16  ;;  %v2532_v2 = vshll.u32 %v10259_v11, 16  ;;  %2387 = vrot.lane.b32.xlu0 %v12274_v56, %s12613_s19  ;;  %v6521_v39 = vor.u32 %v6520_v15, %v6516_v49  ;;  %v12281_v42 = vld [vmem:[%s12754_s20 + $0x64] sm:$0xff]  }
 0x132   : > { %10864 = vmatprep.mubr.msk.bf16.mxu0 %vm2231_vm6, %v10832_v62  ;;  %v2527_v34 = vsel %vm12844_vm5, %v2522_v7, %v2526_v59  ;;  %v2538_v26 = vshll.u32 %v10260_v58, 16  ;;  %v2542_v50 = vshrl.u32 %v10260_v58, 16  ;;  %4179 = vmatpush1.bf16.msra.mxu1 %v12280_v51  ;;  %v6526_v38 = vrot.slane %v6524_v61, 5  ;;  %v1400_v45 = vpop.permute.xlu1 %1399  ;;  %v12408_v11 = vld [vmem:[%s12948_s30 + $0x108] sm:$0xff] }
 0x133   : > { %6982 = vmatmul.mubr.bf16.gmra.mrb[36].mxu0 %v10831_v35  ;;  %v10295_v12 = vcombine.low %v2517_v60, %v2527_v34  ;;  %v6512_v16 = vrot.slane %v6511_v36, 4  ;;  %v2531_v21 = vrot.slane %v2529_v47, 4  ;;  %4180 = vmatprep.subr.bf16.mxu1 %v16519_v0  ;;  %v6522_v37 = vrot.slane %v6521_v39, 4  ;;  %1438 = vst.msk [vmem:[#allocation2 + $0x148] sm:$0xff] %vm1427_vm8, %v1400_v45  ;;  %v10263_v58 = vld [vmem:[%s12754_s20 + $0x4c] sm:$0x1] }
 0x134   : > { %v2534_v43 = vrot.slane %v2532_v2, 5  ;;  %v2540_v28 = vrot.slane %v2538_v26, 5  ;;  %v2544_v63 = vrot.slane %v2542_v50, 4  ;;  %v2548_v6 = vshll.u32 %v10261_v25, 16  ;;  %v12285_v59 = vld [vmem:[%s16510_s2 + $0xa8] sm:$0xff]  }
 0x135   : > { %2886 = vrot.lane.b32.xlu1 %v10295_v12, %s12614_s18  ;;  %v6517_v48 = vsel %vm12844_vm5, %v6512_v16, %v6516_v49  ;;  %v2552_v41 = vshrl.u32 %v10261_v25, 16  ;;  %v6528_v30 = vshrl.u32 %v12407_v57, 16  ;;  %2389 = vrot.lane.b32.xlu0 %v12279_v22, %s12613_s19  ;;  %v6527_v33 = vsel %vm12844_vm5, %v6522_v37, %v6526_v38  ;;  %v1905_v29 = vpop.permute.xlu0 %1904  ;;  %v12286_v62 = vld [vmem:[%s12754_s20 + $0x6c] sm:$0xff]   ;;  %v12288_v57 = vld [vmem:[%s12754_s20 + $0x78] sm:$0xff]  }
 0x136   : > { %v2535_v55 = vor.u32 %v2534_v43, %v2531_v21  ;;  %v2545_v5 = vor.u32 %v2544_v63, %v2540_v28  ;;  %v6534_v56 = vshll.u32 %v12408_v11, 16  ;;  %v10834_v54 = vcombine.high %v6517_v48, %v6527_v33  ;;  %1943 = vst.msk [vmem:[#allocation2 + $0x148] sm:$0xff] %vm1932_vm9, %v1905_v29  ;;  %4181 = vmatpush1.bf16.msra.mxu1 %v12285_v59  ;;  %v3229_v21 = vld [vmem:[#allocation2 + $0x80] sm:$0xff]  ;;  %v10264_v45 = vld [vmem:[%s12754_s20 + $0x50] sm:$0xf] }
 0x137   : > { %v10833_v20 = vcombine.low %v6517_v48, %v6527_v33  ;;  %v2550_v1 = vrot.slane %v2548_v6, 5  ;;  %v6530_v24 = vrot.slane %v6528_v30, 4  ;;  %4066 = vmatmul.mubr.bf16.gmra.mrb[76].mxu1 %v3225_v44  ;;  %v6538_v53 = vshrl.u32 %v12408_v11, 16  ;;  %433 = vst.msk [vmem:[#allocation2 + $0x160] sm:$0xff] %vm421_vm11, %v12286_v62  ;;  %4182 = vmatprep.subr.bf16.mxu1 %v16519_v0  ;;  %v10265_v44 = vld [vmem:[%s12754_s20 + $0x54] sm:$0xf] }
 0x138   : > { %v2536_v17 = vrot.slane %v2535_v55, 4  ;;  %v2546_v23 = vrot.slane %v2545_v5, 4  ;;  %v6536_v51 = vrot.slane %v6534_v56, 5  ;;  %4073 = vmatprep.mubr.bf16.mxu1 %v3230_v46  ;;  %10865 = vmatprep.mubr.msk.bf16.mxu0 %vm2231_vm6, %v10834_v54  ;;  %v6544_v9 = vshll.u32 %v10782_v27, 16  ;;  %v3234_v27 = vld [vmem:[#allocation2 + $0xa8] sm:$0xff]  ;;  %v12289_v5 = vld [vmem:[%s16510_s2 + $0xb0] sm:$0xff]  }
 0x139   : > { %v6531_v60 = vor.u32 %v6530_v24, %v6526_v38  ;;  %v2554_v49 = vrot.slane %v2552_v41, 4  ;;  %v2558_v14 = vshll.u32 %v10262_v40, 16  ;;  %2391 = vrot.lane.b32.xlu0 %v12281_v42, %s12613_s19  ;;  %v6540_v15 = vrot.slane %v6538_v53, 4  ;;  %v2202_v61 = vpop.permute.xlu0 %2201 }
 0x13a   : > { %v2541_v35 = vsel %vm12844_vm5, %v2536_v17, %v2540_v28  ;;  %v2551_v7 = vsel %vm12844_vm5, %v2546_v23, %v2550_v1  ;;  %v2562_v36 = vshrl.u32 %v10262_v40, 16  ;;  %v6546_v22 = vrot.slane %v6544_v9, 5  ;;  %2251 = vst.msk [vmem:[#allocation2 + $0x148] sm:$0xff] %vm2229_vm10, %v2202_v61  ;;  %4183 = vmatpush1.bf16.msra.mxu1 %v12289_v5 }
 0x13b   : > { %6990 = vmatmul.mubr.bf16.gmra.mrb[40].mxu0 %v10833_v20  ;;  %v10296_v47 = vcombine.low %v2541_v35, %v2551_v7  ;;  %v6532_v2 = vrot.slane %v6531_v60, 4  ;;  %v2555_v3 = vor.u32 %v2554_v49, %v2550_v1  ;;  %2252 = vst.msk [vmem:[#allocation2 + $0x150] sm:$0xff] %vm2231_vm6, %v2202_v61  ;;  %v6541_v34 = vor.u32 %v6540_v15, %v6536_v51  ;;  %v3233_v49 = vld [vmem:[#allocation2 + $0xa0] sm:$0xff]  ;;  %v10267_v15 = vld [vmem:[%s12754_s20 + $0x5c] sm:$0xf] }
 0x13c   : > { %v2560_v39 = vrot.slane %v2558_v14, 5  ;;  %v2564_v25 = vrot.slane %v2562_v36, 4  ;;  %v2568_v26 = vshll.u32 %v10263_v58, 16  ;;  %v6549_v16 = vshrl.u32 %v13900_v19, 16  ;;  %v902_v32 = vpop.permute.xlu1 %901  ;;  %v10787_v58 = vld [vmem:[%s12948_s30 + $0x138] sm:$0x11]  ;;  %4184 = vmatprep.subr.bf16.mxu1 %v16519_v0 }
 0x13d   : > { %2888 = vrot.lane.b32.xlu1 %v10296_v47, %s12614_s18  ;;  %v6537_v50 = vsel %vm12844_vm5, %v6532_v2, %v6536_v51  ;;  %v2556_v12 = vrot.slane %v2555_v3, 4  ;;  %v6552_v38 = vshll.u32 %v13900_v19, 16  ;;  %2393 = vrot.lane.b32.xlu0 %v12284_v31, %s12613_s19  ;;  %v6542_v37 = vrot.slane %v6541_v34, 4  ;;  %940 = vst.msk [vmem:[#allocation2 + $0x140] sm:$0xff] %vm929_vm12, %v902_v32  ;;  %v1402_v41 = vpop.permute.xlu0 %1401  ;;  %v12290_v61 = vld [vmem:[%s12754_s20 + $0x80] sm:$0xff]   ;;  %v12291_v34 = vld [vmem:[%s12754_s20 + $0x78] sm:$0xff]  }
 0x13e   : > { %v2565_v43 = vor.u32 %v2564_v25, %v2560_v39  ;;  %v2570_v28 = vrot.slane %v2568_v26, 5  ;;  %v6558_v63 = vshll.u32 %v13906_v18, 16  ;;  %v6551_v48 = vrot.slane %v6549_v16, 4  ;;  %1251 = vst.msk [vmem:[#allocation2 + $0x140] sm:$0xff] %vm1229_vm13, %v14135_v13  ;;  %v10266_v13 = vld [vmem:[%s12754_s20 + $0x58] sm:$0xf] }
 0x13f   : > { %v2561_v40 = vsel %vm12844_vm5, %v2556_v12, %v2560_v39  ;;  %v6554_v19 = vrot.slane %v6552_v38, 5  ;;  %v6562_v6 = vshrl.u32 %v13906_v18, 16  ;;  %4074 = vmatmul.mubr.bf16.gmra.mrb[80].mxu1 %v3229_v21  ;;  %v6547_v30 = vsel %vm12844_vm5, %v6542_v37, %v6546_v22  ;;  %v3238_v12 = vld [vmem:[#allocation2 + $0xc8] sm:$0xff]  ;;  %434 = vst.msk [vmem:[#allocation2 + $0x180] sm:$0xff] %vm421_vm11, %v12291_v34 }
 0x140   : > { %v2566_v42 = vrot.slane %v2565_v43, 4  ;;  %v6560_v33 = vrot.slane %v6558_v63, 5  ;;  %v6568_v55 = vshll.u32 %v13955_v4, 16  ;;  %4081 = vmatprep.mubr.bf16.mxu1 %v3234_v27  ;;  %v10836_v18 = vcombine.high %v6537_v50, %v6547_v30  ;;  %v1204_v29 = vpop.permute.xlu1 %1203 }
 0x141   : > { %v10835_v11 = vcombine.low %v6537_v50, %v6547_v30  ;;  %v6555_v56 = vor.u32 %v6554_v19, %v6551_v48  ;;  %v6564_v46 = vrot.slane %v6562_v6, 4  ;;  %2395 = vrot.lane.b32.xlu0 %v12288_v57, %s12613_s19  ;;  %v2573_v1 = vshrl.u32 %v10264_v45, 16  ;;  %1254 = vst.msk [vmem:[#allocation2 + $0x168] sm:$0xff] %vm1231_vm7, %v1204_v29  ;;  %v10789_v19 = vld [vmem:[%s12948_s30 + $0x148] sm:$0xff]  ;;  %v12293_v6 = vld [vmem:[%s12754_s20 + $0x80] sm:$0xff]  }
 0x142   : > { %v2571_v54 = vsel %vm12844_vm5, %v2566_v42, %v2570_v28  ;;  %v14222_v20 = vrot.slane %v6568_v55, 5  ;;  %v2576_v24 = vshll.u32 %v10264_v45, 16  ;;  %10866 = vmatprep.mubr.msk.bf16.mxu0 %vm2231_vm6, %v10836_v18  ;;  %v2582_v23 = vshll.u32 %v10265_v44, 16  ;;  %1439 = vst.msk [vmem:[#allocation2 + $0x168] sm:$0xff] %vm1427_vm8, %v1402_v41  ;;  %v10268_v45 = vld [vmem:[%s12754_s20 + $0x60] sm:$0x1] }
 0x143   : > { %v10297_v31 = vcombine.low %v2561_v40, %v2571_v54  ;;  %v6556_v59 = vrot.slane %v6555_v56, 4  ;;  %v6565_v17 = vor.u32 %v6564_v46, %v6560_v33  ;;  %6998 = vmatmul.mubr.bf16.gmra.mrb[44].mxu0 %v10835_v11  ;;  %v2575_v51 = vrot.slane %v2573_v1, 4  ;;  %v10788_v28 = vld [vmem:[%s12948_s30 + $0x140] sm:$0xff]  ;;  %v14257_v18 = vld [vmem:[%s12948_s30 + $0x150] sm:$0xff]  ;;  %435 = vst.msk [vmem:[#allocation2 + $0x1a0] sm:$0xff] %vm421_vm11, %v12293_v6 }
 0x144   : > { %v2578_v53 = vrot.slane %v2576_v24, 5  ;;  %v2586_v60 = vshrl.u32 %v10265_v44, 16  ;;  %v2592_v9 = vshll.u32 %v10266_v13, 16  ;;  %v2584_v35 = vrot.slane %v2582_v23, 5  ;;  %v904_v36 = vpop.permute.xlu0 %903  ;;  %v3237_v56 = vld [vmem:[#allocation2 + $0xc0] sm:$0xff] }
 0x145   : > { %2890 = vrot.lane.b32.xlu1 %v10297_v31, %s12614_s18  ;;  %v6561_v14 = vsel %vm12844_vm5, %v6556_v59, %v6560_v33  ;;  %v6566_v62 = vrot.slane %v6565_v17, 4  ;;  %v2596_v7 = vshrl.u32 %v10266_v13, 16  ;;  %v6572_v3 = vshrl.u32 %v13955_v4, 16  ;;  %941 = vst.msk [vmem:[#allocation2 + $0x160] sm:$0xff] %vm929_vm12, %v904_v36  ;;  %2397 = vrot.lane.b32.xlu0 %v12290_v61, %s12613_s19  ;;  %v10269_v1 = vld [vmem:[%s12754_s20 + $0x64] sm:$0xf] }
 0x146   : > { %v2579_v47 = vor.u32 %v2578_v53, %v2575_v51  ;;  %v2588_v2 = vrot.slane %v2586_v60, 4  ;;  %v2594_v22 = vrot.slane %v2592_v9, 5  ;;  %v6578_v25 = vshll.u32 %v13958_v52, 16  ;;  %1253 = vst.msk [vmem:[#allocation2 + $0x160] sm:$0xff] %vm1229_vm13, %v1204_v29  ;;  %v14278_v61 = vld [vmem:[%s12754_s20 + $0x6c] sm:$0xf] }
 0x147   : > { %v6571_v39 = vsel %vm12844_vm5, %v6566_v62, %v14222_v20  ;;  %v6582_v26 = vshrl.u32 %v13958_v52, 16  ;;  %v6588_v50 = vshll.u32 %v10787_v58, 16  ;;  %4082 = vmatmul.mubr.bf16.gmra.mrb[84].mxu1 %v3233_v49  ;;  %v6574_v32 = vrot.slane %v6572_v3, 4  ;;  %v12294_v58 = vld [vmem:[%s16510_s2 + $0xb8] sm:$0xff]   ;;  %v10270_v49 = vld [vmem:[%s12754_s20 + $0x68] sm:$0xf] }
 0x148   : > { %v10838_v4 = vcombine.high %v6561_v14, %v6571_v39  ;;  %v10837_v16 = vcombine.low %v6561_v14, %v6571_v39  ;;  %v2580_v38 = vrot.slane %v2579_v47, 4  ;;  %v2589_v21 = vor.u32 %v2588_v2, %v2584_v35  ;;  %4089 = vmatprep.mubr.bf16.mxu1 %v3238_v12  ;;  %v1907_v63 = vpop.permute.xlu1 %1906  ;;  %v12295_v62 = vld [vmem:[%s12754_s20 + $0x8c] sm:$0xff]   ;;  %4185 = vmatpush1.bf16.msra.mxu1 %v12294_v58 }
 0x149   : > { %v6580_v52 = vrot.slane %v6578_v25, 5  ;;  %v6584_v37 = vrot.slane %v6582_v26, 4  ;;  %v6590_v43 = vrot.slane %v6588_v50, 5  ;;  %v2598_v40 = vrot.slane %v2596_v7, 4  ;;  %1944 = vst.msk [vmem:[#allocation2 + $0x168] sm:$0xff] %vm1932_vm9, %v1907_v63  ;;  %2399 = vrot.lane.b32.xlu0 %v12295_v62, %s12613_s19  ;;  %4186 = vmatprep.subr.bf16.mxu1 %v16519_v0  ;;  %v12296_v50 = vld [vmem:[%s12754_s20 + $0x94] sm:$0xff]  }
 0x14a   : > { %10867 = vmatprep.mubr.msk.bf16.mxu0 %vm2231_vm6, %v10838_v4  ;;  %v2585_v27 = vsel %vm12844_vm5, %v2580_v38, %v2584_v35  ;;  %v2590_v44 = vrot.slane %v2589_v21, 4  ;;  %v2602_v48 = vshll.u32 %v10267_v15, 16  ;;  %v6575_v41 = vor.u32 %v6574_v32, %v14222_v20  ;;  %v3242_v20 = vld [vmem:[#allocation2 + $0xe8] sm:$0xff]  ;;  %v10791_v21 = vld [vmem:[%s12948_s30 + $0x158] sm:$0xff] }
 0x14b   : > { %v6585_v57 = vor.u32 %v6584_v37, %v6580_v52  ;;  %v2606_v30 = vshrl.u32 %v10267_v15, 16  ;;  %v2612_v42 = vshll.u32 %v10268_v45, 16  ;;  %7006 = vmatmul.mubr.bf16.gmra.mrb[48].mxu0 %v10837_v16  ;;  %v2599_v55 = vor.u32 %v2598_v40, %v2594_v22  ;;  %v10871_v58 = vld [vmem:[%s12948_s30 + $0x28] sm:$0xee] }
 0x14c   : > { %v2595_v33 = vsel %vm12844_vm5, %v2590_v44, %v2594_v22  ;;  %v2604_v5 = vrot.slane %v2602_v48, 5  ;;  %v6593_v11 = vshrl.u32 %v10788_v28, 16  ;;  %v6576_v13 = vrot.slane %v6575_v41, 4  ;;  %v14261_v24 = vpop.permute.xlu0 %1205  ;;  %v10792_v48 = vld [vmem:[%s12948_s30 + $0x160] sm:$0x11] }
 0x14d   : > { %v10298_v46 = vcombine.low %v2585_v27, %v2595_v33  ;;  %v6586_v29 = vrot.slane %v6585_v57, 4  ;;  %v2608_v54 = vrot.slane %v2606_v30, 4  ;;  %v2600_v31 = vrot.slane %v2599_v55, 4  ;;  %1256 = vst.msk [vmem:[#allocation2 + $0x188] sm:$0xff] %vm1231_vm7, %v14261_v24  ;;  %2401 = vrot.lane.b32.xlu0 %v12296_v50, %s12613_s19 }
 0x14e   : > { %v2614_v59 = vrot.slane %v2612_v42, 5  ;;  %v6595_v17 = vrot.slane %v6593_v11, 4  ;;  %v6596_v23 = vshll.u32 %v10788_v28, 16  ;;  %v6581_v51 = vsel %vm12844_vm5, %v6576_v13, %v6580_v52  ;;  %v2204_v14 = vpop.permute.xlu1 %2203  ;;  %v12298_v28 = vld [vmem:[%s16510_s2 + $0xc0] sm:$0xff]  }
 0x14f   : > { %2892 = vrot.lane.b32.xlu1 %v10298_v46, %s12614_s18  ;;  %v6591_v53 = vsel %vm12844_vm5, %v6586_v29, %v6590_v43  ;;  %v2609_v60 = vor.u32 %v2608_v54, %v2604_v5  ;;  %v6602_v9 = vshll.u32 %v10789_v19, 16  ;;  %4090 = vmatmul.mubr.bf16.gmra.mrb[88].mxu1 %v3237_v56  ;;  %v2605_v15 = vsel %vm12844_vm5, %v2600_v31, %v2604_v5  ;;  %v3241_v42 = vld [vmem:[#allocation2 + $0xe0] sm:$0xff]  ;;  %v3246_v56 = vld [vmem:[#allocation2 + $0x108] sm:$0xff]  ;;  %v10272_v46 = vld [vmem:[%s12754_s20 + $0x70] sm:$0xf] }
 0x150   : > { %v10840_v35 = vcombine.high %v6581_v51, %v6591_v53  ;;  %v10839_v7 = vcombine.low %v6581_v51, %v6591_v53  ;;  %v6598_v36 = vrot.slane %v6596_v23, 5  ;;  %4097 = vmatprep.mubr.bf16.mxu1 %v3242_v20  ;;  %2253 = vst.msk [vmem:[#allocation2 + $0x168] sm:$0xff] %vm2229_vm10, %v2204_v14  ;;  %v6606_v22 = vshrl.u32 %v10789_v19, 16  ;;  %v12299_v19 = vld [vmem:[%s12754_s20 + $0x8c] sm:$0xff]   ;;  %4187 = vmatpush1.bf16.msra.mxu1 %v12298_v28  ;;  %v12300_v51 = vld [vmem:[%s12754_s20 + $0xa0] sm:$0xff]   ;;  %v12410_v28 = vld [vmem:[%s12948_s30 + $0x38] sm:$0xff] }
 0x151   : > { %2254 = vst.msk [vmem:[#allocation2 + $0x170] sm:$0xff] %vm2231_vm6, %v2204_v14  ;;  %v2610_v47 = vrot.slane %v2609_v60, 4  ;;  %v6604_v2 = vrot.slane %v6602_v9, 5  ;;  %v6612_v3 = vshll.u32 %v14257_v18, 16  ;;  %v2617_v39 = vshrl.u32 %v10269_v1, 16  ;;  %4188 = vmatprep.subr.bf16.mxu1 %v16519_v0  ;;  %2403 = vrot.lane.b32.xlu0 %v12300_v51, %s12613_s19 }
 0x152   : > { %10868 = vmatprep.mubr.msk.bf16.mxu0 %vm2231_vm6, %v10840_v35  ;;  %v6599_v34 = vor.u32 %v6598_v36, %v6595_v17  ;;  %v2620_v25 = vshll.u32 %v10269_v1, 16  ;;  %v2626_v26 = vshll.u32 %v10270_v49, 16  ;;  %v6608_v4 = vrot.slane %v6606_v22, 4  ;;  %v1404_v45 = vpop.permute.xlu1 %1403  ;;  %436 = vst.msk [vmem:[#allocation2 + $0x1c0] sm:$0xff] %vm421_vm11, %v12299_v19  ;;  %v10273_v1 = vld [vmem:[%s12754_s20 + $0x74] sm:$0x1] }
 0x153   : > { %v2615_v12 = vsel %vm12844_vm5, %v2610_v47, %v2614_v59  ;;  %v6614_v16 = vrot.slane %v6612_v3, 5  ;;  %v2630_v38 = vshrl.u32 %v10270_v49, 16  ;;  %7014 = vmatmul.mubr.bf16.gmra.mrb[52].mxu0 %v10839_v7  ;;  %v2619_v37 = vrot.slane %v2617_v39, 4  ;;  %1440 = vst.msk [vmem:[#allocation2 + $0x188] sm:$0xff] %vm1427_vm8, %v1404_v45  ;;  %v3245_v3 = vld [vmem:[#allocation2 + $0x100] sm:$0xff]  ;;  %v12301_v39 = vld [vmem:[%s12754_s20 + $0x94] sm:$0xff]  }
 0x154   : > { %v10299_v32 = vcombine.low %v2605_v15, %v2615_v12  ;;  %v6600_v52 = vrot.slane %v6599_v34, 4  ;;  %v2622_v43 = vrot.slane %v2620_v25, 5  ;;  %v6609_v63 = vor.u32 %v6608_v4, %v6604_v2  ;;  %v10274_v15 = vld [vmem:[%s12754_s20 + $0x78] sm:$0xf]  ;;  %v14320_v34 = vld [vmem:[%s12754_s20 + $0x7c] sm:$0xf] }
 0x155   : > { %v2628_v27 = vrot.slane %v2626_v26, 5  ;;  %v2632_v44 = vrot.slane %v2630_v38, 4  ;;  %v2636_v40 = vshll.u32 %v14278_v61, 16  ;;  %v2640_v57 = vshrl.u32 %v14278_v61, 16  ;;  %v3250_v4 = vld [vmem:[#allocation2 + $0x128] sm:$0xff]  ;;  %v12409_v45 = vld [vmem:[%s12948_s30 + $0x30] sm:$0xff] }
 0x156   : > { %2894 = vrot.lane.b32.xlu1 %v10299_v32, %s12614_s18  ;;  %v6605_v6 = vsel %vm12844_vm5, %v6600_v52, %v6604_v2  ;;  %v2623_v41 = vor.u32 %v2622_v43, %v2619_v37  ;;  %v6616_v30 = vshrl.u32 %v14257_v18, 16  ;;  %v6610_v33 = vrot.slane %v6609_v63, 4  ;;  %437 = vst.msk [vmem:[#allocation2 + $0x1e0] sm:$0xff] %vm421_vm11, %v12301_v39  ;;  %v12303_v52 = vld [vmem:[%s16510_s2 + $0xc8] sm:$0xff]   ;;  %v10872_v51 = vld [vmem:[%s12948_s30 + $0x50] sm:$0xee] }
 0x157   : > { %v2633_v55 = vor.u32 %v2632_v44, %v2628_v27  ;;  %v2638_v5 = vrot.slane %v2636_v40, 5  ;;  %v6622_v11 = vshll.u32 %v10791_v21, 16  ;;  %4098 = vmatmul.mubr.bf16.gmra.mrb[92].mxu1 %v3241_v42  ;;  %v1909_v13 = vpop.permute.xlu0 %1908  ;;  %v6626_v18 = vshrl.u32 %v10791_v21, 16 }
 0x158   : > { %v2624_v29 = vrot.slane %v2623_v41, 4  ;;  %v6618_v54 = vrot.slane %v6616_v30, 4  ;;  %v6632_v20 = vshll.u32 %v10792_v48, 16  ;;  %4105 = vmatprep.mubr.bf16.mxu1 %v3246_v56  ;;  %1945 = vst.msk [vmem:[#allocation2 + $0x188] sm:$0xff] %vm1932_vm9, %v1909_v13  ;;  %v6615_v31 = vsel %vm12844_vm5, %v6610_v33, %v6614_v16  ;;  %4189 = vmatpush1.bf16.msra.mxu1 %v12303_v52  ;;  %v12304_v41 = vld [vmem:[%s12754_s20 + $0xa8] sm:$0xff]  }
 0x159   : > { %v2634_v59 = vrot.slane %v2633_v55, 4  ;;  %v6624_v17 = vrot.slane %v6622_v11, 5  ;;  %v2642_v23 = vrot.slane %v2640_v57, 4  ;;  %v10842_v53 = vcombine.high %v6605_v6, %v6615_v31  ;;  %v12305_v55 = vld [vmem:[%s12754_s20 + $0xb4] sm:$0xff]   ;;  %4190 = vmatprep.subr.bf16.mxu1 %v16519_v0  ;;  %2405 = vrot.lane.b32.xlu0 %v12304_v41, %s12613_s19 }
 0x15a   : > { %v10841_v60 = vcombine.low %v6605_v6, %v6615_v31  ;;  %v2629_v9 = vsel %vm12844_vm5, %v2624_v29, %v2628_v27  ;;  %v6619_v49 = vor.u32 %v6618_v54, %v6614_v16  ;;  %v6628_v62 = vrot.slane %v6626_v18, 4  ;;  %v10276_v27 = vld [vmem:[%s12754_s20 + $0x80] sm:$0xf]  ;;  %v12306_v29 = vld [vmem:[%s16510_s2 + $0xd0] sm:$0xff]  }
 0x15b   : > { %v2639_v14 = vsel %vm12844_vm5, %v2634_v59, %v2638_v5  ;;  %v6634_v35 = vrot.slane %v6632_v20, 5  ;;  %v2643_v7 = vor.u32 %v2642_v23, %v2638_v5  ;;  %v2206_v36 = vpop.permute.xlu0 %2205  ;;  %10869 = vmatprep.mubr.msk.bf16.mxu0 %vm2231_vm6, %v10842_v53  ;;  %v2646_v2 = vshll.u32 %v10272_v46, 16 }
 0x15c   : > { %v10300_v61 = vcombine.low %v2629_v9, %v2639_v14  ;;  %v6620_v47 = vrot.slane %v6619_v49, 4  ;;  %v2650_v22 = vshrl.u32 %v10272_v46, 16  ;;  %2255 = vst.msk [vmem:[#allocation2 + $0x188] sm:$0xff] %vm2229_vm10, %v2206_v36  ;;  %7022 = vmatmul.mubr.bf16.gmra.mrb[56].mxu0 %v10841_v60  ;;  %v6629_v25 = vor.u32 %v6628_v62, %v6624_v17  ;;  %4191 = vmatpush1.bf16.msra.mxu1 %v12306_v29  ;;  %v12411_v49 = vld [vmem:[%s12948_s30 + $0x40] sm:$0xff]  ;;  %v12292_v29 = vld [vmem:[%s16511_s3 + $0x1e8] sm:$0xff]  }
 0x15d   : > { %2256 = vst.msk [vmem:[#allocation2 + $0x190] sm:$0xff] %vm2231_vm6, %v2206_v36  ;;  %v2644_v26 = vrot.slane %v2643_v7, 4  ;;  %v2656_v50 = vshll.u32 %v10273_v1, 16  ;;  %v10879_v12 = vrot.slane %v10871_v58, 9  ;;  %v2648_v38 = vrot.slane %v2646_v2, 5  ;;  %v3249_v62 = vld [vmem:[#allocation2 + $0x120] sm:$0xff]  ;;  %4964 = vmatprep.subr.bf16.mxu1 %v16519_v0  ;;  %2407 = vrot.lane.b32.xlu0 %v12305_v55, %s12613_s19 }
 0x15e   : > { %2896 = vrot.lane.b32.xlu1 %v10300_v61, %s12614_s18  ;;  %v6625_v16 = vsel %vm12844_vm5, %v6620_v47, %v6624_v17  ;;  %v2652_v21 = vrot.slane %v2650_v22, 4  ;;  %v7120_v32 = vrot.slane %v12409_v45, 5  ;;  %v6630_v37 = vrot.slane %v6629_v25, 4  ;;  %v10277_v1 = vld [vmem:[%s12754_s20 + $0x84] sm:$0xf] }
 0x15f   : > { %v2658_v43 = vrot.slane %v2656_v50, 5  ;;  %v7123_v63 = vrot.slane %v12410_v28, 5  ;;  %4106 = vmatmul.mubr.bf16.gmra.mrb[96].mxu1 %v3245_v3  ;;  %v2661_v44 = vshrl.u32 %v10274_v15, 16  ;;  %v2649_v40 = vsel %vm12844_vm5, %v2644_v26, %v2648_v38  ;;  %v10278_v58 = vld [vmem:[%s12754_s20 + $0x88] sm:$0x1]  ;;  %v1406_v25 = vpop.permute.xlu0 %1405  ;;  %v12287_v26 = vld [vmem:[%s16511_s3 + $0x1e0] sm:$0xff]  }
 0x160   : > { %v2653_v48 = vor.u32 %v2652_v21, %v2648_v38  ;;  %v14339_v19 = vsel %vm12771_vm2, %v10879_v12, %v7120_v32  ;;  %v7122_v6 = vrot.slane %v7120_v32, 4  ;;  %4113 = vmatprep.mubr.bf16.mxu1 %v3250_v4  ;;  %v6635_v57 = vsel %vm12844_vm5, %v6630_v37, %v6634_v35  ;;  %v12308_v35 = vld [vmem:[%s12754_s20 + $0xbc] sm:$0xff]   ;;  %v12412_v61 = vld [vmem:[%s12948_s30 + $0x48] sm:$0x11]  ;;  %v10280_v37 = vld [vmem:[%s12754_s20 + $0x90] sm:$0xf] }
 0x161   : > { %v2663_v30 = vrot.slane %v2661_v44, 4  ;;  %v2664_v42 = vshll.u32 %v10274_v15, 16  ;;  %v2670_v33 = vshll.u32 %v14320_v34, 16  ;;  %v10844_v5 = vcombine.high %v6625_v16, %v6635_v57  ;;  %v10279_v38 = vld [vmem:[%s12754_s20 + $0x8c] sm:$0xf]  ;;  %2409 = vrot.lane.b32.xlu0 %v12308_v35, %s12613_s19 }
 0x162   : > { %v10843_v11 = vcombine.low %v6625_v16, %v6635_v57  ;;  %v2654_v56 = vrot.slane %v2653_v48, 4  ;;  %v14349_v46 = vsel %vm12771_vm2, %v7122_v6, %v7123_v63  ;;  %v906_v13 = vpop.permute.xlu1 %905  ;;  %v2674_v59 = vshrl.u32 %v14320_v34, 16  ;;  %v3254_v34 = vld [vmem:[#allocation2 + $0x148] sm:$0xff]  ;;  %v12413_v48 = vld [vmem:[%s12948_s30 + $0x58] sm:$0xff]  ;;  %v12414_v6 = vld [vmem:[%s12948_s30 + $0x60] sm:$0xff] }
 0x163   : > { %v10908_v54 = vcombine.high %v14339_v19, %v14349_v46  ;;  %v2666_v18 = vrot.slane %v2664_v42, 5  ;;  %v14357_v20 = vrot.slane %v2670_v33, 5  ;;  %942 = vst.msk [vmem:[#allocation2 + $0x180] sm:$0xff] %vm929_vm12, %v906_v13  ;;  %10870 = vmatprep.mubr.msk.bf16.mxu0 %vm2231_vm6, %v10844_v5  ;;  %v2680_v17 = vshll.u32 %v10276_v27, 16  ;;  %v10281_v57 = vld [vmem:[%s12754_s20 + $0x94] sm:$0xf] }
 0x164   : > { %v2659_v31 = vsel %vm12844_vm5, %v2654_v56, %v2658_v43  ;;  %v2684_v23 = vshrl.u32 %v10276_v27, 16  ;;  %1255 = vst.msk [vmem:[#allocation2 + $0x180] sm:$0xff] %vm1229_vm13, %v14261_v24  ;;  %7030 = vmatmul.mubr.bf16.gmra.mrb[60].mxu0 %v10843_v11  ;;  %v7125_v9 = vrot.slane %v7123_v63, 4  ;;  %v7126_v14 = vrot.slane %v12411_v49, 5 }
 0x165   : > { %v10301_v53 = vcombine.low %v2649_v40, %v2659_v31  ;;  %v2667_v60 = vor.u32 %v2666_v18, %v2663_v30  ;;  %10949 = vmatprep.mubr.msk.bf16.mxu0 %vm2231_vm6, %v10908_v54  ;;  %v2676_v7 = vrot.slane %v2674_v59, 4  ;;  %v2682_v15 = vrot.slane %v2680_v17, 5  ;;  %v3253_v59 = vld [vmem:[#allocation2 + $0x140] sm:$0xff] }
 0x166   : > { %v2686_v36 = vrot.slane %v2684_v23, 4  ;;  %v7129_v24 = vrot.slane %v12412_v61, 5  ;;  %v14378_v22 = vsel %vm12771_vm2, %v7125_v9, %v7126_v14  ;;  %v7128_v3 = vrot.slane %v7126_v14, 4  ;;  %v10282_v14 = vld [vmem:[%s12754_s20 + $0x98] sm:$0xf] }
 0x167   : > { %2898 = vrot.lane.b32.xlu1 %v10301_v53, %s12614_s18  ;;  %v2668_v2 = vrot.slane %v2667_v60, 4  ;;  %4114 = vmatmul.mubr.bf16.gmra.mrb[100].mxu1 %v3249_v62  ;;  %v2690_v39 = vshll.u32 %v10277_v1, 16  ;;  %v2677_v50 = vor.u32 %v2676_v7, %v14357_v20  ;;  %v2694_v4 = vshrl.u32 %v10277_v1, 16  ;;  %v3258_v60 = vld [vmem:[#allocation2 + $0x168] sm:$0xff]  ;;  %v10283_v62 = vld [vmem:[%s12754_s20 + $0x9c] sm:$0x1] }
 0x168   : > { %v1208_v47 = vpop.permute.xlu1 %1207  ;;  %v2687_v12 = vor.u32 %v2686_v36, %v2682_v15  ;;  %4121 = vmatprep.mubr.bf16.mxu1 %v3254_v34  ;;  %v2700_v16 = vshll.u32 %v10278_v58, 16  ;;  %v10907_v21 = vcombine.low %v14339_v19, %v14349_v46  ;;  %v14391_v45 = vsel %vm12771_vm2, %v7128_v3, %v7129_v24  ;;  %v12416_v34 = vld [vmem:[%s12948_s30 + $0x70] sm:$0x11] }
 0x169   : > { %1258 = vst.msk [vmem:[#allocation2 + $0x1a8] sm:$0xff] %vm1231_vm7, %v1208_v47  ;;  %v2692_v32 = vrot.slane %v2690_v39, 5  ;;  %v10880_v52 = vrot.slane %v10872_v51, 9  ;;  %v2673_v43 = vsel %vm12844_vm5, %v2668_v2, %v14357_v20  ;;  %v2678_v28 = vrot.slane %v2677_v50, 4 }
 0x16a   : > { %1441 = vst.msk [vmem:[#allocation2 + $0x1a8] sm:$0xff] %vm1427_vm8, %v1406_v25  ;;  %v2688_v63 = vrot.slane %v2687_v12, 4  ;;  %v10910_v27 = vcombine.high %v14378_v22, %v14391_v45  ;;  %v2696_v44 = vrot.slane %v2694_v4, 4  ;;  %v2702_v40 = vrot.slane %v2700_v16, 5  ;;  %v12297_v25 = vld [vmem:[%s16511_s3 + $0x1f0] sm:$0xff]  }
 0x16b   : > { %v7133_v19 = vrot.slane %v12413_v48, 5  ;;  %v7136_v41 = vrot.slane %v12414_v6, 5  ;;  %v2683_v30 = vsel %vm12844_vm5, %v2678_v28, %v2682_v15  ;;  %v2705_v33 = vshrl.u32 %v10279_v38, 16  ;;  %v3262_v6 = vld [vmem:[#allocation2 + $0x188] sm:$0xff] }
 0x16c   : > { %v2693_v42 = vsel %vm12844_vm5, %v2688_v63, %v2692_v32  ;;  %v2708_v55 = vshll.u32 %v10279_v38, 16  ;;  %7496 = vmatmul.mubr.bf16.vlgmr.msra.gmra.mrb[0].mxu0 %v10907_v21  ;;  %v10302_v5 = vcombine.low %v2673_v43, %v2683_v30  ;;  %v2697_v11 = vor.u32 %v2696_v44, %v2692_v32  ;;  %v908_v13 = vpop.permute.xlu0 %907  ;;  %v10285_v44 = vld [vmem:[%s12754_s20 + $0xa4] sm:$0xf]  ;;  %v12302_v30 = vld [vmem:[%s16511_s3 + $0x1f8] sm:$0xff]  }
 0x16d   : > { %v14409_v56 = vsel %vm12771_vm2, %v10880_v52, %v7133_v19  ;;  %v7135_v46 = vrot.slane %v7133_v19, 4  ;;  %7965 = vmatpush1.bf16.msra.mxu0 %v12287_v26  ;;  %10950 = vmatprep.mubr.msk.bf16.mxu0 %vm2231_vm6, %v10910_v27  ;;  %943 = vst.msk [vmem:[#allocation2 + $0x1a0] sm:$0xff] %vm929_vm12, %v908_v13  ;;  %v2707_v54 = vrot.slane %v2705_v33, 4  ;;  %v2714_v20 = vshll.u32 %v10280_v37, 16  ;;  %v14442_v26 = vld [vmem:[%s12948_s30 + $0x78] sm:$0xee] }
 0x16e   : > { %v2710_v18 = vrot.slane %v2708_v55, 5  ;;  %v2718_v1 = vshrl.u32 %v10280_v37, 16  ;;  %2900 = vrot.lane.b32.xlu1 %v10302_v5, %s12614_s18  ;;  %v2698_v58 = vrot.slane %v2697_v11, 4  ;;  %7966 = vmatprep.subr.bf16.mxu0 %v16519_v0  ;;  %1257 = vst.msk [vmem:[#allocation2 + $0x1a0] sm:$0xff] %vm1229_vm13, %v1208_v47  ;;  %v2724_v17 = vshll.u32 %v10281_v57, 16  ;;  %v3257_v33 = vld [vmem:[#allocation2 + $0x160] sm:$0xff] }
 0x16f   : > { %v14419_v31 = vsel %vm12771_vm2, %v7135_v46, %v7136_v41  ;;  %v2728_v23 = vshrl.u32 %v10281_v57, 16  ;;  %v10909_v51 = vcombine.low %v14378_v22, %v14391_v45  ;;  %4122 = vmatmul.mubr.bf16.gmra.mrb[104].mxu1 %v3253_v59  ;;  %v2716_v49 = vrot.slane %v2714_v20, 5  ;;  %v12415_v22 = vld [vmem:[%s12948_s30 + $0x68] sm:$0xff]  ;;  %v10284_v52 = vld [vmem:[%s12754_s20 + $0xa0] sm:$0xf] }
 0x170   : > { %v10912_v53 = vcombine.high %v14409_v56, %v14419_v31  ;;  %v2711_v9 = vor.u32 %v2710_v18, %v2707_v54  ;;  %v2703_v35 = vsel %vm12844_vm5, %v2698_v58, %v2702_v40  ;;  %4129 = vmatprep.mubr.bf16.mxu1 %v3258_v60  ;;  %v1911_v7 = vpop.permute.xlu1 %1910  ;;  %v2720_v15 = vrot.slane %v2718_v1, 4  ;;  %v10286_v40 = vld [vmem:[%s12754_s20 + $0xa8] sm:$0xf]  ;;  %v12307_v59 = vld [vmem:[%s16511_s3 + $0x200] sm:$0xff]  }
 0x171   : > { %v2726_v36 = vrot.slane %v2724_v17, 5  ;;  %v7138_v61 = vrot.slane %v7136_v41, 4  ;;  %v14431_v24 = vpop.permute.xlu0 %1209  ;;  %v10303_v47 = vcombine.low %v2693_v42, %v2703_v35  ;;  %7967 = vmatpush1.bf16.msra.mxu0 %v12292_v29  ;;  %1946 = vst.msk [vmem:[#allocation2 + $0x1a8] sm:$0xff] %vm1932_vm9, %v1911_v7  ;;  %v7139_v3 = vrot.slane %v12415_v22, 5  ;;  %v12417_v41 = vld [vmem:[%s12948_s30 + $0x80] sm:$0xff]  ;;  %v12418_v20 = vld [vmem:[%s12948_s30 + $0x88] sm:$0xff] }
 0x172   : > { %v2712_v2 = vrot.slane %v2711_v9, 4  ;;  %v7142_v39 = vrot.slane %v12416_v34, 5  ;;  %1260 = vst.msk [vmem:[#allocation2 + $0x1c8] sm:$0xff] %vm1231_vm7, %v14431_v24  ;;  %v2721_v50 = vor.u32 %v2720_v15, %v2716_v49  ;;  %7968 = vmatprep.subr.bf16.mxu0 %v16519_v0  ;;  %v2730_v12 = vrot.slane %v2728_v23, 4  ;;  %v10287_v7 = vld [vmem:[%s12754_s20 + $0xac] sm:$0xf] }
 0x173   : > { %v2734_v4 = vshll.u32 %v10282_v14, 16  ;;  %v2738_v16 = vshrl.u32 %v10282_v14, 16  ;;  %2902 = vrot.lane.b32.xlu1 %v10303_v47, %s12614_s18  ;;  %v14450_v21 = vsel %vm12771_vm2, %v7138_v61, %v7139_v3  ;;  %v7141_v45 = vrot.slane %v7139_v3, 4  ;;  %v12310_v22 = vld [vmem:[%s16511_s3 + $0x208] sm:$0xff]  }
 0x174   : > { %v2717_v38 = vsel %vm12844_vm5, %v2712_v2, %v2716_v49  ;;  %v2744_v32 = vshll.u32 %v10283_v62, 16  ;;  %7504 = vmatmul.mubr.bf16.gmra.mrb[4].mxu0 %v10909_v51  ;;  %v2722_v37 = vrot.slane %v2721_v50, 4  ;;  %v2208_v43 = vpop.permute.xlu1 %2207  ;;  %v2731_v28 = vor.u32 %v2730_v12, %v2726_v36  ;;  %v10288_v2 = vld [vmem:[%s12754_s20 + $0xb0] sm:$0x1]  ;;  %v3261_v12 = vld [vmem:[#allocation2 + $0x180] sm:$0xff] }
 0x175   : > { %v2736_v63 = vrot.slane %v2734_v4, 5  ;;  %v2740_v27 = vrot.slane %v2738_v16, 4  ;;  %10951 = vmatprep.mubr.msk.bf16.mxu0 %vm2231_vm6, %v10912_v53  ;;  %v10911_v48 = vcombine.low %v14409_v56, %v14419_v31  ;;  %v14460_v19 = vsel %vm12771_vm2, %v7141_v45, %v7142_v39  ;;  %2257 = vst.msk [vmem:[#allocation2 + $0x1a8] sm:$0xff] %vm2229_vm10, %v2208_v43  ;;  %7969 = vmatpush1.bf16.msra.mxu0 %v12297_v25  ;;  %v12419_v25 = vld [vmem:[%s12948_s30 + $0x90] sm:$0xff] }
 0x176   : > { %2258 = vst.msk [vmem:[#allocation2 + $0x1b0] sm:$0xff] %vm2231_vm6, %v2208_v43  ;;  %v7146_v57 = vrot.slane %v12417_v41, 5  ;;  %v2727_v42 = vsel %vm12844_vm5, %v2722_v37, %v2726_v36  ;;  %v2732_v55 = vrot.slane %v2731_v28, 4  ;;  %v2746_v5 = vrot.slane %v2744_v32, 5  ;;  %7970 = vmatprep.subr.bf16.mxu0 %v16519_v0 }
 0x177   : > { %v10881_v11 = vrot.slane %v14442_v26, 9  ;;  %v10304_v56 = vcombine.low %v2717_v38, %v2727_v42  ;;  %v10914_v46 = vcombine.high %v14450_v21, %v14460_v19  ;;  %4130 = vmatmul.mubr.bf16.gmra.mrb[108].mxu1 %v3257_v33  ;;  %v2741_v13 = vor.u32 %v2740_v27, %v2736_v63 }
 0x178   : > { %v7148_v29 = vrot.slane %v7146_v57, 4  ;;  %v1408_v54 = vpop.permute.xlu1 %1407  ;;  %4137 = vmatprep.mubr.bf16.mxu1 %v3262_v6  ;;  %v2737_v18 = vsel %vm12844_vm5, %v2732_v55, %v2736_v63  ;;  %v7149_v1 = vrot.slane %v12418_v20, 5  ;;  %v2749_v58 = vshrl.u32 %v10284_v52, 16  ;;  %v12420_v6 = vld [vmem:[%s12948_s30 + $0x98] sm:$0x11] }
 0x179   : > { %v2752_v31 = vshll.u32 %v10284_v52, 16  ;;  %2904 = vrot.lane.b32.xlu1 %v10304_v56, %s12614_s18  ;;  %1442 = vst.msk [vmem:[#allocation2 + $0x1c8] sm:$0xff] %vm1427_vm8, %v1408_v54  ;;  %v2742_v17 = vrot.slane %v2741_v13, 4  ;;  %v2758_v23 = vshll.u32 %v10285_v44, 16  ;;  %v2762_v51 = vshrl.u32 %v10285_v44, 16  ;;  %7971 = vmatpush1.bf16.msra.mxu0 %v12302_v30  ;;  %v12312_v56 = vld [vmem:[%s16511_s3 + $0x210] sm:$0xff]  }
 0x17a   : > { %v2768_v53 = vshll.u32 %v10286_v40, 16  ;;  %v2751_v60 = vrot.slane %v2749_v58, 4  ;;  %v2772_v49 = vshrl.u32 %v10286_v40, 16  ;;  %7972 = vmatprep.subr.bf16.mxu0 %v16519_v0  ;;  %v14489_v36 = vsel %vm12771_vm2, %v10881_v11, %v7146_v57  ;;  %v10290_v30 = vld [vmem:[%s12754_s20 + $0xb8] sm:$0xf] }
 0x17b   : > { %v2754_v9 = vrot.slane %v2752_v31, 5  ;;  %v2747_v62 = vsel %vm12844_vm5, %v2742_v17, %v2746_v5  ;;  %v2760_v35 = vrot.slane %v2758_v23, 5  ;;  %v2764_v47 = vrot.slane %v2762_v51, 4  ;;  %v10291_v11 = vld [vmem:[%s12754_s20 + $0xbc] sm:$0xf] }
 0x17c   : > { %v1913_v14 = vpop.permute.xlu0 %1912  ;;  %7512 = vmatmul.mubr.bf16.gmra.mrb[8].mxu0 %v10911_v48  ;;  %v10305_v15 = vcombine.low %v2737_v18, %v2747_v62  ;;  %v14498_v3 = vsel %vm12771_vm2, %v7148_v29, %v7149_v1  ;;  %v3266_v34 = vld [vmem:[#allocation2 + $0x1a8] sm:$0xff]  ;;  %v2770_v39 = vrot.slane %v2768_v53, 5  ;;  %v7152_v26 = vrot.slane %v12419_v25, 5  ;;  %v14531_v18 = vld [vmem:[%s12948_s30 + $0xa0] sm:$0xee]  ;;  %v12314_v62 = vld [vmem:[%s16511_s3 + $0x218] sm:$0xff]  }
 0x17d   : > { %1947 = vst.msk [vmem:[#allocation2 + $0x1c8] sm:$0xff] %vm1932_vm9, %v1913_v14  ;;  %v2755_v61 = vor.u32 %v2754_v9, %v2751_v60  ;;  %10952 = vmatprep.mubr.msk.bf16.mxu0 %vm2231_vm6, %v10914_v46  ;;  %v2774_v50 = vrot.slane %v2772_v49, 4  ;;  %7973 = vmatpush1.bf16.msra.mxu0 %v12307_v59  ;;  %v2765_v16 = vor.u32 %v2764_v47, %v2760_v35  ;;  %v2778_v38 = vshll.u32 %v10287_v7, 16  ;;  %v12421_v59 = vld [vmem:[%s12948_s30 + $0xa8] sm:$0xff] }
 0x17e   : > { %2906 = vrot.lane.b32.xlu1 %v10305_v15, %s12614_s18  ;;  %v2782_v45 = vshrl.u32 %v10287_v7, 16  ;;  %7974 = vmatprep.subr.bf16.mxu0 %v16519_v0  ;;  %v10913_v32 = vcombine.low %v14450_v21, %v14460_v19  ;;  %v7151_v37 = vrot.slane %v7149_v1, 4  ;;  %v2788_v28 = vshll.u32 %v10288_v2, 16  ;;  %v10289_v21 = vld [vmem:[%s12754_s20 + $0xb4] sm:$0xf] }
 0x17f   : > { %v2756_v4 = vrot.slane %v2755_v61, 4  ;;  %4138 = vmatmul.mubr.bf16.gmra.mrb[112].mxu1 %v3261_v12  ;;  %v2775_v43 = vor.u32 %v2774_v50, %v2770_v39  ;;  %v2766_v27 = vrot.slane %v2765_v16, 4  ;;  %v2780_v44 = vrot.slane %v2778_v38, 5 }
 0x180   : > { %v2210_v52 = vpop.permute.xlu0 %2209  ;;  %4145 = vmatprep.mubr.bf16.mxu1 %v3266_v34  ;;  %v2784_v40 = vrot.slane %v2782_v45, 4  ;;  %v10916_v48 = vcombine.high %v14489_v36, %v14498_v3  ;;  %v7154_v19 = vrot.slane %v7152_v26, 4  ;;  %v7155_v41 = vrot.slane %v12420_v6, 5  ;;  %v10292_v34 = vld [vmem:[%s12754_s20 + $0xc0] sm:$0xf] }
 0x181   : > { %2259 = vst.msk [vmem:[#allocation2 + $0x1c8] sm:$0xff] %vm2229_vm10, %v2210_v52  ;;  %v2761_v63 = vsel %vm12844_vm5, %v2756_v4, %v2760_v35  ;;  %v2776_v57 = vrot.slane %v2775_v43, 4  ;;  %7975 = vmatpush1.bf16.msra.mxu0 %v12310_v22  ;;  %v2771_v33 = vsel %vm12844_vm5, %v2766_v27, %v2770_v39  ;;  %v2790_v5 = vrot.slane %v2788_v28, 5  ;;  %v10293_v39 = vld [vmem:[%s12754_s20 + $0xc4] sm:$0x1]  ;;  %v12422_v4 = vld [vmem:[%s12948_s30 + $0xb0] sm:$0xff] }
 0x182   : > { %2260 = vst.msk [vmem:[#allocation2 + $0x1d0] sm:$0xff] %vm2231_vm6, %v2210_v52  ;;  %v2785_v55 = vor.u32 %v2784_v40, %v2780_v44  ;;  %7976 = vmatprep.subr.bf16.mxu0 %v16519_v0  ;;  %v10306_v46 = vcombine.low %v2761_v63, %v2771_v33  ;;  %v14524_v13 = vsel %vm12771_vm2, %v7151_v37, %v7152_v26  ;;  %v2793_v20 = vshrl.u32 %v10289_v21, 16  ;;  %v10310_v37 = vld [vmem:[%s12754_s20 + $0x28] sm:$0xe]  ;;  %v10311_v27 = vld [vmem:[%s12754_s20 + $0x2c] sm:$0xf] }
 0x183   : > { %v910_v42 = vpop.permute.xlu1 %909  ;;  %v2781_v29 = vsel %vm12844_vm5, %v2776_v57, %v2780_v44  ;;  %v2796_v1 = vshll.u32 %v10289_v21, 16  ;;  %v2802_v58 = vshll.u32 %v10290_v30, 16  ;;  %v14537_v31 = vsel %vm12771_vm2, %v7154_v19, %v7155_v41  ;;  %v12423_v21 = vld [vmem:[%s12948_s30 + $0xb8] sm:$0xff]  ;;  %v10312_v41 = vld [vmem:[%s12754_s20 + $0x30] sm:$0xf] }
 0x184   : > { %944 = vst.msk [vmem:[#allocation2 + $0x1c0] sm:$0xff] %vm929_vm12, %v910_v42  ;;  %7520 = vmatmul.mubr.bf16.gmra.mrb[12].mxu0 %v10913_v32  ;;  %v2786_v54 = vrot.slane %v2785_v55, 4  ;;  %2908 = vrot.lane.b32.xlu1 %v10306_v46, %s12614_s18  ;;  %v7159_v17 = vrot.slane %v12421_v59, 5  ;;  %v2806_v23 = vshrl.u32 %v10290_v30, 16  ;;  %v2812_v51 = vshll.u32 %v10291_v11, 16  ;;  %v1410_v35 = vpop.permute.xlu0 %1409 }
 0x185   : > { %1259 = vst.msk [vmem:[#allocation2 + $0x1c0] sm:$0xff] %vm1229_vm13, %v14431_v24  ;;  %10953 = vmatprep.mubr.msk.bf16.mxu0 %vm2231_vm6, %v10916_v48  ;;  %v3265_v24 = vld [vmem:[#allocation2 + $0x1a0] sm:$0xff]  ;;  %v2795_v9 = vrot.slane %v2793_v20, 4  ;;  %v2798_v49 = vrot.slane %v2796_v1, 5  ;;  %v2804_v14 = vrot.slane %v2802_v58, 5  ;;  %7977 = vmatpush1.bf16.msra.mxu0 %v12312_v56  ;;  %v10915_v47 = vcombine.low %v14489_v36, %v14498_v3 }
 0x186   : > { %v2791_v60 = vsel %vm12844_vm5, %v2786_v54, %v2790_v5  ;;  %v2808_v61 = vrot.slane %v2806_v23, 4  ;;  %7978 = vmatprep.subr.bf16.mxu0 %v16519_v0  ;;  %v2816_v22 = vshrl.u32 %v10291_v11, 16  ;;  %v10918_v25 = vcombine.high %v14524_v13, %v14537_v31  ;;  %v12316_v36 = vld [vmem:[%s16511_s3 + $0x220] sm:$0xff]   ;;  %v10313_v5 = vld [vmem:[%s12754_s20 + $0x34] sm:$0xf]  ;;  %v12318_v11 = vld [vmem:[%s16511_s3 + $0x228] sm:$0xff]  }
 0x187   : > { %v1212_v53 = vpop.permute.xlu1 %1211  ;;  %4146 = vmatmul.mubr.bf16.gmra.mrb[116].mxu1 %v3265_v24  ;;  %v10307_v7 = vcombine.low %v2781_v29, %v2791_v60  ;;  %v2799_v2 = vor.u32 %v2798_v49, %v2795_v9  ;;  %v10882_v26 = vrot.slane %v14531_v18, 9  ;;  %v2814_v12 = vrot.slane %v2812_v51, 5  ;;  %v12424_v29 = vld [vmem:[%s12948_s30 + $0xc0] sm:$0x11]  ;;  %v10314_v49 = vld [vmem:[%s12754_s20 + $0x38] sm:$0x1] }
 0x188   : > { %1262 = vst.msk [vmem:[#allocation2 + $0x1e8] sm:$0xff] %vm1231_vm7, %v1212_v53  ;;  %v3270_v15 = vld [vmem:[#allocation2 + $0x1c8] sm:$0xff]  ;;  %v2809_v50 = vor.u32 %v2808_v61, %v2804_v14  ;;  %v7161_v3 = vrot.slane %v7159_v17, 4  ;;  %v7162_v16 = vrot.slane %v12422_v4, 5  ;;  %v2818_v45 = vrot.slane %v2816_v22, 4  ;;  %v12425_v22 = vld [vmem:[%s12948_s30 + $0xd0] sm:$0xff] }
 0x189   : > { %1443 = vst.msk [vmem:[#allocation2 + $0x1e8] sm:$0xff] %vm1427_vm8, %v1410_v35  ;;  %4153 = vmatprep.mubr.bf16.mxu1 %v3270_v15  ;;  %2910 = vrot.lane.b32.xlu1 %v10307_v7, %s12614_s18  ;;  %v2800_v38 = vrot.slane %v2799_v2, 4  ;;  %v2822_v52 = vshll.u32 %v10292_v34, 16  ;;  %v2826_v63 = vshrl.u32 %v10292_v34, 16  ;;  %v7165_v48 = vrot.slane %v12423_v21, 5  ;;  %v12426_v21 = vld [vmem:[%s12948_s30 + $0xd8] sm:$0xff] }
 0x18a   : > { %7979 = vmatpush1.bf16.msra.mxu0 %v12314_v62  ;;  %v2810_v32 = vrot.slane %v2809_v50, 4  ;;  %v2819_v28 = vor.u32 %v2818_v45, %v2814_v12  ;;  %v2832_v6 = vshll.u32 %v10293_v39, 16  ;;  %v10917_v57 = vcombine.low %v14524_v13, %v14537_v31  ;;  %v10315_v15 = vld [vmem:[%s12754_s20 + $0x3c] sm:$0xe]  ;;  %v10875_v2 = vld [vmem:[%s12948_s30 + $0xc8] sm:$0xee] }
 0x18b   : > { %7980 = vmatprep.subr.bf16.mxu0 %v16519_v0  ;;  %v2805_v43 = vsel %vm12844_vm5, %v2800_v38, %v2804_v14  ;;  %v2824_v19 = vrot.slane %v2822_v52, 5  ;;  %v14575_v30 = vsel %vm12771_vm2, %v10882_v26, %v7159_v17  ;;  %v14579_v42 = vsel %vm12771_vm2, %v7161_v3, %v7162_v16  ;;  %v10317_v4 = vld [vmem:[%s12754_s20 + $0x44] sm:$0xf] }
 0x18c   : > { %7528 = vmatmul.mubr.bf16.gmra.mrb[16].mxu0 %v10915_v47  ;;  %v2815_v40 = vsel %vm12844_vm5, %v2810_v32, %v2814_v12  ;;  %v3269_v33 = vld [vmem:[#allocation2 + $0x1c0] sm:$0xff]  ;;  %vm2427_vm14 = vcmask 654592   ;;  %v7164_v56 = vrot.slane %v7162_v16, 4  ;;  %v2820_v46 = vrot.slane %v2819_v28, 4 }
 0x18d   : > { %10954 = vmatprep.mubr.msk.bf16.mxu0 %vm2231_vm6, %v10918_v25  ;;  %v10308_v55 = vcombine.low %v2805_v43, %v2815_v40  ;;  %v2828_v13 = vrot.slane %v2826_v63, 4  ;;  %v7168_v54 = vrot.slane %v12424_v29, 5  ;;  %v10350_v18 = vrot.slane %v10310_v37, 9  ;;  %v10316_v25 = vld [vmem:[%s12754_s20 + $0x40] sm:$0xf] }
 0x18e   : > { %v912_v44 = vpop.permute.xlu0 %911  ;;  %7981 = vmatpush1.bf16.msra.mxu0 %v12316_v36  ;;  %v3031_v20 = vrot.slane %v10311_v27, 5  ;;  %v3034_v1 = vrot.slane %v10312_v41, 5  ;;  %v10920_v58 = vcombine.high %v14575_v30, %v14579_v42  ;;  %v7167_v31 = vrot.slane %v7165_v48, 4  ;;  %v10318_v37 = vld [vmem:[%s12754_s20 + $0x48] sm:$0xf] }
 0x18f   : > { %945 = vst.msk [vmem:[#allocation2 + $0x1e0] sm:$0xff] %vm929_vm12, %v912_v44  ;;  %4154 = vmatmul.mubr.bf16.gmra.mrb[120].mxu1 %v3269_v33  ;;  %7982 = vmatprep.subr.bf16.mxu0 %v16519_v0  ;;  %v2829_v59 = vor.u32 %v2828_v13, %v2824_v19  ;;  %v2834_v17 = vrot.slane %v2832_v6, 5  ;;  %v2825_v60 = vsel %vm12844_vm5, %v2820_v46, %v2824_v19  ;;  %v3037_v62 = vrot.slane %v10313_v5, 5  ;;  %v10319_v44 = vld [vmem:[%s12754_s20 + $0x4c] sm:$0x1] }
 0x190   : > { %1261 = vst.msk [vmem:[#allocation2 + $0x1e0] sm:$0xff] %vm1229_vm13, %v1212_v53  ;;  %2912 = vrot.lane.b32.xlu1 %v10308_v55, %s12614_s18  ;;  %v3032_v51 = vsel %vm12771_vm2, %v10350_v18, %v3031_v20  ;;  %v3033_v53 = vrot.slane %v3031_v20, 4  ;;  %v3036_v14 = vrot.slane %v3034_v1, 4  ;;  %v14601_v35 = vsel %vm12771_vm2, %v7164_v56, %v7165_v48  ;;  %v10321_v55 = vld [vmem:[%s12754_s20 + $0x54] sm:$0xf] }
 0x191   : > { %v2830_v9 = vrot.slane %v2829_v59, 4  ;;  %v14609_v61 = vsel %vm12771_vm2, %v7167_v31, %v7168_v54  ;;  %v7172_v34 = vrot.slane %v12425_v22, 5  ;;  %v3039_v36 = vrot.slane %v3037_v62, 4  ;;  %v10322_v5 = vld [vmem:[%s12754_s20 + $0x58] sm:$0xf] }
 0x192   : > { %7983 = vmatpush1.bf16.msra.mxu0 %v12318_v11  ;;  %v3035_v7 = vsel %vm12771_vm2, %v3033_v53, %v3034_v1  ;;  %v3038_v12 = vsel %vm12771_vm2, %v3036_v14, %v3037_v62  ;;  %v3040_v3 = vrot.slane %v10314_v49, 5  ;;  %v10351_v38 = vrot.slane %v10315_v15, 9  ;;  %v12427_v1 = vld [vmem:[%s12948_s30 + $0xe0] sm:$0xff] }
 0x193   : > { %v2380_v23 = vpop.permute.xlu0 %2379  ;;  %8790 = vmatprep.subr.bf16.mxu0 %v16519_v0  ;;  %v2835_v47 = vsel %vm12844_vm5, %v2830_v9, %v2834_v17  ;;  %v10358_v39 = vcombine.low %v3032_v51, %v3035_v7  ;;  %v10919_v45 = vcombine.low %v14575_v30, %v14579_v42  ;;  %v3044_v52 = vrot.slane %v10316_v25, 5  ;;  %v10320_v42 = vld [vmem:[%s12754_s20 + $0x50] sm:$0xe]  ;;  %v10324_v51 = vld [vmem:[%s12754_s20 + $0x60] sm:$0x1] }
 0x194   : > { %v1915_v24 = vpop.permute.xlu1 %1914  ;;  %2428 = vst.msk [vmem:[#allocation2 + $0x10] sm:$0xff] %vm2427_vm14, %v2380_v23  ;;  %7536 = vmatmul.mubr.bf16.gmra.mrb[20].mxu0 %v10917_v57  ;;  %v10309_v26 = vcombine.low %v2825_v60, %v2835_v47  ;;  %v3041_v32 = vsel %vm12771_vm2, %v3039_v36, %v3040_v3  ;;  %v10922_v43 = vcombine.high %v14601_v35, %v14609_v61  ;;  %v10883_v28 = vrot.slane %v10875_v2, 9  ;;  %v10323_v23 = vld [vmem:[%s12754_s20 + $0x5c] sm:$0xf]  ;;  %v14666_v7 = vld [vmem:[%s12948_s30 + $0xf0] sm:$0xee] }
 0x195   : > { %1948 = vst.msk [vmem:[#allocation2 + $0x1e8] sm:$0xff] %vm1932_vm9, %v1915_v24  ;;  %10955 = vmatprep.mubr.msk.bf16.mxu0 %vm2231_vm6, %v10920_v58  ;;  %v10359_v63 = vcombine.low %v3038_v12, %v3041_v32  ;;  %v3047_v27 = vrot.slane %v10317_v4, 5  ;;  %v7174_v40 = vrot.slane %v7172_v34, 4  ;;  %v7175_v48 = vrot.slane %v12426_v21, 5  ;;  %v10325_v22 = vld [vmem:[%s12754_s20 + $0x64] sm:$0xe] }
 0x196   : > { %3197 = vst.msk [vmem:[#allocation2 + $0x18] sm:$0xff] %vm421_vm11, %v10358_v39  ;;  %2914 = vrot.lane.b32.xlu1 %v10309_v26, %s12614_s18  ;;  %v3045_v6 = vsel %vm12771_vm2, %v10351_v38, %v3044_v52  ;;  %v3046_v41 = vrot.slane %v3044_v52, 4  ;;  %v3050_v30 = vrot.slane %v10318_v37, 5  ;;  %vm2932_vm15 = vcmask 1048192   ;;  %v10326_v26 = vld [vmem:[%s12754_s20 + $0x68] sm:$0xf] }
 0x197   : > { %v2382_v50 = vpop.permute.xlu0 %2381  ;;  %3198 = vst.msk [vmem:[#allocation2 + $0x38] sm:$0xff] %vm421_vm11, %v10359_v63  ;;  %v3049_v57 = vrot.slane %v3047_v27, 4  ;;  %v14645_v11 = vsel %vm12771_vm2, %v10883_v28, %v7172_v34  ;;  %v7177_v56 = vrot.slane %v7175_v48, 4  ;;  %v3273_v54 = vld [vmem:[#allocation2 + $0x1e0] sm:$0xff]  ;;  %v14649_v18 = vsel %vm12771_vm2, %v7174_v40, %v7175_v48  ;;  %v10327_v38 = vld [vmem:[%s12754_s20 + $0x6c] sm:$0xf] }
 0x198   : > { %v2212_v16 = vpop.permute.xlu1 %2211  ;;  %2429 = vst.msk [vmem:[#allocation2 + $0x30] sm:$0xff] %vm2427_vm14, %v2382_v50  ;;  %v3048_v33 = vsel %vm12771_vm2, %v3046_v41, %v3047_v27  ;;  %v3052_v13 = vrot.slane %v3050_v30, 4  ;;  %v7178_v58 = vrot.slane %v12427_v1, 5  ;;  %v3053_v17 = vrot.slane %v10319_v44, 5  ;;  %v12429_v50 = vld [vmem:[%s12948_s30 + $0xf8] sm:$0xff]  ;;  %v12430_v41 = vld [vmem:[%s12948_s30 + $0x100] sm:$0xff] }
 0x199   : > { %2261 = vst.msk [vmem:[#allocation2 + $0x1e8] sm:$0xff] %vm2229_vm10, %v2212_v16  ;;  %v10360_v46 = vcombine.low %v3045_v6, %v3048_v33  ;;  %v3051_v59 = vsel %vm12771_vm2, %v3049_v57, %v3050_v30  ;;  %v10352_v24 = vrot.slane %v10320_v42, 9  ;;  %v3057_v60 = vrot.slane %v10321_v55, 5  ;;  %v10328_v48 = vld [vmem:[%s12754_s20 + $0x70] sm:$0xf]  ;;  %s9857_s18 = sshll.u32 %s16294_s15, 4  ;;  %s16454_s18 = int_to_ptr.vmem [resolvable:$true] %s9857_s18 }
 0x19a   : > { %2262 = vst.msk [vmem:[#allocation2 + $0x1f0] sm:$0xff] %vm2231_vm6, %v2212_v16  ;;  %v3060_v9 = vrot.slane %v10322_v5, 5  ;;  %v10921_v49 = vcombine.low %v14601_v35, %v14609_v61  ;;  %v3054_v14 = vsel %vm12771_vm2, %v3052_v13, %v3053_v17  ;;  %v10924_v62 = vcombine.high %v14645_v11, %v14649_v18  ;;  %v12428_v61 = vld [vmem:[%s12948_s30 + $0xe8] sm:$0x11]  ;;  %v10329_v5 = vld [vmem:[%s12754_s20 + $0x74] sm:$0x1] }
 0x19b   : > { %v2384_v19 = vpop.permute.xlu0 %2383  ;;  %3199 = vst.msk [vmem:[#allocation2 + $0x58] sm:$0xff] %vm421_vm11, %v10360_v46  ;;  %v10361_v15 = vcombine.low %v3051_v59, %v3054_v14  ;;  %v3058_v47 = vsel %vm12771_vm2, %v10352_v24, %v3057_v60  ;;  %v3059_v2 = vrot.slane %v3057_v60, 4  ;;  %v7180_v35 = vrot.slane %v7178_v58, 4  ;;  %v14717_v1 = vld [vmem:[%s12948_s30 + $0x118] sm:$0xee]  ;;  %s12520_s19 = scalar_lea.vmem %s16454_s18, 2048 }
 0x19c   : > { %2430 = vst.msk [vmem:[#allocation2 + $0x50] sm:$0xff] %vm2427_vm14, %v2384_v19  ;;  %7544 = vmatmul.mubr.bf16.gmra.mrb[24].mxu0 %v10919_v45  ;;  %v7181_v34 = vrot.slane %v12428_v61, 5  ;;  %v3062_v25 = vrot.slane %v3060_v9, 4  ;;  %v7185_v12 = vrot.slane %v12429_v50, 5  ;;  %v3063_v3 = vrot.slane %v10323_v23, 5  ;;  %v12309_v45 = vld [vmem:[%s16511_s3 + $0x50] sm:$0xff]   ;;  %p12521_p4 = scmp.ne.s32.totalorder %s16454_s18, %s12520_s19 }
 0x19d   : > { %10956 = vmatprep.mubr.msk.bf16.mxu0 %vm2231_vm6, %v10922_v43  ;;  %v3216_v20 = vld [vmem:[#allocation2 + $0x18] sm:$0xff]  ;;  %3200 = vst.msk [vmem:[#allocation2 + $0x78] sm:$0xff] %vm421_vm11, %v10361_v15  ;;  %v3061_v36 = vsel %vm12771_vm2, %v3059_v2, %v3060_v9  ;;  %v3066_v4 = vrot.slane %v10324_v51, 5  ;;  %v14686_v32 = vsel %vm12771_vm2, %v7177_v56, %v7178_v58  ;;  %v10884_v27 = vrot.slane %v14666_v7, 9  ;;  %v10332_v17 = vld [vmem:[%s12754_s20 + $0x80] sm:$0xf] }
 0x19e   : > { %v10362_v16 = vcombine.low %v3058_v47, %v3061_v36  ;;  %v3064_v52 = vsel %vm12771_vm2, %v3062_v25, %v3063_v3  ;;  %v3065_v37 = vrot.slane %v3063_v3, 4  ;;  %v14692_v63 = vsel %vm12771_vm2, %v7180_v35, %v7181_v34  ;;  %v3220_v19 = vld [vmem:[#allocation2 + $0x38] sm:$0xff]  ;;  %v10334_v14 = vld [vmem:[%s12754_s20 + $0x88] sm:$0x1]  ;;  %v12432_v7 = vld [vmem:[%s12948_s30 + $0x110] sm:$0x11]  ;;  %p12522_p10 = pnand %p12521_p4, %p16579_p8 }
 0x19f   : > { %v2885_v29 = vpop.permute.xlu1 %2884  ;;  %v2386_v31 = vpop.permute.xlu0 %2385  ;;  %v10353_v40 = vrot.slane %v10325_v22, 9  ;;  %v3070_v21 = vrot.slane %v10326_v26, 5  ;;  %v7187_v6 = vrot.slane %v7185_v12, 4  ;;  %v7188_v57 = vrot.slane %v12430_v41, 5  ;;  %v12313_v47 = vld [vmem:[%s16511_s3 + $0x60] sm:$0xff]  }
 0x1a0   : > { %2933 = vst.msk [vmem:[#allocation2 + $0x10] sm:$0xff] %vm2932_vm15, %v2885_v29  ;;  %v3274_v53 = vld [vmem:[#allocation2 + $0x1e8] sm:$0xff]  ;;  %v3067_v30 = vsel %vm12771_vm2, %v3065_v37, %v3066_v4  ;;  %v3073_v42 = vrot.slane %v10327_v38, 5  ;;  %v10923_v33 = vcombine.low %v14645_v11, %v14649_v18  ;;  %v10926_v56 = vcombine.high %v14686_v32, %v14692_v63  ;;  %v10330_v29 = vld [vmem:[%s12754_s20 + $0x78] sm:$0xe]  ;;  %p12523_p11 = pneg %p12522_p10 }
 0x1a1   : > { %2431 = vst.msk [vmem:[#allocation2 + $0x70] sm:$0xff] %vm2427_vm14, %v2386_v31  ;;  %4161 = vmatprep.mubr.bf16.mxu1 %v3274_v53  ;;  %v10363_v55 = vcombine.low %v3064_v52, %v3067_v30  ;;  %v3071_v46 = vsel %vm12771_vm2, %v10353_v40, %v3070_v21  ;;  %v3072_v13 = vrot.slane %v3070_v21, 4  ;;  %v12311_v11 = vld [vmem:[%s16511_s3 + $0x58] sm:$0xff]   ;;  %v12431_v18 = vld [vmem:[%s12948_s30 + $0x108] sm:$0xff]  ;;  %v3076_v59 = vrot.slane %v10328_v48, 5 }
 0x1a2   : > { %4162 = vmatmul.mubr.bf16.gmra.mrb[124].mxu1 %v3273_v54  ;;  %3201 = vst.msk [vmem:[#allocation2 + $0x98] sm:$0xff] %vm421_vm11, %v10362_v16  ;;  %v10331_v54 = vld [vmem:[%s12754_s20 + $0x7c] sm:$0xf]  ;;  %v3075_v31 = vrot.slane %v3073_v42, 4  ;;  %v14724_v23 = vsel %vm12771_vm2, %v10884_v27, %v7185_v12  ;;  %v14728_v51 = vsel %vm12771_vm2, %v7187_v6, %v7188_v57  ;;  %v3079_v24 = vrot.slane %v10329_v5, 5  ;;  %v12315_v37 = vld [vmem:[%s16511_s3 + $0x68] sm:$0xff]  }
 0x1a3   : > { %10461 = vmatprep.mubr.msk.bf16.mxu1 %vm421_vm11, %v3216_v20  ;;  %v2388_v39 = vpop.permute.xlu0 %2387  ;;  %v7191_v20 = vrot.slane %v12431_v18, 5  ;;  %3202 = vst.msk [vmem:[#allocation2 + $0xb8] sm:$0xff] %vm421_vm11, %v10363_v55  ;;  %v3074_v53 = vsel %vm12771_vm2, %v3072_v13, %v3073_v42  ;;  %v10925_v60 = vcombine.low %v14686_v32, %v14692_v63  ;;  %v7194_v15 = vrot.slane %v12432_v7, 5  ;;  %v10335_v35 = vld [vmem:[%s12754_s20 + $0x8c] sm:$0xe]  ;;  %v3224_v4 = vld [vmem:[#allocation2 + $0x58] sm:$0xff] }
 0x1a4   : > { %2432 = vst.msk [vmem:[#allocation2 + $0x90] sm:$0xff] %vm2427_vm14, %v2388_v39  ;;  %7552 = vmatmul.mubr.bf16.gmra.mrb[28].mxu0 %v10921_v49  ;;  %v10364_v9 = vcombine.low %v3071_v46, %v3074_v53  ;;  %v10333_v49 = vld [vmem:[%s12754_s20 + $0x84] sm:$0xf]  ;;  %v3077_v2 = vsel %vm12771_vm2, %v3075_v31, %v3076_v59  ;;  %v3078_v22 = vrot.slane %v3076_v59, 4  ;;  %v10336_v61 = vld [vmem:[%s12754_s20 + $0x90] sm:$0xf]  ;;  %v10928_v26 = vcombine.high %v14724_v23, %v14728_v51 }
 0x1a5   : > { %10957 = vmatprep.mubr.msk.bf16.mxu0 %vm2231_vm6, %v10924_v62  ;;  %v7190_v62 = vrot.slane %v7188_v57, 4  ;;  %v14747_v34 = vld [vmem:[%s12754_s20 + $0x94] sm:$0xf]  ;;  %v7193_v50 = vrot.slane %v7191_v20, 4  ;;  %v10354_v36 = vrot.slane %v10330_v29, 9  ;;  %v3083_v3 = vrot.slane %v10331_v54, 5 }
 0x1a6   : > { %3203 = vst.msk [vmem:[#allocation2 + $0xd8] sm:$0xff] %vm421_vm11, %v10364_v9  ;;  %v10885_v16 = vrot.slane %v14717_v1, 9  ;;  %v3080_v38 = vsel %vm12771_vm2, %v3078_v22, %v3079_v24  ;;  %v3089_v52 = vrot.slane %v10333_v49, 5  ;;  %v10338_v40 = vld [vmem:[%s12754_s20 + $0x98] sm:$0xf]  ;;  %v10355_v5 = vrot.slane %v10335_v35, 9 }
 0x1a7   : > { %v2887_v43 = vpop.permute.xlu1 %2886  ;;  %v3215_v28 = vld [vmem:[#allocation2 + $0x10] sm:$0xff]  ;;  %v2390_v44 = vpop.permute.xlu0 %2389  ;;  %v3085_v27 = vrot.slane %v3083_v3, 4  ;;  %v14765_v21 = vld [vmem:[%s12754_s20 + $0x9c] sm:$0x1]  ;;  %v14769_v48 = vsel %vm12771_vm2, %v7190_v62, %v7191_v20  ;;  %v10340_v30 = vld [vmem:[%s12754_s20 + $0xa0] sm:$0xe] }
 0x1a8   : > { %2934 = vst.msk [vmem:[#allocation2 + $0x30] sm:$0xff] %vm2932_vm15, %v2887_v43  ;;  %v10365_v43 = vcombine.low %v3077_v2, %v3080_v38  ;;  %v3091_v57 = vrot.slane %v3089_v52, 4  ;;  %v10341_v42 = vld [vmem:[%s12754_s20 + $0xa4] sm:$0xf]  ;;  %v3099_v46 = vrot.slane %v14747_v34, 5  ;;  %v14784_v29 = vld [vmem:[%s12948_s30 + $0x128] sm:$0xff] }
 0x1a9   : > { %2433 = vst.msk [vmem:[#allocation2 + $0xb0] sm:$0xff] %vm2427_vm14, %v2390_v44  ;;  %v3092_v44 = vrot.slane %v10334_v14, 5  ;;  %v10342_v13 = vld [vmem:[%s12754_s20 + $0xa8] sm:$0xf]  ;;  %v7201_v54 = vrot.slane %v14784_v29, 5  ;;  %v12317_v31 = vld [vmem:[%s16511_s3 + $0x70] sm:$0xff]  }
 0x1aa   : > { %4203 = vmatmul.mubr.bf16.vlgmr.msra.gmra.mrb[0].mxu1 %v3215_v28  ;;  %v3084_v28 = vsel %vm12771_vm2, %v10354_v36, %v3083_v3  ;;  %3204 = vst.msk [vmem:[#allocation2 + $0xf8] sm:$0xff] %vm421_vm11, %v10365_v43  ;;  %v10343_v24 = vld [vmem:[%s12754_s20 + $0xac] sm:$0xf]  ;;  %v10344_v9 = vld [vmem:[%s12754_s20 + $0xb0] sm:$0x1]  ;;  %v3101_v63 = vrot.slane %v3099_v46, 4 }
 0x1ab   : > { %4965 = vmatpush1.bf16.msra.mxu1 %v12309_v45  ;;  %10462 = vmatprep.mubr.msk.bf16.mxu1 %vm421_vm11, %v3220_v19  ;;  %v2392_v58 = vpop.permute.xlu0 %2391  ;;  %v3086_v45 = vrot.slane %v10332_v17, 5  ;;  %v14772_v19 = vld [vmem:[%s12948_s30 + $0x120] sm:$0xff]  ;;  %v3093_v20 = vsel %vm12771_vm2, %v3091_v57, %v3092_v44  ;;  %v3105_v49 = vrot.slane %v14765_v21, 5  ;;  %v10345_v14 = vld [vmem:[%s12754_s20 + $0xb4] sm:$0xe]  ;;  %v3109_v2 = vrot.slane %v10341_v42, 5 }
 0x1ac   : > { %4966 = vmatprep.subr.bf16.mxu1 %v16519_v0  ;;  %2434 = vst.msk [vmem:[#allocation2 + $0xd0] sm:$0xff] %vm2427_vm14, %v2392_v58  ;;  %7560 = vmatmul.mubr.bf16.gmra.mrb[32].mxu0 %v10923_v33  ;;  %v7198_v6 = vrot.slane %v14772_v19, 5  ;;  %v14798_v58 = vsel %vm12771_vm2, %v7193_v50, %v7194_v15  ;;  %v3228_v22 = vld [vmem:[#allocation2 + $0x78] sm:$0xff]  ;;  %v10348_v50 = vld [vmem:[%s12754_s20 + $0xc0] sm:$0xf]  ;;  %v10357_v44 = vrot.slane %v10345_v14, 9 }
 0x1ad   : > { %10958 = vmatprep.mubr.msk.bf16.mxu0 %vm2231_vm6, %v10926_v56  ;;  %v3088_v41 = vrot.slane %v3086_v45, 4  ;;  %v3087_v55 = vsel %vm12771_vm2, %v3085_v27, %v3086_v45  ;;  %v3096_v56 = vrot.slane %v10336_v61, 5  ;;  %v10930_v36 = vcombine.high %v14769_v48, %v14798_v58  ;;  %v12321_v45 = vld [vmem:[%s16511_s3 + $0x78] sm:$0xff]   ;;  %v10349_v43 = vld [vmem:[%s12754_s20 + $0xc4] sm:$0x1]  ;;  %v12435_v19 = vld [vmem:[%s12948_s30 + $0x130] sm:$0xff] }
 0x1ae   : > { %v7200_v32 = vrot.slane %v7198_v6, 4  ;;  %v3111_v38 = vrot.slane %v3109_v2, 4  ;;  %v14849_v57 = vsel %vm12771_vm2, %v10885_v16, %v7198_v6  ;;  %v12324_v1 = vld [vmem:[%s16511_s3 + $0x80] sm:$0xff]   ;;  %v3131_v6 = vrot.slane %v10349_v43, 5 }
 0x1af   : > { %v2889_v39 = vpop.permute.xlu1 %2888  ;;  %v3219_v25 = vld [vmem:[#allocation2 + $0x30] sm:$0xff]  ;;  %4967 = vmatpush1.bf16.msra.mxu1 %v12311_v11  ;;  %v2394_v12 = vpop.permute.xlu0 %2393  ;;  %v10366_v11 = vcombine.low %v3084_v28, %v3087_v55  ;;  %v3090_v18 = vsel %vm12771_vm2, %v3088_v41, %v3089_v52  ;;  %v3097_v17 = vsel %vm12771_vm2, %v10355_v5, %v3096_v56  ;;  %v3098_v53 = vrot.slane %v3096_v56, 4 }
 0x1b0   : > { %2935 = vst.msk [vmem:[#allocation2 + $0x50] sm:$0xff] %vm2932_vm15, %v2889_v39  ;;  %4968 = vmatprep.subr.bf16.mxu1 %v16519_v0  ;;  %v10367_v59 = vcombine.low %v3090_v18, %v3093_v20  ;;  %v3112_v39 = vrot.slane %v10342_v13, 5  ;;  %v3115_v52 = vrot.slane %v10343_v24, 5  ;;  %v14857_v55 = vsel %vm12771_vm2, %v7200_v32, %v7201_v54  ;;  %v3232_v20 = vld [vmem:[#allocation2 + $0x98] sm:$0xff]  ;;  %v12328_v32 = vld [vmem:[%s16511_s3 + $0x88] sm:$0xff]  }
 0x1b1   : > { %2435 = vst.msk [vmem:[#allocation2 + $0xf0] sm:$0xff] %vm2427_vm14, %v2394_v12  ;;  %v3100_v15 = vsel %vm12771_vm2, %v3098_v53, %v3099_v46  ;;  %v10927_v12 = vcombine.low %v14724_v23, %v14728_v51  ;;  %v7204_v5 = vrot.slane %v12435_v19, 5  ;;  %v3244_v19 = vld [vmem:[#allocation2 + $0xf8] sm:$0xff]  ;;  %vm9807_vm0 = vcmask 519168  }
 0x1b2   : > { %4211 = vmatmul.mubr.bf16.gmra.mrb[4].mxu1 %v3219_v25  ;;  %3205 = vst.msk [vmem:[#allocation2 + $0x118] sm:$0xff] %vm421_vm11, %v10366_v11  ;;  %3206 = vst.msk [vmem:[#allocation2 + $0x138] sm:$0xff] %vm421_vm11, %v10367_v59  ;;  %v10368_v35 = vcombine.low %v3097_v17, %v3100_v15  ;;  %v10346_v25 = vld [vmem:[%s12754_s20 + $0xb8] sm:$0xf]  ;;  %v3114_v51 = vrot.slane %v3112_v39, 4  ;;  %v3113_v27 = vsel %vm12771_vm2, %v3111_v38, %v3112_v39  ;;  %v3117_v41 = vrot.slane %v3115_v52, 4 }
 0x1b3   : > { %10463 = vmatprep.mubr.msk.bf16.mxu1 %vm421_vm11, %v3224_v4  ;;  %4969 = vmatpush1.bf16.msra.mxu1 %v12313_v47  ;;  %v2396_v33 = vpop.permute.xlu0 %2395  ;;  %v10356_v47 = vrot.slane %v10340_v30, 9  ;;  %v3122_v30 = vrot.slane %v10346_v25, 5  ;;  %v10929_v17 = vcombine.low %v14769_v48, %v14798_v58  ;;  %v7203_v58 = vrot.slane %v7201_v54, 4  ;;  %v10878_v15 = vld [vmem:[%s12948_s30 + $0x140] sm:$0xee] }
 0x1b4   : > { %4970 = vmatprep.subr.bf16.mxu1 %v16519_v0  ;;  %2436 = vst.msk [vmem:[#allocation2 + $0x110] sm:$0xff] %vm2427_vm14, %v2396_v33  ;;  %7568 = vmatmul.mubr.bf16.gmra.mrb[36].mxu0 %v10925_v60  ;;  %v3102_v60 = vrot.slane %v10338_v40, 5  ;;  %v3116_v21 = vsel %vm12771_vm2, %v3114_v51, %v3115_v52  ;;  %v3128_v33 = vrot.slane %v10348_v50, 5  ;;  %v10931_v25 = vcombine.low %v14849_v57, %v14857_v55  ;;  %v3240_v51 = vld [vmem:[#allocation2 + $0xd8] sm:$0xff] }
 0x1b5   : > { %10959 = vmatprep.mubr.msk.bf16.mxu0 %vm2231_vm6, %v10928_v26  ;;  %v10347_v26 = vld [vmem:[%s12754_s20 + $0xbc] sm:$0xf]  ;;  %v3110_v4 = vsel %vm12771_vm2, %v10356_v47, %v3109_v2  ;;  %3207 = vst.msk [vmem:[#allocation2 + $0x158] sm:$0xff] %vm421_vm11, %v10368_v35  ;;  %v3123_v13 = vsel %vm12771_vm2, %v10357_v44, %v3122_v30  ;;  %v3124_v11 = vrot.slane %v3122_v30, 4  ;;  %v7205_v29 = vsel %vm12771_vm2, %v7203_v58, %v7204_v5  ;;  %v12437_v47 = vld [vmem:[%s12948_s30 + $0x148] sm:$0xff]  ;;  %v12332_v35 = vld [vmem:[%s16511_s3 + $0x90] sm:$0xff]  }
 0x1b6   : > { %v3103_v61 = vsel %vm12771_vm2, %v3101_v63, %v3102_v60  ;;  %v3104_v34 = vrot.slane %v3102_v60, 4  ;;  %v10370_v40 = vcombine.low %v3110_v4, %v3113_v27  ;;  %v3125_v42 = vrot.slane %v10347_v26, 5  ;;  %v12335_v4 = vld [vmem:[%s16511_s3 + $0x98] sm:$0xff]  }
 0x1b7   : > { %v2891_v62 = vpop.permute.xlu1 %2890  ;;  %v3223_v7 = vld [vmem:[#allocation2 + $0x50] sm:$0xff]  ;;  %4971 = vmatpush1.bf16.msra.mxu1 %v12315_v37  ;;  %v2398_v3 = vpop.permute.xlu0 %2397  ;;  %v3118_v37 = vrot.slane %v10344_v9, 5  ;;  %v10932_v9 = vcombine.high %v14849_v57, %v14857_v55  ;;  %v7206_v60 = vrot.slane %v7204_v5, 4  ;;  %v7211_v2 = vrot.slane %v12437_v47, 5  ;;  %v12439_v52 = vld [vmem:[%s12948_s30 + $0x158] sm:$0xff] }
 0x1b8   : > { %2936 = vst.msk [vmem:[#allocation2 + $0x70] sm:$0xff] %vm2932_vm15, %v2891_v62  ;;  %4972 = vmatprep.subr.bf16.mxu1 %v16519_v0  ;;  %v3106_v23 = vsel %vm12771_vm2, %v3104_v34, %v3105_v49  ;;  %v3127_v18 = vrot.slane %v3125_v42, 4  ;;  %v3126_v53 = vsel %vm12771_vm2, %v3124_v11, %v3125_v42  ;;  %v12436_v49 = vld [vmem:[%s12948_s30 + $0x138] sm:$0x11]  ;;  %v10886_v50 = vrot.slane %v10878_v15, 9 }
 0x1b9   : > { %2437 = vst.msk [vmem:[#allocation2 + $0x130] sm:$0xff] %vm2427_vm14, %v2398_v3  ;;  %v10369_v28 = vcombine.low %v3103_v61, %v3106_v23  ;;  %v3119_v16 = vsel %vm12771_vm2, %v3117_v41, %v3118_v37  ;;  %v10372_v63 = vcombine.low %v3123_v13, %v3126_v53  ;;  %v7207_v14 = vrot.slane %v12436_v49, 5  ;;  %v3236_v34 = vld [vmem:[#allocation2 + $0xb8] sm:$0xff]  ;;  %v12440_v41 = vld [vmem:[%s12948_s30 + $0x160] sm:$0x11] }
 0x1ba   : > { %4219 = vmatmul.mubr.bf16.gmra.mrb[8].mxu1 %v3223_v7  ;;  %3209 = vst.msk [vmem:[#allocation2 + $0x198] sm:$0xff] %vm421_vm11, %v10370_v40  ;;  %v10371_v46 = vcombine.low %v3116_v21, %v3119_v16  ;;  %v3129_v24 = vsel %vm12771_vm2, %v3127_v18, %v3128_v33  ;;  %v7217_v37 = vrot.slane %v12439_v52, 5  ;;  %v7220_v57 = vrot.slane %v12440_v41, 5  ;;  %v14939_v13 = vld [vmem:[%s12948_s30 + $0x58] sm:$0xff]  ;;  %v14948_v53 = vld [vmem:[%s12948_s30 + $0x60] sm:$0xff] }
 0x1bb   : > { %10464 = vmatprep.mubr.msk.bf16.mxu1 %vm421_vm11, %v3228_v22  ;;  %4973 = vmatpush1.bf16.msra.mxu1 %v12317_v31  ;;  %3208 = vst.msk [vmem:[#allocation2 + $0x178] sm:$0xff] %vm421_vm11, %v10369_v28  ;;  %v3130_v31 = vrot.slane %v3128_v33, 4  ;;  %v2400_v62 = vpop.permute.xlu0 %2399  ;;  %3211 = vst.msk [vmem:[#allocation2 + $0x1d8] sm:$0xff] %vm421_vm11, %v10372_v63  ;;  %v7208_v54 = vsel %vm12771_vm2, %v7206_v60, %v7207_v14  ;;  %v3248_v11 = vld [vmem:[#allocation2 + $0x118] sm:$0xff]  ;;  %v15018_v41 = vld [vmem:[%s12948_s30 + $0xa0] sm:$0xff] }
 0x1bc   : > { %4974 = vmatprep.subr.bf16.mxu1 %v16519_v0  ;;  %7576 = vmatmul.mubr.bf16.gmra.mrb[40].mxu0 %v10927_v12  ;;  %3210 = vst.msk [vmem:[#allocation2 + $0x1b8] sm:$0xff] %vm421_vm11, %v10371_v46  ;;  %v10934_v26 = vcombine.high %v7205_v29, %v7208_v54  ;;  %v7213_v12 = vrot.slane %v7211_v2, 4  ;;  %v10933_v27 = vcombine.low %v7205_v29, %v7208_v54  ;;  %v7219_v21 = vrot.slane %v7217_v37, 4  ;;  %v14936_v46 = vld [vmem:[%s12948_s30 + $0x50] sm:$0xff]  ;;  %v12326_v49 = vld [vmem:[%s16511_s3 + $0x238] sm:$0xff]  }
 0x1bd   : > { %10960 = vmatprep.mubr.msk.bf16.mxu0 %vm2231_vm6, %v10930_v36  ;;  %v3132_v48 = vsel %vm12771_vm2, %v3130_v31, %v3131_v6  ;;  %2438 = vst.msk [vmem:[#allocation2 + $0x150] sm:$0xff] %vm2427_vm14, %v2400_v62  ;;  %v12438_v36 = vld [vmem:[%s12948_s30 + $0x150] sm:$0xff]  ;;  %v14967_v62 = vld [vmem:[%s12948_s30 + $0x78] sm:$0xff] }
 0x1be   : > { %v10373_v7 = vcombine.low %v3129_v24, %v3132_v48  ;;  %v7214_v3 = vrot.slane %v12438_v36, 5  ;;  %v7221_v33 = vsel %vm12771_vm2, %v7219_v21, %v7220_v57  ;;  %v14951_v24 = vld [vmem:[%s12948_s30 + $0x68] sm:$0xff]  ;;  %v12322_v48 = vld [vmem:[%s16511_s3 + $0x230] sm:$0xff]   ;;  %v3256_v29 = vld [vmem:[#allocation2 + $0x158] sm:$0xff] }
 0x1bf   : > { %v3227_v56 = vld [vmem:[#allocation2 + $0x70] sm:$0xff]  ;;  %4975 = vmatpush1.bf16.msra.mxu1 %v12321_v45  ;;  %v2402_v22 = vpop.permute.xlu0 %2401  ;;  %v7212_v45 = vsel %vm12771_vm2, %v10886_v50, %v7211_v2  ;;  %v11022_v58 = vcombine.high %v14948_v53, %v14951_v24  ;;  %v11021_v54 = vcombine.low %v14948_v53, %v14951_v24  ;;  %v15021_v57 = vld [vmem:[%s12948_s30 + $0xa8] sm:$0xff] }
 0x1c0   : > { %4976 = vmatprep.subr.bf16.mxu1 %v16519_v0  ;;  %3212 = vst.msk [vmem:[#allocation2 + $0x1f8] sm:$0xff] %vm421_vm11, %v10373_v7  ;;  %v7215_v23 = vsel %vm12771_vm2, %v7213_v12, %v7214_v3  ;;  %v7216_v40 = vrot.slane %v7214_v3, 4  ;;  %v14970_v7 = vld [vmem:[%s12948_s30 + $0x80] sm:$0xff]  ;;  %v14992_v12 = vld [vmem:[%s12948_s30 + $0x88] sm:$0xff]  ;;  %v14995_v36 = vld [vmem:[%s12948_s30 + $0x90] sm:$0xff] }
 0x1c1   : > { %v2893_v59 = vpop.permute.xlu1 %2892  ;;  %2439 = vst.msk [vmem:[#allocation2 + $0x170] sm:$0xff] %vm2427_vm14, %v2402_v22  ;;  %v10936_v44 = vcombine.high %v7212_v45, %v7215_v23  ;;  %v10935_v16 = vcombine.low %v7212_v45, %v7215_v23  ;;  %v11024_v47 = vcombine.high %v14967_v62, %v14970_v7  ;;  %v12329_v22 = vld [vmem:[%s16511_s3 + $0x240] sm:$0xff]   ;;  %v11026_v45 = vcombine.high %v14992_v12, %v14995_v36 }
 0x1c2   : > { %2937 = vst.msk [vmem:[#allocation2 + $0x90] sm:$0xff] %vm2932_vm15, %v2893_v59  ;;  %4227 = vmatmul.mubr.bf16.gmra.mrb[12].mxu1 %v3227_v56  ;;  %v7218_v42 = vsel %vm12771_vm2, %v7216_v40, %v7217_v37  ;;  %v11020_v59 = vcombine.high %v14936_v46, %v14939_v13  ;;  %v12342_v40 = vld [vmem:[%s16511_s3 + $0x258] sm:$0xff]  }
 0x1c3   : > { %10465 = vmatprep.mubr.msk.bf16.mxu1 %vm421_vm11, %v3232_v20  ;;  %4977 = vmatpush1.bf16.msra.mxu1 %v12324_v1  ;;  %v2404_v38 = vpop.permute.xlu0 %2403  ;;  %v10938_v6 = vcombine.high %v7218_v42, %v7221_v33  ;;  %v10937_v31 = vcombine.low %v7218_v42, %v7221_v33  ;;  %v11025_v42 = vcombine.low %v14992_v12, %v14995_v36 }
 0x1c4   : > { %4978 = vmatprep.subr.bf16.mxu1 %v16519_v0  ;;  %7584 = vmatmul.mubr.bf16.gmra.mrb[44].mxu0 %v10929_v17  ;;  %2440 = vst.msk [vmem:[#allocation2 + $0x190] sm:$0xff] %vm2427_vm14, %v2404_v38  ;;  %v11023_v38 = vcombine.low %v14967_v62, %v14970_v7  ;;  %v11028_v33 = vcombine.high %v15018_v41, %v15021_v57 }
 0x1c5   : > { %10961 = vmatprep.mubr.msk.bf16.mxu0 %vm2231_vm6, %v10932_v9  ;;  %v3252_v9 = vld [vmem:[#allocation2 + $0x138] sm:$0xff] }
 0x1c7   : > { %4979 = vmatpush1.bf16.msra.mxu1 %v12328_v32  ;;  %v11019_v32 = vcombine.low %v14936_v46, %v14939_v13 }
 0x1c8   : > { %v2895_v61 = vpop.permute.xlu1 %2894  ;;  %4980 = vmatprep.subr.bf16.mxu1 %v16519_v0 }
 0x1c9   : > { %2938 = vst.msk [vmem:[#allocation2 + $0xb0] sm:$0xff] %vm2932_vm15, %v2895_v61  ;;  %v3231_v39 = vld [vmem:[#allocation2 + $0x90] sm:$0xff] }
 0x1ca   : > { %4235 = vmatmul.mubr.bf16.gmra.mrb[16].mxu1 %v3231_v39 }
 0x1cb   : > { %10466 = vmatprep.mubr.msk.bf16.mxu1 %vm421_vm11, %v3236_v34  ;;  %4981 = vmatpush1.bf16.msra.mxu1 %v12332_v35  ;;  %v2406_v30 = vpop.permute.xlu0 %2405 }
 0x1cc   : > { %4982 = vmatprep.subr.bf16.mxu1 %v16519_v0  ;;  %7592 = vmatmul.mubr.bf16.gmra.mrb[48].mxu0 %v10931_v25  ;;  %2441 = vst.msk [vmem:[#allocation2 + $0x1b0] sm:$0xff] %vm2427_vm14, %v2406_v30  ;;  %v3264_v30 = vld [vmem:[#allocation2 + $0x198] sm:$0xff] }
 0x1cd   : > { %10962 = vmatprep.mubr.msk.bf16.mxu0 %vm2231_vm6, %v10934_v26  ;;  %v12333_v26 = vld [vmem:[%s16511_s3 + $0x248] sm:$0xff]  }
 0x1cf   : > { %4983 = vmatpush1.bf16.msra.mxu1 %v12335_v4  ;;  %v2408_v5 = vpop.permute.xlu0 %2407  ;;  %v3260_v4 = vld [vmem:[#allocation2 + $0x178] sm:$0xff] }
 0x1d0   : > { %v2897_v43 = vpop.permute.xlu1 %2896  ;;  %v3235_v28 = vld [vmem:[#allocation2 + $0xb0] sm:$0xff]  ;;  %5550 = vmatprep.subr.bf16.mxu1 %v16519_v0  ;;  %2442 = vst.msk [vmem:[#allocation2 + $0x1d0] sm:$0xff] %vm2427_vm14, %v2408_v5 }
 0x1d1   : > { %2939 = vst.msk [vmem:[#allocation2 + $0xd0] sm:$0xff] %vm2932_vm15, %v2897_v43 }
 0x1d2   : > { %4243 = vmatmul.mubr.bf16.gmra.mrb[20].mxu1 %v3235_v28 }
 0x1d3   : > { %10467 = vmatprep.mubr.msk.bf16.mxu1 %vm421_vm11, %v3240_v51  ;;  %v2410_v56 = vpop.permute.xlu0 %2409  ;;  %v12337_v51 = vld [vmem:[%s16511_s3 + $0x250] sm:$0xff]  }
 0x1d4   : > { %7600 = vmatmul.mubr.bf16.gmra.mrb[52].mxu0 %v10933_v27  ;;  %2443 = vst.msk [vmem:[#allocation2 + $0x1f0] sm:$0xff] %vm2427_vm14, %v2410_v56 }
 0x1d5   : > { %10963 = vmatprep.mubr.msk.bf16.mxu0 %vm2231_vm6, %v10936_v44 }
 0x1d8   : > { %v3239_v55 = vld [vmem:[#allocation2 + $0xd0] sm:$0xff] }
 0x1d9   : > { %v2899_v1 = vpop.permute.xlu1 %2898 }
 0x1da   : > { %2940 = vst.msk [vmem:[#allocation2 + $0xf0] sm:$0xff] %vm2932_vm15, %v2899_v1  ;;  %4251 = vmatmul.mubr.bf16.gmra.mrb[24].mxu1 %v3239_v55 }
 0x1db   : > { %10468 = vmatprep.mubr.msk.bf16.mxu1 %vm421_vm11, %v3244_v19  ;;  %v12349_v19 = vld [vmem:[%s16511_s3 + $0x260] sm:$0xff]  }
 0x1dc   : > { %7608 = vmatmul.mubr.bf16.gmra.mrb[56].mxu0 %v10935_v16 }
 0x1dd   : > { %10964 = vmatprep.mubr.msk.bf16.mxu0 %vm2231_vm6, %v10938_v6 }
 0x1e0   : > { %v2901_v18 = vpop.permute.xlu1 %2900 }
 0x1e1   : > { %v3243_v20 = vld [vmem:[#allocation2 + $0xf0] sm:$0xff]  ;;  %2941 = vst.msk [vmem:[#allocation2 + $0x110] sm:$0xff] %vm2932_vm15, %v2901_v18  ;;  %v12353_v18 = vld [vmem:[%s16511_s3 + $0x268] sm:$0xff]  }
 0x1e2   : > { %4259 = vmatmul.mubr.bf16.gmra.mrb[28].mxu1 %v3243_v20 }
 0x1e3   : > { %10469 = vmatprep.mubr.msk.bf16.mxu1 %vm421_vm11, %v3248_v11 }
 0x1e4   : > { %7616 = vmatmul.mubr.bf16.gmra.mrb[60].mxu0 %v10937_v31  ;;  %v15043_v31 = vld [vmem:[%s12948_s30 + $0xb0] sm:$0xff] }
 0x1e5   : > { %11061 = vmatprep.mubr.msk.bf16.mxu0 %vm2231_vm6, %v11020_v59  ;;  %v2903_v17 = vpop.permute.xlu1 %2902  ;;  %v15046_v59 = vld [vmem:[%s12948_s30 + $0xb8] sm:$0xff] }
 0x1e6   : > { %2942 = vst.msk [vmem:[#allocation2 + $0x130] sm:$0xff] %vm2932_vm15, %v2903_v17  ;;  %v3268_v17 = vld [vmem:[#allocation2 + $0x1b8] sm:$0xff] }
 0x1e8   : > { %v3247_v63 = vld [vmem:[#allocation2 + $0x110] sm:$0xff] }
 0x1ea   : > { %4267 = vmatmul.mubr.bf16.gmra.mrb[32].mxu1 %v3247_v63  ;;  %v4332_v63 = vld [vmem:[%s12948_s30 + $0x8] sm:$0xff] }
 0x1eb   : > { %10470 = vmatprep.mubr.msk.bf16.mxu1 %vm421_vm11, %v3252_v9  ;;  %v2905_v60 = vpop.permute.xlu1 %2904  ;;  %v4331_v9 = vld [vmem:[%s12948_s30] sm:$0xff] }
 0x1ec   : > { %7997 = vmatmul.mubr.bf16.vlgmr.msra.gmra.mrb[0].mxu0 %v11019_v32  ;;  %2943 = vst.msk [vmem:[#allocation2 + $0x150] sm:$0xff] %vm2932_vm15, %v2905_v60  ;;  %v11027_v32 = vcombine.low %v15018_v41, %v15021_v57  ;;  %v12361_v60 = vld [vmem:[%s16511_s3 + $0x270] sm:$0xff]  }
 0x1ed   : > { %8791 = vmatpush1.bf16.msra.mxu0 %v12322_v48  ;;  %11062 = vmatprep.mubr.msk.bf16.mxu0 %vm2231_vm6, %v11022_v58  ;;  %v3251_v14 = vld [vmem:[#allocation2 + $0x130] sm:$0xff]  ;;  %v11030_v48 = vcombine.high %v15043_v31, %v15046_v59 }
 0x1ee   : > { %8792 = vmatprep.subr.bf16.mxu0 %v16519_v0 }
 0x1f0   : > { %v2907_v15 = vpop.permute.xlu1 %2906 }
 0x1f1   : > { %2944 = vst.msk [vmem:[#allocation2 + $0x170] sm:$0xff] %vm2932_vm15, %v2907_v15  ;;  %8793 = vmatpush1.bf16.msra.mxu0 %v12326_v49 }
 0x1f2   : > { %4275 = vmatmul.mubr.bf16.gmra.mrb[36].mxu1 %v3251_v14  ;;  %v11381_v2 = vpop.f32.mrb[64].mxu1  ;;  %8794 = vmatprep.subr.bf16.mxu0 %v16519_v0 }
 0x1f3   : > { %10471 = vmatprep.mubr.msk.bf16.mxu1 %vm421_vm11, %v3256_v29  ;;  %v11382_v35 = vpop.f32.mrb[65].mxu1  ;;  %v3255_v50 = vld [vmem:[#allocation2 + $0x150] sm:$0xff]  ;;  %v4372_v29 = vshrl.u32 %v4331_v9, 16 }
 0x1f4   : > { %v14983_v61 = vadd.f32 %v11382_v35, %v11381_v2  ;;  %v11384_v34 = vpop.f32.mrb[66].mxu1  ;;  %8005 = vmatmul.mubr.bf16.gmra.mrb[4].mxu0 %v11021_v54  ;;  %v4375_v54 = vshll.u32 %v4331_v9, 16  ;;  %v4381_v2 = vshll.u32 %v4332_v63, 16  ;;  %v4336_v9 = vld [vmem:[%s12948_s30 + $0x28] sm:$0xff] }
 0x1f5   : > { %v11385_v39 = vpop.f32.mrb[67].mxu1  ;;  %11063 = vmatprep.mubr.msk.bf16.mxu0 %vm2231_vm6, %v11024_v47  ;;  %8795 = vmatpush1.bf16.msra.mxu0 %v12329_v22  ;;  %v4385_v22 = vshrl.u32 %v4332_v63, 16 }
 0x1f6   : > { %v14986_v25 = vadd.f32 %v11385_v39, %v11384_v34  ;;  %8796 = vmatprep.subr.bf16.mxu0 %v16519_v0  ;;  %v2909_v3 = vpop.permute.xlu1 %2908  ;;  %v12368_v39 = vld [vmem:[%s16511_s3 + $0x278] sm:$0xff]  }
 0x1f7   : > { %2945 = vst.msk [vmem:[#allocation2 + $0x190] sm:$0xff] %vm2932_vm15, %v2909_v3  ;;  %v15073_v3 = vld [vmem:[%s12948_s30 + $0xd0] sm:$0xff] }
 0x1f8   : > { %v3259_v21 = vld [vmem:[#allocation2 + $0x170] sm:$0xff] }
 0x1f9   : > { %8797 = vmatpush1.bf16.msra.mxu0 %v12333_v26 }
 0x1fa   : > { %4283 = vmatmul.mubr.bf16.gmra.mrb[40].mxu1 %v3255_v50  ;;  %v11387_v23 = vpop.f32.mrb[68].mxu1  ;;  %8798 = vmatprep.subr.bf16.mxu0 %v16519_v0  ;;  %v15070_v50 = vld [vmem:[%s12948_s30 + $0xc8] sm:$0xff] }
 0x1fb   : > { %10472 = vmatprep.mubr.msk.bf16.mxu1 %vm421_vm11, %v3260_v4  ;;  %v11388_v52 = vpop.f32.mrb[69].mxu1  ;;  %v2911_v28 = vpop.permute.xlu1 %2910  ;;  %v4374_v4 = vrot.slane %v4372_v29, 4 }
 0x1fc   : > { %v15008_v37 = vadd.f32 %v11388_v52, %v11387_v23  ;;  %v11390_v43 = vpop.f32.mrb[70].mxu1  ;;  %8013 = vmatmul.mubr.bf16.gmra.mrb[8].mxu0 %v11023_v38  ;;  %2946 = vst.msk [vmem:[#allocation2 + $0x1b0] sm:$0xff] %vm2932_vm15, %v2911_v28  ;;  %v4377_v38 = vrot.slane %v4375_v54, 5  ;;  %v4333_v23 = vld [vmem:[%s12948_s30 + $0x10] sm:$0xff]  ;;  %v4387_v52 = vrot.slane %v4385_v22, 4  ;;  %v4334_v28 = vld [vmem:[%s12948_s30 + $0x18] sm:$0xff] }
 0x1fd   : > { %v11391_v27 = vpop.f32.mrb[71].mxu1  ;;  %11064 = vmatprep.mubr.msk.bf16.mxu0 %vm2231_vm6, %v11026_v45  ;;  %8799 = vmatpush1.bf16.msra.mxu0 %v12337_v51  ;;  %v3272_v45 = vld [vmem:[#allocation2 + $0x1d8] sm:$0xff]  ;;  %v4383_v51 = vrot.slane %v4381_v2, 5  ;;  %v11031_v2 = vcombine.low %v15070_v50, %v15073_v3  ;;  %v4416_v22 = vshrl.u32 %v4336_v9, 16 }
 0x1fe   : > { %v15012_v44 = vadd.f32 %v11391_v27, %v11390_v43  ;;  %8800 = vmatprep.subr.bf16.mxu0 %v16519_v0  ;;  %v3263_v20 = vld [vmem:[#allocation2 + $0x190] sm:$0xff]  ;;  %v11029_v43 = vcombine.low %v15043_v31, %v15046_v59  ;;  %v11032_v27 = vcombine.high %v15070_v50, %v15073_v3 }
 0x201   : > { %8801 = vmatpush1.bf16.msra.mxu0 %v12342_v40 }
 0x202   : > { %4291 = vmatmul.mubr.bf16.gmra.mrb[44].mxu1 %v3259_v21  ;;  %v11393_v55 = vpop.f32.mrb[72].mxu1  ;;  %v2913_v1 = vpop.permute.xlu1 %2912  ;;  %8802 = vmatprep.subr.bf16.mxu0 %v16519_v0 }
 0x203   : > { %10473 = vmatprep.mubr.msk.bf16.mxu1 %vm421_vm11, %v3264_v30  ;;  %v11394_v5 = vpop.f32.mrb[73].mxu1  ;;  %2947 = vst.msk [vmem:[#allocation2 + $0x1d0] sm:$0xff] %vm2932_vm15, %v2913_v1  ;;  %v3267_v26 = vld [vmem:[#allocation2 + $0x1b0] sm:$0xff]  ;;  %v4378_v30 = vor.u32 %v4377_v38, %v4374_v4  ;;  %v4401_v1 = vshll.u32 %v4334_v28, 16 }
 0x204   : > { %v15033_v16 = vadd.f32 %v11394_v5, %v11393_v55  ;;  %v11396_v6 = vpop.f32.mrb[74].mxu1  ;;  %8021 = vmatmul.mubr.bf16.gmra.mrb[12].mxu0 %v11025_v42  ;;  %v4391_v42 = vshll.u32 %v4333_v23, 16  ;;  %v4388_v5 = vor.u32 %v4387_v52, %v4383_v51 }
 0x205   : > { %v11397_v56 = vpop.f32.mrb[75].mxu1  ;;  %11065 = vmatprep.mubr.msk.bf16.mxu0 %vm2231_vm6, %v11028_v33  ;;  %8803 = vmatpush1.bf16.msra.mxu0 %v12349_v19  ;;  %v4395_v33 = vshrl.u32 %v4333_v23, 16  ;;  %v4379_v63 = vrot.slane %v4378_v30, 4  ;;  %v4403_v54 = vrot.slane %v4401_v1, 5 }
 0x206   : > { %v15037_v11 = vadd.f32 %v11397_v56, %v11396_v6  ;;  %8804 = vmatprep.subr.bf16.mxu0 %v16519_v0  ;;  %v4405_v6 = vshrl.u32 %v4334_v28, 16 }
 0x207   : > { %v4397_v29 = vrot.slane %v4395_v33, 4  ;;  %v4384_v23 = vsel %vm12844_vm5, %v4379_v63, %v4383_v51  ;;  %v15113_v51 = vld [vmem:[%s12948_s30 + $0xf0] sm:$0xff]  ;;  %v4339_v63 = vld [vmem:[%s12948_s30 + $0x40] sm:$0xff] }
 0x208   : > { %v2915_v14 = vpop.permute.xlu1 %2914 }
 0x209   : > { %8805 = vmatpush1.bf16.msra.mxu0 %v12353_v18  ;;  %2948 = vst.msk [vmem:[#allocation2 + $0x1f0] sm:$0xff] %vm2932_vm15, %v2915_v14  ;;  %v4389_v14 = vrot.slane %v4388_v5, 4  ;;  %v4338_v5 = vld [vmem:[%s12948_s30 + $0x38] sm:$0xff] }
 0x20a   : > { %4299 = vmatmul.mubr.bf16.gmra.mrb[48].mxu1 %v3263_v20  ;;  %v11399_v58 = vpop.f32.mrb[76].mxu1  ;;  %8806 = vmatprep.subr.bf16.mxu0 %v16519_v0  ;;  %v15090_v20 = vld [vmem:[%s12948_s30 + $0xd8] sm:$0xff] }
 0x20b   : > { %10474 = vmatprep.mubr.msk.bf16.mxu1 %vm421_vm11, %v3268_v17  ;;  %v11400_v49 = vpop.f32.mrb[77].mxu1  ;;  %v15093_v17 = vld [vmem:[%s12948_s30 + $0xe0] sm:$0xff] }
 0x20c   : > { %v15060_v15 = vadd.f32 %v11400_v49, %v11399_v58  ;;  %v11402_v47 = vpop.f32.mrb[78].mxu1  ;;  %8029 = vmatmul.mubr.bf16.gmra.mrb[16].mxu0 %v11027_v32  ;;  %v3271_v32 = vld [vmem:[#allocation2 + $0x1d0] sm:$0xff]  ;;  %v4335_v58 = vld [vmem:[%s12948_s30 + $0x20] sm:$0x11]  ;;  %v3276_v49 = vld [vmem:[#allocation2 + $0x1f8] sm:$0xff] }
 0x20d   : > { %v11403_v35 = vpop.f32.mrb[79].mxu1  ;;  %11066 = vmatprep.mubr.msk.bf16.mxu0 %vm2231_vm6, %v11030_v48  ;;  %8807 = vmatpush1.bf16.msra.mxu0 %v12361_v60  ;;  %v4393_v48 = vrot.slane %v4391_v42, 5  ;;  %v4337_v60 = vld [vmem:[%s12948_s30 + $0x30] sm:$0xff]  ;;  %v4411_v52 = vshll.u32 %v4335_v58, 16  ;;  %v4418_v42 = vrot.slane %v4416_v22, 4 }
 0x20e   : > { %v15064_v34 = vadd.f32 %v11403_v35, %v11402_v47  ;;  %8808 = vmatprep.subr.bf16.mxu0 %v16519_v0  ;;  %v4407_v47 = vrot.slane %v4405_v6, 4  ;;  %v4419_v35 = vshll.u32 %v4336_v9, 16  ;;  %v4425_v4 = vshll.u32 %v4337_v60, 16 }
 0x20f   : > { %v4429_v38 = vshrl.u32 %v4337_v60, 16  ;;  %v4413_v60 = vrot.slane %v4411_v52, 5 }
 0x210   : > { %v4421_v33 = vrot.slane %v4419_v35, 5  ;;  %v4427_v1 = vrot.slane %v4425_v4, 5 }
 0x211   : > { %8809 = vmatpush1.bf16.msra.mxu0 %v12368_v39  ;;  %v11034_v39 = vcombine.high %v15090_v20, %v15093_v17  ;;  %v4431_v6 = vrot.slane %v4429_v38, 4 }
 0x212   : > { %4307 = vmatmul.mubr.bf16.gmra.mrb[52].mxu1 %v3267_v26  ;;  %v11405_v40 = vpop.f32.mrb[80].mxu1  ;;  %9376 = vmatprep.subr.bf16.mxu0 %v16519_v0 }
 0x213   : > { %10475 = vmatprep.mubr.msk.bf16.mxu1 %vm421_vm11, %v3272_v45  ;;  %v11406_v21 = vpop.f32.mrb[81].mxu1  ;;  %v4432_v35 = vor.u32 %v4431_v6, %v4427_v1  ;;  %v15135_v6 = vld [vmem:[%s12948_s30 + $0x100] sm:$0xff] }
 0x214   : > { %v15084_v55 = vadd.f32 %v11406_v21, %v11405_v40  ;;  %v11408_v19 = vpop.f32.mrb[82].mxu1  ;;  %8037 = vmatmul.mubr.bf16.gmra.mrb[20].mxu0 %v11029_v43  ;;  %v4398_v40 = vor.u32 %v4397_v29, %v4393_v48  ;;  %v4408_v21 = vor.u32 %v4407_v47, %v4403_v54  ;;  %v4435_v29 = vshll.u32 %v4338_v5, 16 }
 0x215   : > { %v11409_v56 = vpop.f32.mrb[83].mxu1  ;;  %11067 = vmatprep.mubr.msk.bf16.mxu0 %vm2231_vm6, %v11032_v27  ;;  %v4394_v27 = vsel %vm12844_vm5, %v4389_v14, %v4393_v48  ;;  %v4422_v14 = vor.u32 %v4421_v33, %v4418_v42  ;;  %v4439_v47 = vshrl.u32 %v4338_v5, 16 }
 0x216   : > { %v15087_v18 = vadd.f32 %v11409_v56, %v11408_v19  ;;  %v3275_v56 = vld [vmem:[#allocation2 + $0x1f0] sm:$0xff]  ;;  %v10498_v9 = vcombine.high %v4384_v23, %v4394_v27  ;;  %v4399_v48 = vrot.slane %v4398_v40, 4  ;;  %v4409_v58 = vrot.slane %v4408_v21, 4 }
 0x217   : > { %v10497_v40 = vcombine.low %v4384_v23, %v4394_v27  ;;  %v4437_v42 = vrot.slane %v4435_v29, 5  ;;  %v4441_v33 = vrot.slane %v4439_v47, 4  ;;  %v4340_v23 = vld [vmem:[%s12948_s30 + $0x48] sm:$0x11] }
 0x218   : > { %v4404_v52 = vsel %vm12844_vm5, %v4399_v48, %v4403_v54  ;;  %v12341_v48 = vld [vmem:[%s16511_s3 + $0xa0] sm:$0xff]  }
 0x21a   : > { %4315 = vmatmul.mubr.bf16.gmra.mrb[56].mxu1 %v3271_v32  ;;  %v11411_v26 = vpop.f32.mrb[84].mxu1  ;;  %v15117_v32 = vld [vmem:[%s12948_s30 + $0xf8] sm:$0xff] }
 0x21b   : > { %10476 = vmatprep.mubr.msk.bf16.mxu1 %vm421_vm11, %v3276_v49  ;;  %v11412_v45 = vpop.f32.mrb[85].mxu1  ;;  %v11033_v49 = vcombine.low %v15090_v20, %v15093_v17  ;;  %v11035_v27 = vcombine.low %v15113_v51, %v15117_v32 }
 0x21c   : > { %v15105_v43 = vadd.f32 %v11412_v45, %v11411_v26  ;;  %v11414_v28 = vpop.f32.mrb[86].mxu1  ;;  %8045 = vmatmul.mubr.bf16.gmra.mrb[24].mxu0 %v11031_v2  ;;  %v11036_v2 = vcombine.high %v15113_v51, %v15117_v32  ;;  %v4449_v26 = vshrl.u32 %v4339_v63, 16 }
 0x21d   : > { %v11415_v30 = vpop.f32.mrb[87].mxu1  ;;  %11068 = vmatprep.mubr.msk.bf16.mxu0 %vm2231_vm6, %v11034_v39  ;;  %v4445_v39 = vshll.u32 %v4339_v63, 16 }
 0x21e   : > { %v15110_v19 = vadd.f32 %v11415_v30, %v11414_v28  ;;  %v4414_v28 = vsel %vm12844_vm5, %v4409_v58, %v4413_v60  ;;  %v4423_v30 = vrot.slane %v4422_v14, 4  ;;  %v4451_v54 = vrot.slane %v4449_v26, 4 }
 0x21f   : > { %v4447_v63 = vrot.slane %v4445_v39, 5  ;;  %v10500_v58 = vcombine.high %v4404_v52, %v4414_v28  ;;  %v12345_v39 = vld [vmem:[%s16511_s3 + $0xa8] sm:$0xff]   ;;  %v4460_v26 = vshrl.u32 %v14936_v46, 16 }
 0x220   : > { %16532 = vst [vmem:[#allocation9_spill] sm:$0xff] %v15110_v19  ;;  %v15147_v29 = vsel %vm12844_vm5, %v4423_v30, %v4427_v1  ;;  %v4469_v1 = vshll.u32 %v14939_v13, 16  ;;  %v10499_v30 = vcombine.low %v4404_v52, %v4414_v28  ;;  %v15933_v19 = vld [vmem:[%s12948_s30 + $0x178] sm:$0xff] }
 0x222   : > { %4323 = vmatmul.mubr.bf16.gmra.mrb[60].mxu1 %v3275_v56  ;;  %v11417_v22 = vpop.f32.mrb[88].mxu1  ;;  %v10986_v56 = vld [vmem:[%s12948_s30 + $0x108] sm:$0xff]  ;;  %v4471_v52 = vrot.slane %v4469_v1, 5  ;;  %v4493_v1 = vshrl.u32 %v14951_v24, 16 }
 0x223   : > { %10539 = vmatprep.mubr.msk.bf16.mxu1 %vm2231_vm6, %v10498_v9  ;;  %v11418_v4 = vpop.f32.mrb[89].mxu1  ;;  %v4433_v9 = vrot.slane %v4432_v35, 4  ;;  %v11038_v60 = vcombine.high %v15135_v6, %v10986_v56 }
 0x224   : > { %v15125_v38 = vadd.f32 %v11418_v4, %v11417_v22  ;;  %v11420_v45 = vpop.f32.mrb[90].mxu1  ;;  %8053 = vmatmul.mubr.bf16.gmra.mrb[28].mxu0 %v11033_v49  ;;  %v4442_v49 = vor.u32 %v4441_v33, %v4437_v42  ;;  %v4455_v22 = vshll.u32 %v4340_v23, 16  ;;  %v4463_v4 = vshll.u32 %v14936_v46, 16 }
 0x225   : > { %v11421_v21 = vpop.f32.mrb[91].mxu1  ;;  %11069 = vmatprep.mubr.msk.bf16.mxu0 %vm2231_vm6, %v11036_v2  ;;  %v15151_v47 = vsel %vm12844_vm5, %v4433_v9, %v4437_v42  ;;  %v4452_v2 = vor.u32 %v4451_v54, %v4447_v63 }
 0x226   : > { %16533 = vst [vmem:[#allocation10_spill] sm:$0xff] %v15125_v38  ;;  %v15132_v5 = vadd.f32 %v11421_v21, %v11420_v45  ;;  %v4473_v45 = vshrl.u32 %v14939_v13, 16  ;;  %v10502_v33 = vcombine.high %v15147_v29, %v15151_v47  ;;  %v4443_v46 = vrot.slane %v4442_v49, 4  ;;  %v12352_v13 = vld [vmem:[%s16511_s3 + $0xb0] sm:$0xff]   ;;  %v5160_v38 = vld [vmem:[%s12948_s30 + $0x78] sm:$0xee] }
 0x227   : > { %v4453_v54 = vrot.slane %v4452_v2, 4  ;;  %v4465_v23 = vrot.slane %v4463_v4, 5 }
 0x228   : > { %16534 = vst [vmem:[#allocation11_spill] sm:$0xff] %v15132_v5  ;;  %v4475_v28 = vrot.slane %v4473_v45, 4  ;;  %v15178_v2 = vsel %vm12844_vm5, %v4443_v46, %v4447_v63  ;;  %v12359_v63 = vld [vmem:[%s16511_s3 + $0xb8] sm:$0xff]   ;;  %v15202_v46 = vld [vmem:[%s12948_s30 + $0x128] sm:$0xff] }
 0x22a   : > { %4997 = vmatmul.mubr.bf16.vlgmr.msra.gmra.mrb[0].mxu1 %v10497_v40  ;;  %v11423_v14 = vpop.f32.mrb[92].mxu1  ;;  %v4476_v4 = vor.u32 %v4475_v28, %v4471_v52  ;;  %v4495_v28 = vrot.slane %v4493_v1, 4 }
 0x22b   : > { %5551 = vmatpush1.bf16.msra.mxu1 %v12341_v48  ;;  %10540 = vmatprep.mubr.msk.bf16.mxu1 %vm2231_vm6, %v10500_v58  ;;  %v11424_v35 = vpop.f32.mrb[93].mxu1  ;;  %v4457_v48 = vrot.slane %v4455_v22, 5  ;;  %v4462_v58 = vrot.slane %v4460_v26, 4 }
 0x22c   : > { %v15161_v40 = vadd.f32 %v11424_v35, %v11423_v14  ;;  %v11426_v21 = vpop.f32.mrb[94].mxu1  ;;  %5552 = vmatprep.subr.bf16.mxu1 %v16519_v0  ;;  %8061 = vmatmul.mubr.bf16.gmra.mrb[32].mxu0 %v11035_v27  ;;  %v11037_v27 = vcombine.low %v15135_v6, %v10986_v56  ;;  %v12346_v14 = vld [vmem:[%s12948_s30 + $0x11c] ss:$8 sps:$4 sm:$0xff]   ;;  %v4483_v35 = vshrl.u32 %v14948_v53, 16 }
 0x22d   : > { %v11427_v42 = vpop.f32.mrb[95].mxu1  ;;  %11070 = vmatprep.mubr.msk.bf16.mxu0 %vm2231_vm6, %v11038_v60  ;;  %v4479_v60 = vshll.u32 %v14948_v53, 16  ;;  %v15182_v22 = vsel %vm12844_vm5, %v4453_v54, %v4457_v48  ;;  %v4466_v26 = vor.u32 %v4465_v23, %v4462_v58  ;;  %v4345_v54 = vld [vmem:[%s12948_s30 + $0x70] sm:$0x11]  ;;  %v4504_v58 = vshrl.u32 %v14967_v62, 16 }
 0x22e   : > { %16535 = vst [vmem:[#allocation12_spill] sm:$0xff] %v15161_v40  ;;  %v15167_v9 = vadd.f32 %v11427_v42, %v11426_v21  ;;  %v10501_v21 = vcombine.low %v15147_v29, %v15151_v47  ;;  %v10504_v42 = vcombine.high %v15178_v2, %v15182_v22  ;;  %v4485_v48 = vrot.slane %v4483_v35, 4  ;;  %v15207_v23 = vld [vmem:[%s12948_s30 + $0x130] sm:$0xff]  ;;  %v15877_v40 = vld [vmem:[%s12948_s30 + $0x160] sm:$0x11] }
 0x22f   : > { %5553 = vmatpush1.bf16.msra.mxu1 %v12345_v39  ;;  %v4489_v39 = vshll.u32 %v14951_v24, 16  ;;  %v4467_v29 = vrot.slane %v4466_v26, 4  ;;  %v4477_v47 = vrot.slane %v4476_v4, 4  ;;  %v4517_v35 = vshrl.u32 %v14970_v7, 16 }
 0x230   : > { %16536 = vst [vmem:[#allocation13_spill] sm:$0xff] %v15167_v9  ;;  %5554 = vmatprep.subr.bf16.mxu1 %v16519_v0  ;;  %v4499_v4 = vshll.u32 %v4345_v54, 16  ;;  %v4506_v1 = vrot.slane %v4504_v58, 4  ;;  %v4533_v58 = vshll.u32 %v14995_v36, 16  ;;  %v12455_v9 = vld [vmem:[%s12948_s30 + $0x68] sm:$0xff] }
 0x232   : > { %5005 = vmatmul.mubr.bf16.gmra.mrb[4].mxu1 %v10499_v30  ;;  %v11429_v49 = vpop.f32.mrb[96].mxu1 }
 0x233   : > { %10541 = vmatprep.mubr.msk.bf16.mxu1 %vm2231_vm6, %v10502_v33  ;;  %v11430_v56 = vpop.f32.mrb[97].mxu1  ;;  %5555 = vmatpush1.bf16.msra.mxu1 %v12352_v13  ;;  %v4481_v33 = vrot.slane %v4479_v60, 5  ;;  %v4491_v13 = vrot.slane %v4489_v39, 5  ;;  %v12365_v60 = vld [vmem:[%s16511_s3 + $0xc0] sm:$0xff]   ;;  %v11042_v39 = vcombine.high %v15202_v46, %v15207_v23 }
 0x234   : > { %v15191_v45 = vadd.f32 %v11430_v56, %v11429_v49  ;;  %v11432_v53 = vpop.f32.mrb[98].mxu1  ;;  %5556 = vmatprep.subr.bf16.mxu1 %v16519_v0  ;;  %8069 = vmatmul.mubr.bf16.gmra.mrb[36].mxu0 %v11037_v27  ;;  %v4507_v27 = vshll.u32 %v14967_v62, 16  ;;  %v4513_v49 = vshll.u32 %v14970_v7, 16 }
 0x235   : > { %v11433_v30 = vpop.f32.mrb[99].mxu1  ;;  %11071 = vmatprep.mubr.msk.bf16.mxu0 %vm2231_vm6, %v12346_v14  ;;  %v12348_v14 = vld [vmem:[%s12948_s30 + $0x118] ss:$8 sps:$4 sm:$0xff]   ;;  %v4486_v26 = vor.u32 %v4485_v48, %v4481_v33  ;;  %v4496_v7 = vor.u32 %v4495_v28, %v4491_v13  ;;  %v10503_v28 = vcombine.low %v15178_v2, %v15182_v22  ;;  %v15248_v2 = vrot.slane %v4533_v58, 5 }
 0x236   : > { %16537 = vst [vmem:[#allocation14_spill] sm:$0xff] %v15191_v45  ;;  %v15199_v24 = vadd.f32 %v11433_v30, %v11432_v53  ;;  %v15226_v53 = vsel %vm12844_vm5, %v4477_v47, %v4481_v33  ;;  %v12370_v30 = vld [vmem:[%s16511_s3 + $0xc8] sm:$0xff]   ;;  %v4519_v47 = vrot.slane %v4517_v35, 4 }
 0x237   : > { %5557 = vmatpush1.bf16.msra.mxu1 %v12359_v63  ;;  %v15222_v63 = vsel %vm12844_vm5, %v4467_v29, %v4471_v52  ;;  %v4537_v52 = vshrl.u32 %v14995_v36, 16  ;;  %v4515_v29 = vrot.slane %v4513_v49, 5  ;;  %v12372_v49 = vld [vmem:[%s16511_s3 + $0xd0] sm:$0xff]  }
 0x238   : > { %16538 = vst [vmem:[#allocation15_spill] sm:$0xff] %v15199_v24  ;;  %5558 = vmatprep.subr.bf16.mxu1 %v16519_v0  ;;  %v10506_v36 = vcombine.high %v15222_v63, %v15226_v53  ;;  %v12364_v45 = vld [vmem:[%s12948_s30 + $0x168] ss:$8 sps:$4 sm:$0xff]  }
 0x239   : > { %v4539_v22 = vrot.slane %v4537_v52, 4  ;;  %v4557_v52 = vshll.u32 %v15021_v57, 16 }
 0x23a   : > { %5013 = vmatmul.mubr.bf16.gmra.mrb[8].mxu1 %v10501_v21  ;;  %v11435_v56 = vpop.f32.mrb[100].mxu1  ;;  %v4509_v21 = vrot.slane %v4507_v27, 5 }
 0x23b   : > { %10542 = vmatprep.mubr.msk.bf16.mxu1 %vm2231_vm6, %v10504_v42  ;;  %v11436_v62 = vpop.f32.mrb[101].mxu1  ;;  %5559 = vmatpush1.bf16.msra.mxu1 %v12365_v60  ;;  %v4527_v42 = vshrl.u32 %v14992_v12, 16  ;;  %v4487_v60 = vrot.slane %v4486_v26, 4  ;;  %v4520_v26 = vor.u32 %v4519_v47, %v4515_v29 }
 0x23c   : > { %v15231_v54 = vadd.f32 %v11436_v62, %v11435_v56  ;;  %v11438_v48 = vpop.f32.mrb[102].mxu1  ;;  %5560 = vmatprep.subr.bf16.mxu1 %v16519_v0  ;;  %8077 = vmatmul.mubr.bf16.gmra.mrb[40].mxu0 %v12348_v14  ;;  %v4523_v56 = vshll.u32 %v14992_v12, 16  ;;  %v4497_v62 = vrot.slane %v4496_v7, 4  ;;  %v4501_v14 = vrot.slane %v4499_v4, 5 }
 0x23d   : > { %v11439_v33 = vpop.f32.mrb[103].mxu1  ;;  %11072 = vmatprep.mubr.msk.bf16.mxu0 %vm2231_vm6, %v11042_v39  ;;  %v4510_v0 = vor.u32 %v4509_v21, %v4506_v1  ;;  %v4529_v35 = vrot.slane %v4527_v42, 4  ;;  %v16541_v39 = vmov 0   ;;  %v11041_v12 = vcombine.low %v15202_v46, %v15207_v23  ;;  %v12354_v1 = vld [vmem:[%s12948_s30 + $0x144] ss:$8 sps:$4 sm:$0xff]  }
 0x23e   : > { %16539 = vst [vmem:[#allocation16_spill] sm:$0xff] %v15231_v54  ;;  %v15240_v27 = vadd.f32 %v11439_v33, %v11438_v48  ;;  %v4350_v48 = vld [vmem:[%s12948_s30 + $0x98] sm:$0x11]  ;;  %v4548_v7 = vshrl.u32 %v15018_v41, 16  ;;  %v4551_v4 = vshll.u32 %v15018_v41, 16  ;;  %v15259_v21 = vsel %vm12844_vm5, %v4487_v60, %v4491_v13 }
 0x23f   : > { %5561 = vmatpush1.bf16.msra.mxu1 %v12370_v30  ;;  %v4525_v30 = vrot.slane %v4523_v56, 5  ;;  %v15264_v58 = vsel %vm12844_vm5, %v4497_v62, %v4501_v14  ;;  %v4511_v23 = vrot.slane %v4510_v0, 4  ;;  %v4561_v41 = vshrl.u32 %v15021_v57, 16  ;;  %v12374_v13 = vld [vmem:[%s16511_s3 + $0xd8] sm:$0xff]   ;;  %v11077_v14 = vld [vmem:[%s12948_s30 + $0x50] sm:$0xff] }
 0x240   : > { %16540 = vst [vmem:[#allocation17_spill] sm:$0xff] %v15240_v27  ;;  %5562 = vmatprep.subr.bf16.mxu1 %v16541_v39  ;;  %v4543_v60 = vshll.u32 %v4350_v48, 16  ;;  %v4550_v62 = vrot.slane %v4548_v7, 4  ;;  %v4553_v57 = vrot.slane %v4551_v4, 5  ;;  %v11078_v4 = vld [vmem:[%s12948_s30 + $0x58] sm:$0xff] }
 0x241   : > { %v4530_v47 = vor.u32 %v4529_v35, %v4525_v30  ;;  %v4563_v7 = vrot.slane %v4561_v41, 4  ;;  %v8201_v41 = vshll.u32 %v11077_v14, 16 }
 0x242   : > { %5021 = vmatmul.mubr.bf16.gmra.mrb[12].mxu1 %v10503_v28  ;;  %v11441_v42 = vpop.f32.mrb[104].mxu1  ;;  %v4540_v28 = vor.u32 %v4539_v22, %v15248_v2  ;;  %v10508_v22 = vcombine.high %v15259_v21, %v15264_v58 }
 0x243   : > { %10543 = vmatprep.mubr.msk.bf16.mxu1 %vm2231_vm6, %v10506_v36  ;;  %5563 = vmatpush1.bf16.msra.mxu1 %v12372_v49  ;;  %v11442_v33 = vpop.f32.mrb[105].mxu1  ;;  %v4521_v36 = vrot.slane %v4520_v26, 4  ;;  %v10505_v49 = vcombine.low %v15222_v63, %v15226_v53  ;;  %v15287_v26 = vrot.slane %v4557_v52, 5  ;;  %v12376_v63 = vld [vmem:[%s16511_s3 + $0xe0] sm:$0xff]   ;;  %v4531_v53 = vrot.slane %v4530_v47, 4 }
 0x244   : > { %5564 = vmatprep.subr.bf16.mxu1 %v16541_v39  ;;  %8085 = vmatmul.mubr.bf16.gmra.mrb[44].mxu0 %v11041_v12  ;;  %v15273_v0 = vadd.f32 %v11442_v33, %v11441_v42  ;;  %v11444_v56 = vpop.f32.mrb[106].mxu1  ;;  %v15285_v12 = vsel %vm12844_vm5, %v4511_v23, %v4515_v29  ;;  %v4545_v42 = vrot.slane %v4543_v60, 5  ;;  %v8198_v33 = vshrl.u32 %v11077_v14, 16 }
 0x245   : > { %11073 = vmatprep.mubr.msk.bf16.mxu0 %vm2231_vm6, %v12354_v1  ;;  %v11445_v35 = vpop.f32.mrb[107].mxu1  ;;  %v4541_v1 = vrot.slane %v4540_v28, 4  ;;  %v15297_v29 = vsel %vm12844_vm5, %v4521_v36, %v4525_v30  ;;  %v4554_v23 = vor.u32 %v4553_v57, %v4550_v62  ;;  %v4567_v52 = vshll.u32 %v15043_v31, 16  ;;  %v12378_v30 = vld [vmem:[%s16511_s3 + $0xe8] sm:$0xff]  }
 0x246   : > { %16542 = vst [vmem:[#allocation18_spill] sm:$0xff] %v15273_v0  ;;  %v15281_v48 = vadd.f32 %v11445_v35, %v11444_v56  ;;  %v12356_v56 = vld [vmem:[%s12948_s30 + $0x140] ss:$8 sps:$4 sm:$0xff]   ;;  %v8207_v35 = vshll.u32 %v11078_v4, 16  ;;  %v10507_v47 = vcombine.low %v15259_v21, %v15264_v58  ;;  %v4564_v60 = vor.u32 %v4563_v7, %v15287_v26 }
 0x247   : > { %5565 = vmatpush1.bf16.msra.mxu1 %v12374_v13  ;;  %v12357_v13 = vld [vmem:[%s12948_s30 + $0x154] ss:$8 sps:$4 sm:$0xff]   ;;  %v10510_v62 = vcombine.high %v15285_v12, %v15297_v29  ;;  %v15313_v57 = vsel %vm12844_vm5, %v4531_v53, %v15248_v2  ;;  %v15317_v21 = vsel %vm12844_vm5, %v4541_v1, %v4545_v42  ;;  %v8200_v58 = vrot.slane %v8198_v33, 4  ;;  %v11079_v53 = vld [vmem:[%s12948_s30 + $0x60] sm:$0xff] }
 0x248   : > { %16543 = vst [vmem:[#allocation19_spill] sm:$0xff] %v15281_v48  ;;  %5566 = vmatprep.subr.bf16.mxu1 %v16541_v39  ;;  %v8211_v48 = vshrl.u32 %v11078_v4, 16  ;;  %v15322_v7 = vrot.slane %v4567_v52, 5  ;;  %v8203_v4 = vrot.slane %v8201_v41, 5  ;;  %v8209_v0 = vrot.slane %v8207_v35, 5 }
 0x249   : > { %v4571_v1 = vshrl.u32 %v15043_v31, 16  ;;  %v4577_v42 = vshll.u32 %v15046_v59, 16  ;;  %v4581_v33 = vshrl.u32 %v15046_v59, 16  ;;  %v10509_v31 = vcombine.low %v15285_v12, %v15297_v29 }
 0x24a   : > { %5029 = vmatmul.mubr.bf16.gmra.mrb[16].mxu1 %v10505_v49  ;;  %v11447_v28 = vpop.f32.mrb[108].mxu1  ;;  %v8213_v52 = vrot.slane %v8211_v48, 4  ;;  %v10512_v35 = vcombine.high %v15313_v57, %v15317_v21  ;;  %v8204_v59 = vor.u32 %v8203_v4, %v8200_v58  ;;  %v11081_v58 = vld [vmem:[%s12948_s30 + $0x70] sm:$0x11] }
 0x24b   : > { %10544 = vmatprep.mubr.msk.bf16.mxu1 %vm2231_vm6, %v10508_v22  ;;  %5567 = vmatpush1.bf16.msra.mxu1 %v12376_v63  ;;  %v11448_v36 = vpop.f32.mrb[109].mxu1  ;;  %v4555_v22 = vrot.slane %v4554_v23, 4  ;;  %v11080_v63 = vld [vmem:[%s12948_s30 + $0x68] sm:$0xff]  ;;  %v4565_v23 = vrot.slane %v4564_v60, 4  ;;  %v8217_v60 = vshll.u32 %v11079_v53, 16  ;;  %v4573_v48 = vrot.slane %v4571_v1, 4 }
 0x24c   : > { %5568 = vmatprep.subr.bf16.mxu1 %v16541_v39  ;;  %8093 = vmatmul.mubr.bf16.gmra.mrb[48].mxu0 %v12356_v56  ;;  %v15320_v14 = vadd.f32 %v11448_v36, %v11447_v28  ;;  %v11450_v49 = vpop.f32.mrb[110].mxu1  ;;  %v8221_v28 = vshrl.u32 %v11079_v53, 16  ;;  %v8227_v41 = vshll.u32 %v11080_v63, 16  ;;  %v8231_v36 = vshrl.u32 %v11080_v63, 16 }
 0x24d   : > { %11074 = vmatprep.mubr.msk.bf16.mxu0 %vm2231_vm6, %v12357_v13  ;;  %v11451_v2 = vpop.f32.mrb[111].mxu1  ;;  %v12360_v13 = vld [vmem:[%s12948_s30 + $0x150] ss:$8 sps:$4 sm:$0xff]   ;;  %v15350_v12 = vsel %vm12844_vm5, %v4565_v23, %v15322_v7  ;;  %v8214_v29 = vor.u32 %v8213_v52, %v8209_v0  ;;  %v4601_v23 = vshll.u32 %v15073_v3, 16  ;;  %v4605_v52 = vshrl.u32 %v15073_v3, 16 }
 0x24e   : > { %16544 = vst [vmem:[#allocation20_spill] sm:$0xff] %v15320_v14  ;;  %v15330_v56 = vadd.f32 %v11451_v2, %v11450_v49  ;;  %v12362_v49 = vld [vmem:[%s12948_s30 + $0x16c] ss:$8 sps:$4 sm:$0xff]   ;;  %v15339_v2 = vrot.slane %v4577_v42, 5  ;;  %v8223_v4 = vrot.slane %v8221_v28, 4  ;;  %v15354_v1 = vrot.slane %v8227_v41, 5 }
 0x24f   : > { %5569 = vmatpush1.bf16.msra.mxu1 %v12378_v30  ;;  %v4583_v30 = vrot.slane %v4581_v33, 4  ;;  %v8233_v42 = vrot.slane %v8231_v36, 4  ;;  %v4595_v33 = vshll.u32 %v15070_v50, 16  ;;  %v8205_v14 = vrot.slane %v8204_v59, 4  ;;  %v11082_v3 = vld [vmem:[%s12948_s30 + $0x78] sm:$0xff] }
 0x250   : > { %16545 = vst [vmem:[#allocation21_spill] sm:$0xff] %v15330_v56  ;;  %11477 = vmatprep.subr.bf16.mxu1 %v16541_v39  ;;  %v15345_v56 = vsel %vm12844_vm5, %v4555_v22, %v15287_v26  ;;  %v8219_v41 = vrot.slane %v8217_v60, 5  ;;  %v4574_v36 = vor.u32 %v4573_v48, %v15322_v7  ;;  %v10511_v59 = vcombine.low %v15313_v57, %v15317_v21  ;;  %v11083_v60 = vld [vmem:[%s12948_s30 + $0x80] sm:$0xff] }
 0x251   : > { %v4597_v24 = vrot.slane %v4595_v33, 5  ;;  %v10514_v7 = vcombine.high %v15345_v56, %v15350_v12  ;;  %v15377_v48 = vsel %vm12844_vm5, %v8205_v14, %v8209_v0  ;;  %v12366_v57 = vld [vmem:[%s12948_s30 + $0x17c] ss:$8 sps:$4 sm:$0xff]   ;;  %v8245_v33 = vshll.u32 %v11082_v3, 16 }
 0x252   : > { %5037 = vmatmul.mubr.bf16.gmra.mrb[20].mxu1 %v10507_v47  ;;  %v11453_v63 = vpop.f32.mrb[112].mxu1  ;;  %v4355_v47 = vld [vmem:[%s12948_s30 + $0xc0] sm:$0x11]  ;;  %v4575_v21 = vrot.slane %v4574_v36, 4 }
 0x253   : > { %10545 = vmatprep.mubr.msk.bf16.mxu1 %vm2231_vm6, %v10510_v62  ;;  %v11454_v53 = vpop.f32.mrb[113].mxu1  ;;  %v4592_v62 = vshrl.u32 %v15070_v50, 16  ;;  %v4584_v50 = vor.u32 %v4583_v30, %v15339_v2  ;;  %v4603_v30 = vrot.slane %v4601_v23, 5 }
 0x254   : > { %8101 = vmatmul.mubr.bf16.gmra.mrb[52].mxu0 %v12360_v13  ;;  %v15358_v26 = vadd.f32 %v11454_v53, %v11453_v63  ;;  %v11456_v22 = vpop.f32.mrb[114].mxu1  ;;  %v4587_v13 = vshll.u32 %v4355_v47, 16  ;;  %v8215_v63 = vrot.slane %v8214_v29, 4  ;;  %v8237_v53 = vshll.u32 %v11081_v58, 16 }
 0x255   : > { %11075 = vmatprep.mubr.msk.bf16.mxu0 %vm2231_vm6, %v12362_v49  ;;  %v11457_v28 = vpop.f32.mrb[115].mxu1  ;;  %v8234_v49 = vor.u32 %v8233_v42, %v15354_v1  ;;  %v4594_v54 = vrot.slane %v4592_v62, 4  ;;  %v4607_v47 = vrot.slane %v4605_v52, 4  ;;  %v4585_v29 = vrot.slane %v4584_v50, 4 }
 0x256   : > { %16546 = vst [vmem:[#allocation22_spill] sm:$0xff] %v15358_v26  ;;  %v15365_v27 = vadd.f32 %v11457_v28, %v11456_v22  ;;  %v8224_v26 = vor.u32 %v8223_v4, %v8219_v41  ;;  %v4589_v58 = vrot.slane %v4587_v13, 5  ;;  %v8242_v4 = vshrl.u32 %v11082_v3, 16 }
 0x257   : > { %v15383_v62 = vsel %vm12844_vm5, %v8215_v63, %v8219_v41  ;;  %v8251_v22 = vshll.u32 %v11083_v60, 16  ;;  %v8255_v28 = vshrl.u32 %v11083_v60, 16  ;;  %v8235_v23 = vrot.slane %v8234_v49, 4 }
 0x258   : > { %16547 = vst [vmem:[#allocation23_spill] sm:$0xff] %v15365_v27  ;;  %v8225_v14 = vrot.slane %v8224_v26, 4  ;;  %v8239_v52 = vrot.slane %v8237_v53, 5  ;;  %v4608_v13 = vor.u32 %v4607_v47, %v4603_v30  ;;  %v4611_v41 = vshll.u32 %v15090_v20, 16  ;;  %v11085_v47 = vld [vmem:[%s12948_s30 + $0x90] sm:$0xff] }
 0x259   : > { %v8247_v3 = vrot.slane %v8245_v33, 5  ;;  %v15404_v49 = vrot.slane %v8251_v22, 5  ;;  %v8257_v60 = vrot.slane %v8255_v28, 4  ;;  %v4621_v22 = vshll.u32 %v15093_v17, 16 }
 0x25a   : > { %5045 = vmatmul.mubr.bf16.gmra.mrb[24].mxu1 %v10509_v31  ;;  %v11459_v42 = vpop.f32.mrb[116].mxu1  ;;  %v4598_v31 = vor.u32 %v4597_v24, %v4594_v54  ;;  %v15400_v24 = vsel %vm12844_vm5, %v4585_v29, %v4589_v58  ;;  %v8244_v54 = vrot.slane %v8242_v4, 4  ;;  %v11084_v29 = vld [vmem:[%s12948_s30 + $0x88] sm:$0xff]  ;;  %v4615_v58 = vshrl.u32 %v15090_v20, 16  ;;  %v12369_v4 = vld [vmem:[%s12948_s30 + $0x178] ss:$8 sps:$4 sm:$0xff]  }
 0x25b   : > { %10546 = vmatprep.mubr.msk.bf16.mxu1 %vm2231_vm6, %v10512_v35  ;;  %v11460_v0 = vpop.f32.mrb[117].mxu1  ;;  %v4613_v33 = vrot.slane %v4611_v41, 5  ;;  %v4625_v28 = vshrl.u32 %v15093_v17, 16 }
 0x25c   : > { %8109 = vmatmul.mubr.bf16.gmra.mrb[56].mxu0 %v12364_v45  ;;  %v15385_v36 = vadd.f32 %v11460_v0, %v11459_v42  ;;  %v11462_v50 = vpop.f32.mrb[118].mxu1  ;;  %v15396_v45 = vsel %vm12844_vm5, %v4575_v21, %v15339_v2  ;;  %v15414_v2 = vsel %vm12844_vm5, %v8235_v23, %v8239_v52  ;;  %v4599_v21 = vrot.slane %v4598_v31, 4 }
 0x25d   : > { %11076 = vmatprep.mubr.msk.bf16.mxu0 %vm2231_vm6, %v12366_v57  ;;  %v11463_v63 = vpop.f32.mrb[119].mxu1  ;;  %v15410_v57 = vsel %vm12844_vm5, %v8225_v14, %v15354_v1  ;;  %v4609_v42 = vrot.slane %v4608_v13, 4  ;;  %v11138_v1 = vcombine.high %v15377_v48, %v15383_v62  ;;  %v8265_v0 = vshrl.u32 %v11084_v29, 16 }
 0x25e   : > { %16548 = vst [vmem:[#allocation24_spill] sm:$0xff] %v15385_v36  ;;  %v15402_v53 = vadd.f32 %v11463_v63, %v11462_v50  ;;  %v8271_v14 = vshll.u32 %v11085_v47, 16  ;;  %v8275_v50 = vshrl.u32 %v11085_v47, 16  ;;  %v10516_v20 = vcombine.high %v15396_v45, %v15400_v24  ;;  %v11088_v36 = vld [vmem:[%s12948_s30 + $0xa8] sm:$0xff] }
 0x25f   : > { %v8248_v52 = vor.u32 %v8247_v3, %v8244_v54  ;;  %v8258_v31 = vor.u32 %v8257_v60, %v15404_v49  ;;  %v8261_v13 = vshll.u32 %v11084_v29, 16  ;;  %v11140_v17 = vcombine.high %v15410_v57, %v15414_v2 }
 0x260   : > { %16549 = vst [vmem:[#allocation25_spill] sm:$0xff] %v15402_v53  ;;  %v15433_v63 = vsel %vm12844_vm5, %v4599_v21, %v4603_v30  ;;  %v15439_v3 = vsel %vm12844_vm5, %v4609_v42, %v4613_v33  ;;  %v4623_v60 = vrot.slane %v4621_v22, 5  ;;  %v4627_v29 = vrot.slane %v4625_v28, 4  ;;  %v4360_v21 = vld [vmem:[%s12948_s30 + $0xe8] sm:$0x11]  ;;  %v11087_v22 = vld [vmem:[%s12948_s30 + $0xa0] sm:$0xff] }
 0x261   : > { %v8249_v26 = vrot.slane %v8248_v52, 4  ;;  %v8259_v35 = vrot.slane %v8258_v31, 4  ;;  %v8263_v42 = vrot.slane %v8261_v13, 5  ;;  %v10518_v28 = vcombine.high %v15433_v63, %v15439_v3  ;;  %v12371_v31 = vld [vmem:[%s16511_s3 + $0x280] sm:$0xff]  }
 0x262   : > { %5053 = vmatmul.mubr.bf16.gmra.mrb[28].mxu1 %v10511_v59  ;;  %v11465_v23 = vpop.f32.mrb[120].mxu1  ;;  %v4636_v53 = vshrl.u32 %v15113_v51, 16  ;;  %v4639_v30 = vshll.u32 %v15113_v51, 16  ;;  %v16552_v52 = vcombine.low %v15345_v56, %v15350_v12  ;;  %v8286_v51 = vshrl.u32 %v11087_v22, 16 }
 0x263   : > { %10547 = vmatprep.mubr.msk.bf16.mxu1 %vm2231_vm6, %v10514_v7  ;;  %v11466_v41 = vpop.f32.mrb[121].mxu1  ;;  %v4617_v7 = vrot.slane %v4615_v58, 4  ;;  %v8267_v58 = vrot.slane %v8265_v0, 4  ;;  %v4628_v0 = vor.u32 %v4627_v29, %v4623_v60  ;;  %v8295_v29 = vshll.u32 %v11088_v36, 16 }
 0x264   : > { %8117 = vmatmul.mubr.bf16.gmra.mrb[60].mxu0 %v12369_v4  ;;  %v15435_v47 = vadd.f32 %v11466_v41, %v11465_v23  ;;  %v11468_v54 = vpop.f32.mrb[122].mxu1  ;;  %v15445_v4 = vrot.slane %v8271_v14, 5  ;;  %v8277_v23 = vrot.slane %v8275_v50, 4  ;;  %v4631_v14 = vshll.u32 %v4360_v21, 16 }
 0x265   : > { %11179 = vmatprep.mubr.msk.bf16.mxu0 %vm2231_vm6, %v11138_v1  ;;  %v11469_v59 = vpop.f32.mrb[123].mxu1  ;;  %v4618_v1 = vor.u32 %v4617_v7, %v4613_v33  ;;  %v4645_v50 = vshll.u32 %v15117_v32, 16  ;;  %v8268_v33 = vor.u32 %v8267_v58, %v8263_v42  ;;  %v8299_v56 = vshrl.u32 %v11088_v36, 16  ;;  %v12373_v36 = vld [vmem:[%s16511_s3 + $0x288] sm:$0xff]  }
 0x266   : > { %16550 = vst [vmem:[#allocation26_spill] sm:$0xff] %v15435_v47  ;;  %v15447_v41 = vadd.f32 %v11469_v59, %v11468_v54  ;;  %v11086_v47 = vld [vmem:[%s12948_s30 + $0x98] sm:$0x11]  ;;  %v4649_v59 = vshrl.u32 %v15117_v32, 16  ;;  %v8278_v13 = vor.u32 %v8277_v23, %v15445_v4  ;;  %v15469_v54 = vsel %vm12844_vm5, %v8249_v26, %v15404_v49 }
 0x267   : > { %v8281_v7 = vshll.u32 %v11086_v47, 16  ;;  %v8289_v32 = vshll.u32 %v11087_v22, 16  ;;  %v15473_v12 = vsel %vm12844_vm5, %v8259_v35, %v8263_v42  ;;  %v4619_v21 = vrot.slane %v4618_v1, 4  ;;  %v4364_v22 = vld [vmem:[%s12948_s30 + $0x108] sm:$0xff] }
 0x268   : > { %16551 = vst [vmem:[#allocation27_spill] sm:$0xff] %v15447_v41  ;;  %v4638_v58 = vrot.slane %v4636_v53, 4  ;;  %v4641_v47 = vrot.slane %v4639_v30, 5  ;;  %v4629_v23 = vrot.slane %v4628_v0, 4  ;;  %v15478_v26 = vrot.slane %v4645_v50, 5 }
 0x269   : > { %v4651_v49 = vrot.slane %v4649_v59, 4  ;;  %v8269_v35 = vrot.slane %v8268_v33, 4  ;;  %v8279_v53 = vrot.slane %v8278_v13, 4  ;;  %v8283_v42 = vrot.slane %v8281_v7, 5 }
 0x26a   : > { %5061 = vmatmul.mubr.bf16.gmra.mrb[32].mxu1 %v16552_v52  ;;  %v4633_v52 = vrot.slane %v4631_v14, 5  ;;  %v8288_v30 = vrot.slane %v8286_v51, 4  ;;  %v15489_v1 = vrot.slane %v8295_v29, 5  ;;  %v8301_v0 = vrot.slane %v8299_v56, 4 }
 0x26b   : > { %10548 = vmatprep.mubr.msk.bf16.mxu1 %vm2231_vm6, %v10516_v20  ;;  %v16553_v20 = vcombine.low %v15377_v48, %v15383_v62  ;;  %v15487_v48 = vld [vmem:[%s12948_s30 + $0xb0] sm:$0xff]  ;;  %v8291_v62 = vrot.slane %v8289_v32, 5  ;;  %v4659_v14 = vshrl.u32 %v15135_v6, 16  ;;  %v15496_v50 = vsel %vm12844_vm5, %v4619_v21, %v4623_v60  ;;  %v11090_v21 = vld [vmem:[%s12948_s30 + $0xb8] sm:$0xff] }
 0x26c   : > { %v4642_v59 = vor.u32 %v4641_v47, %v4638_v58  ;;  %v15501_v33 = vsel %vm12844_vm5, %v4629_v23, %v4633_v52  ;;  %v4652_v13 = vor.u32 %v4651_v49, %v15478_v26  ;;  %v4665_v7 = vshll.u32 %v4364_v22, 16  ;;  %v12375_v60 = vld [vmem:[%s16511_s3 + $0x290] sm:$0xff]  }
 0x26d   : > { %8823 = vmatmul.mubr.bf16.vlgmr.msra.gmra.mrb[0].mxu0 %v16553_v20  ;;  %v4669_v51 = vshrl.u32 %v4364_v22, 16  ;;  %v16554_v32 = vcombine.low %v15396_v45, %v15400_v24  ;;  %v8305_v45 = vshll.u32 %v15487_v48, 16  ;;  %v11141_v24 = vcombine.low %v15469_v54, %v15473_v12  ;;  %v4365_v23 = vld [vmem:[%s12948_s30 + $0x110] sm:$0x11] }
 0x26e   : > { %9377 = vmatpush1.bf16.msra.mxu0 %v12371_v31  ;;  %11180 = vmatprep.mubr.msk.bf16.mxu0 %vm2231_vm6, %v11140_v17  ;;  %v10517_v17 = vcombine.low %v15433_v63, %v15439_v3  ;;  %v4655_v31 = vshll.u32 %v15135_v6, 16  ;;  %v11142_v63 = vcombine.high %v15469_v54, %v15473_v12  ;;  %v15512_v6 = vsel %vm12844_vm5, %v8269_v35, %v15445_v4 }
 0x26f   : > { %9378 = vmatprep.subr.bf16.mxu0 %v16541_v39  ;;  %v15516_v3 = vsel %vm12844_vm5, %v8279_v53, %v8283_v42  ;;  %v8292_v4 = vor.u32 %v8291_v62, %v8288_v30  ;;  %v8302_v29 = vor.u32 %v8301_v0, %v15489_v1  ;;  %v4661_v56 = vrot.slane %v4659_v14, 4  ;;  %v4366_v53 = vld [vmem:[%s12948_s30 + $0x118] sm:$0xff]  ;;  %v4367_v42 = vld [vmem:[%s12948_s30 + $0x120] sm:$0xff] }
 0x270   : > { %v10520_v58 = vcombine.high %v15496_v50, %v15501_v33  ;;  %v10519_v47 = vcombine.low %v15496_v50, %v15501_v33  ;;  %v4643_v20 = vrot.slane %v4642_v59, 4  ;;  %v16555_v54 = vcombine.low %v15410_v57, %v15414_v2  ;;  %v12377_v0 = vld [vmem:[%s16511_s3 + $0x298] sm:$0xff]  }
 0x271   : > { %v11144_v52 = vcombine.high %v15512_v6, %v15516_v3  ;;  %v4653_v49 = vrot.slane %v4652_v13, 4  ;;  %v4671_v35 = vrot.slane %v4669_v51, 4  ;;  %v15543_v22 = vrot.slane %v8305_v45, 5  ;;  %v15552_v51 = vld [vmem:[%s12948_s30 + $0xc0] sm:$0x11] }
 0x272   : > { %5069 = vmatmul.mubr.bf16.gmra.mrb[36].mxu1 %v16554_v32  ;;  %9379 = vmatpush1.bf16.msra.mxu0 %v12373_v36  ;;  %v15538_v36 = vrot.slane %v4665_v7, 5  ;;  %v8309_v57 = vshrl.u32 %v15487_v48, 16  ;;  %v8315_v2 = vshll.u32 %v11090_v21, 16  ;;  %v8319_v62 = vshrl.u32 %v11090_v21, 16 }
 0x273   : > { %10549 = vmatprep.mubr.msk.bf16.mxu1 %vm2231_vm6, %v10518_v28  ;;  %9380 = vmatprep.subr.bf16.mxu0 %v16541_v39  ;;  %v4657_v28 = vrot.slane %v4655_v31, 5  ;;  %v8293_v31 = vrot.slane %v8292_v4, 4  ;;  %v8303_v13 = vrot.slane %v8302_v29, 4  ;;  %v4683_v48 = vshll.u32 %v4366_v53, 16 }
 0x274   : > { %v4693_v45 = vshrl.u32 %v4367_v42, 16  ;;  %v4672_v4 = vor.u32 %v4671_v35, %v15538_v36  ;;  %v4675_v29 = vshll.u32 %v4365_v23, 16  ;;  %v8325_v23 = vshll.u32 %v15552_v51, 16 }
 0x275   : > { %8831 = vmatmul.mubr.bf16.gmra.mrb[4].mxu0 %v16555_v54  ;;  %v11471_v12 = vpop.f32.mrb[124].mxu1  ;;  %v4662_v7 = vor.u32 %v4661_v56, %v4657_v28  ;;  %v15560_v54 = vsel %vm12844_vm5, %v4643_v20, %v15478_v26  ;;  %v15565_v56 = vsel %vm12844_vm5, %v4653_v49, %v4657_v28  ;;  %v12379_v26 = vld [vmem:[%s16511_s3 + $0x2a0] sm:$0xff]   ;;  %v15582_v20 = vsel %vm12844_vm5, %v8303_v13, %v15543_v22  ;;  %v15586_v49 = vld [vmem:[%s12948_s30 + $0xd0] sm:$0xff] }
 0x276   : > { %v11472_v30 = vpop.f32.mrb[125].mxu1  ;;  %11181 = vmatprep.mubr.msk.bf16.mxu0 %vm2231_vm6, %v11142_v63  ;;  %9381 = vmatpush1.bf16.msra.mxu0 %v12375_v60  ;;  %v4680_v63 = vshrl.u32 %v4366_v53, 16  ;;  %v4689_v60 = vshll.u32 %v4367_v42, 16  ;;  %v15567_v53 = vrot.slane %v8315_v2, 5  ;;  %v8321_v42 = vrot.slane %v8319_v62, 4 }
 0x277   : > { %v15549_v14 = vadd.f32 %v11472_v30, %v11471_v12  ;;  %v11474_v59 = vpop.f32.mrb[126].mxu1  ;;  %9382 = vmatprep.subr.bf16.mxu0 %v16541_v39  ;;  %v8311_v12 = vrot.slane %v8309_v57, 4  ;;  %v11092_v30 = vld [vmem:[%s12948_s30 + $0xc8] sm:$0xff]  ;;  %v4663_v28 = vrot.slane %v4662_v7, 4  ;;  %v4685_v57 = vrot.slane %v4683_v48, 5 }
 0x278   : > { %v11475_v32 = vpop.f32.mrb[127].mxu1  ;;  %v4682_v35 = vrot.slane %v4680_v63, 4  ;;  %v4695_v2 = vrot.slane %v4693_v45, 4  ;;  %v4677_v62 = vrot.slane %v4675_v29, 5  ;;  %v8322_v13 = vor.u32 %v8321_v42, %v15567_v53 }
 0x279   : > { %16556 = vst [vmem:[#allocation28_spill] sm:$0xff] %v15549_v14  ;;  %v15555_v21 = vadd.f32 %v11475_v32, %v11474_v59  ;;  %v8333_v59 = vshll.u32 %v11092_v30, 16  ;;  %v8339_v7 = vshll.u32 %v15586_v49, 16  ;;  %v8343_v32 = vshrl.u32 %v15586_v49, 16 }
 0x27a   : > { %5077 = vmatmul.mubr.bf16.gmra.mrb[40].mxu1 %v10517_v17  ;;  %9383 = vmatpush1.bf16.msra.mxu0 %v12377_v0  ;;  %v15577_v17 = vsel %vm12844_vm5, %v8293_v31, %v15489_v1  ;;  %v15591_v1 = vrot.slane %v4672_v4, 4  ;;  %v8330_v0 = vshrl.u32 %v11092_v30, 16  ;;  %v8312_v31 = vor.u32 %v8311_v12, %v15543_v22 }
 0x27b   : > { %16557 = vst [vmem:[#allocation29_spill] sm:$0xff] %v15555_v21  ;;  %10550 = vmatprep.mubr.msk.bf16.mxu1 %vm2231_vm6, %v10520_v58  ;;  %9384 = vmatprep.subr.bf16.mxu0 %v16541_v39  ;;  %v15589_v58 = vrot.slane %v4689_v60, 5  ;;  %v11143_v63 = vcombine.low %v15512_v6, %v15516_v3  ;;  %v11146_v22 = vcombine.high %v15577_v17, %v15582_v20  ;;  %v8327_v60 = vrot.slane %v8325_v23, 5  ;;  %v15616_v3 = vld [vmem:[%s12948_s30 + $0x130] sm:$0xff] }
 0x27c   : > { %v15610_v48 = vsel %vm12844_vm5, %v4663_v28, %v15538_v36  ;;  %v4686_v45 = vor.u32 %v4685_v57, %v4682_v35  ;;  %v4699_v6 = vshll.u32 %v15202_v46, 16  ;;  %v15621_v29 = vsel %vm12844_vm5, %v15591_v1, %v4677_v62  ;;  %v12381_v57 = vld [vmem:[%s16511_s3 + $0x2b0] sm:$0xff]  }
 0x27d   : > { %8839 = vmatmul.mubr.bf16.gmra.mrb[8].mxu0 %v11141_v24  ;;  %v12380_v24 = vld [vmem:[%s16511_s3 + $0x2a8] sm:$0xff]   ;;  %v4696_v4 = vor.u32 %v4695_v2, %v15589_v58  ;;  %v8332_v12 = vrot.slane %v8330_v0, 4  ;;  %v8335_v42 = vrot.slane %v8333_v59, 5  ;;  %v4703_v30 = vshrl.u32 %v15202_v46, 16  ;;  %v15632_v2 = vld [vmem:[%s12948_s30 + $0xd8] sm:$0xff]  ;;  %v15642_v59 = vld [vmem:[%s12948_s30 + $0xe0] sm:$0xff] }
 0x27e   : > { %11182 = vmatprep.mubr.msk.bf16.mxu0 %vm2231_vm6, %v11144_v52  ;;  %9385 = vmatpush1.bf16.msra.mxu0 %v12379_v26  ;;  %v10522_v52 = vcombine.high %v15560_v54, %v15565_v56  ;;  %v8313_v26 = vrot.slane %v8312_v31, 4  ;;  %v8323_v28 = vrot.slane %v8322_v13, 4  ;;  %v8341_v23 = vrot.slane %v8339_v7, 5 }
 0x27f   : > { %9386 = vmatprep.subr.bf16.mxu0 %v16541_v39  ;;  %v8345_v35 = vrot.slane %v8343_v32, 4  ;;  %v4709_v46 = vshll.u32 %v15616_v3, 16  ;;  %v4713_v62 = vshrl.u32 %v15616_v3, 16  ;;  %v10521_v50 = vcombine.low %v15560_v54, %v15565_v56 }
 0x280   : > { %v4687_v33 = vrot.slane %v4686_v45, 4  ;;  %v4701_v0 = vrot.slane %v4699_v6, 5  ;;  %v10524_v31 = vcombine.high %v15610_v48, %v15621_v29  ;;  %v8336_v13 = vor.u32 %v8335_v42, %v8332_v12  ;;  %v12382_v45 = vld [vmem:[%s16511_s3 + $0x2b8] sm:$0xff]  }
 0x281   : > { %v4705_v7 = vrot.slane %v4703_v30, 4  ;;  %v8353_v32 = vshrl.u32 %v15632_v2, 16  ;;  %v15651_v54 = vsel %vm12844_vm5, %v8313_v26, %v15567_v53  ;;  %v15655_v56 = vsel %vm12844_vm5, %v8323_v28, %v8327_v60 }
 0x282   : > { %5085 = vmatmul.mubr.bf16.gmra.mrb[44].mxu1 %v10519_v47  ;;  %9387 = vmatpush1.bf16.msra.mxu0 %v12380_v24  ;;  %v15639_v47 = vrot.slane %v4696_v4, 4  ;;  %v8346_v24 = vor.u32 %v8345_v35, %v8341_v23  ;;  %v4715_v4 = vrot.slane %v4713_v62, 4  ;;  %v8359_v53 = vshll.u32 %v15642_v59, 16  ;;  %v15690_v62 = vld [vmem:[%s12948_s30 + $0xe8] sm:$0x11] }
 0x283   : > { %10551 = vmatprep.mubr.msk.bf16.mxu1 %vm2231_vm6, %v10522_v52  ;;  %9388 = vmatprep.subr.bf16.mxu0 %v16541_v39  ;;  %v15659_v52 = vld [vmem:[%s12948_s30 + $0x138] sm:$0x11]  ;;  %v8363_v6 = vshrl.u32 %v15642_v59, 16  ;;  %v11145_v60 = vcombine.low %v15577_v17, %v15582_v20  ;;  %v15674_v12 = vsel %vm12844_vm5, %v4687_v33, %v15589_v58  ;;  %v8337_v30 = vrot.slane %v8336_v13, 4  ;;  %v12383_v58 = vld [vmem:[%s16511_s3 + $0x2c0] sm:$0xff]   ;;  %v15693_v13 = vld [vmem:[%s12948_s30 + $0xf0] sm:$0xff] }
 0x284   : > { %v15679_v42 = vsel %vm12844_vm5, %v15639_v47, %v4701_v0  ;;  %v4706_v26 = vor.u32 %v4705_v7, %v4701_v0  ;;  %v4719_v28 = vshll.u32 %v15659_v52, 16  ;;  %v8355_v35 = vrot.slane %v8353_v32, 4  ;;  %v15701_v32 = vld [vmem:[%s12948_s30 + $0xf8] sm:$0xff] }
 0x285   : > { %8847 = vmatmul.mubr.bf16.gmra.mrb[12].mxu0 %v11143_v63  ;;  %v8349_v63 = vshll.u32 %v15632_v2, 16  ;;  %v11148_v17 = vcombine.high %v15651_v54, %v15655_v56  ;;  %v8347_v20 = vrot.slane %v8346_v24, 4  ;;  %v8361_v33 = vrot.slane %v8359_v53, 5 }
 0x286   : > { %11183 = vmatprep.mubr.msk.bf16.mxu0 %vm2231_vm6, %v11146_v22  ;;  %9389 = vmatpush1.bf16.msra.mxu0 %v12381_v57  ;;  %v15664_v22 = vrot.slane %v4709_v46, 5  ;;  %v8365_v0 = vrot.slane %v8363_v6, 4  ;;  %v10526_v7 = vcombine.high %v15674_v12, %v15679_v42  ;;  %v4707_v24 = vrot.slane %v4706_v26, 4 }
 0x287   : > { %9390 = vmatprep.subr.bf16.mxu0 %v16541_v39  ;;  %v8351_v57 = vrot.slane %v8349_v63, 5  ;;  %v4721_v63 = vrot.slane %v4719_v28, 5  ;;  %v8369_v53 = vshll.u32 %v15690_v62, 16  ;;  %v8387_v26 = vshrl.u32 %v15701_v32, 16 }
 0x288   : > { %v4716_v46 = vor.u32 %v4715_v4, %v15664_v22  ;;  %v11147_v28 = vcombine.low %v15651_v54, %v15655_v56 }
 0x289   : > { %v8352_v4 = vsel %vm12844_vm5, %v8347_v20, %v8351_v57  ;;  %v8389_v27 = vrot.slane %v8387_v26, 4 }
 0x28a   : > { %5093 = vmatmul.mubr.bf16.gmra.mrb[48].mxu1 %v10521_v50  ;;  %9391 = vmatpush1.bf16.msra.mxu0 %v12382_v45  ;;  %v10523_v50 = vcombine.low %v15610_v48, %v15621_v29  ;;  %v8356_v45 = vor.u32 %v8355_v35, %v8351_v57  ;;  %v8374_v48 = vshrl.u32 %v15693_v13, 16  ;;  %v8377_v29 = vshll.u32 %v15693_v13, 16 }
 0x28b   : > { %10552 = vmatprep.mubr.msk.bf16.mxu1 %vm2231_vm6, %v10524_v31  ;;  %9392 = vmatprep.subr.bf16.mxu0 %v16541_v39  ;;  %v8342_v31 = vsel %vm12844_vm5, %v8337_v30, %v8341_v23  ;;  %v12384_v23 = vld [vmem:[%s16511_s3 + $0x2c8] sm:$0xff]   ;;  %v15714_v6 = vrot.slane %v4716_v46, 4  ;;  %v8383_v30 = vshll.u32 %v15701_v32, 16  ;;  %v8371_v57 = vrot.slane %v8369_v53, 5  ;;  %v12442_v53 = vld [vmem:[%s12948_s30 + $0x10] sm:$0xff] }
 0x28c   : > { %v11150_v35 = vcombine.high %v8342_v31, %v8352_v4  ;;  %v8357_v20 = vrot.slane %v8356_v45, 4  ;;  %v12441_v46 = vld [vmem:[%s12948_s30 + $0x8] sm:$0xff]  ;;  %v8376_v21 = vrot.slane %v8374_v48, 4  ;;  %v8379_v14 = vrot.slane %v8377_v29, 5 }
 0x28d   : > { %8855 = vmatmul.mubr.bf16.gmra.mrb[16].mxu0 %v11145_v60  ;;  %v8366_v60 = vor.u32 %v8365_v0, %v8361_v33  ;;  %v5207_v0 = vrot.slane %v12441_v46, 5  ;;  %v4722_v54 = vsel %vm12844_vm5, %v15714_v6, %v4721_v63  ;;  %v8385_v41 = vrot.slane %v8383_v30, 5  ;;  %v15750_v46 = vld [vmem:[%s12948_s30 + $0x110] sm:$0x11] }
 0x28e   : > { %11184 = vmatprep.mubr.msk.bf16.mxu0 %vm2231_vm6, %v11148_v17  ;;  %9393 = vmatpush1.bf16.msra.mxu0 %v12383_v58  ;;  %v4712_v17 = vsel %vm12844_vm5, %v4707_v24, %v15664_v22  ;;  %v5157_v58 = vld [vmem:[%s12948_s30] sm:$0xee]  ;;  %v5210_v48 = vrot.slane %v12442_v53, 5  ;;  %v8413_v53 = vshll.u32 %v15750_v46, 16 }
 0x28f   : > { %9394 = vmatprep.subr.bf16.mxu0 %v16541_v39  ;;  %v8367_v56 = vrot.slane %v8366_v60, 4  ;;  %v15731_v24 = vld [vmem:[%s12948_s30 + $0x100] sm:$0xff]  ;;  %v10555_v45 = vrot.slane %v5157_v58, 9  ;;  %v10528_v29 = vcombine.high %v4712_v17, %v4722_v54  ;;  %v5209_v63 = vrot.slane %v5207_v0, 4 }
 0x290   : > { %v8390_v30 = vor.u32 %v8389_v27, %v8385_v41  ;;  %v8393_v26 = vshll.u32 %v15731_v24, 16  ;;  %v12443_v27 = vld [vmem:[%s12948_s30 + $0x18] sm:$0xff] }
 0x291   : > { %v8372_v60 = vsel %vm12844_vm5, %v8367_v56, %v8371_v57  ;;  %v5213_v57 = vrot.slane %v12443_v27, 5 }
 0x292   : > { %5101 = vmatmul.mubr.bf16.gmra.mrb[52].mxu1 %v10523_v50  ;;  %9395 = vmatpush1.bf16.msra.mxu0 %v12384_v23  ;;  %v10525_v50 = vcombine.low %v15674_v12, %v15679_v42  ;;  %v8380_v23 = vor.u32 %v8379_v14, %v8376_v21  ;;  %v8397_v42 = vshrl.u32 %v15731_v24, 16  ;;  %v8391_v21 = vrot.slane %v8390_v30, 4 }
 0x293   : > { %10553 = vmatprep.mubr.msk.bf16.mxu1 %vm2231_vm6, %v10526_v7  ;;  %v8362_v7 = vsel %vm12844_vm5, %v8357_v20, %v8361_v33  ;;  %v5211_v33 = vsel %vm12771_vm2, %v5209_v63, %v5210_v48  ;;  %v8395_v20 = vrot.slane %v8393_v26, 5  ;;  %v8415_v26 = vrot.slane %v8413_v53, 5 }
 0x294   : > { %v11152_v58 = vcombine.high %v8362_v7, %v8372_v60  ;;  %v8381_v14 = vrot.slane %v8380_v23, 4  ;;  %v8399_v56 = vrot.slane %v8397_v42, 4  ;;  %v5215_v23 = vrot.slane %v5213_v57, 4 }
 0x295   : > { %8863 = vmatmul.mubr.bf16.gmra.mrb[20].mxu0 %v11147_v28  ;;  %v11149_v28 = vcombine.low %v8342_v31, %v8352_v4  ;;  %v10527_v31 = vcombine.low %v4712_v17, %v4722_v54  ;;  %v8396_v63 = vsel %vm12844_vm5, %v8391_v21, %v8395_v20  ;;  %v11151_v17 = vcombine.low %v8362_v7, %v8372_v60  ;;  %v15767_v21 = vld [vmem:[%s12948_s30 + $0x128] sm:$0xff] }
 0x296   : > { %11185 = vmatprep.mubr.msk.bf16.mxu0 %vm2231_vm6, %v11150_v35  ;;  %v5208_v35 = vsel %vm12771_vm2, %v10555_v45, %v5207_v0  ;;  %v12444_v0 = vld [vmem:[%s12948_s30 + $0x20] sm:$0x11]  ;;  %v8400_v30 = vor.u32 %v8399_v56, %v8395_v20  ;;  %v15773_v20 = vsel %vm12844_vm5, %v15591_v1, %v8415_v26 }
 0x297   : > { %v10584_v4 = vcombine.high %v5208_v35, %v5211_v33  ;;  %v5216_v45 = vrot.slane %v12444_v0, 5  ;;  %v10583_v7 = vcombine.low %v5208_v35, %v5211_v33  ;;  %v8441_v35 = vshrl.u32 %v15767_v21, 16  ;;  %v15782_v0 = vld [vmem:[%s12948_s30 + $0x140] sm:$0xff] }
 0x298   : > { %v8462_v26 = vshrl.u32 %v15782_v0, 16 }
 0x299   : > { %v5217_v42 = vsel %vm12771_vm2, %v5215_v23, %v5216_v45  ;;  %v15785_v45 = vld [vmem:[%s12948_s30 + $0x148] sm:$0xff] }
 0x29a   : > { %5109 = vmatmul.mubr.bf16.gmra.mrb[56].mxu1 %v10525_v50  ;;  %v5212_v50 = vrot.slane %v5210_v48, 4 }
 0x29b   : > { %10554 = vmatprep.mubr.msk.bf16.mxu1 %vm2231_vm6, %v10528_v29  ;;  %v8386_v29 = vsel %vm12844_vm5, %v8381_v14, %v8385_v41  ;;  %v5158_v41 = vld [vmem:[%s12948_s30 + $0x28] sm:$0xee] }
 0x29c   : > { %v11154_v54 = vcombine.high %v8386_v29, %v8396_v63  ;;  %v5214_v48 = vsel %vm12771_vm2, %v5212_v50, %v5213_v57  ;;  %v10556_v27 = vrot.slane %v5158_v41, 9  ;;  %v8437_v57 = vshll.u32 %v15767_v21, 16 }
 0x29d   : > { %8871 = vmatmul.mubr.bf16.gmra.mrb[24].mxu0 %v11149_v28  ;;  %v8401_v28 = vrot.slane %v8400_v30, 4  ;;  %v10586_v60 = vcombine.high %v5214_v48, %v5217_v42  ;;  %v11153_v33 = vcombine.low %v8386_v29, %v8396_v63  ;;  %v12448_v63 = vld [vmem:[%s12948_s30 + $0x40] sm:$0xff]  ;;  %v8471_v41 = vshll.u32 %v15785_v45, 16 }
 0x29e   : > { %11186 = vmatprep.mubr.msk.bf16.mxu0 %vm2231_vm6, %v11152_v58  ;;  %v12445_v58 = vld [vmem:[%s12948_s30 + $0x30] sm:$0xff]  ;;  %v8439_v53 = vrot.slane %v8437_v57, 5  ;;  %v5226_v30 = vrot.slane %v12448_v63, 5  ;;  %v12449_v57 = vld [vmem:[%s16511_s3 + $0xf8] sm:$0xff]  }
 0x29f   : > { %v5220_v14 = vrot.slane %v12445_v58, 5  ;;  %v8406_v56 = vsel %vm12844_vm5, %v8401_v28, %v15538_v36  ;;  %v12447_v36 = vld [vmem:[%s16511_s3 + $0xf0] sm:$0xff]   ;;  %v8465_v28 = vshll.u32 %v15782_v0, 16  ;;  %v8475_v58 = vshrl.u32 %v15785_v45, 16 }
 0x2a0   : > { %v11156_v1 = vcombine.high %v8406_v56, %v15773_v20  ;;  %v15825_v63 = vld [vmem:[%s12948_s30 + $0x150] sm:$0xff] }
 0x2a1   : > { %v15794_v23 = vsel %vm12771_vm2, %v10556_v27, %v5220_v14 }
 0x2a2   : > { %5117 = vmatmul.mubr.bf16.gmra.mrb[60].mxu1 %v10527_v31  ;;  %v5222_v31 = vrot.slane %v5220_v14, 4  ;;  %v10585_v14 = vcombine.low %v5214_v48, %v5217_v42 }
 0x2a3   : > { %10625 = vmatprep.mubr.msk.bf16.mxu1 %vm2231_vm6, %v10584_v4  ;;  %v12446_v4 = vld [vmem:[%s12948_s30 + $0x38] sm:$0xff] }
 0x2a4   : > { %v5223_v50 = vrot.slane %v12446_v4, 5  ;;  %v12450_v4 = vld [vmem:[%s12948_s30 + $0x48] sm:$0x11] }
 0x2a5   : > { %8879 = vmatmul.mubr.bf16.gmra.mrb[28].mxu0 %v11151_v17  ;;  %v8443_v17 = vrot.slane %v8441_v35, 4  ;;  %v5229_v35 = vrot.slane %v12450_v4, 5  ;;  %v15830_v4 = vld [vmem:[%s12948_s30 + $0x158] sm:$0xff] }
 0x2a6   : > { %11187 = vmatprep.mubr.msk.bf16.mxu0 %vm2231_vm6, %v11154_v54  ;;  %v15798_v29 = vsel %vm12771_vm2, %v5222_v31, %v5223_v50  ;;  %v15803_v54 = vld [vmem:[%s12948_s30 + $0x138] sm:$0x11]  ;;  %v5225_v27 = vrot.slane %v5223_v50, 4  ;;  %v5228_v31 = vrot.slane %v5226_v30, 4  ;;  %v8477_v50 = vrot.slane %v8475_v58, 4 }
 0x2a7   : > { %v8444_v48 = vor.u32 %v8443_v17, %v8439_v53  ;;  %v8457_v42 = vshll.u32 %v15803_v54, 16 }
 0x2a8   : > { %v15839_v17 = vsel %vm12771_vm2, %v5228_v31, %v5229_v35  ;;  %v8491_v31 = vshll.u32 %v15830_v4, 16  ;;  %v8495_v35 = vshrl.u32 %v15830_v4, 16 }
 0x2aa   : > { %5583 = vmatmul.mubr.bf16.vlgmr.msra.gmra.mrb[0].mxu1 %v10583_v7  ;;  %v10588_v7 = vcombine.high %v15794_v23, %v15798_v29 }
 0x2ab   : > { %11487 = vmatpush1.bf16.msra.mxu1 %v12447_v36  ;;  %10626 = vmatprep.mubr.msk.bf16.mxu1 %vm2231_vm6, %v10586_v60  ;;  %v15815_v60 = vsel %vm12844_vm5, %v15639_v47, %v8439_v53  ;;  %v8473_v47 = vrot.slane %v8471_v41, 5  ;;  %v11155_v36 = vcombine.low %v8406_v56, %v15773_v20  ;;  %v15835_v53 = vsel %vm12771_vm2, %v5225_v27, %v5226_v30  ;;  %v12451_v56 = vld [vmem:[%s16511_s3 + $0x100] sm:$0xff]   ;;  %v12452_v41 = vld [vmem:[%s12948_s30 + $0x58] sm:$0xff] }
 0x2ac   : > { %11478 = vmatprep.subr.bf16.mxu1 %v16541_v39  ;;  %v8459_v20 = vrot.slane %v8457_v42, 5  ;;  %v5233_v58 = vrot.slane %v12452_v41, 5  ;;  %v8481_v30 = vshll.u32 %v15825_v63, 16  ;;  %v8485_v27 = vshrl.u32 %v15825_v63, 16 }
 0x2ad   : > { %8887 = vmatmul.mubr.bf16.gmra.mrb[32].mxu0 %v11153_v33  ;;  %v8464_v33 = vrot.slane %v8462_v26, 4  ;;  %v8445_v26 = vrot.slane %v8444_v48, 4  ;;  %v10587_v48 = vcombine.low %v15794_v23, %v15798_v29  ;;  %v10590_v42 = vcombine.high %v15835_v53, %v15839_v17  ;;  %v12454_v23 = vld [vmem:[%s16511_s3 + $0x108] sm:$0xff]  }
 0x2ae   : > { %11188 = vmatprep.mubr.msk.bf16.mxu0 %vm2231_vm6, %v11156_v1  ;;  %v8467_v1 = vrot.slane %v8465_v28, 5  ;;  %v5159_v28 = vld [vmem:[%s12948_s30 + $0x50] sm:$0xee]  ;;  %v5235_v29 = vrot.slane %v5233_v58, 4  ;;  %v8497_v41 = vrot.slane %v8495_v35, 4  ;;  %v8501_v35 = vshll.u32 %v15877_v40, 16 }
 0x2af   : > { %11488 = vmatpush1.bf16.msra.mxu1 %v12449_v57  ;;  %v11158_v57 = vcombine.high %v15674_v12, %v15815_v60 }
 0x2b0   : > { %11479 = vmatprep.subr.bf16.mxu1 %v16541_v39 }
 0x2b2   : > { %5591 = vmatmul.mubr.bf16.gmra.mrb[4].mxu1 %v10585_v14  ;;  %v8468_v14 = vor.u32 %v8467_v1, %v8464_v33  ;;  %v15859_v33 = vsel %vm12844_vm5, %v8445_v26, %v15664_v22  ;;  %v15864_v1 = vsel %vm12844_vm5, %v15714_v6, %v8459_v20  ;;  %v8483_v26 = vrot.slane %v8481_v30, 5 }
 0x2b3   : > { %10627 = vmatprep.mubr.msk.bf16.mxu1 %vm2231_vm6, %v10588_v7  ;;  %11489 = vmatpush1.bf16.msra.mxu1 %v12451_v56  ;;  %v8478_v7 = vor.u32 %v8477_v50, %v8473_v47  ;;  %v10557_v50 = vrot.slane %v5159_v28, 9  ;;  %v11157_v6 = vcombine.low %v15674_v12, %v15815_v60  ;;  %v8487_v20 = vrot.slane %v8485_v27, 4  ;;  %v12456_v12 = vld [vmem:[%s16511_s3 + $0x110] sm:$0xff]  }
 0x2b4   : > { %11480 = vmatprep.subr.bf16.mxu1 %v16541_v39  ;;  %v8469_v56 = vrot.slane %v8468_v14, 4  ;;  %v8493_v28 = vrot.slane %v8491_v31, 5  ;;  %v10589_v14 = vcombine.low %v15835_v53, %v15839_v17  ;;  %v15903_v17 = vld [vmem:[%s12948_s30 + $0x170] sm:$0xff] }
 0x2b5   : > { %8895 = vmatmul.mubr.bf16.gmra.mrb[36].mxu0 %v11155_v36  ;;  %v12453_v36 = vld [vmem:[%s12948_s30 + $0x60] sm:$0xff]  ;;  %v8479_v22 = vrot.slane %v8478_v7, 4  ;;  %v11112_v7 = vld [vmem:[%s12948_s30 + $0x168] sm:$0xff]  ;;  %v15888_v60 = vsel %vm12771_vm2, %v10557_v50, %v5233_v58  ;;  %v8488_v58 = vor.u32 %v8487_v20, %v8483_v26 }
 0x2b6   : > { %11189 = vmatprep.mubr.msk.bf16.mxu0 %vm2231_vm6, %v11158_v57  ;;  %v5236_v57 = vrot.slane %v12453_v36, 5  ;;  %v11160_v36 = vcombine.high %v15859_v33, %v15864_v1  ;;  %v15896_v30 = vsel %vm12844_vm5, %v8469_v56, %v8473_v47  ;;  %v8498_v31 = vor.u32 %v8497_v41, %v8493_v28 }
 0x2b7   : > { %11490 = vmatpush1.bf16.msra.mxu1 %v12454_v23  ;;  %v5239_v23 = vrot.slane %v12455_v9, 5  ;;  %v15900_v53 = vsel %vm12844_vm5, %v8479_v22, %v8483_v26  ;;  %v8506_v50 = vshrl.u32 %v11112_v7, 16  ;;  %v8515_v22 = vshll.u32 %v15903_v17, 16 }
 0x2b8   : > { %11481 = vmatprep.subr.bf16.mxu1 %v16541_v39  ;;  %v15892_v9 = vsel %vm12771_vm2, %v5235_v29, %v5236_v57  ;;  %v5238_v27 = vrot.slane %v5236_v57, 4  ;;  %v8509_v29 = vshll.u32 %v11112_v7, 16  ;;  %v12458_v57 = vld [vmem:[%s16511_s3 + $0x118] sm:$0xff]   ;;  %v11159_v26 = vcombine.low %v15859_v33, %v15864_v1 }
 0x2b9   : > { %v10592_v56 = vcombine.high %v15888_v60, %v15892_v9  ;;  %v11162_v20 = vcombine.high %v15896_v30, %v15900_v53  ;;  %v8499_v7 = vrot.slane %v8498_v31, 4  ;;  %v8508_v1 = vrot.slane %v8506_v50, 4  ;;  %v15941_v31 = vld [vmem:[%s12948_s30 + $0x180] sm:$0xff]  ;;  %v12461_v50 = vld [vmem:[%s12948_s30 + $0x88] sm:$0xff] }
 0x2ba   : > { %5599 = vmatmul.mubr.bf16.gmra.mrb[8].mxu1 %v10587_v48  ;;  %v5241_v48 = vrot.slane %v5239_v23, 4  ;;  %v15923_v41 = vsel %vm12771_vm2, %v5238_v27, %v5239_v23  ;;  %v8511_v5 = vrot.slane %v8509_v29, 5  ;;  %v8517_v23 = vrot.slane %v8515_v22, 5 }
 0x2bb   : > { %10628 = vmatprep.mubr.msk.bf16.mxu1 %vm2231_vm6, %v10590_v42  ;;  %11491 = vmatpush1.bf16.msra.mxu1 %v12456_v12  ;;  %v12457_v42 = vld [vmem:[%s12948_s30 + $0x70] sm:$0x11]  ;;  %v8503_v12 = vrot.slane %v8501_v35, 5  ;;  %v5249_v29 = vrot.slane %v12461_v50, 5  ;;  %v8525_v22 = vshll.u32 %v15933_v19, 16 }
 0x2bc   : > { %11482 = vmatprep.subr.bf16.mxu1 %v16541_v39  ;;  %v5242_v47 = vrot.slane %v12457_v42, 5 }
 0x2bd   : > { %8903 = vmatmul.mubr.bf16.gmra.mrb[40].mxu0 %v11157_v6  ;;  %v8519_v6 = vshrl.u32 %v15903_v17, 16 }
 0x2be   : > { %11190 = vmatprep.mubr.msk.bf16.mxu0 %vm2231_vm6, %v11160_v36  ;;  %v8489_v36 = vrot.slane %v8488_v58, 4  ;;  %v15927_v42 = vsel %vm12771_vm2, %v5241_v48, %v5242_v47  ;;  %v10591_v58 = vcombine.low %v15888_v60, %v15892_v9  ;;  %v8504_v47 = vsel %vm12844_vm5, %v8499_v7, %v8503_v12 }
 0x2bf   : > { %11492 = vmatpush1.bf16.msra.mxu1 %v12458_v57  ;;  %v12459_v57 = vld [vmem:[%s12948_s30 + $0x80] sm:$0xff]  ;;  %v8521_v27 = vrot.slane %v8519_v6, 4  ;;  %v10594_v35 = vcombine.high %v15923_v41, %v15927_v42  ;;  %v8512_v9 = vor.u32 %v8511_v5, %v8508_v1  ;;  %v8527_v12 = vrot.slane %v8525_v22, 5 }
 0x2c0   : > { %11483 = vmatprep.subr.bf16.mxu1 %v16541_v39  ;;  %v5246_v33 = vrot.slane %v12459_v57, 5  ;;  %v8494_v48 = vsel %vm12844_vm5, %v8489_v36, %v8493_v28  ;;  %v8535_v57 = vshll.u32 %v15941_v31, 16  ;;  %v12462_v28 = vld [vmem:[%s16511_s3 + $0x128] sm:$0xff]  }
 0x2c1   : > { %v8522_v6 = vor.u32 %v8521_v27, %v8517_v23  ;;  %v11164_v5 = vcombine.high %v8494_v48, %v8504_v47  ;;  %v8513_v7 = vrot.slane %v8512_v9, 4 }
 0x2c2   : > { %5607 = vmatmul.mubr.bf16.gmra.mrb[12].mxu1 %v10589_v14  ;;  %v12460_v14 = vld [vmem:[%s16511_s3 + $0x120] sm:$0xff]   ;;  %v5248_v60 = vrot.slane %v5246_v33, 4  ;;  %v8537_v50 = vrot.slane %v8535_v57, 5  ;;  %v5251_v57 = vrot.slane %v5249_v29, 4 }
 0x2c3   : > { %10629 = vmatprep.mubr.msk.bf16.mxu1 %vm2231_vm6, %v10592_v56  ;;  %11493 = vmatpush1.bf16.msra.mxu1 %v12460_v14  ;;  %v10558_v56 = vrot.slane %v5160_v38, 9  ;;  %v8539_v14 = vshrl.u32 %v15941_v31, 16  ;;  %v11161_v38 = vcombine.low %v15896_v30, %v15900_v53  ;;  %v8523_v1 = vrot.slane %v8522_v6, 4  ;;  %v12463_v30 = vld [vmem:[%s16511_s3 + $0x130] sm:$0xff]  }
 0x2c4   : > { %11484 = vmatprep.subr.bf16.mxu1 %v16541_v39  ;;  %v5250_v36 = vsel %vm12771_vm2, %v5248_v60, %v5249_v29  ;;  %v12464_v53 = vld [vmem:[%s12948_s30 + $0x90] sm:$0xff]  ;;  %v8518_v60 = vsel %vm12844_vm5, %v8513_v7, %v8517_v23 }
 0x2c5   : > { %8911 = vmatmul.mubr.bf16.gmra.mrb[44].mxu0 %v11159_v26  ;;  %v8529_v26 = vshrl.u32 %v15933_v19, 16  ;;  %v8528_v9 = vsel %vm12844_vm5, %v8523_v1, %v8527_v12 }
 0x2c6   : > { %11191 = vmatprep.mubr.msk.bf16.mxu0 %vm2231_vm6, %v11162_v20  ;;  %v5247_v20 = vsel %vm12771_vm2, %v10558_v56, %v5246_v33  ;;  %v15972_v33 = vld [vmem:[%s12948_s30 + $0x188] sm:$0x11]  ;;  %v11166_v23 = vcombine.high %v8518_v60, %v8528_v9 }
 0x2c7   : > { %11494 = vmatpush1.bf16.msra.mxu1 %v12462_v28  ;;  %v8531_v27 = vrot.slane %v8529_v26, 4  ;;  %v8541_v28 = vrot.slane %v8539_v14, 4  ;;  %v10596_v56 = vcombine.high %v5247_v20, %v5250_v36  ;;  %v8545_v26 = vshll.u32 %v15972_v33, 16 }
 0x2c8   : > { %11485 = vmatprep.subr.bf16.mxu1 %v16541_v39 }
 0x2c9   : > { %v8532_v22 = vor.u32 %v8531_v27, %v8527_v12  ;;  %v8542_v6 = vor.u32 %v8541_v28, %v8537_v50  ;;  %v8547_v12 = vrot.slane %v8545_v26, 5  ;;  %v12467_v27 = vld [vmem:[%s12948_s30 + $0xa8] sm:$0xff]  ;;  %v12469_v26 = vld [vmem:[%s12948_s30 + $0xb0] sm:$0xff] }
 0x2ca   : > { %5615 = vmatmul.mubr.bf16.gmra.mrb[16].mxu1 %v10591_v58  ;;  %v5252_v58 = vrot.slane %v12464_v53, 5  ;;  %v5259_v28 = vrot.slane %v12467_v27, 5  ;;  %v12472_v27 = vld [vmem:[%s12948_s30 + $0x68] sm:$0xff] }
 0x2cb   : > { %10630 = vmatprep.mubr.msk.bf16.mxu1 %vm2231_vm6, %v10594_v35  ;;  %11495 = vmatpush1.bf16.msra.mxu1 %v12463_v30  ;;  %v10593_v35 = vcombine.low %v15923_v41, %v15927_v42  ;;  %v12466_v42 = vld [vmem:[%s12948_s30 + $0x98] sm:$0x11]  ;;  %v8543_v7 = vrot.slane %v8542_v6, 4 }
 0x2cc   : > { %11486 = vmatprep.subr.bf16.mxu1 %v16541_v39  ;;  %v12465_v39 = vld [vmem:[%s16511_s3 + $0x138] sm:$0xff]   ;;  %v5254_v41 = vrot.slane %v5252_v58, 4  ;;  %v5255_v14 = vrot.slane %v12466_v42, 5  ;;  %v5253_v1 = vsel %vm12771_vm2, %v5251_v57, %v5252_v58  ;;  %v5261_v6 = vrot.slane %v5259_v28, 4  ;;  %v11195_v57 = vld [vmem:[%s12948_s30 + $0x50] sm:$0xee] }
 0x2cd   : > { %8919 = vmatmul.mubr.bf16.gmra.mrb[48].mxu0 %v11161_v38  ;;  %v11163_v38 = vcombine.low %v8494_v48, %v8504_v47  ;;  %v5161_v48 = vld [vmem:[%s12948_s30 + $0xa0] sm:$0xee]  ;;  %v10595_v47 = vcombine.low %v5247_v20, %v5250_v36  ;;  %v12468_v58 = vld [vmem:[%s12948_s30 + $0x58] sm:$0xff]  ;;  %v11203_v20 = vrot.slane %v11195_v57, 9 }
 0x2ce   : > { %11192 = vmatprep.mubr.msk.bf16.mxu0 %vm2231_vm6, %v11164_v5  ;;  %v8533_v5 = vrot.slane %v8532_v22, 4  ;;  %v5256_v29 = vsel %vm12771_vm2, %v5254_v41, %v5255_v14  ;;  %v10559_v22 = vrot.slane %v5161_v48, 9  ;;  %v11165_v41 = vcombine.low %v8518_v60, %v8528_v9 }
 0x2cf   : > { %11496 = vmatpush1.bf16.msra.mxu1 %v12465_v39  ;;  %v10598_v30 = vcombine.high %v5253_v1, %v5256_v29  ;;  %v5262_v39 = vrot.slane %v12469_v26, 5  ;;  %v10597_v60 = vcombine.low %v5253_v1, %v5256_v29 }
 0x2d0   : > { %v8538_v53 = vsel %vm12844_vm5, %v8533_v5, %v8537_v50  ;;  %v12470_v50 = vld [vmem:[%s12948_s30 + $0x60] sm:$0xff]  ;;  %v5260_v14 = vsel %vm12771_vm2, %v10559_v22, %v5259_v28  ;;  %v9039_v28 = vrot.slane %v12472_v27, 5 }
 0x2d1   : > { %v9036_v8 = vrot.slane %v12470_v50, 5  ;;  %v5264_v48 = vrot.slane %v5262_v39, 4 }
 0x2d2   : > { %5623 = vmatmul.mubr.bf16.gmra.mrb[20].mxu1 %v10593_v35  ;;  %v8548_v35 = vsel %vm12844_vm5, %v8543_v7, %v8547_v12  ;;  %v9041_v29 = vrot.slane %v9039_v28, 4 }
 0x2d3   : > { %10631 = vmatprep.mubr.msk.bf16.mxu1 %vm2231_vm6, %v10596_v56  ;;  %v9033_v56 = vrot.slane %v12468_v58, 5  ;;  %v11168_v42 = vcombine.high %v8538_v53, %v8548_v35  ;;  %v11167_v22 = vcombine.low %v8538_v53, %v8548_v35  ;;  %v9038_v1 = vrot.slane %v9036_v8, 4  ;;  %v5162_v53 = vld [vmem:[%s12948_s30 + $0xc8] sm:$0xee] }
 0x2d5   : > { %8927 = vmatmul.mubr.bf16.gmra.mrb[52].mxu0 %v11163_v38  ;;  %v9035_v36 = vrot.slane %v9033_v56, 4  ;;  %v5263_v38 = vsel %vm12771_vm2, %v5261_v6, %v5262_v39  ;;  %v9034_v7 = vsel %vm12771_vm2, %v11203_v20, %v9033_v56  ;;  %v12474_v56 = vld [vmem:[%s12948_s30 + $0x70] sm:$0x11] }
 0x2d6   : > { %11193 = vmatprep.mubr.msk.bf16.mxu0 %vm2231_vm6, %v11166_v23  ;;  %v12471_v23 = vld [vmem:[%s12948_s30 + $0xb8] sm:$0xff]  ;;  %v10600_v9 = vcombine.high %v5260_v14, %v5263_v38  ;;  %v9042_v26 = vrot.slane %v12474_v56, 5  ;;  %v10599_v35 = vcombine.low %v5260_v14, %v5263_v38 }
 0x2d7   : > { %v5265_v5 = vrot.slane %v12471_v23, 5  ;;  %v9037_v12 = vsel %vm12771_vm2, %v9035_v36, %v9036_v8  ;;  %v9040_v36 = vsel %vm12771_vm2, %v9038_v1, %v9039_v28  ;;  %v12476_v8 = vld [vmem:[%s12948_s30 + $0x80] sm:$0xff]  ;;  %v12478_v28 = vld [vmem:[%s12948_s30 + $0x88] sm:$0xff] }
 0x2d8   : > { %v11232_v6 = vcombine.high %v9034_v7, %v9037_v12  ;;  %v9043_v50 = vsel %vm12771_vm2, %v9041_v29, %v9042_v26  ;;  %v9046_v23 = vrot.slane %v12476_v8, 5  ;;  %v12479_v1 = vld [vmem:[%s12948_s30 + $0xe0] sm:$0xff] }
 0x2d9   : > { %v5266_v57 = vsel %vm12771_vm2, %v5264_v48, %v5265_v5  ;;  %v11196_v48 = vld [vmem:[%s12948_s30 + $0x78] sm:$0xee]  ;;  %v5278_v29 = vrot.slane %v12479_v1, 5 }
 0x2da   : > { %5631 = vmatmul.mubr.bf16.gmra.mrb[24].mxu1 %v10595_v47  ;;  %v5267_v47 = vrot.slane %v5265_v5, 4  ;;  %v10560_v5 = vrot.slane %v5162_v53, 9  ;;  %v11204_v14 = vrot.slane %v11196_v48, 9  ;;  %v9048_v38 = vrot.slane %v9046_v23, 4 }
 0x2db   : > { %10632 = vmatprep.mubr.msk.bf16.mxu1 %vm2231_vm6, %v10598_v30  ;;  %v12473_v30 = vld [vmem:[%s12948_s30 + $0xc0] sm:$0x11] }
 0x2dc   : > { %v5268_v58 = vrot.slane %v12473_v30, 5  ;;  %v11234_v30 = vcombine.high %v9040_v36, %v9043_v50  ;;  %v9047_v56 = vsel %vm12771_vm2, %v11204_v14, %v9046_v23  ;;  %v12482_v23 = vld [vmem:[%s12948_s30 + $0x98] sm:$0x11] }
 0x2dd   : > { %8935 = vmatmul.mubr.bf16.gmra.mrb[56].mxu0 %v11165_v41  ;;  %v12475_v41 = vld [vmem:[%s12948_s30 + $0xd0] sm:$0xff] }
 0x2de   : > { %11194 = vmatprep.mubr.msk.bf16.mxu0 %vm2231_vm6, %v11168_v42  ;;  %v5269_v39 = vsel %vm12771_vm2, %v5267_v47, %v5268_v58  ;;  %v5272_v42 = vrot.slane %v12475_v41, 5  ;;  %v11231_v47 = vcombine.low %v9034_v7, %v9037_v12  ;;  %v9049_v58 = vrot.slane %v12478_v28, 5  ;;  %v12480_v41 = vld [vmem:[%s12948_s30 + $0x90] sm:$0xff] }
 0x2df   : > { %v10602_v20 = vcombine.high %v5266_v57, %v5269_v39  ;;  %v10601_v7 = vcombine.low %v5266_v57, %v5269_v39 }
 0x2e0   : > { %v9050_v26 = vsel %vm12771_vm2, %v9048_v38, %v9049_v58  ;;  %v9051_v57 = vrot.slane %v9049_v58, 4  ;;  %v12484_v58 = vld [vmem:[%s12948_s30 + $0xa8] sm:$0xff] }
 0x2e1   : > { %v9059_v1 = vrot.slane %v12484_v58, 5 }
 0x2e2   : > { %5639 = vmatmul.mubr.bf16.gmra.mrb[28].mxu1 %v10597_v60  ;;  %v5274_v60 = vrot.slane %v5272_v42, 4 }
 0x2e3   : > { %10633 = vmatprep.mubr.msk.bf16.mxu1 %vm2231_vm6, %v10600_v9  ;;  %v12477_v9 = vld [vmem:[%s12948_s30 + $0xd8] sm:$0xff] }
 0x2e4   : > { %v5275_v27 = vrot.slane %v12477_v9, 5  ;;  %v9055_v9 = vrot.slane %v12482_v23, 5 }
 0x2e5   : > { %8943 = vmatmul.mubr.bf16.gmra.mrb[60].mxu0 %v11167_v22  ;;  %v5273_v22 = vsel %vm12771_vm2, %v10560_v5, %v5272_v42  ;;  %v9052_v42 = vrot.slane %v12480_v41, 5  ;;  %v11233_v5 = vcombine.low %v9040_v36, %v9043_v50  ;;  %v5163_v36 = vld [vmem:[%s12948_s30 + $0xf0] sm:$0xee] }
 0x2e6   : > { %11273 = vmatprep.mubr.msk.bf16.mxu0 %vm2231_vm6, %v11232_v6  ;;  %v5276_v6 = vsel %vm12771_vm2, %v5274_v60, %v5275_v27  ;;  %v5277_v53 = vrot.slane %v5275_v27, 4  ;;  %v11236_v60 = vcombine.high %v9047_v56, %v9050_v26 }
 0x2e7   : > { %v10604_v12 = vcombine.high %v5273_v22, %v5276_v6  ;;  %v9054_v39 = vrot.slane %v9052_v42, 4  ;;  %v10603_v50 = vcombine.low %v5273_v22, %v5276_v6  ;;  %v9053_v38 = vsel %vm12771_vm2, %v9051_v57, %v9052_v42  ;;  %v12486_v42 = vld [vmem:[%s12948_s30 + $0xb0] sm:$0xff]  ;;  %v12487_v57 = vld [vmem:[%s12948_s30 + $0x108] sm:$0xff] }
 0x2e8   : > { %v5279_v48 = vsel %vm12771_vm2, %v5277_v53, %v5278_v29  ;;  %v11197_v53 = vld [vmem:[%s12948_s30 + $0xa0] sm:$0xee]  ;;  %v9061_v6 = vrot.slane %v9059_v1, 4 }
 0x2e9   : > { %v9056_v28 = vsel %vm12771_vm2, %v9054_v39, %v9055_v9  ;;  %v11205_v22 = vrot.slane %v11197_v53, 9  ;;  %v16069_v39 = vrot.slane %v12487_v57, 5  ;;  %v5164_v53 = vld [vmem:[%s12948_s30 + $0x118] sm:$0xee]  ;;  %v12491_v57 = vld [vmem:[%s12948_s30 + $0x128] sm:$0xff] }
 0x2ea   : > { %5647 = vmatmul.mubr.bf16.gmra.mrb[32].mxu1 %v10599_v35  ;;  %v5280_v35 = vrot.slane %v5278_v29, 4  ;;  %v10561_v29 = vrot.slane %v5163_v36, 9 }
 0x2eb   : > { %10634 = vmatprep.mubr.msk.bf16.mxu1 %vm2231_vm6, %v10602_v20  ;;  %v12481_v20 = vld [vmem:[%s12948_s30 + $0xe8] sm:$0x11]  ;;  %v9060_v23 = vsel %vm12771_vm2, %v11205_v22, %v9059_v1  ;;  %v9068_v1 = vrot.slane %v15552_v51, 5 }
 0x2ec   : > { %v5281_v8 = vrot.slane %v12481_v20, 5  ;;  %v11238_v20 = vcombine.high %v9053_v38, %v9056_v28 }
 0x2ed   : > { %9409 = vmatmul.mubr.bf16.vlgmr.msra.gmra.mrb[0].mxu0 %v11231_v47  ;;  %v12483_v47 = vld [vmem:[%s12948_s30 + $0xf8] sm:$0xff] }
 0x2ee   : > { %11274 = vmatprep.mubr.msk.bf16.mxu0 %vm2231_vm6, %v11234_v30  ;;  %v5282_v27 = vsel %vm12771_vm2, %v5280_v35, %v5281_v8  ;;  %v5285_v30 = vrot.slane %v12483_v47, 5  ;;  %v11235_v35 = vcombine.low %v9047_v56, %v9050_v26  ;;  %v9062_v8 = vrot.slane %v12486_v42, 5  ;;  %v12488_v47 = vld [vmem:[%s12948_s30 + $0xb8] sm:$0xff] }
 0x2ef   : > { %v10606_v14 = vcombine.high %v5279_v48, %v5282_v27  ;;  %v10605_v56 = vcombine.low %v5279_v48, %v5282_v27  ;;  %v10562_v42 = vrot.slane %v5164_v53, 9  ;;  %v9081_v53 = vrot.slane %v15690_v62, 5 }
 0x2f0   : > { %v9063_v9 = vsel %vm12771_vm2, %v9061_v6, %v9062_v8  ;;  %v9064_v48 = vrot.slane %v9062_v8, 4  ;;  %v9072_v6 = vrot.slane %v15586_v49, 5 }
 0x2f2   : > { %5655 = vmatmul.mubr.bf16.gmra.mrb[36].mxu1 %v10601_v7  ;;  %v5287_v7 = vrot.slane %v5285_v30, 4 }
 0x2f3   : > { %10635 = vmatprep.mubr.msk.bf16.mxu1 %vm2231_vm6, %v10604_v12  ;;  %v12485_v12 = vld [vmem:[%s12948_s30 + $0x100] sm:$0xff] }
 0x2f4   : > { %v5288_v41 = vrot.slane %v12485_v12, 5 }
 0x2f5   : > { %9417 = vmatmul.mubr.bf16.gmra.mrb[4].mxu0 %v11233_v5  ;;  %v5286_v5 = vsel %vm12771_vm2, %v10561_v29, %v5285_v30  ;;  %v9065_v30 = vrot.slane %v12488_v47, 5  ;;  %v11237_v29 = vcombine.low %v9053_v38, %v9056_v28  ;;  %v12490_v38 = vld [vmem:[%s12948_s30 + $0x120] sm:$0xff]  ;;  %v11239_v47 = vcombine.low %v9060_v23, %v9063_v9 }
 0x2f6   : > { %11275 = vmatprep.mubr.msk.bf16.mxu0 %vm2231_vm6, %v11236_v60  ;;  %v5289_v60 = vsel %vm12771_vm2, %v5287_v7, %v5288_v41  ;;  %v5290_v36 = vrot.slane %v5288_v41, 4  ;;  %v11240_v7 = vcombine.high %v9060_v23, %v9063_v9  ;;  %v16089_v28 = vrot.slane %v12490_v38, 5 }
 0x2f7   : > { %v10608_v26 = vcombine.high %v5286_v5, %v5289_v60  ;;  %v9067_v27 = vrot.slane %v9065_v30, 4  ;;  %v9066_v51 = vsel %vm12771_vm2, %v9064_v48, %v9065_v30  ;;  %v9075_v30 = vrot.slane %v15632_v2, 5 }
 0x2f8   : > { %v5292_v12 = vsel %vm12771_vm2, %v5290_v36, %v16069_v39  ;;  %v5300_v8 = vrot.slane %v16089_v28, 4 }
 0x2f9   : > { %v9069_v22 = vsel %vm12771_vm2, %v9067_v27, %v9068_v1  ;;  %v5307_v1 = vrot.slane %v15659_v52, 5 }
 0x2fa   : > { %5663 = vmatmul.mubr.bf16.gmra.mrb[40].mxu1 %v10603_v50  ;;  %v5293_v50 = vrot.slane %v16069_v39, 4  ;;  %v11242_v36 = vcombine.high %v9066_v51, %v9069_v22 }
 0x2fb   : > { %10636 = vmatprep.mubr.msk.bf16.mxu1 %vm2231_vm6, %v10606_v14  ;;  %v12489_v14 = vld [vmem:[%s12948_s30 + $0x110] sm:$0x11] }
 0x2fc   : > { %v5294_v58 = vrot.slane %v12489_v14, 5  ;;  %v5299_v14 = vsel %vm12771_vm2, %v10562_v42, %v16089_v28 }
 0x2fd   : > { %9425 = vmatmul.mubr.bf16.gmra.mrb[8].mxu0 %v11235_v35  ;;  %v10607_v35 = vcombine.low %v5286_v5, %v5289_v60  ;;  %v9074_v60 = vrot.slane %v9072_v6, 4 }
 0x2fe   : > { %11276 = vmatprep.mubr.msk.bf16.mxu0 %vm2231_vm6, %v11238_v20  ;;  %v5295_v41 = vsel %vm12771_vm2, %v5293_v50, %v5294_v58  ;;  %v16111_v58 = vrot.slane %v15616_v3, 5  ;;  %v11241_v3 = vcombine.low %v9066_v51, %v9069_v22  ;;  %v9085_v22 = vrot.slane %v15701_v32, 5 }
 0x2ff   : > { %v10610_v20 = vcombine.high %v5292_v12, %v5295_v41  ;;  %v10609_v23 = vcombine.low %v5292_v12, %v5295_v41  ;;  %v9077_v12 = vrot.slane %v9075_v30, 4 }
 0x300   : > { %v5306_v27 = vrot.slane %v16111_v58, 4 }
 0x302   : > { %5671 = vmatmul.mubr.bf16.gmra.mrb[44].mxu1 %v10605_v56  ;;  %v5301_v56 = vrot.slane %v12491_v57, 5 }
 0x303   : > { %10637 = vmatprep.mubr.msk.bf16.mxu1 %vm2231_vm6, %v10608_v26  ;;  %v11198_v26 = vld [vmem:[%s12948_s30 + $0xc8] sm:$0xee] }
 0x304   : > { %v11206_v5 = vrot.slane %v11198_v26, 9  ;;  %v5302_v49 = vsel %vm12771_vm2, %v5300_v8, %v5301_v56  ;;  %v5303_v48 = vrot.slane %v5301_v56, 4  ;;  %v9087_v26 = vrot.slane %v9085_v22, 4 }
 0x305   : > { %9433 = vmatmul.mubr.bf16.gmra.mrb[12].mxu0 %v11237_v29  ;;  %v10612_v9 = vcombine.high %v5299_v14, %v5302_v49  ;;  %v9076_v29 = vsel %vm12771_vm2, %v9074_v60, %v9075_v30  ;;  %v10611_v52 = vcombine.low %v5299_v14, %v5302_v49 }
 0x306   : > { %11277 = vmatprep.mubr.msk.bf16.mxu0 %vm2231_vm6, %v11240_v7  ;;  %v9073_v2 = vsel %vm12771_vm2, %v11206_v5, %v9072_v6  ;;  %v9078_v7 = vrot.slane %v15642_v59, 5  ;;  %v5308_v59 = vsel %vm12771_vm2, %v5306_v27, %v5307_v1  ;;  %v11199_v6 = vld [vmem:[%s12948_s30 + $0xf0] sm:$0xee]  ;;  %v11200_v1 = vld [vmem:[%s12948_s30 + $0x118] sm:$0xee] }
 0x307   : > { %v11244_v38 = vcombine.high %v9073_v2, %v9076_v29  ;;  %v11243_v42 = vcombine.low %v9073_v2, %v9076_v29  ;;  %v11207_v56 = vrot.slane %v11199_v6, 9  ;;  %v12387_v5 = vld [vmem:[%s12948_s30 + $0xcc] ss:$8 sps:$4 sm:$0xff]   ;;  %v12385_v2 = vld [vmem:[%s12948_s30 + $0xc8] ss:$8 sps:$4 sm:$0xff]  }
 0x308   : > { %v9080_v41 = vrot.slane %v9078_v7, 4  ;;  %v9079_v51 = vsel %vm12771_vm2, %v9077_v12, %v9078_v7  ;;  %v12388_v29 = vld [vmem:[%s12948_s30 + $0xdc] ss:$8 sps:$4 sm:$0xff]   ;;  %v9101_v12 = vrot.slane %v15767_v21, 5 }
 0x309   : > { %v9086_v60 = vsel %vm12771_vm2, %v11207_v56, %v9085_v22  ;;  %v11201_v6 = vld [vmem:[%s12948_s30 + $0x140] sm:$0xee]  ;;  %v9114_v56 = vrot.slane %v15825_v63, 5 }
 0x30a   : > { %5679 = vmatmul.mubr.bf16.gmra.mrb[48].mxu1 %v10607_v35  ;;  %v5305_v35 = vsel %vm12771_vm2, %v5303_v48, %v16111_v58  ;;  %v9082_v62 = vsel %vm12771_vm2, %v9080_v41, %v9081_v53  ;;  %v12390_v41 = vld [vmem:[%s12948_s30 + $0xd8] ss:$8 sps:$4 sm:$0xff]   ;;  %v9102_v53 = vsel %vm12771_vm2, %v5300_v8, %v9101_v12 }
 0x30b   : > { %10638 = vmatprep.mubr.msk.bf16.mxu1 %vm2231_vm6, %v10610_v20  ;;  %v10614_v20 = vcombine.high %v5305_v35, %v5308_v59  ;;  %v11246_v57 = vcombine.high %v9079_v51, %v9082_v62  ;;  %v11245_v14 = vcombine.low %v9079_v51, %v9082_v62  ;;  %v10666_v51 = vld [vmem:[%s12948_s30 + $0x108] sm:$0xff]  ;;  %v10715_v62 = vcombine.low %v15693_v13, %v15701_v32 }
 0x30d   : > { %9441 = vmatmul.mubr.bf16.gmra.mrb[16].mxu0 %v11239_v47  ;;  %v9088_v47 = vrot.slane %v15731_v24, 5 }
 0x30e   : > { %11278 = vmatprep.mubr.msk.bf16.mxu0 %vm2231_vm6, %v11242_v36  ;;  %v10613_v36 = vcombine.low %v5305_v35, %v5308_v59 }
 0x30f   : > { %v9089_v30 = vsel %vm12771_vm2, %v9087_v26, %v9088_v47 }
 0x310   : > { %v11248_v49 = vcombine.high %v9086_v60, %v9089_v30 }
 0x312   : > { %5687 = vmatmul.mubr.bf16.gmra.mrb[52].mxu1 %v10609_v23  ;;  %v9090_v23 = vrot.slane %v9088_v47, 4 }
 0x313   : > { %10639 = vmatprep.mubr.msk.bf16.mxu1 %vm2231_vm6, %v10612_v9  ;;  %v9094_v9 = vrot.slane %v15750_v46, 5  ;;  %v11208_v46 = vrot.slane %v11200_v1, 9 }
 0x314   : > { %v9092_v7 = vsel %vm12771_vm2, %v9090_v23, %v16069_v39  ;;  %v10716_v39 = vcombine.high %v15693_v13, %v15701_v32  ;;  %v11209_v13 = vrot.slane %v11201_v6, 9  ;;  %v12397_v23 = vld [vmem:[%s12948_s30 + $0x118] ss:$8 sps:$4 sm:$0xff]  }
 0x315   : > { %9449 = vmatmul.mubr.bf16.gmra.mrb[20].mxu0 %v11241_v3  ;;  %v9095_v48 = vsel %vm12771_vm2, %v5293_v50, %v9094_v9  ;;  %v11247_v3 = vcombine.low %v9086_v60, %v9089_v30  ;;  %v9099_v50 = vsel %vm12771_vm2, %v11208_v46, %v16089_v28  ;;  %v10718_v28 = vcombine.high %v15731_v24, %v10666_v51 }
 0x316   : > { %11279 = vmatprep.mubr.msk.bf16.mxu0 %vm2231_vm6, %v11244_v38  ;;  %v11250_v38 = vcombine.high %v9092_v7, %v9095_v48  ;;  %v11249_v35 = vcombine.low %v9092_v7, %v9095_v48  ;;  %v11252_v59 = vcombine.high %v9099_v50, %v9102_v53  ;;  %v9116_v30 = vrot.slane %v9114_v56, 4  ;;  %v11202_v48 = vld [vmem:[%s12948_s30 + $0x168] sm:$0xee] }
 0x317   : > { %v9124_v7 = vrot.slane %v15903_v17, 5  ;;  %v9127_v46 = vrot.slane %v15933_v19, 5 }
 0x319   : > { %v9129_v19 = vrot.slane %v9127_v46, 4 }
 0x31a   : > { %5695 = vmatmul.mubr.bf16.gmra.mrb[56].mxu1 %v10611_v52  ;;  %v9103_v52 = vrot.slane %v9101_v12, 4 }
 0x31b   : > { %10640 = vmatprep.mubr.msk.bf16.mxu1 %vm2231_vm6, %v10614_v20  ;;  %v9107_v20 = vrot.slane %v15803_v54, 5  ;;  %v9111_v54 = vrot.slane %v15785_v45, 5 }
 0x31c   : > { %v9105_v8 = vsel %vm12771_vm2, %v9103_v52, %v16111_v58  ;;  %v10717_v58 = vcombine.low %v15731_v24, %v10666_v51  ;;  %v10670_v24 = vld [vmem:[%s12948_s30 + $0x130] sm:$0xff]  ;;  %v10723_v52 = vcombine.low %v15782_v0, %v15785_v45 }
 0x31d   : > { %9457 = vmatmul.mubr.bf16.gmra.mrb[24].mxu0 %v11243_v42  ;;  %v9108_v22 = vsel %vm12771_vm2, %v5306_v27, %v9107_v20  ;;  %v11251_v42 = vcombine.low %v9099_v50, %v9102_v53  ;;  %v9113_v32 = vrot.slane %v9111_v54, 4  ;;  %v12395_v27 = vld [vmem:[%s12948_s30 + $0x11c] ss:$8 sps:$4 sm:$0xff]   ;;  %v9112_v26 = vsel %vm12771_vm2, %v11209_v13, %v9111_v54  ;;  %s12615_s30 = smov [#allocation6]  }
 0x31e   : > { %11280 = vmatprep.mubr.msk.bf16.mxu0 %vm2231_vm6, %v11246_v57  ;;  %v11254_v57 = vcombine.high %v9105_v8, %v9108_v22  ;;  %v10722_v9 = vcombine.high %v15767_v21, %v10670_v24  ;;  %v10721_v12 = vcombine.low %v15767_v21, %v10670_v24  ;;  %v9130_v50 = vrot.slane %v15941_v31, 5  ;;  %s12524_s14 = sshll.u32 %s12615_s30, 4  ;;  %s12525_s14 = int_to_ptr.vmem [resolvable:$false] %s12524_s14 }
 0x31f   : > { %v9115_v47 = vsel %vm12771_vm2, %v9113_v32, %v9114_v56  ;;  %v9133_v21 = vrot.slane %v15972_v33, 5  ;;  %v10726_v20 = vcombine.high %v15825_v63, %v15830_v4  ;;  %s12526_s27 = scalar_lea.vmem %s12525_s14, 4096  ;;  %p12527_p13 = scmp.lt.s32.totalorder %s16454_s18, %s12525_s14 }
 0x320   : > { %v11256_v60 = vcombine.high %v9112_v26, %v9115_v47  ;;  %v11255_v1 = vcombine.low %v9112_v26, %v9115_v47  ;;  %v9131_v31 = vsel %vm12771_vm2, %v9129_v19, %v9130_v50  ;;  %p12528_p1 = scmp.lt.s32.totalorder %s12526_s27, %s12520_s19 }
 0x322   : > { %5703 = vmatmul.mubr.bf16.gmra.mrb[60].mxu1 %v10613_v36  ;;  %v9117_v36 = vrot.slane %v15830_v4, 5  ;;  %p12529_p3 = por %p12528_p1, %p12527_p13 }
 0x323   : > { %10745 = vmatprep.mubr.msk.bf16.mxu1 %vm2231_vm6, %v12387_v5  ;;  %v11253_v5 = vcombine.low %v9105_v8, %v9108_v22 }
 0x324   : > { %p12530_p5 = pnand %p12529_p3, %p12523_p11 }
 0x325   : > { %9465 = vmatmul.mubr.bf16.gmra.mrb[28].mxu0 %v11245_v14  ;;  %v9119_v14 = vrot.slane %v9117_v36, 4 }
 0x326   : > { %11281 = vmatprep.mubr.msk.bf16.mxu0 %vm2231_vm6, %v11248_v49  ;;  %v9120_v49 = vrot.slane %v15877_v40, 5  ;;  %v11210_v40 = vrot.slane %v11202_v48, 9 }
 0x328   : > { %v9125_v17 = vsel %vm12771_vm2, %v11210_v40, %v9124_v7 }
 0x32a   : > { %6148 = vmatmul.mubr.bf16.vlgmr.msra.gmra.mrb[32].mxu1 %v12385_v2  ;;  %v9118_v2 = vsel %vm12771_vm2, %v9116_v30, %v9117_v36 }
 0x32b   : > { %10746 = vmatprep.mubr.msk.bf16.mxu1 %vm2231_vm6, %v12388_v29  ;;  %v9121_v29 = vsel %vm12771_vm2, %v9119_v14, %v9120_v49 }
 0x32c   : > { %v11257_v53 = vcombine.low %v9118_v2, %v9121_v29 }
 0x32d   : > { %9473 = vmatmul.mubr.bf16.gmra.mrb[32].mxu0 %v11247_v3  ;;  %v11258_v3 = vcombine.high %v9118_v2, %v9121_v29  ;;  %v16558_v29 = vld [vmem:[#allocation9_spill] sm:$0xff] }
 0x32e   : > { %11282 = vmatprep.mubr.msk.bf16.mxu0 %vm2231_vm6, %v11250_v38  ;;  %v9126_v38 = vrot.slane %v9124_v7, 4 }
 0x332   : > { %6156 = vmatmul.mubr.bf16.gmra.mrb[36].mxu1 %v12390_v41  ;;  %v10724_v41 = vcombine.high %v15782_v0, %v15785_v45  ;;  %v10725_v0 = vcombine.low %v15825_v63, %v15830_v4 }
 0x333   : > { %10747 = vmatprep.mubr.msk.bf16.mxu1 %vm2231_vm6, %v10716_v39  ;;  %v9128_v39 = vsel %vm12771_vm2, %v9126_v38, %v9127_v46 }
 0x335   : > { %9481 = vmatmul.mubr.bf16.gmra.mrb[36].mxu0 %v11249_v35  ;;  %v11260_v35 = vcombine.high %v9125_v17, %v9128_v39 }
 0x336   : > { %11283 = vmatprep.mubr.msk.bf16.mxu0 %vm2231_vm6, %v11252_v59  ;;  %v9132_v59 = vrot.slane %v9130_v50, 4  ;;  %v16562_v50 = vld [vmem:[#allocation13_spill] sm:$0xff] }
 0x338   : > { %v9134_v51 = vsel %vm12771_vm2, %v9132_v59, %v9133_v21  ;;  %v16280_v59 = vld [vmem:[%s16512_s4] ss:$0 sm:$0xff] }
 0x339   : > { %v11261_v45 = vcombine.low %v9131_v31, %v9134_v51 }
 0x33a   : > { %6164 = vmatmul.mubr.bf16.gmra.mrb[40].mxu1 %v10715_v62  ;;  %v11259_v62 = vcombine.low %v9125_v17, %v9128_v39 }
 0x33b   : > { %10748 = vmatprep.mubr.msk.bf16.mxu1 %vm2231_vm6, %v10718_v28  ;;  %v11262_v28 = vcombine.high %v9131_v31, %v9134_v51 }
 0x33d   : > { %9489 = vmatmul.mubr.bf16.gmra.mrb[40].mxu0 %v11251_v42 }
 0x33e   : > { %11284 = vmatprep.mubr.msk.bf16.mxu0 %vm2231_vm6, %v11254_v57 }
 0x342   : > { %6172 = vmatmul.mubr.bf16.gmra.mrb[44].mxu1 %v10717_v58 }
 0x343   : > { %10749 = vmatprep.mubr.msk.bf16.mxu1 %vm2231_vm6, %v12395_v27 }
 0x345   : > { %9497 = vmatmul.mubr.bf16.gmra.mrb[44].mxu0 %v11253_v5 }
 0x346   : > { %11285 = vmatprep.mubr.msk.bf16.mxu0 %vm2231_vm6, %v11256_v60 }
 0x34a   : > { %6180 = vmatmul.mubr.bf16.gmra.mrb[48].mxu1 %v12397_v23 }
 0x34b   : > { %10750 = vmatprep.mubr.msk.bf16.mxu1 %vm2231_vm6, %v10722_v9 }
 0x34d   : > { %9505 = vmatmul.mubr.bf16.gmra.mrb[48].mxu0 %v11255_v1  ;;  %v16559_v1 = vld [vmem:[#allocation10_spill] sm:$0xff] }
 0x34e   : > { %11286 = vmatprep.mubr.msk.bf16.mxu0 %vm2231_vm6, %v11258_v3 }
 0x352   : > { %6188 = vmatmul.mubr.bf16.gmra.mrb[52].mxu1 %v10721_v12 }
 0x353   : > { %10751 = vmatprep.mubr.msk.bf16.mxu1 %vm2231_vm6, %v10724_v41 }
 0x355   : > { %9513 = vmatmul.mubr.bf16.gmra.mrb[52].mxu0 %v11257_v53 }
 0x356   : > { %11287 = vmatprep.mubr.msk.bf16.mxu0 %vm2231_vm6, %v11260_v35 }
 0x35a   : > { %6196 = vmatmul.mubr.bf16.gmra.mrb[56].mxu1 %v10723_v52 }
 0x35b   : > { %10752 = vmatprep.mubr.msk.bf16.mxu1 %vm2231_vm6, %v10726_v20  ;;  %v16286_v20 = vld [vmem:[%s16513_s5] ss:$0 sm:$0xff] }
 0x35d   : > { %9521 = vmatmul.mubr.bf16.gmra.mrb[56].mxu0 %v11259_v62 }
 0x35e   : > { %11288 = vmatprep.mubr.msk.bf16.mxu0 %vm2231_vm6, %v11262_v28 }
 0x362   : > { %6204 = vmatmul.mubr.bf16.gmra.mrb[60].mxu1 %v10725_v0 }
 0x365   : > { %9529 = vmatmul.mubr.bf16.gmra.mrb[60].mxu0 %v11261_v45 }
 0x37d   : > { %v5584_v33 = vpop.f32.mrb[0].mxu1 }
 0x37e   : > { %v11497_v8 = vadd.f32 %v14983_v61, %v5584_v33  ;;  %v5586_v22 = vpop.f32.mrb[1].mxu1 }
 0x37f   : > { %v5587_v10 = vpop.f32.mrb[2].mxu1 }
 0x380   : > { %v11499_v54 = vadd.f32 %v14986_v25, %v5587_v10  ;;  %v5589_v6 = vpop.f32.mrb[3].mxu1 }
 0x385   : > { %v5592_v42 = vpop.f32.mrb[4].mxu1 }
 0x386   : > { %v11501_v57 = vadd.f32 %v15008_v37, %v5592_v42  ;;  %v5594_v13 = vpop.f32.mrb[5].mxu1 }
 0x387   : > { %v5595_v32 = vpop.f32.mrb[6].mxu1 }
 0x388   : > { %v16239_v56 = vadd.f32 %v15012_v44, %v5595_v32  ;;  %v5597_v63 = vpop.f32.mrb[7].mxu1 }
 0x38d   : > { %v5600_v4 = vpop.f32.mrb[8].mxu1 }
 0x38e   : > { %v16242_v58 = vadd.f32 %v15033_v16, %v5600_v4  ;;  %v5602_v27 = vpop.f32.mrb[9].mxu1 }
 0x38f   : > { %v5603_v61 = vpop.f32.mrb[10].mxu1 }
 0x390   : > { %v16245_v26 = vadd.f32 %v15037_v11, %v5603_v61  ;;  %v5605_v25 = vpop.f32.mrb[11].mxu1 }
 0x395   : > { %v5608_v47 = vpop.f32.mrb[12].mxu1 }
 0x396   : > { %v16248_v36 = vadd.f32 %v15060_v15, %v5608_v47  ;;  %v5610_v37 = vpop.f32.mrb[13].mxu1 }
 0x397   : > { %v5611_v5 = vpop.f32.mrb[14].mxu1 }
 0x398   : > { %v16251_v44 = vadd.f32 %v15064_v34, %v5611_v5  ;;  %v5613_v60 = vpop.f32.mrb[15].mxu1 }
 0x39d   : > { %v5616_v30 = vpop.f32.mrb[16].mxu1 }
 0x39e   : > { %v16254_v16 = vadd.f32 %v15084_v55, %v5616_v30  ;;  %v5618_v14 = vpop.f32.mrb[17].mxu1 }
 0x39f   : > { %v5619_v49 = vpop.f32.mrb[18].mxu1 }
 0x3a0   : > { %v16257_v11 = vadd.f32 %v15087_v18, %v5619_v49  ;;  %v5621_v24 = vpop.f32.mrb[19].mxu1  ;;  %v16560_v18 = vld [vmem:[#allocation11_spill] sm:$0xff] }
 0x3a5   : > { %v5624_v23 = vpop.f32.mrb[20].mxu1 }
 0x3a6   : > { %v16260_v15 = vadd.f32 %v15105_v43, %v5624_v23  ;;  %v5626_v9 = vpop.f32.mrb[21].mxu1  ;;  %v16561_v43 = vld [vmem:[#allocation12_spill] sm:$0xff] }
 0x3a7   : > { %v5627_v2 = vpop.f32.mrb[22].mxu1 }
 0x3a8   : > { %v16263_v34 = vadd.f32 %v16558_v29, %v5627_v2  ;;  %v5629_v7 = vpop.f32.mrb[23].mxu1 }
 0x3ad   : > { %v5632_v48 = vpop.f32.mrb[24].mxu1 }
 0x3ae   : > { %v16266_v55 = vadd.f32 %v16559_v1, %v5632_v48  ;;  %v5634_v3 = vpop.f32.mrb[25].mxu1 }
 0x3af   : > { %v5635_v40 = vpop.f32.mrb[26].mxu1 }
 0x3b0   : > { %v16269_v38 = vadd.f32 %v16560_v18, %v5635_v40  ;;  %v5637_v46 = vpop.f32.mrb[27].mxu1 }
 0x3b5   : > { %v5640_v12 = vpop.f32.mrb[28].mxu1 }
 0x3b6   : > { %v16272_v41 = vadd.f32 %v16561_v43, %v5640_v12  ;;  %v5642_v17 = vpop.f32.mrb[29].mxu1 }
 0x3b7   : > { %v5643_v39 = vpop.f32.mrb[30].mxu1 }
 0x3b8   : > { %v16275_v53 = vadd.f32 %v16562_v50, %v5643_v39  ;;  %v5645_v35 = vpop.f32.mrb[31].mxu1 }
 0x3c0   : > { %v9410_v19 = vpop.f32.mrb[0].mxu0 }
 0x3c1   : > { %v11498_v21 = vadd.f32 %v11497_v8, %v9410_v19  ;;  %v9412_v52 = vpop.f32.mrb[1].mxu0 }
 0x3c2   : > { %v9413_v31 = vpop.f32.mrb[2].mxu0 }
 0x3c3   : > { %v9576_v51 = vmul.f32 %v11498_v21, %v16280_v59  ;;  %v11500_v62 = vadd.f32 %v11499_v54, %v9413_v31  ;;  %v9415_v28 = vpop.f32.mrb[3].mxu0 }
 0x3c5   : > { %v9615_v0 = vadd.f32 %v16286_v20, %v9576_v51  ;;  %v9577_v45 = vmul.f32 %v11500_v62, %v16280_v59 }
 0x3c7   : > { %v9647_v33 = vmax.f32 %v9615_v0, 0.0  ;;  %v9616_v8 = vadd.f32 %v16286_v20, %v9577_v45 }
 0x3c8   : > { %v9418_v22 = vpop.f32.mrb[4].mxu0 }
 0x3c9   : > { %v11331_v10 = vpack.c.bf16 %v9647_v33, %v9647_v33  ;;  %v9648_v6 = vmax.f32 %v9616_v8, 0.0  ;;  %v11502_v42 = vadd.f32 %v11501_v57, %v9418_v22  ;;  %v9420_v13 = vpop.f32.mrb[5].mxu0 }
 0x3ca   : > { %v9421_v32 = vpop.f32.mrb[6].mxu0 }
 0x3cb   : > { %9808 = vst.msk [vmem:[%s16294_s15] sm:$0xf] %vm9807_vm0, %v11331_v10  ;;  %v11332_v54 = vpack.c.bf16 %v9648_v6, %v9648_v6  ;;  %v9578_v63 = vmul.f32 %v11502_v42, %v16280_v59  ;;  %v11504_v4 = vadd.f32 %v16239_v56, %v9421_v32  ;;  %v9423_v27 = vpop.f32.mrb[7].mxu0 }
 0x3cd   : > { %9809 = vst.msk [vmem:[%s16294_s15 + $0x4] sm:$0xf] %vm9807_vm0, %v11332_v54  ;;  %v9617_v57 = vadd.f32 %v16286_v20, %v9578_v63  ;;  %v9579_v61 = vmul.f32 %v11504_v4, %v16280_v59 }
 0x3cf   : > { %v9649_v25 = vmax.f32 %v9617_v57, 0.0  ;;  %v9618_v47 = vadd.f32 %v16286_v20, %v9579_v61 }
 0x3d0   : > { %v9426_v37 = vpop.f32.mrb[8].mxu0 }
 0x3d1   : > { %v11333_v5 = vpack.c.bf16 %v9649_v25, %v9649_v25  ;;  %v9650_v60 = vmax.f32 %v9618_v47, 0.0  ;;  %v11506_v30 = vadd.f32 %v16242_v58, %v9426_v37  ;;  %v9428_v14 = vpop.f32.mrb[9].mxu0 }
 0x3d2   : > { %v9429_v49 = vpop.f32.mrb[10].mxu0 }
 0x3d3   : > { %9810 = vst.msk [vmem:[%s16294_s15 + $0x8] sm:$0xf] %vm9807_vm0, %v11333_v5  ;;  %v11334_v56 = vpack.c.bf16 %v9650_v60, %v9650_v60  ;;  %v9580_v24 = vmul.f32 %v11506_v30, %v16280_v59  ;;  %v11508_v23 = vadd.f32 %v16245_v26, %v9429_v49  ;;  %v9431_v9 = vpop.f32.mrb[11].mxu0 }
 0x3d5   : > { %9811 = vst.msk [vmem:[%s16294_s15 + $0xc] sm:$0xf] %vm9807_vm0, %v11334_v56  ;;  %v9619_v2 = vadd.f32 %v16286_v20, %v9580_v24  ;;  %v9581_v29 = vmul.f32 %v11508_v23, %v16280_v59 }
 0x3d7   : > { %v9651_v7 = vmax.f32 %v9619_v2, 0.0  ;;  %v9620_v58 = vadd.f32 %v16286_v20, %v9581_v29 }
 0x3d8   : > { %v9434_v48 = vpop.f32.mrb[12].mxu0 }
 0x3d9   : > { %v11335_v1 = vpack.c.bf16 %v9651_v7, %v9651_v7  ;;  %v9652_v3 = vmax.f32 %v9620_v58, 0.0  ;;  %v11510_v40 = vadd.f32 %v16248_v36, %v9434_v48  ;;  %v9436_v18 = vpop.f32.mrb[13].mxu0 }
 0x3da   : > { %v9437_v46 = vpop.f32.mrb[14].mxu0 }
 0x3db   : > { %9812 = vst.msk [vmem:[%s16294_s15 + $0x10] sm:$0xf] %vm9807_vm0, %v11335_v1  ;;  %v11336_v26 = vpack.c.bf16 %v9652_v3, %v9652_v3  ;;  %v9582_v12 = vmul.f32 %v11510_v40, %v16280_v59  ;;  %v11512_v43 = vadd.f32 %v16251_v44, %v9437_v46  ;;  %v9439_v17 = vpop.f32.mrb[15].mxu0 }
 0x3dc   : > { %v16563_v17 = vld [vmem:[#allocation14_spill] sm:$0xff] }
 0x3dd   : > { %9813 = vst.msk [vmem:[%s16294_s15 + $0x14] sm:$0xf] %vm9807_vm0, %v11336_v26  ;;  %v9621_v39 = vadd.f32 %v16286_v20, %v9582_v12  ;;  %v9583_v50 = vmul.f32 %v11512_v43, %v16280_v59 }
 0x3df   : > { %v9653_v35 = vmax.f32 %v9621_v39, 0.0  ;;  %v9622_v36 = vadd.f32 %v16286_v20, %v9583_v50 }
 0x3e0   : > { %v9442_v19 = vpop.f32.mrb[16].mxu0 }
 0x3e1   : > { %v11337_v21 = vpack.c.bf16 %v9653_v35, %v9653_v35  ;;  %v9654_v52 = vmax.f32 %v9622_v36, 0.0  ;;  %v11514_v31 = vadd.f32 %v16254_v16, %v9442_v19  ;;  %v9444_v51 = vpop.f32.mrb[17].mxu0 }
 0x3e2   : > { %v9445_v62 = vpop.f32.mrb[18].mxu0 }
 0x3e3   : > { %9814 = vst.msk [vmem:[%s16294_s15 + $0x18] sm:$0xf] %vm9807_vm0, %v11337_v21  ;;  %v11338_v44 = vpack.c.bf16 %v9654_v52, %v9654_v52  ;;  %v9584_v28 = vmul.f32 %v11514_v31, %v16280_v59  ;;  %v11516_v0 = vadd.f32 %v16257_v11, %v9445_v62  ;;  %v9447_v45 = vpop.f32.mrb[19].mxu0  ;;  %v16564_v21 = vld [vmem:[#allocation15_spill] sm:$0xff] }
 0x3e5   : > { %9815 = vst.msk [vmem:[%s16294_s15 + $0x1c] sm:$0xf] %vm9807_vm0, %v11338_v44  ;;  %v9623_v33 = vadd.f32 %v16286_v20, %v9584_v28  ;;  %v9585_v8 = vmul.f32 %v11516_v0, %v16280_v59 }
 0x3e7   : > { %v9655_v22 = vmax.f32 %v9623_v33, 0.0  ;;  %v9624_v16 = vadd.f32 %v16286_v20, %v9585_v8 }
 0x3e8   : > { %v9450_v10 = vpop.f32.mrb[20].mxu0 }
 0x3e9   : > { %v11339_v6 = vpack.c.bf16 %v9655_v22, %v9655_v22  ;;  %v9656_v42 = vmax.f32 %v9624_v16, 0.0  ;;  %v11518_v13 = vadd.f32 %v16260_v15, %v9450_v10  ;;  %v9452_v32 = vpop.f32.mrb[21].mxu0 }
 0x3ea   : > { %v9453_v54 = vpop.f32.mrb[22].mxu0 }
 0x3eb   : > { %9816 = vst.msk [vmem:[%s16294_s15 + $0x20] sm:$0xf] %vm9807_vm0, %v11339_v6  ;;  %v11340_v11 = vpack.c.bf16 %v9656_v42, %v9656_v42  ;;  %v9586_v63 = vmul.f32 %v11518_v13, %v16280_v59  ;;  %v11520_v4 = vadd.f32 %v16263_v34, %v9453_v54  ;;  %v9455_v27 = vpop.f32.mrb[23].mxu0  ;;  %v16565_v6 = vld [vmem:[#allocation16_spill] sm:$0xff] }
 0x3ed   : > { %9817 = vst.msk [vmem:[%s16294_s15 + $0x24] sm:$0xf] %vm9807_vm0, %v11340_v11  ;;  %v9625_v57 = vadd.f32 %v16286_v20, %v9586_v63  ;;  %v9587_v61 = vmul.f32 %v11520_v4, %v16280_v59  ;;  %v16566_v4 = vld [vmem:[#allocation17_spill] sm:$0xff] }
 0x3ef   : > { %v9657_v25 = vmax.f32 %v9625_v57, 0.0  ;;  %v9626_v15 = vadd.f32 %v16286_v20, %v9587_v61 }
 0x3f0   : > { %v9458_v47 = vpop.f32.mrb[24].mxu0 }
 0x3f1   : > { %v11341_v37 = vpack.c.bf16 %v9657_v25, %v9657_v25  ;;  %v9658_v5 = vmax.f32 %v9626_v15, 0.0  ;;  %v11522_v60 = vadd.f32 %v16266_v55, %v9458_v47  ;;  %v9460_v30 = vpop.f32.mrb[25].mxu0 }
 0x3f2   : > { %v9461_v14 = vpop.f32.mrb[26].mxu0 }
 0x3f3   : > { %9818 = vst.msk [vmem:[%s16294_s15 + $0x28] sm:$0xf] %vm9807_vm0, %v11341_v37  ;;  %v11342_v34 = vpack.c.bf16 %v9658_v5, %v9658_v5  ;;  %v9588_v49 = vmul.f32 %v11522_v60, %v16280_v59  ;;  %v11524_v56 = vadd.f32 %v16269_v38, %v9461_v14  ;;  %v9463_v24 = vpop.f32.mrb[27].mxu0 }
 0x3f4   : > { %v16567_v24 = vld [vmem:[#allocation18_spill] sm:$0xff] }
 0x3f5   : > { %9819 = vst.msk [vmem:[%s16294_s15 + $0x2c] sm:$0xf] %vm9807_vm0, %v11342_v34  ;;  %v9627_v23 = vadd.f32 %v16286_v20, %v9588_v49  ;;  %v9589_v9 = vmul.f32 %v11524_v56, %v16280_v59 }
 0x3f7   : > { %v9659_v2 = vmax.f32 %v9627_v23, 0.0  ;;  %v9628_v55 = vadd.f32 %v16286_v20, %v9589_v9 }
 0x3f8   : > { %v9466_v29 = vpop.f32.mrb[28].mxu0 }
 0x3f9   : > { %v11343_v7 = vpack.c.bf16 %v9659_v2, %v9659_v2  ;;  %v9660_v58 = vmax.f32 %v9628_v55, 0.0  ;;  %v11526_v48 = vadd.f32 %v16272_v41, %v9466_v29  ;;  %v9468_v1 = vpop.f32.mrb[29].mxu0 }
 0x3fa   : > { %v9469_v3 = vpop.f32.mrb[30].mxu0 }
 0x3fb   : > { %9820 = vst.msk [vmem:[%s16294_s15 + $0x30] sm:$0xf] %vm9807_vm0, %v11343_v7  ;;  %v11344_v38 = vpack.c.bf16 %v9660_v58, %v9660_v58  ;;  %v9590_v40 = vmul.f32 %v11526_v48, %v16280_v59  ;;  %v11528_v18 = vadd.f32 %v16275_v53, %v9469_v3  ;;  %v9471_v46 = vpop.f32.mrb[31].mxu0  ;;  %v16568_v58 = vld [vmem:[#allocation19_spill] sm:$0xff] }
 0x3fd   : > { %9821 = vst.msk [vmem:[%s16294_s15 + $0x34] sm:$0xf] %vm9807_vm0, %v11344_v38  ;;  %v9629_v26 = vadd.f32 %v16286_v20, %v9590_v40  ;;  %v9591_v12 = vmul.f32 %v11528_v18, %v16280_v59  ;;  %v6149_v43 = vpop.f32.mrb[32].mxu1 }
 0x3fe   : > { %v11529_v41 = vadd.f32 %v16563_v17, %v6149_v43  ;;  %v6151_v39 = vpop.f32.mrb[33].mxu1 }
 0x3ff   : > { %v9661_v50 = vmax.f32 %v9629_v26, 0.0  ;;  %v9630_v35 = vadd.f32 %v16286_v20, %v9591_v12  ;;  %v6152_v36 = vpop.f32.mrb[34].mxu1 }
 0x400   : > { %v9474_v19 = vpop.f32.mrb[32].mxu0  ;;  %v11531_v53 = vadd.f32 %v16564_v21, %v6152_v36  ;;  %v6154_v52 = vpop.f32.mrb[35].mxu1 }
 0x401   : > { %v11345_v31 = vpack.c.bf16 %v9661_v50, %v9661_v50  ;;  %v9662_v51 = vmax.f32 %v9630_v35, 0.0  ;;  %v11530_v62 = vadd.f32 %v11529_v41, %v9474_v19  ;;  %v9476_v44 = vpop.f32.mrb[33].mxu0  ;;  %v16569_v35 = vld [vmem:[#allocation20_spill] sm:$0xff] }
 0x402   : > { %v9477_v28 = vpop.f32.mrb[34].mxu0 }
 0x403   : > { %9822 = vst.msk [vmem:[%s16294_s15 + $0x38] sm:$0xf] %vm9807_vm0, %v11345_v31  ;;  %v11346_v0 = vpack.c.bf16 %v9662_v51, %v9662_v51  ;;  %v9592_v45 = vmul.f32 %v11530_v62, %v16280_v59  ;;  %v11532_v33 = vadd.f32 %v11531_v53, %v9477_v28  ;;  %v9479_v8 = vpop.f32.mrb[35].mxu0  ;;  %v16570_v51 = vld [vmem:[#allocation21_spill] sm:$0xff] }
 0x405   : > { %9823 = vst.msk [vmem:[%s16294_s15 + $0x3c] sm:$0xf] %vm9807_vm0, %v11346_v0  ;;  %v9631_v22 = vadd.f32 %v16286_v20, %v9592_v45  ;;  %v9593_v16 = vmul.f32 %v11532_v33, %v16280_v59  ;;  %v6157_v10 = vpop.f32.mrb[36].mxu1 }
 0x406   : > { %v11533_v42 = vadd.f32 %v16565_v6, %v6157_v10  ;;  %v6159_v13 = vpop.f32.mrb[37].mxu1 }
 0x407   : > { %v9663_v32 = vmax.f32 %v9631_v22, 0.0  ;;  %v9632_v54 = vadd.f32 %v16286_v20, %v9593_v16  ;;  %v6160_v11 = vpop.f32.mrb[38].mxu1 }
 0x408   : > { %v9482_v63 = vpop.f32.mrb[36].mxu0  ;;  %v11535_v27 = vadd.f32 %v16566_v4, %v6160_v11  ;;  %v6162_v57 = vpop.f32.mrb[39].mxu1 }
 0x409   : > { %v11347_v61 = vpack.c.bf16 %v9663_v32, %v9663_v32  ;;  %v9664_v25 = vmax.f32 %v9632_v54, 0.0  ;;  %v11534_v15 = vadd.f32 %v11533_v42, %v9482_v63  ;;  %v9484_v47 = vpop.f32.mrb[37].mxu0  ;;  %v16571_v54 = vld [vmem:[#allocation22_spill] sm:$0xff] }
 0x40a   : > { %v9485_v37 = vpop.f32.mrb[38].mxu0 }
 0x40b   : > { %9824 = vst.msk [vmem:[%s16294_s15 + $0x40] sm:$0xf] %vm9807_vm0, %v11347_v61  ;;  %v11348_v5 = vpack.c.bf16 %v9664_v25, %v9664_v25  ;;  %v9594_v60 = vmul.f32 %v11534_v15, %v16280_v59  ;;  %v11536_v30 = vadd.f32 %v11535_v27, %v9485_v37  ;;  %v9487_v14 = vpop.f32.mrb[39].mxu0  ;;  %v16572_v25 = vld [vmem:[#allocation23_spill] sm:$0xff] }
 0x40d   : > { %9825 = vst.msk [vmem:[%s16294_s15 + $0x44] sm:$0xf] %vm9807_vm0, %v11348_v5  ;;  %v9633_v34 = vadd.f32 %v16286_v20, %v9594_v60  ;;  %v9595_v49 = vmul.f32 %v11536_v30, %v16280_v59  ;;  %v6165_v56 = vpop.f32.mrb[40].mxu1 }
 0x40e   : > { %v11537_v23 = vadd.f32 %v16567_v24, %v6165_v56  ;;  %v6167_v9 = vpop.f32.mrb[41].mxu1 }
 0x40f   : > { %v9665_v2 = vmax.f32 %v9633_v34, 0.0  ;;  %v9634_v55 = vadd.f32 %v16286_v20, %v9595_v49  ;;  %v6168_v29 = vpop.f32.mrb[42].mxu1 }
 0x410   : > { %v9490_v7 = vpop.f32.mrb[40].mxu0  ;;  %v11539_v48 = vadd.f32 %v16568_v58, %v6168_v29  ;;  %v6170_v1 = vpop.f32.mrb[43].mxu1 }
 0x411   : > { %v11349_v3 = vpack.c.bf16 %v9665_v2, %v9665_v2  ;;  %v9666_v38 = vmax.f32 %v9634_v55, 0.0  ;;  %v11538_v40 = vadd.f32 %v11537_v23, %v9490_v7  ;;  %v9492_v18 = vpop.f32.mrb[41].mxu0  ;;  %v16573_v55 = vld [vmem:[#allocation24_spill] sm:$0xff] }
 0x412   : > { %v9493_v46 = vpop.f32.mrb[42].mxu0 }
 0x413   : > { %9826 = vst.msk [vmem:[%s16294_s15 + $0x48] sm:$0xf] %vm9807_vm0, %v11349_v3  ;;  %v11350_v26 = vpack.c.bf16 %v9666_v38, %v9666_v38  ;;  %v9596_v12 = vmul.f32 %v11538_v40, %v16280_v59  ;;  %v11540_v43 = vadd.f32 %v11539_v48, %v9493_v46  ;;  %v9495_v17 = vpop.f32.mrb[43].mxu0  ;;  %v16574_v38 = vld [vmem:[#allocation25_spill] sm:$0xff] }
 0x415   : > { %9827 = vst.msk [vmem:[%s16294_s15 + $0x4c] sm:$0xf] %vm9807_vm0, %v11350_v26  ;;  %v9635_v41 = vadd.f32 %v16286_v20, %v9596_v12  ;;  %v9597_v39 = vmul.f32 %v11540_v43, %v16280_v59  ;;  %v6173_v50 = vpop.f32.mrb[44].mxu1 }
 0x416   : > { %v11541_v36 = vadd.f32 %v16569_v35, %v6173_v50  ;;  %v6175_v19 = vpop.f32.mrb[45].mxu1 }
 0x417   : > { %v9667_v21 = vmax.f32 %v9635_v41, 0.0  ;;  %v9636_v53 = vadd.f32 %v16286_v20, %v9597_v39  ;;  %v6176_v52 = vpop.f32.mrb[46].mxu1 }
 0x418   : > { %v9498_v31 = vpop.f32.mrb[44].mxu0  ;;  %v11543_v62 = vadd.f32 %v16570_v51, %v6176_v52  ;;  %v6178_v44 = vpop.f32.mrb[47].mxu1 }
 0x419   : > { %v11351_v28 = vpack.c.bf16 %v9667_v21, %v9667_v21  ;;  %v9668_v0 = vmax.f32 %v9636_v53, 0.0  ;;  %v11542_v45 = vadd.f32 %v11541_v36, %v9498_v31  ;;  %v9500_v33 = vpop.f32.mrb[45].mxu0  ;;  %v16575_v53 = vld [vmem:[#allocation26_spill] sm:$0xff] }
 0x41a   : > { %v9501_v8 = vpop.f32.mrb[46].mxu0 }
 0x41b   : > { %9828 = vst.msk [vmem:[%s16294_s15 + $0x50] sm:$0xf] %vm9807_vm0, %v11351_v28  ;;  %v11352_v22 = vpack.c.bf16 %v9668_v0, %v9668_v0  ;;  %v9598_v16 = vmul.f32 %v11542_v45, %v16280_v59  ;;  %v11544_v10 = vadd.f32 %v11543_v62, %v9501_v8  ;;  %v9503_v6 = vpop.f32.mrb[47].mxu0  ;;  %v16576_v0 = vld [vmem:[#allocation27_spill] sm:$0xff] }
 0x41d   : > { %9829 = vst.msk [vmem:[%s16294_s15 + $0x54] sm:$0xf] %vm9807_vm0, %v11352_v22  ;;  %v9637_v42 = vadd.f32 %v16286_v20, %v9598_v16  ;;  %v9599_v13 = vmul.f32 %v11544_v10, %v16280_v59  ;;  %v6181_v32 = vpop.f32.mrb[48].mxu1 }
 0x41e   : > { %v11545_v11 = vadd.f32 %v16571_v54, %v6181_v32  ;;  %v6183_v63 = vpop.f32.mrb[49].mxu1 }
 0x41f   : > { %v9669_v4 = vmax.f32 %v9637_v42, 0.0  ;;  %v9638_v27 = vadd.f32 %v16286_v20, %v9599_v13  ;;  %v6184_v57 = vpop.f32.mrb[50].mxu1 }
 0x420   : > { %v9506_v61 = vpop.f32.mrb[48].mxu0  ;;  %v11547_v15 = vadd.f32 %v16572_v25, %v6184_v57  ;;  %v6186_v47 = vpop.f32.mrb[51].mxu1 }
 0x421   : > { %v11353_v37 = vpack.c.bf16 %v9669_v4, %v9669_v4  ;;  %v9670_v5 = vmax.f32 %v9638_v27, 0.0  ;;  %v11546_v60 = vadd.f32 %v11545_v11, %v9506_v61  ;;  %v9508_v30 = vpop.f32.mrb[49].mxu0  ;;  %v16577_v27 = vld [vmem:[#allocation28_spill] sm:$0xff] }
 0x422   : > { %v9509_v14 = vpop.f32.mrb[50].mxu0 }
 0x423   : > { %9830 = vst.msk [vmem:[%s16294_s15 + $0x58] sm:$0xf] %vm9807_vm0, %v11353_v37  ;;  %v11354_v34 = vpack.c.bf16 %v9670_v5, %v9670_v5  ;;  %v9600_v49 = vmul.f32 %v11546_v60, %v16280_v59  ;;  %v11548_v56 = vadd.f32 %v11547_v15, %v9509_v14  ;;  %v9511_v24 = vpop.f32.mrb[51].mxu0  ;;  %v16578_v5 = vld [vmem:[#allocation29_spill] sm:$0xff] }
 0x425   : > { %9831 = vst.msk [vmem:[%s16294_s15 + $0x5c] sm:$0xf] %vm9807_vm0, %v11354_v34  ;;  %v9639_v23 = vadd.f32 %v16286_v20, %v9600_v49  ;;  %v9601_v9 = vmul.f32 %v11548_v56, %v16280_v59  ;;  %v6189_v2 = vpop.f32.mrb[52].mxu1 }
 0x426   : > { %v11549_v29 = vadd.f32 %v16573_v55, %v6189_v2  ;;  %v6191_v7 = vpop.f32.mrb[53].mxu1 }
 0x427   : > { %v9671_v58 = vmax.f32 %v9639_v23, 0.0  ;;  %v9640_v48 = vadd.f32 %v16286_v20, %v9601_v9  ;;  %v6192_v1 = vpop.f32.mrb[54].mxu1 }
 0x428   : > { %v9514_v3 = vpop.f32.mrb[52].mxu0  ;;  %v11551_v40 = vadd.f32 %v16574_v38, %v6192_v1  ;;  %v6194_v18 = vpop.f32.mrb[55].mxu1 }
 0x429   : > { %v11355_v46 = vpack.c.bf16 %v9671_v58, %v9671_v58  ;;  %v9672_v26 = vmax.f32 %v9640_v48, 0.0  ;;  %v11550_v12 = vadd.f32 %v11549_v29, %v9514_v3  ;;  %v9516_v43 = vpop.f32.mrb[53].mxu0 }
 0x42a   : > { %v9517_v17 = vpop.f32.mrb[54].mxu0 }
 0x42b   : > { %9832 = vst.msk [vmem:[%s16294_s15 + $0x60] sm:$0xf] %vm9807_vm0, %v11355_v46  ;;  %v11356_v41 = vpack.c.bf16 %v9672_v26, %v9672_v26  ;;  %v9602_v39 = vmul.f32 %v11550_v12, %v16280_v59  ;;  %v11552_v50 = vadd.f32 %v11551_v40, %v9517_v17  ;;  %v9519_v35 = vpop.f32.mrb[55].mxu0 }
 0x42d   : > { %9833 = vst.msk [vmem:[%s16294_s15 + $0x64] sm:$0xf] %vm9807_vm0, %v11356_v41  ;;  %v9641_v36 = vadd.f32 %v16286_v20, %v9602_v39  ;;  %v9603_v19 = vmul.f32 %v11552_v50, %v16280_v59  ;;  %v6197_v21 = vpop.f32.mrb[56].mxu1 }
 0x42e   : > { %v11553_v52 = vadd.f32 %v16575_v53, %v6197_v21  ;;  %v6199_v31 = vpop.f32.mrb[57].mxu1 }
 0x42f   : > { %v9673_v51 = vmax.f32 %v9641_v36, 0.0  ;;  %v9642_v62 = vadd.f32 %v16286_v20, %v9603_v19  ;;  %v6200_v44 = vpop.f32.mrb[58].mxu1 }
 0x430   : > { %v9522_v28 = vpop.f32.mrb[56].mxu0  ;;  %v11555_v45 = vadd.f32 %v16576_v0, %v6200_v44  ;;  %v6202_v33 = vpop.f32.mrb[59].mxu1 }
 0x431   : > { %v11357_v8 = vpack.c.bf16 %v9673_v51, %v9673_v51  ;;  %v9674_v22 = vmax.f32 %v9642_v62, 0.0  ;;  %v11554_v16 = vadd.f32 %v11553_v52, %v9522_v28  ;;  %v9524_v10 = vpop.f32.mrb[57].mxu0 }
 0x432   : > { %v9525_v6 = vpop.f32.mrb[58].mxu0 }
 0x433   : > { %9834 = vst.msk [vmem:[%s16294_s15 + $0x68] sm:$0xf] %vm9807_vm0, %v11357_v8  ;;  %v11358_v42 = vpack.c.bf16 %v9674_v22, %v9674_v22  ;;  %v9604_v13 = vmul.f32 %v11554_v16, %v16280_v59  ;;  %v11556_v32 = vadd.f32 %v11555_v45, %v9525_v6  ;;  %v9527_v54 = vpop.f32.mrb[59].mxu0 }
 0x435   : > { %9835 = vst.msk [vmem:[%s16294_s15 + $0x6c] sm:$0xf] %vm9807_vm0, %v11358_v42  ;;  %v9643_v11 = vadd.f32 %v16286_v20, %v9604_v13  ;;  %v9605_v63 = vmul.f32 %v11556_v32, %v16280_v59  ;;  %v6205_v4 = vpop.f32.mrb[60].mxu1 }
 0x436   : > { %v11557_v57 = vadd.f32 %v16577_v27, %v6205_v4  ;;  %v6207_v61 = vpop.f32.mrb[61].mxu1 }
 0x437   : > { %v9675_v25 = vmax.f32 %v9643_v11, 0.0  ;;  %v9644_v15 = vadd.f32 %v16286_v20, %v9605_v63  ;;  %v6208_v47 = vpop.f32.mrb[62].mxu1 }
 0x438   : > { %v9530_v37 = vpop.f32.mrb[60].mxu0  ;;  %v11559_v60 = vadd.f32 %v16578_v5, %v6208_v47  ;;  %v6210_v30 = vpop.f32.mrb[63].mxu1 }
 0x439   : > { %v11359_v14 = vpack.c.bf16 %v9675_v25, %v9675_v25  ;;  %v9676_v34 = vmax.f32 %v9644_v15, 0.0  ;;  %v11558_v49 = vadd.f32 %v11557_v57, %v9530_v37  ;;  %v9532_v56 = vpop.f32.mrb[61].mxu0 }
 0x43a   : > { %v9533_v24 = vpop.f32.mrb[62].mxu0 }
 0x43b   : > { %9836 = vst.msk [vmem:[%s16294_s15 + $0x70] sm:$0xf] %vm9807_vm0, %v11359_v14  ;;  %v11360_v23 = vpack.c.bf16 %v9676_v34, %v9676_v34  ;;  %v9606_v9 = vmul.f32 %v11558_v49, %v16280_v59  ;;  %v11560_v2 = vadd.f32 %v11559_v60, %v9533_v24  ;;  %v9535_v55 = vpop.f32.mrb[63].mxu0 }
 0x43d   : > { %9837 = vst.msk [vmem:[%s16294_s15 + $0x74] sm:$0xf] %vm9807_vm0, %v11360_v23  ;;  %v9645_v29 = vadd.f32 %v16286_v20, %v9606_v9  ;;  %v9607_v7 = vmul.f32 %v11560_v2, %v16280_v59 }
 0x43f   : > { %v9677_v58 = vmax.f32 %v9645_v29, 0.0  ;;  %v9646_v48 = vadd.f32 %v16286_v20, %v9607_v7 }
 0x441   : > { %v11361_v1 = vpack.c.bf16 %v9677_v58, %v9677_v58  ;;  %v9678_v3 = vmax.f32 %v9646_v48, 0.0 }
 0x443   : > { %9838 = vst.msk [vmem:[%s16294_s15 + $0x78] sm:$0xf] %vm9807_vm0, %v11361_v1  ;;  %v11362_v38 = vpack.c.bf16 %v9678_v3, %v9678_v3 }
 0x445   : > { %9839 = vst.msk [vmem:[%s16294_s15 + $0x7c] sm:$0xf] %vm9807_vm0, %v11362_v38 }
 0x446   : > { %12533 = shalt.err (!%p12530_p5)
}
 0x447   : > { %s12534_s11 = scalar_lea.hbm %s16450_s12, 2048  ;;  %s12538_s15 = scalar_lea.hbm %s16514_s6, 8192 }
 0x448   : > { %p12535_p6 = scmp.ne.s32.totalorder %s16450_s12, %s12534_s11  ;;  %p12539_p12 = scmp.lt.u32.totalorder %s16450_s12, %s16514_s6 }
 0x449   : > { %p12540_p0 = scmp.lt.u32.totalorder %s12538_s15, %s12534_s11  ;;  %p12542_p4 = scmp.lt.u32.totalorder %s12534_s11, %s16450_s12 }
 0x44a   : > { %p12536_p7 = pnand %p12535_p6, %p16579_p8 }
 0x44b   : > { %p12541_p2 = por %p12540_p0, %p12539_p12 }
 0x44c   : > { %p12537_p9 = pneg %p12536_p7 }
 0x44d   : > { %p12543_p10 = por %p12542_p4, %p12541_p2 }
 0x44f   : > { %p12544_p11 = pnand %p12543_p10, %p12537_p9 }
 0x451   : > { %12547 = shalt.err (!%p12544_p11)
}
 0x452   : > { %s12616_s8 = smov 4  }
 0x453   : > { %12077 = dma.vmem_to_hbm [thread:$0]  (%p16579_p8), %s16454_s18, 2048, %s16450_s12, %s16460_s24, %s12611_s13, %s12611_s13, %s12616_s8  }
 0x454 PF: > { %p12089_p13 = scmp.ge.s32.totalorder %s12602_s26, 2  ;;  %s9872_s19 = sand.u32 1, %s12582_s21  }
 0x455   : > { %p16580_p1 = scmp.ne.s32.totalorder %s16522_s9, 0  ;;  %s9873_s30 = scalar_lea.sflag [#allocation5], %s9872_s19 }
 0x457   : > { %p12084_p3 = pnand %p12089_p13, %p16580_p1 }
 0x459   : > { %12577 = dma.done.wait (!%p12084_p3), %s9873_s30, 2048  }
 0x45a   : > { %12579 = vsyncadd (!%p12084_p3), %s9873_s30, 4294965248  ;;  %s20_s26 = sadd.s32 1, %s12602_s26   ;;  %s16581_s21 = smov %s12586_s22 }
 0x45b   : > { %p17_p5 = scmp.ge.s32.totalorder %s20_s26, 6   ;;  %s16582_s22 = smov %s12590_s23 }
 0x45c   : > { %s16583_s23 = smov %s12705_s10  ;;  %s16584_s24 = smov %s12598_s25 }
 0x45d   : > { %s16585_s25 = smov %s16587_s29  ;;  %19 = sbr.rel (!%p17_p5) target bundleno = 5 (0x5), region = 99 }
 0x464   :  { %9878 = vsyncpa [#allocation4], 1 }
 0x465   :  { %9880 = vsyncpa [#allocation4 + $0x1], 1 }
 0x466   :  { %9881 = vsyncpa [#allocation5], 1 }
 0x467   :  { %9883 = vsyncpa [#allocation5 + $0x1], 1 }

</bundles_post_ra>
